<compile_context>
chip_gen: v5e
topology: v5e:2x2
jax: 0.10.0
libtpu: 0.0.40
codegen_flags: <defaults>
</compile_context>

<pallas_src>
import functools
import math

import numpy as np
import jax
import jax.numpy as jnp
from jax import lax
from jax.experimental import pallas as pl
from jax.experimental.pallas import tpu as pltpu

# ---------------- model hyper-params (small, consistent with the torch module) -----------
EMBED = 32
NUM_HEADS = 4
NUM_LAYERS = 2
TOP_K = 8
USE_MULTI_SCALE = True
B, T, N_TOK = 2, 4, 8          # x: (b, t, n, e)


# ----------------------------- fused Pallas kernel ---------------------------------------
def fused_refiner_kernel(x_ref, pS_ref, pST_ref, pTS_ref,
                         wqkv_ref, bqkv_ref, wo_ref, bo_ref, wscore_ref,
                         xout_ref, score_ref,
                         *, num_heads, num_layers, b, t, n):
    """Full SpatioTemporalSignificanceScoring stack + score projection, resident in VMEM.

    Row layouts of the (b*t*n, E) activation matrix:
      NAT = (b, t, n) row order  (natural input order)
      S   = (n, b, t) row order  -> spatial  MHA groups (batch = n, seq = b*t) contiguous
      T   = (t, b, n) row order  -> temporal MHA groups (batch = t, seq = b*n) contiguous
    pS: NAT->S, pST: S->T, pTS: T->S are exact 0/1 permutation (gather) matrices.
    The kernel finishes in T order; the wrapper undoes that with free reshapes.
    """
    R, e = x_ref.shape
    hd = e // num_heads
    scale = 1.0 / math.sqrt(hd)

    def mha(x2, wqkv, bqkv, wo, bo, groups, seq):
        # x2: (R, E) with rows ordered group-major / seq-minor.
        qkv = jnp.dot(x2, wqkv, preferred_element_type=jnp.float32) + bqkv      # (R, 3E)
        q = qkv[:, 0 * e:1 * e] * scale
        k = qkv[:, 1 * e:2 * e]
        v = qkv[:, 2 * e:3 * e]
        out = jnp.zeros((R, e), jnp.float32) + bo        # bias hoisted out of the head loop
        for h in range(num_heads):                       # static; every iter is group-batched
            sl = slice(h * hd, (h + 1) * hd)
            qh = q[:, sl].reshape(groups, seq, hd)
            kh = k[:, sl].reshape(groups, seq, hd)
            vh = v[:, sl].reshape(groups, seq, hd)
            s = jnp.einsum("gld,gmd->glm", qh, kh,
                           preferred_element_type=jnp.float32)                  # (G, L, L)
            s = s - jnp.max(s, axis=-1, keepdims=True)
            p = jnp.exp(s)
            # exact reciprocal; approx=True would also work but eats into the test tolerance
            p = p * pl.reciprocal(jnp.sum(p, axis=-1, keepdims=True), approx=False)
            oh = jnp.einsum("glm,gmd->gld", p, vh,
                            preferred_element_type=jnp.float32)                 # (G, L, hd)
            # Fold this head straight through its slice of the output projection
            # (replaces concat(heads) @ Wo -- no lane concatenate needed).
            out = out + jnp.dot(oh.reshape(R, hd), wo[sl, :],
                                preferred_element_type=jnp.float32)
        return out

    # NAT -> S (exact permutation via MXU)
    x = jnp.dot(pS_ref[...], x_ref[...], preferred_element_type=jnp.float32)
    for l in range(num_layers):
        x = mha(x, wqkv_ref[l, 0], bqkv_ref[l, 0], wo_ref[l, 0], bo_ref[l, 0],
                groups=n, seq=b * t)                                            # spatial
        x = jnp.dot(pST_ref[...], x, preferred_element_type=jnp.float32)        # S -> T
        x = mha(x, wqkv_ref[l, 1], bqkv_ref[l, 1], wo_ref[l, 1], bo_ref[l, 1],
                groups=t, seq=b * n)                                            # temporal
        if l + 1 < num_layers:
            x = jnp.dot(pTS_ref[...], x, preferred_element_type=jnp.float32)    # T -> S

    xout_ref[...] = x.astype(xout_ref.dtype)             # rows in T = (t, b, n) order
    # Token-significance scores as one lane-dense (1, R) row.
    # (score_net bias is zeroed by init_weights(), so it is omitted.)
    score_ref[...] = lax.dot_general(
        wscore_ref[...], x, (((1,), (1,)), ((), ())),
        preferred_element_type=jnp.float32).astype(score_ref.dtype)


# ----------------------------- wrappers / glue --------------------------------------------
def _full_spec(shape):
    shape = tuple(shape)
    return pl.BlockSpec(shape, lambda i: (0,) * len(shape))


def build_perm_matrices(b, t, n):
    """Exact 0/1 row-permutation (gather) matrices between the activation layouts."""
    R = b * t * n

    def nat(bi, ti, ni):
        return (bi * t + ti) * n + ni

    perm_S = np.array([nat(bi, ti, ni)
                       for ni in range(n) for bi in range(b) for ti in range(t)])
    perm_T = np.array([nat(bi, ti, ni)
                       for ti in range(t) for bi in range(b) for ni in range(n)])

    def gather_mat(perm):
        m = np.zeros((R, R), np.float32)
        m[np.arange(R), perm] = 1.0
        return m

    P_S, P_T = gather_mat(perm_S), gather_mat(perm_T)
    return {
        "S": jnp.asarray(P_S),             # NAT -> S
        "ST": jnp.asarray(P_T @ P_S.T),    # S   -> T
        "TS": jnp.asarray(P_S @ P_T.T),    # T   -> S
    }


def multi_scale_pool(tokens, use_multi_scale):
    if not use_multi_scale:
        return tokens
    bsz, k, e = tokens.shape
    outs = []
    for scale in (1, 2, 4):
        if k >= scale:
            m = k // scale     # matches F.avg_pool1d(kernel=stride=scale): tail dropped
            outs.append(tokens[:, :m * scale].reshape(bsz, m, scale, e).mean(axis=2))
    return jnp.concatenate(outs, axis=1)


def refiner_forward_pallas(x, stacked, perms, score_w, *, num_heads, num_layers,
                           top_k, use_multi_scale):
    b, t, n, e = x.shape
    R = b * t * n
    x_flat = x.reshape(R, e)                                   # free reshape, NAT row order

    kernel = functools.partial(fused_refiner_kernel, num_heads=num_heads,
                               num_layers=num_layers, b=b, t=t, n=n)
    x_out, scores_row = pl.pallas_call(
        kernel,
        out_shape=(jax.ShapeDtypeStruct((R, e), jnp.float32),
                   jax.ShapeDtypeStruct((1, R), jnp.float32)),
        grid=(1,),
        in_specs=[_full_spec((R, e)),
                  _full_spec((R, R)), _full_spec((R, R)), _full_spec((R, R)),
                  _full_spec(stacked["wqkv"].shape), _full_spec(stacked["bqkv"].shape),
                  _full_spec(stacked["wo"].shape), _full_spec(stacked["bo"].shape),
                  _full_spec(score_w.shape)],
        out_specs=(_full_spec((R, e)), _full_spec((1, R))),
        compiler_params=pltpu.CompilerParams(dimension_semantics=("arbitrary",)),
    )(x_flat, perms["S"], perms["ST"], perms["TS"],
      stacked["wqkv"], stacked["bqkv"], stacked["wo"], stacked["bo"], score_w)

    # Kernel leaves rows in temporal (t, b, n) order; undo with free reshapes plus a
    # 64-float transpose that fuses into the top-k prep.
    x_t = x_out.reshape(t, b, n, e)
    scores = scores_row.reshape(t, b, n).transpose(1, 0, 2).reshape(b, t * n)

    # TODO(synk): top-k selection, the data-dependent token gather and the multi-scale
    # avg-pool stay in plain JAX (KB-scale, no clean Pallas equivalent needed).
    _, idx = lax.top_k(scores, top_k)                          # (b, top_k), over t*n (t-major)
    frame, token = idx // n, idx % n
    tokens = x_t[frame, jnp.arange(b)[:, None], token]         # (b, top_k, e)
    return multi_scale_pool(tokens, use_multi_scale)


# ----------------------------- pure-JAX reference (independent check) ---------------------
def mha_ref(x_nle, p, num_heads):
    N, L, E = x_nle.shape
    hd = E // num_heads
    qkv = x_nle @ p["wqkv"] + p["bqkv"]
    q, k, v = qkv[..., :E], qkv[..., E:2 * E], qkv[..., 2 * E:]
    q = q.reshape(N, L, num_heads, hd) * (1.0 / math.sqrt(hd))
    k = k.reshape(N, L, num_heads, hd)
    v = v.reshape(N, L, num_heads, hd)
    s = jnp.einsum("nlhd,nmhd->nhlm", q, k)
    pattn = jax.nn.softmax(s, axis=-1)
    o = jnp.einsum("nhlm,nmhd->nlhd", pattn, v).reshape(N, L, E)
    return o @ p["wo"] + p["bo"]


def refiner_forward_ref(x, params, score_w, *, num_heads, top_k, use_multi_scale):
    b, t, n, e = x.shape
    for lp in params:
        # spatial: torch feeds (b*t, n, e) batch_first=False -> seq = b*t, batch = n
        xs = x.reshape(b * t, n, e).transpose(1, 0, 2)
        xs = mha_ref(xs, lp["spatial"], num_heads)
        x = xs.transpose(1, 0, 2).reshape(b, t, n, e)
        # temporal: torch feeds (b*n, t, e) batch_first=False -> seq = b*n, batch = t
        xt = x.transpose(0, 2, 1, 3).reshape(b * n, t, e).transpose(1, 0, 2)
        xt = mha_ref(xt, lp["temporal"], num_heads)
        x = xt.transpose(1, 0, 2).reshape(b, n, t, e).transpose(0, 2, 1, 3)
    scores = (x @ score_w[0]).reshape(b, t * n)
    _, idx = lax.top_k(scores, top_k)
    tokens = jnp.take_along_axis(x.reshape(b, t * n, e), idx[:, :, None], axis=1)
    return multi_scale_pool(tokens, use_multi_scale)


# ----------------------------- deterministic parameter init -------------------------------
def init_params(key, embed, num_layers):
    params = []
    for _ in range(num_layers):
        layer = {}
        for name in ("spatial", "temporal"):
            key, k_in, k_out = jax.random.split(key, 3)
            lim_in = math.sqrt(6.0 / (embed + 3 * embed))            # xavier_uniform_
            w_in = jax.random.uniform(k_in, (3 * embed, embed), jnp.float32, -lim_in, lim_in)
            b_in = jnp.zeros((3 * embed,), jnp.float32)              # in_proj_bias -> 0
            lim_out = math.sqrt(1.0 / embed)
            w_out = jax.random.uniform(k_out, (embed, embed), jnp.float32, -lim_out, lim_out)
            b_out = jnp.zeros((embed,), jnp.float32)                 # out_proj.bias -> 0
            layer[name] = dict(wqkv=w_in.T,                 # (E, 3E)
                               bqkv=b_in.reshape(1, -1),    # (1, 3E)
                               wo=w_out.T,                  # (E, E)
                               bo=b_out.reshape(1, -1))     # (1, E)
        params.append(layer)
    key, k_score = jax.random.split(key)
    lim_s = math.sqrt(1.0 / embed)
    score_w = jax.random.uniform(k_score, (1, embed), jnp.float32, -lim_s, lim_s)  # (1, E)
    return params, score_w


def stack_params(params):
    """Stack per-layer/per-attention params into 4D arrays for the fused kernel."""
    def cat(name):
        return jnp.stack([jnp.stack([lp[nm][name] for nm in ("spatial", "temporal")])
                          for lp in params])
    return {k: cat(k) for k in ("wqkv", "bqkv", "wo", "bo")}


# ----------------------------- main --------------------------------------------------------
if __name__ == "__main__":
    x = jax.random.normal(jax.random.PRNGKey(0), (B, T, N_TOK, EMBED), jnp.float32)
    params, score_w = init_params(jax.random.PRNGKey(1), EMBED, NUM_LAYERS)
    stacked = stack_params(params)
    perms = build_perm_matrices(B, T, N_TOK)

    fwd = jax.jit(functools.partial(refiner_forward_pallas,
                                    num_heads=NUM_HEADS, num_layers=NUM_LAYERS,
                                    top_k=TOP_K, use_multi_scale=USE_MULTI_SCALE))

    out = fwd(x, stacked, perms, score_w)
    out = jax.block_until_ready(out)

    expected_tokens = TOP_K + TOP_K // 2 + TOP_K // 4 if USE_MULTI_SCALE else TOP_K
    assert out.shape == (B, expected_tokens, EMBED), out.shape

    ref = refiner_forward_ref(x, params, score_w, num_heads=NUM_HEADS,
                              top_k=TOP_K, use_multi_scale=USE_MULTI_SCALE)
    np.testing.assert_allclose(np.asarray(out), np.asarray(ref), atol=1e-3, rtol=1e-3)

    print("KERNEL_OK")
</pallas_src>

<mosaic_0001>
module attributes {stable_mosaic.version = 11 : i64} {
  func.func @fused_refiner_kernel(%arg0: i32, %arg1: memref<64x32xf32, #tpu.memory_space<vmem>>, %arg2: memref<64x64xf32, #tpu.memory_space<vmem>>, %arg3: memref<64x64xf32, #tpu.memory_space<vmem>>, %arg4: memref<64x64xf32, #tpu.memory_space<vmem>>, %arg5: memref<2x2x32x96xf32, #tpu.memory_space<vmem>>, %arg6: memref<2x2x1x96xf32, #tpu.memory_space<vmem>>, %arg7: memref<2x2x32x32xf32, #tpu.memory_space<vmem>>, %arg8: memref<2x2x1x32xf32, #tpu.memory_space<vmem>>, %arg9: memref<1x32xf32, #tpu.memory_space<vmem>>, %arg10: memref<64x32xf32, #tpu.memory_space<vmem>>, %arg11: memref<1x64xf32, #tpu.memory_space<vmem>>) attributes {dimension_semantics = [#tpu.dimension_semantics<arbitrary>], iteration_bounds = array<i64: 1>, scalar_prefetch = 0 : i64, scratch_operands = 0 : i64, tpu.core_type = #tpu.core_type<tc>, window_params = [{pipeline_mode = #tpu.pipeline_mode<synchronous>, transform_indices = @transform_0, window_bounds = array<i64: 64, 32>}, {pipeline_mode = #tpu.pipeline_mode<synchronous>, transform_indices = @transform_1, window_bounds = array<i64: 64, 64>}, {pipeline_mode = #tpu.pipeline_mode<synchronous>, transform_indices = @transform_2, window_bounds = array<i64: 64, 64>}, {pipeline_mode = #tpu.pipeline_mode<synchronous>, transform_indices = @transform_3, window_bounds = array<i64: 64, 64>}, {pipeline_mode = #tpu.pipeline_mode<synchronous>, transform_indices = @transform_4, window_bounds = array<i64: 2, 2, 32, 96>}, {pipeline_mode = #tpu.pipeline_mode<synchronous>, transform_indices = @transform_5, window_bounds = array<i64: 2, 2, 1, 96>}, {pipeline_mode = #tpu.pipeline_mode<synchronous>, transform_indices = @transform_6, window_bounds = array<i64: 2, 2, 32, 32>}, {pipeline_mode = #tpu.pipeline_mode<synchronous>, transform_indices = @transform_7, window_bounds = array<i64: 2, 2, 1, 32>}, {pipeline_mode = #tpu.pipeline_mode<synchronous>, transform_indices = @transform_8, window_bounds = array<i64: 1, 32>}, {pipeline_mode = #tpu.pipeline_mode<synchronous>, transform_indices = @transform_9, window_bounds = array<i64: 64, 32>}, {pipeline_mode = #tpu.pipeline_mode<synchronous>, transform_indices = @transform_10, window_bounds = array<i64: 1, 64>}]} {
    %c0 = arith.constant 0 : index
    %c0_0 = arith.constant 0 : index
    %0 = vector.load %arg2[%c0, %c0_0] : memref<64x64xf32, #tpu.memory_space<vmem>>, vector<64x64xf32>
    %c0_1 = arith.constant 0 : index
    %c0_2 = arith.constant 0 : index
    %1 = vector.load %arg1[%c0_1, %c0_2] : memref<64x32xf32, #tpu.memory_space<vmem>>, vector<64x32xf32>
    %cst = arith.constant dense<0.000000e+00> : vector<64x32xf32>
    %2 = tpu.matmul %0, %1, %cst {dimension_numbers = #tpu.dot_dimension_numbers<[1], [0], [0], [1], [0, 0, 1, 1], [], []>} : vector<64x64xf32>, vector<64x32xf32>, vector<64x32xf32> -> vector<64x32xf32>
    %c0_3 = arith.constant 0 : index
    %c0_4 = arith.constant 0 : index
    %c0_5 = arith.constant 0 : index
    %c0_6 = arith.constant 0 : index
    %3 = vector.load %arg5[%c0_3, %c0_4, %c0_5, %c0_6] : memref<2x2x32x96xf32, #tpu.memory_space<vmem>>, vector<1x1x32x96xf32>
    %4 = vector.shape_cast %3 : vector<1x1x32x96xf32> to vector<32x96xf32>
    %c0_7 = arith.constant 0 : index
    %c0_8 = arith.constant 0 : index
    %c0_9 = arith.constant 0 : index
    %c0_10 = arith.constant 0 : index
    %5 = vector.load %arg6[%c0_7, %c0_8, %c0_9, %c0_10] : memref<2x2x1x96xf32, #tpu.memory_space<vmem>>, vector<1x1x1x96xf32>
    %6 = vector.shape_cast %5 : vector<1x1x1x96xf32> to vector<1x96xf32>
    %c0_11 = arith.constant 0 : index
    %c0_12 = arith.constant 0 : index
    %c0_13 = arith.constant 0 : index
    %c0_14 = arith.constant 0 : index
    %7 = vector.load %arg7[%c0_11, %c0_12, %c0_13, %c0_14] : memref<2x2x32x32xf32, #tpu.memory_space<vmem>>, vector<1x1x32x32xf32>
    %8 = vector.shape_cast %7 : vector<1x1x32x32xf32> to vector<32x32xf32>
    %c0_15 = arith.constant 0 : index
    %c0_16 = arith.constant 0 : index
    %c0_17 = arith.constant 0 : index
    %c0_18 = arith.constant 0 : index
    %9 = vector.load %arg8[%c0_15, %c0_16, %c0_17, %c0_18] : memref<2x2x1x32xf32, #tpu.memory_space<vmem>>, vector<1x1x1x32xf32>
    %10 = vector.shape_cast %9 : vector<1x1x1x32xf32> to vector<1x32xf32>
    %cst_19 = arith.constant dense<0.000000e+00> : vector<64x96xf32>
    %11 = tpu.matmul %2, %4, %cst_19 {dimension_numbers = #tpu.dot_dimension_numbers<[1], [0], [0], [1], [0, 0, 1, 1], [], []>} : vector<64x32xf32>, vector<32x96xf32>, vector<64x96xf32> -> vector<64x96xf32>
    %12 = vector.broadcast %6 : vector<1x96xf32> to vector<64x96xf32>
    %13 = arith.addf %11, %12 : vector<64x96xf32>
    %14 = vector.extract_strided_slice %13 {offsets = [0, 0], sizes = [64, 32], strides = [1, 1]} : vector<64x96xf32> to vector<64x32xf32>
    %cst_20 = arith.constant 0.353553385 : f32
    %15 = vector.broadcast %cst_20 : f32 to vector<64x32xf32>
    %16 = arith.mulf %14, %15 : vector<64x32xf32>
    %17 = vector.extract_strided_slice %13 {offsets = [0, 32], sizes = [64, 32], strides = [1, 1]} : vector<64x96xf32> to vector<64x32xf32>
    %18 = vector.extract_strided_slice %13 {offsets = [0, 64], sizes = [64, 32], strides = [1, 1]} : vector<64x96xf32> to vector<64x32xf32>
    %cst_21 = arith.constant 0.000000e+00 : f32
    %19 = vector.broadcast %cst_21 : f32 to vector<64x32xf32>
    %20 = vector.broadcast %10 : vector<1x32xf32> to vector<64x32xf32>
    %21 = arith.addf %19, %20 : vector<64x32xf32>
    %22 = vector.extract_strided_slice %16 {offsets = [0, 0], sizes = [64, 8], strides = [1, 1]} : vector<64x32xf32> to vector<64x8xf32>
    %23 = vector.shape_cast %22 : vector<64x8xf32> to vector<8x8x8xf32>
    %24 = vector.extract_strided_slice %17 {offsets = [0, 0], sizes = [64, 8], strides = [1, 1]} : vector<64x32xf32> to vector<64x8xf32>
    %25 = vector.shape_cast %24 : vector<64x8xf32> to vector<8x8x8xf32>
    %26 = vector.extract_strided_slice %18 {offsets = [0, 0], sizes = [64, 8], strides = [1, 1]} : vector<64x32xf32> to vector<64x8xf32>
    %27 = vector.shape_cast %26 : vector<64x8xf32> to vector<8x8x8xf32>
    "tpu.trace_start"() <{level = 10 : i32, message = "gld,gmd->glm"}> : () -> ()
    %cst_22 = arith.constant dense<0.000000e+00> : vector<8x8x8xf32>
    %28 = tpu.matmul %23, %25, %cst_22 {dimension_numbers = #tpu.dot_dimension_numbers<[2], [2], [1], [1], [0, 0, 0, 1, 1, 1], [0], [0]>} : vector<8x8x8xf32>, vector<8x8x8xf32>, vector<8x8x8xf32> -> vector<8x8x8xf32>
    "tpu.trace_stop"() : () -> ()
    %cst_23 = arith.constant dense<0xFF800000> : vector<8x8xf32>
    %29 = vector.multi_reduction <maximumf>, %28, %cst_23 [2] : vector<8x8x8xf32> to vector<8x8xf32>
    %30 = vector.shape_cast %29 : vector<8x8xf32> to vector<8x8x1xf32>
    %31 = vector.broadcast %30 : vector<8x8x1xf32> to vector<8x8x8xf32>
    %32 = arith.subf %28, %31 : vector<8x8x8xf32>
    %33 = math.exp %32 : vector<8x8x8xf32>
    %cst_24 = arith.constant dense<0.000000e+00> : vector<8x8xf32>
    %34 = vector.multi_reduction <add>, %33, %cst_24 [2] : vector<8x8x8xf32> to vector<8x8xf32>
    %35 = vector.shape_cast %34 : vector<8x8xf32> to vector<8x8x1xf32>
    %36 = tpu.reciprocal %35 : vector<8x8x1xf32> -> vector<8x8x1xf32>
    %37 = vector.broadcast %36 : vector<8x8x1xf32> to vector<8x8x8xf32>
    %38 = arith.mulf %33, %37 : vector<8x8x8xf32>
    "tpu.trace_start"() <{level = 10 : i32, message = "glm,gmd->gld"}> : () -> ()
    %cst_25 = arith.constant dense<0.000000e+00> : vector<8x8x8xf32>
    %39 = tpu.matmul %38, %27, %cst_25 {dimension_numbers = #tpu.dot_dimension_numbers<[2], [1], [1], [2], [0, 0, 0, 1, 1, 2], [0], [0]>} : vector<8x8x8xf32>, vector<8x8x8xf32>, vector<8x8x8xf32> -> vector<8x8x8xf32>
    "tpu.trace_stop"() : () -> ()
    %40 = vector.shape_cast %39 : vector<8x8x8xf32> to vector<64x8xf32>
    %41 = vector.extract_strided_slice %8 {offsets = [0, 0], sizes = [8, 32], strides = [1, 1]} : vector<32x32xf32> to vector<8x32xf32>
    %cst_26 = arith.constant dense<0.000000e+00> : vector<64x32xf32>
    %42 = tpu.matmul %40, %41, %cst_26 {dimension_numbers = #tpu.dot_dimension_numbers<[1], [0], [0], [1], [0, 0, 1, 1], [], []>} : vector<64x8xf32>, vector<8x32xf32>, vector<64x32xf32> -> vector<64x32xf32>
    %43 = arith.addf %21, %42 : vector<64x32xf32>
    %44 = vector.extract_strided_slice %16 {offsets = [0, 8], sizes = [64, 8], strides = [1, 1]} : vector<64x32xf32> to vector<64x8xf32>
    %45 = vector.shape_cast %44 : vector<64x8xf32> to vector<8x8x8xf32>
    %46 = vector.extract_strided_slice %17 {offsets = [0, 8], sizes = [64, 8], strides = [1, 1]} : vector<64x32xf32> to vector<64x8xf32>
    %47 = vector.shape_cast %46 : vector<64x8xf32> to vector<8x8x8xf32>
    %48 = vector.extract_strided_slice %18 {offsets = [0, 8], sizes = [64, 8], strides = [1, 1]} : vector<64x32xf32> to vector<64x8xf32>
    %49 = vector.shape_cast %48 : vector<64x8xf32> to vector<8x8x8xf32>
    "tpu.trace_start"() <{level = 10 : i32, message = "gld,gmd->glm"}> : () -> ()
    %cst_27 = arith.constant dense<0.000000e+00> : vector<8x8x8xf32>
    %50 = tpu.matmul %45, %47, %cst_27 {dimension_numbers = #tpu.dot_dimension_numbers<[2], [2], [1], [1], [0, 0, 0, 1, 1, 1], [0], [0]>} : vector<8x8x8xf32>, vector<8x8x8xf32>, vector<8x8x8xf32> -> vector<8x8x8xf32>
    "tpu.trace_stop"() : () -> ()
    %cst_28 = arith.constant dense<0xFF800000> : vector<8x8xf32>
    %51 = vector.multi_reduction <maximumf>, %50, %cst_28 [2] : vector<8x8x8xf32> to vector<8x8xf32>
    %52 = vector.shape_cast %51 : vector<8x8xf32> to vector<8x8x1xf32>
    %53 = vector.broadcast %52 : vector<8x8x1xf32> to vector<8x8x8xf32>
    %54 = arith.subf %50, %53 : vector<8x8x8xf32>
    %55 = math.exp %54 : vector<8x8x8xf32>
    %cst_29 = arith.constant dense<0.000000e+00> : vector<8x8xf32>
    %56 = vector.multi_reduction <add>, %55, %cst_29 [2] : vector<8x8x8xf32> to vector<8x8xf32>
    %57 = vector.shape_cast %56 : vector<8x8xf32> to vector<8x8x1xf32>
    %58 = tpu.reciprocal %57 : vector<8x8x1xf32> -> vector<8x8x1xf32>
    %59 = vector.broadcast %58 : vector<8x8x1xf32> to vector<8x8x8xf32>
    %60 = arith.mulf %55, %59 : vector<8x8x8xf32>
    "tpu.trace_start"() <{level = 10 : i32, message = "glm,gmd->gld"}> : () -> ()
    %cst_30 = arith.constant dense<0.000000e+00> : vector<8x8x8xf32>
    %61 = tpu.matmul %60, %49, %cst_30 {dimension_numbers = #tpu.dot_dimension_numbers<[2], [1], [1], [2], [0, 0, 0, 1, 1, 2], [0], [0]>} : vector<8x8x8xf32>, vector<8x8x8xf32>, vector<8x8x8xf32> -> vector<8x8x8xf32>
    "tpu.trace_stop"() : () -> ()
    %62 = vector.shape_cast %61 : vector<8x8x8xf32> to vector<64x8xf32>
    %63 = vector.extract_strided_slice %8 {offsets = [8, 0], sizes = [8, 32], strides = [1, 1]} : vector<32x32xf32> to vector<8x32xf32>
    %cst_31 = arith.constant dense<0.000000e+00> : vector<64x32xf32>
    %64 = tpu.matmul %62, %63, %cst_31 {dimension_numbers = #tpu.dot_dimension_numbers<[1], [0], [0], [1], [0, 0, 1, 1], [], []>} : vector<64x8xf32>, vector<8x32xf32>, vector<64x32xf32> -> vector<64x32xf32>
    %65 = arith.addf %43, %64 : vector<64x32xf32>
    %66 = vector.extract_strided_slice %16 {offsets = [0, 16], sizes = [64, 8], strides = [1, 1]} : vector<64x32xf32> to vector<64x8xf32>
    %67 = vector.shape_cast %66 : vector<64x8xf32> to vector<8x8x8xf32>
    %68 = vector.extract_strided_slice %17 {offsets = [0, 16], sizes = [64, 8], strides = [1, 1]} : vector<64x32xf32> to vector<64x8xf32>
    %69 = vector.shape_cast %68 : vector<64x8xf32> to vector<8x8x8xf32>
    %70 = vector.extract_strided_slice %18 {offsets = [0, 16], sizes = [64, 8], strides = [1, 1]} : vector<64x32xf32> to vector<64x8xf32>
    %71 = vector.shape_cast %70 : vector<64x8xf32> to vector<8x8x8xf32>
    "tpu.trace_start"() <{level = 10 : i32, message = "gld,gmd->glm"}> : () -> ()
    %cst_32 = arith.constant dense<0.000000e+00> : vector<8x8x8xf32>
    %72 = tpu.matmul %67, %69, %cst_32 {dimension_numbers = #tpu.dot_dimension_numbers<[2], [2], [1], [1], [0, 0, 0, 1, 1, 1], [0], [0]>} : vector<8x8x8xf32>, vector<8x8x8xf32>, vector<8x8x8xf32> -> vector<8x8x8xf32>
    "tpu.trace_stop"() : () -> ()
    %cst_33 = arith.constant dense<0xFF800000> : vector<8x8xf32>
    %73 = vector.multi_reduction <maximumf>, %72, %cst_33 [2] : vector<8x8x8xf32> to vector<8x8xf32>
    %74 = vector.shape_cast %73 : vector<8x8xf32> to vector<8x8x1xf32>
    %75 = vector.broadcast %74 : vector<8x8x1xf32> to vector<8x8x8xf32>
    %76 = arith.subf %72, %75 : vector<8x8x8xf32>
    %77 = math.exp %76 : vector<8x8x8xf32>
    %cst_34 = arith.constant dense<0.000000e+00> : vector<8x8xf32>
    %78 = vector.multi_reduction <add>, %77, %cst_34 [2] : vector<8x8x8xf32> to vector<8x8xf32>
    %79 = vector.shape_cast %78 : vector<8x8xf32> to vector<8x8x1xf32>
    %80 = tpu.reciprocal %79 : vector<8x8x1xf32> -> vector<8x8x1xf32>
    %81 = vector.broadcast %80 : vector<8x8x1xf32> to vector<8x8x8xf32>
    %82 = arith.mulf %77, %81 : vector<8x8x8xf32>
    "tpu.trace_start"() <{level = 10 : i32, message = "glm,gmd->gld"}> : () -> ()
    %cst_35 = arith.constant dense<0.000000e+00> : vector<8x8x8xf32>
    %83 = tpu.matmul %82, %71, %cst_35 {dimension_numbers = #tpu.dot_dimension_numbers<[2], [1], [1], [2], [0, 0, 0, 1, 1, 2], [0], [0]>} : vector<8x8x8xf32>, vector<8x8x8xf32>, vector<8x8x8xf32> -> vector<8x8x8xf32>
    "tpu.trace_stop"() : () -> ()
    %84 = vector.shape_cast %83 : vector<8x8x8xf32> to vector<64x8xf32>
    %85 = vector.extract_strided_slice %8 {offsets = [16, 0], sizes = [8, 32], strides = [1, 1]} : vector<32x32xf32> to vector<8x32xf32>
    %cst_36 = arith.constant dense<0.000000e+00> : vector<64x32xf32>
    %86 = tpu.matmul %84, %85, %cst_36 {dimension_numbers = #tpu.dot_dimension_numbers<[1], [0], [0], [1], [0, 0, 1, 1], [], []>} : vector<64x8xf32>, vector<8x32xf32>, vector<64x32xf32> -> vector<64x32xf32>
    %87 = arith.addf %65, %86 : vector<64x32xf32>
    %88 = vector.extract_strided_slice %16 {offsets = [0, 24], sizes = [64, 8], strides = [1, 1]} : vector<64x32xf32> to vector<64x8xf32>
    %89 = vector.shape_cast %88 : vector<64x8xf32> to vector<8x8x8xf32>
    %90 = vector.extract_strided_slice %17 {offsets = [0, 24], sizes = [64, 8], strides = [1, 1]} : vector<64x32xf32> to vector<64x8xf32>
    %91 = vector.shape_cast %90 : vector<64x8xf32> to vector<8x8x8xf32>
    %92 = vector.extract_strided_slice %18 {offsets = [0, 24], sizes = [64, 8], strides = [1, 1]} : vector<64x32xf32> to vector<64x8xf32>
    %93 = vector.shape_cast %92 : vector<64x8xf32> to vector<8x8x8xf32>
    "tpu.trace_start"() <{level = 10 : i32, message = "gld,gmd->glm"}> : () -> ()
    %cst_37 = arith.constant dense<0.000000e+00> : vector<8x8x8xf32>
    %94 = tpu.matmul %89, %91, %cst_37 {dimension_numbers = #tpu.dot_dimension_numbers<[2], [2], [1], [1], [0, 0, 0, 1, 1, 1], [0], [0]>} : vector<8x8x8xf32>, vector<8x8x8xf32>, vector<8x8x8xf32> -> vector<8x8x8xf32>
    "tpu.trace_stop"() : () -> ()
    %cst_38 = arith.constant dense<0xFF800000> : vector<8x8xf32>
    %95 = vector.multi_reduction <maximumf>, %94, %cst_38 [2] : vector<8x8x8xf32> to vector<8x8xf32>
    %96 = vector.shape_cast %95 : vector<8x8xf32> to vector<8x8x1xf32>
    %97 = vector.broadcast %96 : vector<8x8x1xf32> to vector<8x8x8xf32>
    %98 = arith.subf %94, %97 : vector<8x8x8xf32>
    %99 = math.exp %98 : vector<8x8x8xf32>
    %cst_39 = arith.constant dense<0.000000e+00> : vector<8x8xf32>
    %100 = vector.multi_reduction <add>, %99, %cst_39 [2] : vector<8x8x8xf32> to vector<8x8xf32>
    %101 = vector.shape_cast %100 : vector<8x8xf32> to vector<8x8x1xf32>
    %102 = tpu.reciprocal %101 : vector<8x8x1xf32> -> vector<8x8x1xf32>
    %103 = vector.broadcast %102 : vector<8x8x1xf32> to vector<8x8x8xf32>
    %104 = arith.mulf %99, %103 : vector<8x8x8xf32>
    "tpu.trace_start"() <{level = 10 : i32, message = "glm,gmd->gld"}> : () -> ()
    %cst_40 = arith.constant dense<0.000000e+00> : vector<8x8x8xf32>
    %105 = tpu.matmul %104, %93, %cst_40 {dimension_numbers = #tpu.dot_dimension_numbers<[2], [1], [1], [2], [0, 0, 0, 1, 1, 2], [0], [0]>} : vector<8x8x8xf32>, vector<8x8x8xf32>, vector<8x8x8xf32> -> vector<8x8x8xf32>
    "tpu.trace_stop"() : () -> ()
    %106 = vector.shape_cast %105 : vector<8x8x8xf32> to vector<64x8xf32>
    %107 = vector.extract_strided_slice %8 {offsets = [24, 0], sizes = [8, 32], strides = [1, 1]} : vector<32x32xf32> to vector<8x32xf32>
    %cst_41 = arith.constant dense<0.000000e+00> : vector<64x32xf32>
    %108 = tpu.matmul %106, %107, %cst_41 {dimension_numbers = #tpu.dot_dimension_numbers<[1], [0], [0], [1], [0, 0, 1, 1], [], []>} : vector<64x8xf32>, vector<8x32xf32>, vector<64x32xf32> -> vector<64x32xf32>
    %109 = arith.addf %87, %108 : vector<64x32xf32>
    %c0_42 = arith.constant 0 : index
    %c0_43 = arith.constant 0 : index
    %110 = vector.load %arg3[%c0_42, %c0_43] : memref<64x64xf32, #tpu.memory_space<vmem>>, vector<64x64xf32>
    %cst_44 = arith.constant dense<0.000000e+00> : vector<64x32xf32>
    %111 = tpu.matmul %110, %109, %cst_44 {dimension_numbers = #tpu.dot_dimension_numbers<[1], [0], [0], [1], [0, 0, 1, 1], [], []>} : vector<64x64xf32>, vector<64x32xf32>, vector<64x32xf32> -> vector<64x32xf32>
    %c0_45 = arith.constant 0 : index
    %c1 = arith.constant 1 : index
    %c0_46 = arith.constant 0 : index
    %c0_47 = arith.constant 0 : index
    %112 = vector.load %arg5[%c0_45, %c1, %c0_46, %c0_47] : memref<2x2x32x96xf32, #tpu.memory_space<vmem>>, vector<1x1x32x96xf32>
    %113 = vector.shape_cast %112 : vector<1x1x32x96xf32> to vector<32x96xf32>
    %c0_48 = arith.constant 0 : index
    %c1_49 = arith.constant 1 : index
    %c0_50 = arith.constant 0 : index
    %c0_51 = arith.constant 0 : index
    %114 = vector.load %arg6[%c0_48, %c1_49, %c0_50, %c0_51] : memref<2x2x1x96xf32, #tpu.memory_space<vmem>>, vector<1x1x1x96xf32>
    %115 = vector.shape_cast %114 : vector<1x1x1x96xf32> to vector<1x96xf32>
    %c0_52 = arith.constant 0 : index
    %c1_53 = arith.constant 1 : index
    %c0_54 = arith.constant 0 : index
    %c0_55 = arith.constant 0 : index
    %116 = vector.load %arg7[%c0_52, %c1_53, %c0_54, %c0_55] : memref<2x2x32x32xf32, #tpu.memory_space<vmem>>, vector<1x1x32x32xf32>
    %117 = vector.shape_cast %116 : vector<1x1x32x32xf32> to vector<32x32xf32>
    %c0_56 = arith.constant 0 : index
    %c1_57 = arith.constant 1 : index
    %c0_58 = arith.constant 0 : index
    %c0_59 = arith.constant 0 : index
    %118 = vector.load %arg8[%c0_56, %c1_57, %c0_58, %c0_59] : memref<2x2x1x32xf32, #tpu.memory_space<vmem>>, vector<1x1x1x32xf32>
    %119 = vector.shape_cast %118 : vector<1x1x1x32xf32> to vector<1x32xf32>
    %cst_60 = arith.constant dense<0.000000e+00> : vector<64x96xf32>
    %120 = tpu.matmul %111, %113, %cst_60 {dimension_numbers = #tpu.dot_dimension_numbers<[1], [0], [0], [1], [0, 0, 1, 1], [], []>} : vector<64x32xf32>, vector<32x96xf32>, vector<64x96xf32> -> vector<64x96xf32>
    %121 = vector.broadcast %115 : vector<1x96xf32> to vector<64x96xf32>
    %122 = arith.addf %120, %121 : vector<64x96xf32>
    %123 = vector.extract_strided_slice %122 {offsets = [0, 0], sizes = [64, 32], strides = [1, 1]} : vector<64x96xf32> to vector<64x32xf32>
    %cst_61 = arith.constant 0.353553385 : f32
    %124 = vector.broadcast %cst_61 : f32 to vector<64x32xf32>
    %125 = arith.mulf %123, %124 : vector<64x32xf32>
    %126 = vector.extract_strided_slice %122 {offsets = [0, 32], sizes = [64, 32], strides = [1, 1]} : vector<64x96xf32> to vector<64x32xf32>
    %127 = vector.extract_strided_slice %122 {offsets = [0, 64], sizes = [64, 32], strides = [1, 1]} : vector<64x96xf32> to vector<64x32xf32>
    %cst_62 = arith.constant 0.000000e+00 : f32
    %128 = vector.broadcast %cst_62 : f32 to vector<64x32xf32>
    %129 = vector.broadcast %119 : vector<1x32xf32> to vector<64x32xf32>
    %130 = arith.addf %128, %129 : vector<64x32xf32>
    %131 = vector.extract_strided_slice %125 {offsets = [0, 0], sizes = [64, 8], strides = [1, 1]} : vector<64x32xf32> to vector<64x8xf32>
    %132 = vector.shape_cast %131 : vector<64x8xf32> to vector<4x16x8xf32>
    %133 = vector.extract_strided_slice %126 {offsets = [0, 0], sizes = [64, 8], strides = [1, 1]} : vector<64x32xf32> to vector<64x8xf32>
    %134 = vector.shape_cast %133 : vector<64x8xf32> to vector<4x16x8xf32>
    %135 = vector.extract_strided_slice %127 {offsets = [0, 0], sizes = [64, 8], strides = [1, 1]} : vector<64x32xf32> to vector<64x8xf32>
    %136 = vector.shape_cast %135 : vector<64x8xf32> to vector<4x16x8xf32>
    "tpu.trace_start"() <{level = 10 : i32, message = "gld,gmd->glm"}> : () -> ()
    %cst_63 = arith.constant dense<0.000000e+00> : vector<4x16x16xf32>
    %137 = tpu.matmul %132, %134, %cst_63 {dimension_numbers = #tpu.dot_dimension_numbers<[2], [2], [1], [1], [0, 0, 0, 1, 1, 1], [0], [0]>} : vector<4x16x8xf32>, vector<4x16x8xf32>, vector<4x16x16xf32> -> vector<4x16x16xf32>
    "tpu.trace_stop"() : () -> ()
    %cst_64 = arith.constant dense<0xFF800000> : vector<4x16xf32>
    %138 = vector.multi_reduction <maximumf>, %137, %cst_64 [2] : vector<4x16x16xf32> to vector<4x16xf32>
    %139 = vector.shape_cast %138 : vector<4x16xf32> to vector<4x16x1xf32>
    %140 = vector.broadcast %139 : vector<4x16x1xf32> to vector<4x16x16xf32>
    %141 = arith.subf %137, %140 : vector<4x16x16xf32>
    %142 = math.exp %141 : vector<4x16x16xf32>
    %cst_65 = arith.constant dense<0.000000e+00> : vector<4x16xf32>
    %143 = vector.multi_reduction <add>, %142, %cst_65 [2] : vector<4x16x16xf32> to vector<4x16xf32>
    %144 = vector.shape_cast %143 : vector<4x16xf32> to vector<4x16x1xf32>
    %145 = tpu.reciprocal %144 : vector<4x16x1xf32> -> vector<4x16x1xf32>
    %146 = vector.broadcast %145 : vector<4x16x1xf32> to vector<4x16x16xf32>
    %147 = arith.mulf %142, %146 : vector<4x16x16xf32>
    "tpu.trace_start"() <{level = 10 : i32, message = "glm,gmd->gld"}> : () -> ()
    %cst_66 = arith.constant dense<0.000000e+00> : vector<4x16x8xf32>
    %148 = tpu.matmul %147, %136, %cst_66 {dimension_numbers = #tpu.dot_dimension_numbers<[2], [1], [1], [2], [0, 0, 0, 1, 1, 2], [0], [0]>} : vector<4x16x16xf32>, vector<4x16x8xf32>, vector<4x16x8xf32> -> vector<4x16x8xf32>
    "tpu.trace_stop"() : () -> ()
    %149 = vector.shape_cast %148 : vector<4x16x8xf32> to vector<64x8xf32>
    %150 = vector.extract_strided_slice %117 {offsets = [0, 0], sizes = [8, 32], strides = [1, 1]} : vector<32x32xf32> to vector<8x32xf32>
    %cst_67 = arith.constant dense<0.000000e+00> : vector<64x32xf32>
    %151 = tpu.matmul %149, %150, %cst_67 {dimension_numbers = #tpu.dot_dimension_numbers<[1], [0], [0], [1], [0, 0, 1, 1], [], []>} : vector<64x8xf32>, vector<8x32xf32>, vector<64x32xf32> -> vector<64x32xf32>
    %152 = arith.addf %130, %151 : vector<64x32xf32>
    %153 = vector.extract_strided_slice %125 {offsets = [0, 8], sizes = [64, 8], strides = [1, 1]} : vector<64x32xf32> to vector<64x8xf32>
    %154 = vector.shape_cast %153 : vector<64x8xf32> to vector<4x16x8xf32>
    %155 = vector.extract_strided_slice %126 {offsets = [0, 8], sizes = [64, 8], strides = [1, 1]} : vector<64x32xf32> to vector<64x8xf32>
    %156 = vector.shape_cast %155 : vector<64x8xf32> to vector<4x16x8xf32>
    %157 = vector.extract_strided_slice %127 {offsets = [0, 8], sizes = [64, 8], strides = [1, 1]} : vector<64x32xf32> to vector<64x8xf32>
    %158 = vector.shape_cast %157 : vector<64x8xf32> to vector<4x16x8xf32>
    "tpu.trace_start"() <{level = 10 : i32, message = "gld,gmd->glm"}> : () -> ()
    %cst_68 = arith.constant dense<0.000000e+00> : vector<4x16x16xf32>
    %159 = tpu.matmul %154, %156, %cst_68 {dimension_numbers = #tpu.dot_dimension_numbers<[2], [2], [1], [1], [0, 0, 0, 1, 1, 1], [0], [0]>} : vector<4x16x8xf32>, vector<4x16x8xf32>, vector<4x16x16xf32> -> vector<4x16x16xf32>
    "tpu.trace_stop"() : () -> ()
    %cst_69 = arith.constant dense<0xFF800000> : vector<4x16xf32>
    %160 = vector.multi_reduction <maximumf>, %159, %cst_69 [2] : vector<4x16x16xf32> to vector<4x16xf32>
    %161 = vector.shape_cast %160 : vector<4x16xf32> to vector<4x16x1xf32>
    %162 = vector.broadcast %161 : vector<4x16x1xf32> to vector<4x16x16xf32>
    %163 = arith.subf %159, %162 : vector<4x16x16xf32>
    %164 = math.exp %163 : vector<4x16x16xf32>
    %cst_70 = arith.constant dense<0.000000e+00> : vector<4x16xf32>
    %165 = vector.multi_reduction <add>, %164, %cst_70 [2] : vector<4x16x16xf32> to vector<4x16xf32>
    %166 = vector.shape_cast %165 : vector<4x16xf32> to vector<4x16x1xf32>
    %167 = tpu.reciprocal %166 : vector<4x16x1xf32> -> vector<4x16x1xf32>
    %168 = vector.broadcast %167 : vector<4x16x1xf32> to vector<4x16x16xf32>
    %169 = arith.mulf %164, %168 : vector<4x16x16xf32>
    "tpu.trace_start"() <{level = 10 : i32, message = "glm,gmd->gld"}> : () -> ()
    %cst_71 = arith.constant dense<0.000000e+00> : vector<4x16x8xf32>
    %170 = tpu.matmul %169, %158, %cst_71 {dimension_numbers = #tpu.dot_dimension_numbers<[2], [1], [1], [2], [0, 0, 0, 1, 1, 2], [0], [0]>} : vector<4x16x16xf32>, vector<4x16x8xf32>, vector<4x16x8xf32> -> vector<4x16x8xf32>
    "tpu.trace_stop"() : () -> ()
    %171 = vector.shape_cast %170 : vector<4x16x8xf32> to vector<64x8xf32>
    %172 = vector.extract_strided_slice %117 {offsets = [8, 0], sizes = [8, 32], strides = [1, 1]} : vector<32x32xf32> to vector<8x32xf32>
    %cst_72 = arith.constant dense<0.000000e+00> : vector<64x32xf32>
    %173 = tpu.matmul %171, %172, %cst_72 {dimension_numbers = #tpu.dot_dimension_numbers<[1], [0], [0], [1], [0, 0, 1, 1], [], []>} : vector<64x8xf32>, vector<8x32xf32>, vector<64x32xf32> -> vector<64x32xf32>
    %174 = arith.addf %152, %173 : vector<64x32xf32>
    %175 = vector.extract_strided_slice %125 {offsets = [0, 16], sizes = [64, 8], strides = [1, 1]} : vector<64x32xf32> to vector<64x8xf32>
    %176 = vector.shape_cast %175 : vector<64x8xf32> to vector<4x16x8xf32>
    %177 = vector.extract_strided_slice %126 {offsets = [0, 16], sizes = [64, 8], strides = [1, 1]} : vector<64x32xf32> to vector<64x8xf32>
    %178 = vector.shape_cast %177 : vector<64x8xf32> to vector<4x16x8xf32>
    %179 = vector.extract_strided_slice %127 {offsets = [0, 16], sizes = [64, 8], strides = [1, 1]} : vector<64x32xf32> to vector<64x8xf32>
    %180 = vector.shape_cast %179 : vector<64x8xf32> to vector<4x16x8xf32>
    "tpu.trace_start"() <{level = 10 : i32, message = "gld,gmd->glm"}> : () -> ()
    %cst_73 = arith.constant dense<0.000000e+00> : vector<4x16x16xf32>
    %181 = tpu.matmul %176, %178, %cst_73 {dimension_numbers = #tpu.dot_dimension_numbers<[2], [2], [1], [1], [0, 0, 0, 1, 1, 1], [0], [0]>} : vector<4x16x8xf32>, vector<4x16x8xf32>, vector<4x16x16xf32> -> vector<4x16x16xf32>
    "tpu.trace_stop"() : () -> ()
    %cst_74 = arith.constant dense<0xFF800000> : vector<4x16xf32>
    %182 = vector.multi_reduction <maximumf>, %181, %cst_74 [2] : vector<4x16x16xf32> to vector<4x16xf32>
    %183 = vector.shape_cast %182 : vector<4x16xf32> to vector<4x16x1xf32>
    %184 = vector.broadcast %183 : vector<4x16x1xf32> to vector<4x16x16xf32>
    %185 = arith.subf %181, %184 : vector<4x16x16xf32>
    %186 = math.exp %185 : vector<4x16x16xf32>
    %cst_75 = arith.constant dense<0.000000e+00> : vector<4x16xf32>
    %187 = vector.multi_reduction <add>, %186, %cst_75 [2] : vector<4x16x16xf32> to vector<4x16xf32>
    %188 = vector.shape_cast %187 : vector<4x16xf32> to vector<4x16x1xf32>
    %189 = tpu.reciprocal %188 : vector<4x16x1xf32> -> vector<4x16x1xf32>
    %190 = vector.broadcast %189 : vector<4x16x1xf32> to vector<4x16x16xf32>
    %191 = arith.mulf %186, %190 : vector<4x16x16xf32>
    "tpu.trace_start"() <{level = 10 : i32, message = "glm,gmd->gld"}> : () -> ()
    %cst_76 = arith.constant dense<0.000000e+00> : vector<4x16x8xf32>
    %192 = tpu.matmul %191, %180, %cst_76 {dimension_numbers = #tpu.dot_dimension_numbers<[2], [1], [1], [2], [0, 0, 0, 1, 1, 2], [0], [0]>} : vector<4x16x16xf32>, vector<4x16x8xf32>, vector<4x16x8xf32> -> vector<4x16x8xf32>
    "tpu.trace_stop"() : () -> ()
    %193 = vector.shape_cast %192 : vector<4x16x8xf32> to vector<64x8xf32>
    %194 = vector.extract_strided_slice %117 {offsets = [16, 0], sizes = [8, 32], strides = [1, 1]} : vector<32x32xf32> to vector<8x32xf32>
    %cst_77 = arith.constant dense<0.000000e+00> : vector<64x32xf32>
    %195 = tpu.matmul %193, %194, %cst_77 {dimension_numbers = #tpu.dot_dimension_numbers<[1], [0], [0], [1], [0, 0, 1, 1], [], []>} : vector<64x8xf32>, vector<8x32xf32>, vector<64x32xf32> -> vector<64x32xf32>
    %196 = arith.addf %174, %195 : vector<64x32xf32>
    %197 = vector.extract_strided_slice %125 {offsets = [0, 24], sizes = [64, 8], strides = [1, 1]} : vector<64x32xf32> to vector<64x8xf32>
    %198 = vector.shape_cast %197 : vector<64x8xf32> to vector<4x16x8xf32>
    %199 = vector.extract_strided_slice %126 {offsets = [0, 24], sizes = [64, 8], strides = [1, 1]} : vector<64x32xf32> to vector<64x8xf32>
    %200 = vector.shape_cast %199 : vector<64x8xf32> to vector<4x16x8xf32>
    %201 = vector.extract_strided_slice %127 {offsets = [0, 24], sizes = [64, 8], strides = [1, 1]} : vector<64x32xf32> to vector<64x8xf32>
    %202 = vector.shape_cast %201 : vector<64x8xf32> to vector<4x16x8xf32>
    "tpu.trace_start"() <{level = 10 : i32, message = "gld,gmd->glm"}> : () -> ()
    %cst_78 = arith.constant dense<0.000000e+00> : vector<4x16x16xf32>
    %203 = tpu.matmul %198, %200, %cst_78 {dimension_numbers = #tpu.dot_dimension_numbers<[2], [2], [1], [1], [0, 0, 0, 1, 1, 1], [0], [0]>} : vector<4x16x8xf32>, vector<4x16x8xf32>, vector<4x16x16xf32> -> vector<4x16x16xf32>
    "tpu.trace_stop"() : () -> ()
    %cst_79 = arith.constant dense<0xFF800000> : vector<4x16xf32>
    %204 = vector.multi_reduction <maximumf>, %203, %cst_79 [2] : vector<4x16x16xf32> to vector<4x16xf32>
    %205 = vector.shape_cast %204 : vector<4x16xf32> to vector<4x16x1xf32>
    %206 = vector.broadcast %205 : vector<4x16x1xf32> to vector<4x16x16xf32>
    %207 = arith.subf %203, %206 : vector<4x16x16xf32>
    %208 = math.exp %207 : vector<4x16x16xf32>
    %cst_80 = arith.constant dense<0.000000e+00> : vector<4x16xf32>
    %209 = vector.multi_reduction <add>, %208, %cst_80 [2] : vector<4x16x16xf32> to vector<4x16xf32>
    %210 = vector.shape_cast %209 : vector<4x16xf32> to vector<4x16x1xf32>
    %211 = tpu.reciprocal %210 : vector<4x16x1xf32> -> vector<4x16x1xf32>
    %212 = vector.broadcast %211 : vector<4x16x1xf32> to vector<4x16x16xf32>
    %213 = arith.mulf %208, %212 : vector<4x16x16xf32>
    "tpu.trace_start"() <{level = 10 : i32, message = "glm,gmd->gld"}> : () -> ()
    %cst_81 = arith.constant dense<0.000000e+00> : vector<4x16x8xf32>
    %214 = tpu.matmul %213, %202, %cst_81 {dimension_numbers = #tpu.dot_dimension_numbers<[2], [1], [1], [2], [0, 0, 0, 1, 1, 2], [0], [0]>} : vector<4x16x16xf32>, vector<4x16x8xf32>, vector<4x16x8xf32> -> vector<4x16x8xf32>
    "tpu.trace_stop"() : () -> ()
    %215 = vector.shape_cast %214 : vector<4x16x8xf32> to vector<64x8xf32>
    %216 = vector.extract_strided_slice %117 {offsets = [24, 0], sizes = [8, 32], strides = [1, 1]} : vector<32x32xf32> to vector<8x32xf32>
    %cst_82 = arith.constant dense<0.000000e+00> : vector<64x32xf32>
    %217 = tpu.matmul %215, %216, %cst_82 {dimension_numbers = #tpu.dot_dimension_numbers<[1], [0], [0], [1], [0, 0, 1, 1], [], []>} : vector<64x8xf32>, vector<8x32xf32>, vector<64x32xf32> -> vector<64x32xf32>
    %218 = arith.addf %196, %217 : vector<64x32xf32>
    %c0_83 = arith.constant 0 : index
    %c0_84 = arith.constant 0 : index
    %219 = vector.load %arg4[%c0_83, %c0_84] : memref<64x64xf32, #tpu.memory_space<vmem>>, vector<64x64xf32>
    %cst_85 = arith.constant dense<0.000000e+00> : vector<64x32xf32>
    %220 = tpu.matmul %219, %218, %cst_85 {dimension_numbers = #tpu.dot_dimension_numbers<[1], [0], [0], [1], [0, 0, 1, 1], [], []>} : vector<64x64xf32>, vector<64x32xf32>, vector<64x32xf32> -> vector<64x32xf32>
    %c1_86 = arith.constant 1 : index
    %c0_87 = arith.constant 0 : index
    %c0_88 = arith.constant 0 : index
    %c0_89 = arith.constant 0 : index
    %221 = vector.load %arg5[%c1_86, %c0_87, %c0_88, %c0_89] : memref<2x2x32x96xf32, #tpu.memory_space<vmem>>, vector<1x1x32x96xf32>
    %222 = vector.shape_cast %221 : vector<1x1x32x96xf32> to vector<32x96xf32>
    %c1_90 = arith.constant 1 : index
    %c0_91 = arith.constant 0 : index
    %c0_92 = arith.constant 0 : index
    %c0_93 = arith.constant 0 : index
    %223 = vector.load %arg6[%c1_90, %c0_91, %c0_92, %c0_93] : memref<2x2x1x96xf32, #tpu.memory_space<vmem>>, vector<1x1x1x96xf32>
    %224 = vector.shape_cast %223 : vector<1x1x1x96xf32> to vector<1x96xf32>
    %c1_94 = arith.constant 1 : index
    %c0_95 = arith.constant 0 : index
    %c0_96 = arith.constant 0 : index
    %c0_97 = arith.constant 0 : index
    %225 = vector.load %arg7[%c1_94, %c0_95, %c0_96, %c0_97] : memref<2x2x32x32xf32, #tpu.memory_space<vmem>>, vector<1x1x32x32xf32>
    %226 = vector.shape_cast %225 : vector<1x1x32x32xf32> to vector<32x32xf32>
    %c1_98 = arith.constant 1 : index
    %c0_99 = arith.constant 0 : index
    %c0_100 = arith.constant 0 : index
    %c0_101 = arith.constant 0 : index
    %227 = vector.load %arg8[%c1_98, %c0_99, %c0_100, %c0_101] : memref<2x2x1x32xf32, #tpu.memory_space<vmem>>, vector<1x1x1x32xf32>
    %228 = vector.shape_cast %227 : vector<1x1x1x32xf32> to vector<1x32xf32>
    %cst_102 = arith.constant dense<0.000000e+00> : vector<64x96xf32>
    %229 = tpu.matmul %220, %222, %cst_102 {dimension_numbers = #tpu.dot_dimension_numbers<[1], [0], [0], [1], [0, 0, 1, 1], [], []>} : vector<64x32xf32>, vector<32x96xf32>, vector<64x96xf32> -> vector<64x96xf32>
    %230 = vector.broadcast %224 : vector<1x96xf32> to vector<64x96xf32>
    %231 = arith.addf %229, %230 : vector<64x96xf32>
    %232 = vector.extract_strided_slice %231 {offsets = [0, 0], sizes = [64, 32], strides = [1, 1]} : vector<64x96xf32> to vector<64x32xf32>
    %cst_103 = arith.constant 0.353553385 : f32
    %233 = vector.broadcast %cst_103 : f32 to vector<64x32xf32>
    %234 = arith.mulf %232, %233 : vector<64x32xf32>
    %235 = vector.extract_strided_slice %231 {offsets = [0, 32], sizes = [64, 32], strides = [1, 1]} : vector<64x96xf32> to vector<64x32xf32>
    %236 = vector.extract_strided_slice %231 {offsets = [0, 64], sizes = [64, 32], strides = [1, 1]} : vector<64x96xf32> to vector<64x32xf32>
    %cst_104 = arith.constant 0.000000e+00 : f32
    %237 = vector.broadcast %cst_104 : f32 to vector<64x32xf32>
    %238 = vector.broadcast %228 : vector<1x32xf32> to vector<64x32xf32>
    %239 = arith.addf %237, %238 : vector<64x32xf32>
    %240 = vector.extract_strided_slice %234 {offsets = [0, 0], sizes = [64, 8], strides = [1, 1]} : vector<64x32xf32> to vector<64x8xf32>
    %241 = vector.shape_cast %240 : vector<64x8xf32> to vector<8x8x8xf32>
    %242 = vector.extract_strided_slice %235 {offsets = [0, 0], sizes = [64, 8], strides = [1, 1]} : vector<64x32xf32> to vector<64x8xf32>
    %243 = vector.shape_cast %242 : vector<64x8xf32> to vector<8x8x8xf32>
    %244 = vector.extract_strided_slice %236 {offsets = [0, 0], sizes = [64, 8], strides = [1, 1]} : vector<64x32xf32> to vector<64x8xf32>
    %245 = vector.shape_cast %244 : vector<64x8xf32> to vector<8x8x8xf32>
    "tpu.trace_start"() <{level = 10 : i32, message = "gld,gmd->glm"}> : () -> ()
    %cst_105 = arith.constant dense<0.000000e+00> : vector<8x8x8xf32>
    %246 = tpu.matmul %241, %243, %cst_105 {dimension_numbers = #tpu.dot_dimension_numbers<[2], [2], [1], [1], [0, 0, 0, 1, 1, 1], [0], [0]>} : vector<8x8x8xf32>, vector<8x8x8xf32>, vector<8x8x8xf32> -> vector<8x8x8xf32>
    "tpu.trace_stop"() : () -> ()
    %cst_106 = arith.constant dense<0xFF800000> : vector<8x8xf32>
    %247 = vector.multi_reduction <maximumf>, %246, %cst_106 [2] : vector<8x8x8xf32> to vector<8x8xf32>
    %248 = vector.shape_cast %247 : vector<8x8xf32> to vector<8x8x1xf32>
    %249 = vector.broadcast %248 : vector<8x8x1xf32> to vector<8x8x8xf32>
    %250 = arith.subf %246, %249 : vector<8x8x8xf32>
    %251 = math.exp %250 : vector<8x8x8xf32>
    %cst_107 = arith.constant dense<0.000000e+00> : vector<8x8xf32>
    %252 = vector.multi_reduction <add>, %251, %cst_107 [2] : vector<8x8x8xf32> to vector<8x8xf32>
    %253 = vector.shape_cast %252 : vector<8x8xf32> to vector<8x8x1xf32>
    %254 = tpu.reciprocal %253 : vector<8x8x1xf32> -> vector<8x8x1xf32>
    %255 = vector.broadcast %254 : vector<8x8x1xf32> to vector<8x8x8xf32>
    %256 = arith.mulf %251, %255 : vector<8x8x8xf32>
    "tpu.trace_start"() <{level = 10 : i32, message = "glm,gmd->gld"}> : () -> ()
    %cst_108 = arith.constant dense<0.000000e+00> : vector<8x8x8xf32>
    %257 = tpu.matmul %256, %245, %cst_108 {dimension_numbers = #tpu.dot_dimension_numbers<[2], [1], [1], [2], [0, 0, 0, 1, 1, 2], [0], [0]>} : vector<8x8x8xf32>, vector<8x8x8xf32>, vector<8x8x8xf32> -> vector<8x8x8xf32>
    "tpu.trace_stop"() : () -> ()
    %258 = vector.shape_cast %257 : vector<8x8x8xf32> to vector<64x8xf32>
    %259 = vector.extract_strided_slice %226 {offsets = [0, 0], sizes = [8, 32], strides = [1, 1]} : vector<32x32xf32> to vector<8x32xf32>
    %cst_109 = arith.constant dense<0.000000e+00> : vector<64x32xf32>
    %260 = tpu.matmul %258, %259, %cst_109 {dimension_numbers = #tpu.dot_dimension_numbers<[1], [0], [0], [1], [0, 0, 1, 1], [], []>} : vector<64x8xf32>, vector<8x32xf32>, vector<64x32xf32> -> vector<64x32xf32>
    %261 = arith.addf %239, %260 : vector<64x32xf32>
    %262 = vector.extract_strided_slice %234 {offsets = [0, 8], sizes = [64, 8], strides = [1, 1]} : vector<64x32xf32> to vector<64x8xf32>
    %263 = vector.shape_cast %262 : vector<64x8xf32> to vector<8x8x8xf32>
    %264 = vector.extract_strided_slice %235 {offsets = [0, 8], sizes = [64, 8], strides = [1, 1]} : vector<64x32xf32> to vector<64x8xf32>
    %265 = vector.shape_cast %264 : vector<64x8xf32> to vector<8x8x8xf32>
    %266 = vector.extract_strided_slice %236 {offsets = [0, 8], sizes = [64, 8], strides = [1, 1]} : vector<64x32xf32> to vector<64x8xf32>
    %267 = vector.shape_cast %266 : vector<64x8xf32> to vector<8x8x8xf32>
    "tpu.trace_start"() <{level = 10 : i32, message = "gld,gmd->glm"}> : () -> ()
    %cst_110 = arith.constant dense<0.000000e+00> : vector<8x8x8xf32>
    %268 = tpu.matmul %263, %265, %cst_110 {dimension_numbers = #tpu.dot_dimension_numbers<[2], [2], [1], [1], [0, 0, 0, 1, 1, 1], [0], [0]>} : vector<8x8x8xf32>, vector<8x8x8xf32>, vector<8x8x8xf32> -> vector<8x8x8xf32>
    "tpu.trace_stop"() : () -> ()
    %cst_111 = arith.constant dense<0xFF800000> : vector<8x8xf32>
    %269 = vector.multi_reduction <maximumf>, %268, %cst_111 [2] : vector<8x8x8xf32> to vector<8x8xf32>
    %270 = vector.shape_cast %269 : vector<8x8xf32> to vector<8x8x1xf32>
    %271 = vector.broadcast %270 : vector<8x8x1xf32> to vector<8x8x8xf32>
    %272 = arith.subf %268, %271 : vector<8x8x8xf32>
    %273 = math.exp %272 : vector<8x8x8xf32>
    %cst_112 = arith.constant dense<0.000000e+00> : vector<8x8xf32>
    %274 = vector.multi_reduction <add>, %273, %cst_112 [2] : vector<8x8x8xf32> to vector<8x8xf32>
    %275 = vector.shape_cast %274 : vector<8x8xf32> to vector<8x8x1xf32>
    %276 = tpu.reciprocal %275 : vector<8x8x1xf32> -> vector<8x8x1xf32>
    %277 = vector.broadcast %276 : vector<8x8x1xf32> to vector<8x8x8xf32>
    %278 = arith.mulf %273, %277 : vector<8x8x8xf32>
    "tpu.trace_start"() <{level = 10 : i32, message = "glm,gmd->gld"}> : () -> ()
    %cst_113 = arith.constant dense<0.000000e+00> : vector<8x8x8xf32>
    %279 = tpu.matmul %278, %267, %cst_113 {dimension_numbers = #tpu.dot_dimension_numbers<[2], [1], [1], [2], [0, 0, 0, 1, 1, 2], [0], [0]>} : vector<8x8x8xf32>, vector<8x8x8xf32>, vector<8x8x8xf32> -> vector<8x8x8xf32>
    "tpu.trace_stop"() : () -> ()
    %280 = vector.shape_cast %279 : vector<8x8x8xf32> to vector<64x8xf32>
    %281 = vector.extract_strided_slice %226 {offsets = [8, 0], sizes = [8, 32], strides = [1, 1]} : vector<32x32xf32> to vector<8x32xf32>
    %cst_114 = arith.constant dense<0.000000e+00> : vector<64x32xf32>
    %282 = tpu.matmul %280, %281, %cst_114 {dimension_numbers = #tpu.dot_dimension_numbers<[1], [0], [0], [1], [0, 0, 1, 1], [], []>} : vector<64x8xf32>, vector<8x32xf32>, vector<64x32xf32> -> vector<64x32xf32>
    %283 = arith.addf %261, %282 : vector<64x32xf32>
    %284 = vector.extract_strided_slice %234 {offsets = [0, 16], sizes = [64, 8], strides = [1, 1]} : vector<64x32xf32> to vector<64x8xf32>
    %285 = vector.shape_cast %284 : vector<64x8xf32> to vector<8x8x8xf32>
    %286 = vector.extract_strided_slice %235 {offsets = [0, 16], sizes = [64, 8], strides = [1, 1]} : vector<64x32xf32> to vector<64x8xf32>
    %287 = vector.shape_cast %286 : vector<64x8xf32> to vector<8x8x8xf32>
    %288 = vector.extract_strided_slice %236 {offsets = [0, 16], sizes = [64, 8], strides = [1, 1]} : vector<64x32xf32> to vector<64x8xf32>
    %289 = vector.shape_cast %288 : vector<64x8xf32> to vector<8x8x8xf32>
    "tpu.trace_start"() <{level = 10 : i32, message = "gld,gmd->glm"}> : () -> ()
    %cst_115 = arith.constant dense<0.000000e+00> : vector<8x8x8xf32>
    %290 = tpu.matmul %285, %287, %cst_115 {dimension_numbers = #tpu.dot_dimension_numbers<[2], [2], [1], [1], [0, 0, 0, 1, 1, 1], [0], [0]>} : vector<8x8x8xf32>, vector<8x8x8xf32>, vector<8x8x8xf32> -> vector<8x8x8xf32>
    "tpu.trace_stop"() : () -> ()
    %cst_116 = arith.constant dense<0xFF800000> : vector<8x8xf32>
    %291 = vector.multi_reduction <maximumf>, %290, %cst_116 [2] : vector<8x8x8xf32> to vector<8x8xf32>
    %292 = vector.shape_cast %291 : vector<8x8xf32> to vector<8x8x1xf32>
    %293 = vector.broadcast %292 : vector<8x8x1xf32> to vector<8x8x8xf32>
    %294 = arith.subf %290, %293 : vector<8x8x8xf32>
    %295 = math.exp %294 : vector<8x8x8xf32>
    %cst_117 = arith.constant dense<0.000000e+00> : vector<8x8xf32>
    %296 = vector.multi_reduction <add>, %295, %cst_117 [2] : vector<8x8x8xf32> to vector<8x8xf32>
    %297 = vector.shape_cast %296 : vector<8x8xf32> to vector<8x8x1xf32>
    %298 = tpu.reciprocal %297 : vector<8x8x1xf32> -> vector<8x8x1xf32>
    %299 = vector.broadcast %298 : vector<8x8x1xf32> to vector<8x8x8xf32>
    %300 = arith.mulf %295, %299 : vector<8x8x8xf32>
    "tpu.trace_start"() <{level = 10 : i32, message = "glm,gmd->gld"}> : () -> ()
    %cst_118 = arith.constant dense<0.000000e+00> : vector<8x8x8xf32>
    %301 = tpu.matmul %300, %289, %cst_118 {dimension_numbers = #tpu.dot_dimension_numbers<[2], [1], [1], [2], [0, 0, 0, 1, 1, 2], [0], [0]>} : vector<8x8x8xf32>, vector<8x8x8xf32>, vector<8x8x8xf32> -> vector<8x8x8xf32>
    "tpu.trace_stop"() : () -> ()
    %302 = vector.shape_cast %301 : vector<8x8x8xf32> to vector<64x8xf32>
    %303 = vector.extract_strided_slice %226 {offsets = [16, 0], sizes = [8, 32], strides = [1, 1]} : vector<32x32xf32> to vector<8x32xf32>
    %cst_119 = arith.constant dense<0.000000e+00> : vector<64x32xf32>
    %304 = tpu.matmul %302, %303, %cst_119 {dimension_numbers = #tpu.dot_dimension_numbers<[1], [0], [0], [1], [0, 0, 1, 1], [], []>} : vector<64x8xf32>, vector<8x32xf32>, vector<64x32xf32> -> vector<64x32xf32>
    %305 = arith.addf %283, %304 : vector<64x32xf32>
    %306 = vector.extract_strided_slice %234 {offsets = [0, 24], sizes = [64, 8], strides = [1, 1]} : vector<64x32xf32> to vector<64x8xf32>
    %307 = vector.shape_cast %306 : vector<64x8xf32> to vector<8x8x8xf32>
    %308 = vector.extract_strided_slice %235 {offsets = [0, 24], sizes = [64, 8], strides = [1, 1]} : vector<64x32xf32> to vector<64x8xf32>
    %309 = vector.shape_cast %308 : vector<64x8xf32> to vector<8x8x8xf32>
    %310 = vector.extract_strided_slice %236 {offsets = [0, 24], sizes = [64, 8], strides = [1, 1]} : vector<64x32xf32> to vector<64x8xf32>
    %311 = vector.shape_cast %310 : vector<64x8xf32> to vector<8x8x8xf32>
    "tpu.trace_start"() <{level = 10 : i32, message = "gld,gmd->glm"}> : () -> ()
    %cst_120 = arith.constant dense<0.000000e+00> : vector<8x8x8xf32>
    %312 = tpu.matmul %307, %309, %cst_120 {dimension_numbers = #tpu.dot_dimension_numbers<[2], [2], [1], [1], [0, 0, 0, 1, 1, 1], [0], [0]>} : vector<8x8x8xf32>, vector<8x8x8xf32>, vector<8x8x8xf32> -> vector<8x8x8xf32>
    "tpu.trace_stop"() : () -> ()
    %cst_121 = arith.constant dense<0xFF800000> : vector<8x8xf32>
    %313 = vector.multi_reduction <maximumf>, %312, %cst_121 [2] : vector<8x8x8xf32> to vector<8x8xf32>
    %314 = vector.shape_cast %313 : vector<8x8xf32> to vector<8x8x1xf32>
    %315 = vector.broadcast %314 : vector<8x8x1xf32> to vector<8x8x8xf32>
    %316 = arith.subf %312, %315 : vector<8x8x8xf32>
    %317 = math.exp %316 : vector<8x8x8xf32>
    %cst_122 = arith.constant dense<0.000000e+00> : vector<8x8xf32>
    %318 = vector.multi_reduction <add>, %317, %cst_122 [2] : vector<8x8x8xf32> to vector<8x8xf32>
    %319 = vector.shape_cast %318 : vector<8x8xf32> to vector<8x8x1xf32>
    %320 = tpu.reciprocal %319 : vector<8x8x1xf32> -> vector<8x8x1xf32>
    %321 = vector.broadcast %320 : vector<8x8x1xf32> to vector<8x8x8xf32>
    %322 = arith.mulf %317, %321 : vector<8x8x8xf32>
    "tpu.trace_start"() <{level = 10 : i32, message = "glm,gmd->gld"}> : () -> ()
    %cst_123 = arith.constant dense<0.000000e+00> : vector<8x8x8xf32>
    %323 = tpu.matmul %322, %311, %cst_123 {dimension_numbers = #tpu.dot_dimension_numbers<[2], [1], [1], [2], [0, 0, 0, 1, 1, 2], [0], [0]>} : vector<8x8x8xf32>, vector<8x8x8xf32>, vector<8x8x8xf32> -> vector<8x8x8xf32>
    "tpu.trace_stop"() : () -> ()
    %324 = vector.shape_cast %323 : vector<8x8x8xf32> to vector<64x8xf32>
    %325 = vector.extract_strided_slice %226 {offsets = [24, 0], sizes = [8, 32], strides = [1, 1]} : vector<32x32xf32> to vector<8x32xf32>
    %cst_124 = arith.constant dense<0.000000e+00> : vector<64x32xf32>
    %326 = tpu.matmul %324, %325, %cst_124 {dimension_numbers = #tpu.dot_dimension_numbers<[1], [0], [0], [1], [0, 0, 1, 1], [], []>} : vector<64x8xf32>, vector<8x32xf32>, vector<64x32xf32> -> vector<64x32xf32>
    %327 = arith.addf %305, %326 : vector<64x32xf32>
    %c0_125 = arith.constant 0 : index
    %c0_126 = arith.constant 0 : index
    %328 = vector.load %arg3[%c0_125, %c0_126] : memref<64x64xf32, #tpu.memory_space<vmem>>, vector<64x64xf32>
    %cst_127 = arith.constant dense<0.000000e+00> : vector<64x32xf32>
    %329 = tpu.matmul %328, %327, %cst_127 {dimension_numbers = #tpu.dot_dimension_numbers<[1], [0], [0], [1], [0, 0, 1, 1], [], []>} : vector<64x64xf32>, vector<64x32xf32>, vector<64x32xf32> -> vector<64x32xf32>
    %c1_128 = arith.constant 1 : index
    %c1_129 = arith.constant 1 : index
    %c0_130 = arith.constant 0 : index
    %c0_131 = arith.constant 0 : index
    %330 = vector.load %arg5[%c1_128, %c1_129, %c0_130, %c0_131] : memref<2x2x32x96xf32, #tpu.memory_space<vmem>>, vector<1x1x32x96xf32>
    %331 = vector.shape_cast %330 : vector<1x1x32x96xf32> to vector<32x96xf32>
    %c1_132 = arith.constant 1 : index
    %c1_133 = arith.constant 1 : index
    %c0_134 = arith.constant 0 : index
    %c0_135 = arith.constant 0 : index
    %332 = vector.load %arg6[%c1_132, %c1_133, %c0_134, %c0_135] : memref<2x2x1x96xf32, #tpu.memory_space<vmem>>, vector<1x1x1x96xf32>
    %333 = vector.shape_cast %332 : vector<1x1x1x96xf32> to vector<1x96xf32>
    %c1_136 = arith.constant 1 : index
    %c1_137 = arith.constant 1 : index
    %c0_138 = arith.constant 0 : index
    %c0_139 = arith.constant 0 : index
    %334 = vector.load %arg7[%c1_136, %c1_137, %c0_138, %c0_139] : memref<2x2x32x32xf32, #tpu.memory_space<vmem>>, vector<1x1x32x32xf32>
    %335 = vector.shape_cast %334 : vector<1x1x32x32xf32> to vector<32x32xf32>
    %c1_140 = arith.constant 1 : index
    %c1_141 = arith.constant 1 : index
    %c0_142 = arith.constant 0 : index
    %c0_143 = arith.constant 0 : index
    %336 = vector.load %arg8[%c1_140, %c1_141, %c0_142, %c0_143] : memref<2x2x1x32xf32, #tpu.memory_space<vmem>>, vector<1x1x1x32xf32>
    %337 = vector.shape_cast %336 : vector<1x1x1x32xf32> to vector<1x32xf32>
    %cst_144 = arith.constant dense<0.000000e+00> : vector<64x96xf32>
    %338 = tpu.matmul %329, %331, %cst_144 {dimension_numbers = #tpu.dot_dimension_numbers<[1], [0], [0], [1], [0, 0, 1, 1], [], []>} : vector<64x32xf32>, vector<32x96xf32>, vector<64x96xf32> -> vector<64x96xf32>
    %339 = vector.broadcast %333 : vector<1x96xf32> to vector<64x96xf32>
    %340 = arith.addf %338, %339 : vector<64x96xf32>
    %341 = vector.extract_strided_slice %340 {offsets = [0, 0], sizes = [64, 32], strides = [1, 1]} : vector<64x96xf32> to vector<64x32xf32>
    %cst_145 = arith.constant 0.353553385 : f32
    %342 = vector.broadcast %cst_145 : f32 to vector<64x32xf32>
    %343 = arith.mulf %341, %342 : vector<64x32xf32>
    %344 = vector.extract_strided_slice %340 {offsets = [0, 32], sizes = [64, 32], strides = [1, 1]} : vector<64x96xf32> to vector<64x32xf32>
    %345 = vector.extract_strided_slice %340 {offsets = [0, 64], sizes = [64, 32], strides = [1, 1]} : vector<64x96xf32> to vector<64x32xf32>
    %cst_146 = arith.constant 0.000000e+00 : f32
    %346 = vector.broadcast %cst_146 : f32 to vector<64x32xf32>
    %347 = vector.broadcast %337 : vector<1x32xf32> to vector<64x32xf32>
    %348 = arith.addf %346, %347 : vector<64x32xf32>
    %349 = vector.extract_strided_slice %343 {offsets = [0, 0], sizes = [64, 8], strides = [1, 1]} : vector<64x32xf32> to vector<64x8xf32>
    %350 = vector.shape_cast %349 : vector<64x8xf32> to vector<4x16x8xf32>
    %351 = vector.extract_strided_slice %344 {offsets = [0, 0], sizes = [64, 8], strides = [1, 1]} : vector<64x32xf32> to vector<64x8xf32>
    %352 = vector.shape_cast %351 : vector<64x8xf32> to vector<4x16x8xf32>
    %353 = vector.extract_strided_slice %345 {offsets = [0, 0], sizes = [64, 8], strides = [1, 1]} : vector<64x32xf32> to vector<64x8xf32>
    %354 = vector.shape_cast %353 : vector<64x8xf32> to vector<4x16x8xf32>
    "tpu.trace_start"() <{level = 10 : i32, message = "gld,gmd->glm"}> : () -> ()
    %cst_147 = arith.constant dense<0.000000e+00> : vector<4x16x16xf32>
    %355 = tpu.matmul %350, %352, %cst_147 {dimension_numbers = #tpu.dot_dimension_numbers<[2], [2], [1], [1], [0, 0, 0, 1, 1, 1], [0], [0]>} : vector<4x16x8xf32>, vector<4x16x8xf32>, vector<4x16x16xf32> -> vector<4x16x16xf32>
    "tpu.trace_stop"() : () -> ()
    %cst_148 = arith.constant dense<0xFF800000> : vector<4x16xf32>
    %356 = vector.multi_reduction <maximumf>, %355, %cst_148 [2] : vector<4x16x16xf32> to vector<4x16xf32>
    %357 = vector.shape_cast %356 : vector<4x16xf32> to vector<4x16x1xf32>
    %358 = vector.broadcast %357 : vector<4x16x1xf32> to vector<4x16x16xf32>
    %359 = arith.subf %355, %358 : vector<4x16x16xf32>
    %360 = math.exp %359 : vector<4x16x16xf32>
    %cst_149 = arith.constant dense<0.000000e+00> : vector<4x16xf32>
    %361 = vector.multi_reduction <add>, %360, %cst_149 [2] : vector<4x16x16xf32> to vector<4x16xf32>
    %362 = vector.shape_cast %361 : vector<4x16xf32> to vector<4x16x1xf32>
    %363 = tpu.reciprocal %362 : vector<4x16x1xf32> -> vector<4x16x1xf32>
    %364 = vector.broadcast %363 : vector<4x16x1xf32> to vector<4x16x16xf32>
    %365 = arith.mulf %360, %364 : vector<4x16x16xf32>
    "tpu.trace_start"() <{level = 10 : i32, message = "glm,gmd->gld"}> : () -> ()
    %cst_150 = arith.constant dense<0.000000e+00> : vector<4x16x8xf32>
    %366 = tpu.matmul %365, %354, %cst_150 {dimension_numbers = #tpu.dot_dimension_numbers<[2], [1], [1], [2], [0, 0, 0, 1, 1, 2], [0], [0]>} : vector<4x16x16xf32>, vector<4x16x8xf32>, vector<4x16x8xf32> -> vector<4x16x8xf32>
    "tpu.trace_stop"() : () -> ()
    %367 = vector.shape_cast %366 : vector<4x16x8xf32> to vector<64x8xf32>
    %368 = vector.extract_strided_slice %335 {offsets = [0, 0], sizes = [8, 32], strides = [1, 1]} : vector<32x32xf32> to vector<8x32xf32>
    %cst_151 = arith.constant dense<0.000000e+00> : vector<64x32xf32>
    %369 = tpu.matmul %367, %368, %cst_151 {dimension_numbers = #tpu.dot_dimension_numbers<[1], [0], [0], [1], [0, 0, 1, 1], [], []>} : vector<64x8xf32>, vector<8x32xf32>, vector<64x32xf32> -> vector<64x32xf32>
    %370 = arith.addf %348, %369 : vector<64x32xf32>
    %371 = vector.extract_strided_slice %343 {offsets = [0, 8], sizes = [64, 8], strides = [1, 1]} : vector<64x32xf32> to vector<64x8xf32>
    %372 = vector.shape_cast %371 : vector<64x8xf32> to vector<4x16x8xf32>
    %373 = vector.extract_strided_slice %344 {offsets = [0, 8], sizes = [64, 8], strides = [1, 1]} : vector<64x32xf32> to vector<64x8xf32>
    %374 = vector.shape_cast %373 : vector<64x8xf32> to vector<4x16x8xf32>
    %375 = vector.extract_strided_slice %345 {offsets = [0, 8], sizes = [64, 8], strides = [1, 1]} : vector<64x32xf32> to vector<64x8xf32>
    %376 = vector.shape_cast %375 : vector<64x8xf32> to vector<4x16x8xf32>
    "tpu.trace_start"() <{level = 10 : i32, message = "gld,gmd->glm"}> : () -> ()
    %cst_152 = arith.constant dense<0.000000e+00> : vector<4x16x16xf32>
    %377 = tpu.matmul %372, %374, %cst_152 {dimension_numbers = #tpu.dot_dimension_numbers<[2], [2], [1], [1], [0, 0, 0, 1, 1, 1], [0], [0]>} : vector<4x16x8xf32>, vector<4x16x8xf32>, vector<4x16x16xf32> -> vector<4x16x16xf32>
    "tpu.trace_stop"() : () -> ()
    %cst_153 = arith.constant dense<0xFF800000> : vector<4x16xf32>
    %378 = vector.multi_reduction <maximumf>, %377, %cst_153 [2] : vector<4x16x16xf32> to vector<4x16xf32>
    %379 = vector.shape_cast %378 : vector<4x16xf32> to vector<4x16x1xf32>
    %380 = vector.broadcast %379 : vector<4x16x1xf32> to vector<4x16x16xf32>
    %381 = arith.subf %377, %380 : vector<4x16x16xf32>
    %382 = math.exp %381 : vector<4x16x16xf32>
    %cst_154 = arith.constant dense<0.000000e+00> : vector<4x16xf32>
    %383 = vector.multi_reduction <add>, %382, %cst_154 [2] : vector<4x16x16xf32> to vector<4x16xf32>
    %384 = vector.shape_cast %383 : vector<4x16xf32> to vector<4x16x1xf32>
    %385 = tpu.reciprocal %384 : vector<4x16x1xf32> -> vector<4x16x1xf32>
    %386 = vector.broadcast %385 : vector<4x16x1xf32> to vector<4x16x16xf32>
    %387 = arith.mulf %382, %386 : vector<4x16x16xf32>
    "tpu.trace_start"() <{level = 10 : i32, message = "glm,gmd->gld"}> : () -> ()
    %cst_155 = arith.constant dense<0.000000e+00> : vector<4x16x8xf32>
    %388 = tpu.matmul %387, %376, %cst_155 {dimension_numbers = #tpu.dot_dimension_numbers<[2], [1], [1], [2], [0, 0, 0, 1, 1, 2], [0], [0]>} : vector<4x16x16xf32>, vector<4x16x8xf32>, vector<4x16x8xf32> -> vector<4x16x8xf32>
    "tpu.trace_stop"() : () -> ()
    %389 = vector.shape_cast %388 : vector<4x16x8xf32> to vector<64x8xf32>
    %390 = vector.extract_strided_slice %335 {offsets = [8, 0], sizes = [8, 32], strides = [1, 1]} : vector<32x32xf32> to vector<8x32xf32>
    %cst_156 = arith.constant dense<0.000000e+00> : vector<64x32xf32>
    %391 = tpu.matmul %389, %390, %cst_156 {dimension_numbers = #tpu.dot_dimension_numbers<[1], [0], [0], [1], [0, 0, 1, 1], [], []>} : vector<64x8xf32>, vector<8x32xf32>, vector<64x32xf32> -> vector<64x32xf32>
    %392 = arith.addf %370, %391 : vector<64x32xf32>
    %393 = vector.extract_strided_slice %343 {offsets = [0, 16], sizes = [64, 8], strides = [1, 1]} : vector<64x32xf32> to vector<64x8xf32>
    %394 = vector.shape_cast %393 : vector<64x8xf32> to vector<4x16x8xf32>
    %395 = vector.extract_strided_slice %344 {offsets = [0, 16], sizes = [64, 8], strides = [1, 1]} : vector<64x32xf32> to vector<64x8xf32>
    %396 = vector.shape_cast %395 : vector<64x8xf32> to vector<4x16x8xf32>
    %397 = vector.extract_strided_slice %345 {offsets = [0, 16], sizes = [64, 8], strides = [1, 1]} : vector<64x32xf32> to vector<64x8xf32>
    %398 = vector.shape_cast %397 : vector<64x8xf32> to vector<4x16x8xf32>
    "tpu.trace_start"() <{level = 10 : i32, message = "gld,gmd->glm"}> : () -> ()
    %cst_157 = arith.constant dense<0.000000e+00> : vector<4x16x16xf32>
    %399 = tpu.matmul %394, %396, %cst_157 {dimension_numbers = #tpu.dot_dimension_numbers<[2], [2], [1], [1], [0, 0, 0, 1, 1, 1], [0], [0]>} : vector<4x16x8xf32>, vector<4x16x8xf32>, vector<4x16x16xf32> -> vector<4x16x16xf32>
    "tpu.trace_stop"() : () -> ()
    %cst_158 = arith.constant dense<0xFF800000> : vector<4x16xf32>
    %400 = vector.multi_reduction <maximumf>, %399, %cst_158 [2] : vector<4x16x16xf32> to vector<4x16xf32>
    %401 = vector.shape_cast %400 : vector<4x16xf32> to vector<4x16x1xf32>
    %402 = vector.broadcast %401 : vector<4x16x1xf32> to vector<4x16x16xf32>
    %403 = arith.subf %399, %402 : vector<4x16x16xf32>
    %404 = math.exp %403 : vector<4x16x16xf32>
    %cst_159 = arith.constant dense<0.000000e+00> : vector<4x16xf32>
    %405 = vector.multi_reduction <add>, %404, %cst_159 [2] : vector<4x16x16xf32> to vector<4x16xf32>
    %406 = vector.shape_cast %405 : vector<4x16xf32> to vector<4x16x1xf32>
    %407 = tpu.reciprocal %406 : vector<4x16x1xf32> -> vector<4x16x1xf32>
    %408 = vector.broadcast %407 : vector<4x16x1xf32> to vector<4x16x16xf32>
    %409 = arith.mulf %404, %408 : vector<4x16x16xf32>
    "tpu.trace_start"() <{level = 10 : i32, message = "glm,gmd->gld"}> : () -> ()
    %cst_160 = arith.constant dense<0.000000e+00> : vector<4x16x8xf32>
    %410 = tpu.matmul %409, %398, %cst_160 {dimension_numbers = #tpu.dot_dimension_numbers<[2], [1], [1], [2], [0, 0, 0, 1, 1, 2], [0], [0]>} : vector<4x16x16xf32>, vector<4x16x8xf32>, vector<4x16x8xf32> -> vector<4x16x8xf32>
    "tpu.trace_stop"() : () -> ()
    %411 = vector.shape_cast %410 : vector<4x16x8xf32> to vector<64x8xf32>
    %412 = vector.extract_strided_slice %335 {offsets = [16, 0], sizes = [8, 32], strides = [1, 1]} : vector<32x32xf32> to vector<8x32xf32>
    %cst_161 = arith.constant dense<0.000000e+00> : vector<64x32xf32>
    %413 = tpu.matmul %411, %412, %cst_161 {dimension_numbers = #tpu.dot_dimension_numbers<[1], [0], [0], [1], [0, 0, 1, 1], [], []>} : vector<64x8xf32>, vector<8x32xf32>, vector<64x32xf32> -> vector<64x32xf32>
    %414 = arith.addf %392, %413 : vector<64x32xf32>
    %415 = vector.extract_strided_slice %343 {offsets = [0, 24], sizes = [64, 8], strides = [1, 1]} : vector<64x32xf32> to vector<64x8xf32>
    %416 = vector.shape_cast %415 : vector<64x8xf32> to vector<4x16x8xf32>
    %417 = vector.extract_strided_slice %344 {offsets = [0, 24], sizes = [64, 8], strides = [1, 1]} : vector<64x32xf32> to vector<64x8xf32>
    %418 = vector.shape_cast %417 : vector<64x8xf32> to vector<4x16x8xf32>
    %419 = vector.extract_strided_slice %345 {offsets = [0, 24], sizes = [64, 8], strides = [1, 1]} : vector<64x32xf32> to vector<64x8xf32>
    %420 = vector.shape_cast %419 : vector<64x8xf32> to vector<4x16x8xf32>
    "tpu.trace_start"() <{level = 10 : i32, message = "gld,gmd->glm"}> : () -> ()
    %cst_162 = arith.constant dense<0.000000e+00> : vector<4x16x16xf32>
    %421 = tpu.matmul %416, %418, %cst_162 {dimension_numbers = #tpu.dot_dimension_numbers<[2], [2], [1], [1], [0, 0, 0, 1, 1, 1], [0], [0]>} : vector<4x16x8xf32>, vector<4x16x8xf32>, vector<4x16x16xf32> -> vector<4x16x16xf32>
    "tpu.trace_stop"() : () -> ()
    %cst_163 = arith.constant dense<0xFF800000> : vector<4x16xf32>
    %422 = vector.multi_reduction <maximumf>, %421, %cst_163 [2] : vector<4x16x16xf32> to vector<4x16xf32>
    %423 = vector.shape_cast %422 : vector<4x16xf32> to vector<4x16x1xf32>
    %424 = vector.broadcast %423 : vector<4x16x1xf32> to vector<4x16x16xf32>
    %425 = arith.subf %421, %424 : vector<4x16x16xf32>
    %426 = math.exp %425 : vector<4x16x16xf32>
    %cst_164 = arith.constant dense<0.000000e+00> : vector<4x16xf32>
    %427 = vector.multi_reduction <add>, %426, %cst_164 [2] : vector<4x16x16xf32> to vector<4x16xf32>
    %428 = vector.shape_cast %427 : vector<4x16xf32> to vector<4x16x1xf32>
    %429 = tpu.reciprocal %428 : vector<4x16x1xf32> -> vector<4x16x1xf32>
    %430 = vector.broadcast %429 : vector<4x16x1xf32> to vector<4x16x16xf32>
    %431 = arith.mulf %426, %430 : vector<4x16x16xf32>
    "tpu.trace_start"() <{level = 10 : i32, message = "glm,gmd->gld"}> : () -> ()
    %cst_165 = arith.constant dense<0.000000e+00> : vector<4x16x8xf32>
    %432 = tpu.matmul %431, %420, %cst_165 {dimension_numbers = #tpu.dot_dimension_numbers<[2], [1], [1], [2], [0, 0, 0, 1, 1, 2], [0], [0]>} : vector<4x16x16xf32>, vector<4x16x8xf32>, vector<4x16x8xf32> -> vector<4x16x8xf32>
    "tpu.trace_stop"() : () -> ()
    %433 = vector.shape_cast %432 : vector<4x16x8xf32> to vector<64x8xf32>
    %434 = vector.extract_strided_slice %335 {offsets = [24, 0], sizes = [8, 32], strides = [1, 1]} : vector<32x32xf32> to vector<8x32xf32>
    %cst_166 = arith.constant dense<0.000000e+00> : vector<64x32xf32>
    %435 = tpu.matmul %433, %434, %cst_166 {dimension_numbers = #tpu.dot_dimension_numbers<[1], [0], [0], [1], [0, 0, 1, 1], [], []>} : vector<64x8xf32>, vector<8x32xf32>, vector<64x32xf32> -> vector<64x32xf32>
    %436 = arith.addf %414, %435 : vector<64x32xf32>
    %c0_167 = arith.constant 0 : index
    %c0_168 = arith.constant 0 : index
    %437 = vector.load %arg10[%c0_167, %c0_168] : memref<64x32xf32, #tpu.memory_space<vmem>>, vector<64x32xf32>
    tpu.vector_store %arg10[%c0_167, %c0_168], %436 {strides = array<i32>} : memref<64x32xf32, #tpu.memory_space<vmem>>, vector<64x32xf32>,
    %c0_169 = arith.constant 0 : index
    %c0_170 = arith.constant 0 : index
    %438 = vector.load %arg9[%c0_169, %c0_170] : memref<1x32xf32, #tpu.memory_space<vmem>>, vector<1x32xf32>
    %cst_171 = arith.constant dense<0.000000e+00> : vector<1x64xf32>
    %439 = tpu.matmul %438, %436, %cst_171 {dimension_numbers = #tpu.dot_dimension_numbers<[1], [1], [0], [0], [0, 0, 1, 0], [], []>} : vector<1x32xf32>, vector<64x32xf32>, vector<1x64xf32> -> vector<1x64xf32>
    %c0_172 = arith.constant 0 : index
    %c0_173 = arith.constant 0 : index
    %440 = vector.load %arg11[%c0_172, %c0_173] : memref<1x64xf32, #tpu.memory_space<vmem>>, vector<1x64xf32>
    tpu.vector_store %arg11[%c0_172, %c0_173], %439 {strides = array<i32>} : memref<1x64xf32, #tpu.memory_space<vmem>>, vector<1x64xf32>,
    return
  }
  func.func @transform_0(%arg0: i32) -> (i32, i32) {
    %c0_i32 = arith.constant 0 : i32
    %c0_i32_0 = arith.constant 0 : i32
    %c0_i32_1 = arith.constant 0 : i32
    return %c0_i32, %c0_i32_0 : i32, i32
  }
  func.func @transform_1(%arg0: i32) -> (i32, i32) {
    %c0_i32 = arith.constant 0 : i32
    %c0_i32_0 = arith.constant 0 : i32
    %c0_i32_1 = arith.constant 0 : i32
    return %c0_i32, %c0_i32_0 : i32, i32
  }
  func.func @transform_2(%arg0: i32) -> (i32, i32) {
    %c0_i32 = arith.constant 0 : i32
    %c0_i32_0 = arith.constant 0 : i32
    %c0_i32_1 = arith.constant 0 : i32
    return %c0_i32, %c0_i32_0 : i32, i32
  }
  func.func @transform_3(%arg0: i32) -> (i32, i32) {
    %c0_i32 = arith.constant 0 : i32
    %c0_i32_0 = arith.constant 0 : i32
    %c0_i32_1 = arith.constant 0 : i32
    return %c0_i32, %c0_i32_0 : i32, i32
  }
  func.func @transform_4(%arg0: i32) -> (i32, i32, i32, i32) {
    %c0_i32 = arith.constant 0 : i32
    %c0_i32_0 = arith.constant 0 : i32
    %c0_i32_1 = arith.constant 0 : i32
    %c0_i32_2 = arith.constant 0 : i32
    %c0_i32_3 = arith.constant 0 : i32
    return %c0_i32, %c0_i32_0, %c0_i32_1, %c0_i32_2 : i32, i32, i32, i32
  }
  func.func @transform_5(%arg0: i32) -> (i32, i32, i32, i32) {
    %c0_i32 = arith.constant 0 : i32
    %c0_i32_0 = arith.constant 0 : i32
    %c0_i32_1 = arith.constant 0 : i32
    %c0_i32_2 = arith.constant 0 : i32
    %c0_i32_3 = arith.constant 0 : i32
    return %c0_i32, %c0_i32_0, %c0_i32_1, %c0_i32_2 : i32, i32, i32, i32
  }
  func.func @transform_6(%arg0: i32) -> (i32, i32, i32, i32) {
    %c0_i32 = arith.constant 0 : i32
    %c0_i32_0 = arith.constant 0 : i32
    %c0_i32_1 = arith.constant 0 : i32
    %c0_i32_2 = arith.constant 0 : i32
    %c0_i32_3 = arith.constant 0 : i32
    return %c0_i32, %c0_i32_0, %c0_i32_1, %c0_i32_2 : i32, i32, i32, i32
  }
  func.func @transform_7(%arg0: i32) -> (i32, i32, i32, i32) {
    %c0_i32 = arith.constant 0 : i32
    %c0_i32_0 = arith.constant 0 : i32
    %c0_i32_1 = arith.constant 0 : i32
    %c0_i32_2 = arith.constant 0 : i32
    %c0_i32_3 = arith.constant 0 : i32
    return %c0_i32, %c0_i32_0, %c0_i32_1, %c0_i32_2 : i32, i32, i32, i32
  }
  func.func @transform_8(%arg0: i32) -> (i32, i32) {
    %c0_i32 = arith.constant 0 : i32
    %c0_i32_0 = arith.constant 0 : i32
    %c0_i32_1 = arith.constant 0 : i32
    return %c0_i32, %c0_i32_0 : i32, i32
  }
  func.func @transform_9(%arg0: i32) -> (i32, i32) {
    %c0_i32 = arith.constant 0 : i32
    %c0_i32_0 = arith.constant 0 : i32
    %c0_i32_1 = arith.constant 0 : i32
    return %c0_i32, %c0_i32_0 : i32, i32
  }
  func.func @transform_10(%arg0: i32) -> (i32, i32) {
    %c0_i32 = arith.constant 0 : i32
    %c0_i32_0 = arith.constant 0 : i32
    %c0_i32_1 = arith.constant 0 : i32
    return %c0_i32, %c0_i32_0 : i32, i32
  }
}

</mosaic_0001>

<bundles_post_ra>
// kernel: refiner_forward_pallas.1
= control target key start
LH: loop header
LB: loop body
LE: loop exit
PB: predicated region body
PF: predicated region fallthrough
CT: control target
= control target key end

     0   :  { %16 = vsyncpa [#allocation3], 0  ;;  %s15890_s0 = inlined_call_operand.hbm [shape: f32[64,32], index: 0, kind: input, shape index: {}]   ;;  %s15891_s1 = inlined_call_operand.hbm [shape: f32[64,64], index: 1, kind: input, shape index: {}]   ;;  %s15892_s2 = inlined_call_operand.hbm [shape: f32[64,64], index: 2, kind: input, shape index: {}]   ;;  %s15893_s3 = inlined_call_operand.hbm [shape: f32[64,64], index: 3, kind: input, shape index: {}]   ;;  %s15894_s4 = inlined_call_operand.hbm [shape: f32[2,2,32,96], index: 4, kind: input, shape index: {}]   ;;  %s15895_s5 = inlined_call_operand.vmem [shape: f32[2,2,1,96], index: 5, kind: input, shape index: {}]   ;;  %s15896_s6 = inlined_call_operand.hbm [shape: f32[2,2,32,32], index: 6, kind: input, shape index: {}]   ;;  %s15897_s7 = inlined_call_operand.vmem [shape: f32[2,2,1,32], index: 7, kind: input, shape index: {}]   ;;  %s15898_s8 = inlined_call_operand.vmem [shape: f32[1,32], index: 8, kind: input, shape index: {}]   ;;  %s15899_s9 = inlined_call_operand.vmem [shape: f32[64,32], index: 9, kind: output, shape index: {0}]   ;;  %s15900_s10 = inlined_call_operand.vmem [shape: f32[1,64], index: 10, kind: output, shape index: {1}]  }
   0x1   :  { %17 = vsyncpa [#allocation5], 0 }
   0x2   :  { %18 = vsyncpa [#allocation8], 0 }
   0x3   :  { %19 = vsyncpa [#allocation11], 0  ;;  %s37_s15 = sshll.u32 %s15891_s1, 4  ;;  %s12480_s16 = smov [#allocation4]   ;;  %s38_s15 = int_to_ptr.hbm [resolvable:$true] %s37_s15 }
   0x4   :  { %s39_s17 = sshll.u32 %s12480_s16, 4  ;;  %s63_s20 = sshll.u32 %s15893_s3, 4  ;;  %s40_s17 = int_to_ptr.vmem [resolvable:$true] %s39_s17  ;;  %s64_s20 = int_to_ptr.hbm [resolvable:$true] %s63_s20 }
   0x5   :  { %s12481_s21 = smov 128   ;;  %s12482_s22 = smov 8  }
   0x6   :  { %45 = dma.hbm_to_vmem [thread:$0]  %s38_s15, 1024, %s40_s17, [#allocation5], %s12481_s21, %s12481_s21, %s12482_s22  }
   0x7   :  { %s12483_s23 = smov [#allocation7]   ;;  %s24_s1 = sshll.u32 %s15890_s0, 4  ;;  %s25_s1 = int_to_ptr.hbm [resolvable:$true] %s24_s1 }
   0x8   :  { %s65_s24 = sshll.u32 %s12483_s23, 4  ;;  %s50_s28 = sshll.u32 %s15892_s2, 4  ;;  %s66_s24 = int_to_ptr.vmem [resolvable:$true] %s65_s24  ;;  %s51_s28 = int_to_ptr.hbm [resolvable:$true] %s50_s28 }
   0x9   :  { %71 = dma.hbm_to_vmem [thread:$0]  %s64_s20, 1024, %s66_s24, [#allocation8], %s12481_s21, %s12481_s21, %s12482_s22  }
   0xa   :  { %s12484_s29 = smov [#allocation2]   ;;  %s12485_s11 = smov [#allocation6]  }
   0xb   :  { %s26_s30 = sshll.u32 %s12484_s29, 4  ;;  %s52_s0 = sshll.u32 %s12485_s11, 4  ;;  %s27_s30 = int_to_ptr.vmem [resolvable:$true] %s26_s30  ;;  %s53_s0 = int_to_ptr.vmem [resolvable:$true] %s52_s0 }
   0xc   :  { %32 = dma.hbm_to_vmem [thread:$0]  %s25_s1, 1024, %s27_s30, [#allocation3], %s12481_s21, %s12481_s21, %s12482_s22  }
   0xd   :  { %s76_s14 = sshll.u32 %s15894_s4, 4  ;;  %s91_s16 = sshll.u32 %s15896_s6, 4  ;;  %s77_s14 = int_to_ptr.hbm [resolvable:$true] %s76_s14  ;;  %s92_s16 = int_to_ptr.hbm [resolvable:$true] %s91_s16 }
   0xe   :  { %58 = dma.hbm_to_vmem [thread:$0]  %s51_s28, 1024, %s53_s0, [#allocation5], %s12481_s21, %s12481_s21, %s12482_s22  }
   0xf   :  { %s12486_s17 = smov [#allocation9]   ;;  %s12487_s19 = smov [#allocation10]  }
  0x10   :  { %s78_s18 = sshll.u32 %s12486_s17, 4  ;;  %s93_s4 = sshll.u32 %s12487_s19, 4  ;;  %s79_s18 = int_to_ptr.vmem [resolvable:$true] %s78_s18  ;;  %s94_s4 = int_to_ptr.vmem [resolvable:$true] %s93_s4 }
  0x11   :  { %84 = dma.hbm_to_vmem [thread:$0]  %s77_s14, 2048, %s79_s18, [#allocation8], %s12481_s21, %s12481_s21, %s12482_s22  }
  0x12   :  { %99 = dma.hbm_to_vmem [thread:$0]  %s92_s16, 2048, %s94_s4, [#allocation11], %s12481_s21, %s12481_s21, %s12482_s22  }
  0x13   :  { %12472 = dma.done.wait [#allocation3], 1024  }
  0x14   :  { %12473 = vsyncadd [#allocation3], 4294966272 }
  0x15   :  { %12474 = dma.done.wait [#allocation5], 2048  }
  0x16   :  { %12475 = vsyncadd [#allocation5], 4294965248 }
  0x17   :  { %12476 = dma.done.wait [#allocation8], 3072  }
  0x18   :  { %12477 = vsyncadd [#allocation8], 4294964224 }
  0x19   :  { %12478 = dma.done.wait [#allocation11], 2048  }
  0x1a   :  { %12479 = vsyncadd [#allocation11], 4294965248  ;;  %v143_v0 = vld [vmem:[#allocation2 + $0x38] sm:$0xff]  ;;  %v142_v1 = vld [vmem:[#allocation2 + $0x30] sm:$0xff]  ;;  %vm144_vm0 = vcmask 523264   ;;  %vm223_vm1 = vcmask 261120  }
  0x1b   :  { %177 = vmatpush.msra.mxu0 %v143_v0  ;;  %v141_v2 = vld [vmem:[#allocation2 + $0x28] sm:$0xff]  ;;  %v140_v3 = vld [vmem:[#allocation2 + $0x20] sm:$0xff]  ;;  %v139_v4 = vld [vmem:[#allocation2 + $0x18] sm:$0xff]  ;;  %s12488_s21 = smov 96   ;;  %vm304_vm2 = vcmask 64512   ;;  %s12489_s22 = smov 64  }
  0x1c   :  { %v138_v5 = vld [vmem:[#allocation2 + $0x10] sm:$0xff]  ;;  %v137_v6 = vld [vmem:[#allocation2 + $0x8] sm:$0xff]  ;;  %v136_v7 = vld [vmem:[#allocation2] sm:$0xff]  ;;  %s12490_s23 = smov 120   ;;  %s12491_s24 = smov 88  }
  0x1d   :  { %178 = vmatpush.msra.mxu0 %v142_v1  ;;  %v128_v8 = vld [vmem:[#allocation4] sm:$0xff]  ;;  %v129_v9 = vld [vmem:[#allocation4 + $0x8] sm:$0xff]  ;;  %v130_v10 = vld [vmem:[#allocation4 + $0x10] sm:$0xff]  ;;  %s12492_s25 = smov 56   ;;  %s12493_s26 = smov 80  }
  0x1e   :  { %v131_v11 = vld [vmem:[#allocation4 + $0x18] sm:$0xff]  ;;  %v212_v13 = vld [vmem:[#allocation9 + $0x10] sm:$0xff]  ;;  %v211_v14 = vld [vmem:[#allocation9 + $0x8] sm:$0xff]  ;;  %s12494_s1 = smov 112   ;;  %s12495_s3 = smov 48  }
  0x1f   :  { %179 = vmatpush.msra.mxu0 %v141_v2  ;;  %v213_v12 = vld [vmem:[#allocation9 + $0x18] sm:$0xff]  ;;  %v132_v15 = vld [vmem:[#allocation4 + $0x20] sm:$0xff]  ;;  %v133_v16 = vld [vmem:[#allocation4 + $0x28] sm:$0xff]  ;;  %s12496_s27 = smov 104   ;;  %s12497_s28 = smov 72  }
  0x20   :  { %11529 = vmatpush.msra.mxu1 %v213_v12  ;;  %v134_v17 = vld [vmem:[#allocation4 + $0x30] sm:$0xff]  ;;  %v135_v18 = vld [vmem:[#allocation4 + $0x38] sm:$0xff]  ;;  %v210_v19 = vld [vmem:[#allocation9] sm:$0xff]  ;;  %s12498_s29 = smov 40  }
  0x21   :  { %180 = vmatpush.msra.mxu0 %v140_v3  ;;  %v11808_v28 = vld [vmem:[%s15895_s5] ss:$0 sm:$0xff] }
  0x22   :  { %11530 = vmatpush.msra.mxu1 %v212_v13 }
  0x23   :  { %181 = vmatpush.msra.mxu0 %v139_v4 }
  0x24   :  { %11531 = vmatpush.msra.mxu1 %v211_v14 }
  0x25   :  { %182 = vmatpush.msra.mxu0 %v138_v5 }
  0x26   :  { %11532 = vmatpush.msra.mxu1 %v210_v19 }
  0x27   :  { %183 = vmatpush.msra.mxu0 %v137_v6 }
  0x29   :  { %184 = vmatpush.msra.mxu0 %v136_v7 }
  0x2a   :  { %10938 = vmatmul.msk.f32.vlgmr.msra.gmra.mxu0 %vm144_vm0, %v128_v8 }
  0x2b   :  { %260 = vmatpush.msrb.mxu0 %v213_v12 }
  0x2d   :  { %261 = vmatpush.msrb.mxu0 %v212_v13 }
  0x2f   :  { %262 = vmatpush.msrb.mxu0 %v211_v14 }
  0x31   :  { %263 = vmatpush.msrb.mxu0 %v210_v19 }
  0x32   :  { %10939 = vmatmul.msk.f32.gmra.mxu0 %vm144_vm0, %v129_v9 }
  0x3a   :  { %10940 = vmatmul.msk.f32.gmra.mxu0 %vm144_vm0, %v130_v10 }
  0x42   :  { %10941 = vmatmul.msk.f32.gmra.mxu0 %vm144_vm0, %v131_v11 }
  0x4a   :  { %10942 = vmatmul.msk.f32.gmra.mxu0 %vm144_vm0, %v132_v15 }
  0x52   :  { %10943 = vmatmul.msk.f32.gmra.mxu0 %vm144_vm0, %v133_v16 }
  0x5a   :  { %10944 = vmatmul.msk.f32.gmra.mxu0 %vm144_vm0, %v134_v17 }
  0x62   :  { %10945 = vmatmul.msk.f32.gmra.mxu0 %vm144_vm0, %v135_v18 }
  0xa7   :  { %v186_v20 = vpop.f32.mrf.mxu0 }
  0xa8   :  { %10946 = vmatmul.msk.f32.vlgmr.msrb.gmra.mxu0 %vm223_vm1, %v186_v20 }
  0xaf   :  { %v189_v21 = vpop.f32.mrf.mxu0 }
  0xb0   :  { %10947 = vmatmul.msk.f32.vlgmr.msra.gmra.mxu1 %vm223_vm1, %v189_v21 }
  0xb7   :  { %v192_v22 = vpop.f32.mrf.mxu0 }
  0xb8   :  { %10948 = vmatmul.msk.f32.gmra.mxu1 %vm223_vm1, %v192_v22 }
  0xbf   :  { %v195_v23 = vpop.f32.mrf.mxu0 }
  0xc0   :  { %10949 = vmatmul.msk.f32.gmra.mxu1 %vm223_vm1, %v195_v23 }
  0xc7   :  { %v198_v24 = vpop.f32.mrf.mxu0 }
  0xc8   :  { %10950 = vmatmul.msk.f32.gmra.mxu1 %vm223_vm1, %v198_v24 }
  0xcf   :  { %v201_v25 = vpop.f32.mrf.mxu0 }
  0xd0   :  { %10951 = vmatmul.msk.f32.gmra.mxu1 %vm223_vm1, %v201_v25 }
  0xd7   :  { %v204_v26 = vpop.f32.mrf.mxu0 }
  0xd8   :  { %10952 = vmatmul.msk.f32.gmra.mxu1 %vm223_vm1, %v204_v26 }
  0xdf   :  { %v207_v27 = vpop.f32.mrf.mxu0 }
  0xe0   :  { %10953 = vmatmul.msk.f32.gmra.mxu1 %vm223_vm1, %v207_v27 }
 0x125   :  { %v265_v29 = vpop.f32.mrf.mxu0 }
 0x126   :  { %v12609_v30 = vadd.f32 %v11808_v28, %v265_v29 }
 0x128   :  { %302 = vrot.lane.b32.xlu0 %v12609_v30, %s12488_s21  ;;  %v12639_v45 = vmul.f32 0.35355338, %v12609_v30 }
 0x12d   :  { %v268_v31 = vpop.f32.mrf.mxu1 }
 0x12e   :  { %v12613_v32 = vadd.f32 %v11808_v28, %v268_v31 }
 0x130   :  { %331 = vrot.lane.b32.xlu0 %v12613_v32, %s12488_s21  ;;  %v12645_v47 = vmul.f32 0.35355338, %v12613_v32 }
 0x135   :  { %v271_v33 = vpop.f32.mrf.mxu1 }
 0x136   :  { %v12617_v34 = vadd.f32 %v11808_v28, %v271_v33 }
 0x138   :  { %359 = vrot.lane.b32.xlu1 %v12617_v34, %s12488_s21  ;;  %v12651_v49 = vmul.f32 0.35355338, %v12617_v34 }
 0x13d   :  { %v274_v35 = vpop.f32.mrf.mxu1 }
 0x13e   :  { %v12621_v36 = vadd.f32 %v11808_v28, %v274_v35 }
 0x140   :  { %387 = vrot.lane.b32.xlu1 %v12621_v36, %s12488_s21  ;;  %v12657_v52 = vmul.f32 0.35355338, %v12621_v36 }
 0x145   :  { %v277_v37 = vpop.f32.mrf.mxu1 }
 0x146   :  { %v12625_v38 = vadd.f32 %v11808_v28, %v277_v37 }
 0x148   :  { %415 = vrot.lane.b32.xlu1 %v12625_v38, %s12488_s21  ;;  %v12665_v55 = vmul.f32 0.35355338, %v12625_v38 }
 0x14d   :  { %v280_v39 = vpop.f32.mrf.mxu1 }
 0x14e   :  { %v12629_v40 = vadd.f32 %v11808_v28, %v280_v39 }
 0x150   :  { %443 = vrot.lane.b32.xlu2 %v12629_v40, %s12488_s21  ;;  %v12668_v56 = vmul.f32 0.35355338, %v12629_v40 }
 0x155   :  { %v283_v41 = vpop.f32.mrf.mxu1 }
 0x156   :  { %v12681_v62 = vadd.f32 %v11808_v28, %v283_v41 }
 0x158   :  { %v12699_v12 = vmul.f32 0.35355338, %v12681_v62 }
 0x15d   :  { %v286_v42 = vpop.f32.mrf.mxu1 }
 0x15e   :  { %v12633_v43 = vadd.f32 %v11808_v28, %v286_v42 }
 0x160   :  { %499 = vrot.lane.b32.xlu2 %v12633_v43, %s12488_s21  ;;  %v12675_v57 = vmul.f32 0.35355338, %v12633_v43 }
 0x19a   :  { %v303_v44 = vpop.permute.xlu0 %302 }
 0x19b   :  { %10954 = vmatpush.xpose.msk.msra.mxu0 %vm304_vm2, %v303_v44 }
 0x19e   :  { %10955 = vmatmul.msk.f32.vlgmr.msra.gmra.mxu0 %vm304_vm2, %v12639_v45 }
 0x1a2   :  { %v332_v46 = vpop.permute.xlu0 %331 }
 0x1a3   :  { %10956 = vmatpush.xpose.msk.msra.mxu3 %vm304_vm2, %v332_v46 }
 0x1a6   :  { %10957 = vmatmul.msk.f32.vlgmr.msra.gmra.mxu3 %vm304_vm2, %v12645_v47 }
 0x1aa   :  { %v360_v48 = vpop.permute.xlu1 %359  ;;  %v444_v50 = vpop.permute.xlu2 %443 }
 0x1ab   :  { %10958 = vmatpush.xpose.msk.msra.mxu2 %vm304_vm2, %v360_v48 }
 0x1ae   :  { %10959 = vmatmul.msk.f32.vlgmr.msra.gmra.mxu2 %vm304_vm2, %v12651_v49 }
 0x1b2   :  { %v388_v51 = vpop.permute.xlu1 %387 }
 0x1b3   :  { %10960 = vmatpush.xpose.msk.msrb.mxu3 %vm304_vm2, %v388_v51 }
 0x1b6   :  { %10961 = vmatmul.msk.f32.vlgmr.msrb.gmra.mxu3 %vm304_vm2, %v12657_v52 }
 0x1b7   :  { %10964 = vmatpush.xpose.msk.msra.mxu3 %vm304_vm2, %v444_v50 }
 0x1ba   :  { %v416_v53 = vpop.permute.xlu1 %415  ;;  %v500_v54 = vpop.permute.xlu2 %499 }
 0x1bb   :  { %10962 = vmatpush.xpose.msk.msrb.mxu2 %vm304_vm2, %v416_v53  ;;  %10968 = vmatpush.xpose.msk.msrb.mxu3 %vm304_vm2, %v500_v54 }
 0x1be   :  { %10963 = vmatmul.msk.f32.vlgmr.msrb.gmra.mxu2 %vm304_vm2, %v12665_v55  ;;  %10965 = vmatmul.msk.f32.vlgmr.msra.gmra.mxu3 %vm304_vm2, %v12668_v56 }
 0x1c6   :  { %10969 = vmatmul.msk.f32.vlgmr.msrb.gmra.mxu3 %vm304_vm2, %v12675_v57 }
 0x21b   :  { %v327_v58 = vpop.f32.mrf.mxu0 }
 0x21c   :  { %v526_v59 = vsel %vm304_vm2, %v327_v58, -inf }
 0x21d   :  { %527 = vmax.xlane.f32.xlu0 %v526_v59 }
 0x229   :  { %v355_v60 = vpop.f32.mrf.mxu3 }
 0x22a   :  { %v529_v61 = vsel %vm304_vm2, %v355_v60, -inf }
 0x22b   :  { %530 = vmax.xlane.f32.xlu1 %v529_v61 }
 0x231   :  { %v383_v63 = vpop.f32.mrf.mxu2  ;;  %471 = vrot.lane.b32.xlu0 %v12681_v62, %s12488_s21 }
 0x232   :  { %v532_v0 = vsel %vm304_vm2, %v383_v63, -inf }
 0x233   :  { %533 = vmax.xlane.f32.xlu2 %v532_v0 }
 0x239   :  { %v411_v1 = vpop.f32.mrf.mxu3 }
 0x23a   :  { %v535_v2 = vsel %vm304_vm2, %v411_v1, -inf }
 0x23b   :  { %536 = vmax.xlane.f32.xlu2 %v535_v2 }
 0x241   :  { %v12725_v25 = vpop.f32.mrf.mxu3 }
 0x242   :  { %v541_v28 = vsel %vm304_vm2, %v12725_v25, -inf }
 0x244   :  { %848 = vrot.lane.b32.xlu1 %v12629_v40, %s12489_s22 }
 0x249   :  { %v12727_v26 = vpop.f32.mrf.mxu3 }
 0x24a   :  { %v547_v27 = vsel %vm304_vm2, %v12727_v26, -inf }
 0x24c   :  { %999 = vrot.lane.b32.xlu1 %v12639_v45, %s12490_s23 }
 0x254   :  { %1027 = vrot.lane.b32.xlu1 %v12645_v47, %s12490_s23 }
 0x290   :  { %v528_v3 = vpop.xlane.xlu0 %527 }
 0x291   :  { %v550_v4 = vsub.f32 %v327_v58, %v528_v3 }
 0x293   :  { %v558_v5 = vmul.f32 1.442695, %v550_v4 }
 0x295   :  { %11816 = vpow2.f32 %v558_v5 }
 0x29b   :  { %v12693_v6 = vpop.eup %11816 }
 0x29c   :  { %v574_v7 = vsel %vm304_vm2, %v12693_v6, 0.0 }
 0x29d   :  { %575 = vadd.xlane.f32.xlu0 %v574_v7 }
 0x29e   :  { %v531_v8 = vpop.xlane.xlu1 %530 }
 0x29f   :  { %v551_v9 = vsub.f32 %v355_v60, %v531_v8 }
 0x2a1   :  { %v560_v10 = vmul.f32 1.442695, %v551_v9 }
 0x2a3   :  { %11818 = vpow2.f32 %v560_v10  ;;  %v472_v11 = vpop.permute.xlu0 %471 }
 0x2a4   :  { %10966 = vmatpush.xpose.msk.msra.mxu2 %vm304_vm2, %v472_v11 }
 0x2a6   :  { %v534_v13 = vpop.xlane.xlu2 %533 }
 0x2a7   :  { %v552_v14 = vsub.f32 %v383_v63, %v534_v13  ;;  %10967 = vmatmul.msk.f32.vlgmr.msra.gmra.mxu2 %vm304_vm2, %v12699_v12 }
 0x2a9   :  { %v12703_v15 = vpop.eup %11818  ;;  %v562_v16 = vmul.f32 1.442695, %v552_v14 }
 0x2aa   :  { %v577_v17 = vsel %vm304_vm2, %v12703_v15, 0.0 }
 0x2ab   :  { %11820 = vpow2.f32 %v562_v16  ;;  %578 = vadd.xlane.f32.xlu2 %v577_v17 }
 0x2ae   :  { %v537_v18 = vpop.xlane.xlu2 %536 }
 0x2af   :  { %v553_v19 = vsub.f32 %v411_v1, %v537_v18 }
 0x2b1   :  { %v12707_v20 = vpop.eup %11820  ;;  %v564_v21 = vmul.f32 1.442695, %v553_v19  ;;  %744 = vrot.lane.b32.xlu0 %v12613_v32, %s12489_s22 }
 0x2b2   :  { %v580_v22 = vsel %vm304_vm2, %v12707_v20, 0.0 }
 0x2b3   :  { %11822 = vpow2.f32 %v564_v21  ;;  %581 = vadd.xlane.f32.xlu2 %v580_v22 }
 0x2b6   :  { %v12741_v31 = vpop.permute.xlu1 %848 }
 0x2b9   :  { %v12713_v23 = vpop.eup %11822  ;;  %770 = vrot.lane.b32.xlu0 %v12617_v34, %s12489_s22 }
 0x2ba   :  { %v583_v24 = vsel %vm304_vm2, %v12713_v23, 0.0 }
 0x2bb   :  { %584 = vadd.xlane.f32.xlu1 %v583_v24 }
 0x2be   :  { %v12747_v37 = vpop.permute.xlu1 %999 }
 0x2c1   :  { %796 = vrot.lane.b32.xlu0 %v12621_v36, %s12489_s22 }
 0x2c6   :  { %v12753_v51 = vpop.permute.xlu1 %1027 }
 0x2cb   :  { %718 = vrot.lane.b32.xlu2 %v12609_v30, %s12489_s22 }
 0x2d4   :  { %1169 = vrot.lane.b32.xlu1 %v12681_v62, %s12491_s24 }
 0x2eb   :  { %548 = vmax.xlane.f32.xlu0 %v547_v27 }
 0x2f4   :  { %542 = vmax.xlane.f32.xlu2 %v541_v28 }
 0x2ff   :  { %1001 = vrot.lane.b32.xlu0 %v12609_v30, %s12491_s24 }
 0x307   :  { %1085 = vrot.lane.b32.xlu0 %v12621_v36, %s12491_s24 }
 0x30c   :  { %900 = vrot.lane.b32.xlu2 %v12633_v43, %s12489_s22 }
 0x30f   :  { %1113 = vrot.lane.b32.xlu0 %v12625_v38, %s12491_s24 }
 0x310   :  { %v576_v29 = vpop.xlane.xlu0 %575 }
 0x311   :  { %11824 = vrcp.f32 %v576_v29  ;;  %v609_v50 = vand.u32 2147483648, %v576_v29  ;;  %vm603_vm4 = vweird.f32 %v576_v29  ;;  %v607_v53 = vand.u32 2147483647, %v576_v29 }
 0x313   :  { %v610_v61 = vor.u32 1.1754944e-38, %v609_v50  ;;  %vm608_vm6 = vcmp.eq.f32.partialorder %v607_v53, 8.507059e+37 }
 0x314   :  { %1029 = vrot.lane.b32.xlu2 %v12613_v32, %s12491_s24 }
 0x317   :  { %v11825_v33 = vpop.eup %11824  ;;  %1167 = vrot.lane.b32.xlu0 %v12699_v12, %s12490_s23 }
 0x318   :  { %v599_v35 = vmul.f32 %v11825_v33, %v576_v29  ;;  %vm604_vm3 = vweird.f32 %v11825_v33 }
 0x319   :  { %vm605_vm5 = vmor %vm603_vm4, %vm604_vm3 }
 0x31a   :  { %v600_v39 = vsub.f32 1.0, %v599_v35 }
 0x31c   :  { %1083 = vrot.lane.b32.xlu2 %v12657_v52, %s12490_s23  ;;  %v601_v42 = vmul.f32 %v11825_v33, %v600_v39 }
 0x31e   :  { %v579_v41 = vpop.xlane.xlu2 %578  ;;  %v602_v46 = vadd.f32 %v11825_v33, %v601_v42 }
 0x31f   :  { %11826 = vrcp.f32 %v579_v41  ;;  %v623_v0 = vand.u32 2147483648, %v579_v41  ;;  %v621_v1 = vand.u32 2147483647, %v579_v41  ;;  %vm617_vm8 = vweird.f32 %v579_v41 }
 0x320   :  { %v606_v59 = vsel %vm605_vm5, %v11825_v33, %v602_v46  ;;  %v439_v46 = vpop.f32.mrf.mxu2 }
 0x321   :  { %v611_v3 = vsel %vm608_vm6, %v610_v61, %v606_v59  ;;  %v624_v8 = vor.u32 1.1754944e-38, %v623_v0  ;;  %vm622_vm10 = vcmp.eq.f32.partialorder %v621_v1, 8.507059e+37  ;;  %v538_v53 = vsel %vm304_vm2, %v439_v46, -inf }
 0x322   :  { %v710_v13 = vmul.f32 %v12693_v6, %v611_v3 }
 0x323   :  { %v745_v44 = vpop.permute.xlu0 %744 }
 0x324   :  { %1111 = vrot.lane.b32.xlu2 %v12665_v55, %s12490_s23  ;;  %765 = vmatpush.msra.mxu3 %v745_v44 }
 0x325   :  { %v11827_v48 = vpop.eup %11826 }
 0x326   :  { %v613_v54 = vmul.f32 %v11827_v48, %v579_v41  ;;  %v582_v58 = vpop.xlane.xlu2 %581  ;;  %vm618_vm7 = vweird.f32 %v11827_v48 }
 0x327   :  { %11828 = vrcp.f32 %v582_v58  ;;  %vm619_vm9 = vmor %vm617_vm8, %vm618_vm7  ;;  %v637_v17 = vand.u32 2147483648, %v582_v58  ;;  %v635_v21 = vand.u32 2147483647, %v582_v58  ;;  %vm631_vm12 = vweird.f32 %v582_v58 }
 0x328   :  { %v614_v60 = vsub.f32 1.0, %v613_v54 }
 0x329   :  { %v638_v27 = vor.u32 1.1754944e-38, %v637_v17  ;;  %vm636_vm14 = vcmp.eq.f32.partialorder %v635_v21, 8.507059e+37 }
 0x32a   :  { %v615_v63 = vmul.f32 %v11827_v48, %v614_v60 }
 0x32b   :  { %v771_v2 = vpop.permute.xlu0 %770 }
 0x32c   :  { %v616_v4 = vadd.f32 %v11827_v48, %v615_v63  ;;  %1195 = vrot.lane.b32.xlu2 %v12675_v57, %s12490_s23 }
 0x32d   :  { %v11829_v5 = vpop.eup %11828 }
 0x32e   :  { %v620_v7 = vsel %vm619_vm9, %v11827_v48, %v616_v4  ;;  %v627_v9 = vmul.f32 %v11829_v5, %v582_v58  ;;  %v719_v10 = vpop.permute.xlu2 %718  ;;  %v585_v11 = vpop.xlane.xlu1 %584  ;;  %vm632_vm11 = vweird.f32 %v11829_v5 }
 0x32f   :  { %11830 = vrcp.f32 %v585_v11  ;;  %739 = vmatpush.msrb.mxu2 %v719_v10  ;;  %v625_v16 = vsel %vm622_vm10, %v624_v8, %v620_v7  ;;  %vm633_vm13 = vmor %vm631_vm12, %vm632_vm11  ;;  %v651_v39 = vand.u32 2147483648, %v585_v11  ;;  %v649_v42 = vand.u32 2147483647, %v585_v11 }
 0x330   :  { %v628_v14 = vsub.f32 1.0, %v627_v9  ;;  %10970 = vmatmul.msk.f32.vlgmr.msrb.gmra.mxu2 %vm304_vm2, %v710_v13  ;;  %v711_v18 = vmul.f32 %v12703_v15, %v625_v16  ;;  %vm645_vm3 = vweird.f32 %v585_v11 }
 0x331   :  { %791 = vmatpush.msra.mxu2 %v771_v2  ;;  %v652_v48 = vor.u32 1.1754944e-38, %v651_v39  ;;  %vm650_vm5 = vcmp.eq.f32.partialorder %v649_v42, 8.507059e+37 }
 0x332   :  { %v629_v19 = vmul.f32 %v11829_v5, %v628_v14  ;;  %10971 = vmatmul.msk.f32.vlgmr.msra.gmra.mxu3 %vm304_vm2, %v711_v18 }
 0x333   :  { %v797_v22 = vpop.permute.xlu0 %796 }
 0x334   :  { %v630_v24 = vadd.f32 %v11829_v5, %v629_v19  ;;  %817 = vmatpush.msrb.mxu3 %v797_v22 }
 0x335   :  { %v11831_v6 = vpop.eup %11830 }
 0x336   :  { %869 = vmatpush.msra.mxu3 %v12741_v31  ;;  %v634_v28 = vsel %vm633_vm13, %v11829_v5, %v630_v24  ;;  %v641_v29 = vmul.f32 %v11831_v6, %v585_v11  ;;  %vm646_vm15 = vweird.f32 %v11831_v6  ;;  %v12789_v11 = vpop.f32.mrf.mxu2 }
 0x337   :  { %v639_v33 = vsel %vm636_vm14, %v638_v27, %v634_v28  ;;  %vm647_vm4 = vmor %vm645_vm3, %vm646_vm15  ;;  %v544_v19 = vsel %vm304_vm2, %v12789_v11, -inf }
 0x338   :  { %v642_v35 = vsub.f32 1.0, %v641_v29  ;;  %v712_v15 = vmul.f32 %v12707_v20, %v639_v33  ;;  %v12767_v20 = vld [vmem:[#allocation10] sm:$0xff] }
 0x339   :  { %965 = vmatpush.msrb.mxu1 %v12767_v20 }
 0x33a   :  { %v643_v41 = vmul.f32 %v11831_v6, %v642_v35  ;;  %10972 = vmatmul.msk.f32.vlgmr.msra.gmra.mxu2 %vm304_vm2, %v712_v15 }
 0x33c   :  { %v644_v44 = vadd.f32 %v11831_v6, %v643_v41 }
 0x33e   :  { %v648_v50 = vsel %vm647_vm4, %v11831_v6, %v644_v44 }
 0x33f   :  { %v653_v31 = vsel %vm650_vm5, %v652_v48, %v648_v50 }
 0x340   :  { %v713_v54 = vmul.f32 %v12713_v23, %v653_v31 }
 0x341   :  { %539 = vmax.xlane.f32.xlu0 %v538_v53 }
 0x342   :  { %10973 = vmatmul.msk.f32.vlgmr.msrb.gmra.mxu3 %vm304_vm2, %v713_v54 }
 0x35e   :  { %v549_v58 = vpop.xlane.xlu0 %548 }
 0x35f   :  { %v557_v61 = vsub.f32 %v12727_v26, %v549_v58  ;;  %v1170_v26 = vpop.permute.xlu1 %1169 }
 0x361   :  { %v572_v0 = vmul.f32 1.442695, %v557_v61 }
 0x367   :  { %v543_v59 = vpop.xlane.xlu2 %542 }
 0x368   :  { %v555_v60 = vsub.f32 %v12725_v25, %v543_v59 }
 0x36a   :  { %v568_v63 = vmul.f32 1.442695, %v555_v60 }
 0x36c   :  { %11832 = vpow2.f32 %v568_v63 }
 0x36d   :  { %11834 = vpow2.f32 %v572_v0 }
 0x36f   :  { %v901_v1 = vpop.permute.xlu2 %900 }
 0x370   :  { %921 = vmatpush.msrb.mxu3 %v901_v1 }
 0x371   :  { %v12772_v2 = vpop.permute.xlu0 %1001 }
 0x372   :  { %v12774_v23 = vpop.eup %11832 }
 0x373   :  { %v589_v3 = vsel %vm304_vm2, %v12774_v23, 0.0  ;;  %v12778_v5 = vpop.eup %11834 }
 0x374   :  { %590 = vadd.xlane.f32.xlu1 %v589_v3  ;;  %v595_v7 = vsel %vm304_vm2, %v12778_v5, 0.0 }
 0x377   :  { %v1030_v4 = vpop.permute.xlu2 %1029 }
 0x378   :  { %10988 = vmatpush.xpose.msk.msra.mxu1 %vm304_vm2, %v1030_v4 }
 0x379   :  { %v1086_v25 = vpop.permute.xlu0 %1085 }
 0x37a   :  { %10992 = vmatpush.xpose.msk.msrb.mxu0 %vm304_vm2, %v1086_v25 }
 0x37c   :  { %596 = vadd.xlane.f32.xlu1 %v595_v7 }
 0x37e   :  { %10998 = vmatpush.xpose.msk.msra.mxu0 %vm304_vm2, %v1170_v26 }
 0x37f   :  { %v1084_v8 = vpop.permute.xlu2 %1083 }
 0x380   :  { %10993 = vmatmul.msk.f32.vlgmr.msrb.gmra.mxu0 %vm304_vm2, %v1084_v8 }
 0x381   :  { %v1114_v9 = vpop.permute.xlu0 %1113 }
 0x387   :  { %v1112_v27 = vpop.permute.xlu2 %1111 }
 0x389   :  { %v1168_v10 = vpop.permute.xlu0 %1167 }
 0x38a   :  { %10999 = vmatmul.msk.f32.vlgmr.msra.gmra.mxu0 %vm304_vm2, %v1168_v10 }
 0x38f   :  { %v1196_v26 = vpop.permute.xlu2 %1195 }
 0x395   :  { %1197 = vrot.lane.b32.xlu1 %v12633_v43, %s12491_s24 }
 0x3b3   :  { %v741_v13 = vpop.f32.mrf.mxu2 }
 0x3b4   :  { %10978 = vmatmul.msk.f32.vlgmr.msrb.gmra.mxu1 %vm304_vm2, %v741_v13  ;;  %v540_v14 = vpop.xlane.xlu0 %539 }
 0x3b5   :  { %10994 = vmatpush.xpose.msk.msrb.mxu1 %vm304_vm2, %v1114_v9  ;;  %v554_v16 = vsub.f32 %v439_v46, %v540_v14  ;;  %v767_v18 = vpop.f32.mrf.mxu3 }
 0x3b7   :  { %v566_v17 = vmul.f32 1.442695, %v554_v16 }
 0x3b9   :  { %11836 = vpow2.f32 %v566_v17 }
 0x3bc   :  { %10979 = vmatmul.msk.f32.gmra.mxu1 %vm304_vm2, %v767_v18 }
 0x3bd   :  { %v793_v24 = vpop.f32.mrf.mxu2 }
 0x3bf   :  { %v12796_v21 = vpop.eup %11836  ;;  %545 = vmax.xlane.f32.xlu1 %v544_v19 }
 0x3c0   :  { %v586_v22 = vsel %vm304_vm2, %v12796_v21, 0.0 }
 0x3c1   :  { %587 = vadd.xlane.f32.xlu2 %v586_v22 }
 0x3c4   :  { %10980 = vmatmul.msk.f32.gmra.mxu1 %vm304_vm2, %v793_v24 }
 0x3c5   :  { %v819_v6 = vpop.f32.mrf.mxu3 }
 0x3cc   :  { %10981 = vmatmul.msk.f32.gmra.mxu1 %vm304_vm2, %v819_v6 }
 0x3d4   :  { %10989 = vmatmul.msk.f32.vlgmr.msra.gmra.mxu1 %vm304_vm2, %v12753_v51 }
 0x3d8   :  { %822 = vrot.lane.b32.xlu1 %v12625_v38, %s12489_s22 }
 0x3d9   :  { %874 = vrot.lane.b32.xlu2 %v12681_v62, %s12489_s22 }
 0x3dc   :  { %10995 = vmatmul.msk.f32.vlgmr.msrb.gmra.mxu1 %vm304_vm2, %v1112_v27 }
 0x3e0   :  { %1055 = vrot.lane.b32.xlu1 %v12651_v49, %s12490_s23 }
 0x3e1   :  { %1139 = vrot.lane.b32.xlu2 %v12668_v56, %s12490_s23 }
 0x3e7   :  { %v591_v28 = vpop.xlane.xlu1 %590 }
 0x3e8   :  { %11838 = vrcp.f32 %v591_v28  ;;  %v679_v15 = vand.u32 2147483648, %v591_v28  ;;  %v677_v41 = vand.u32 2147483647, %v591_v28  ;;  %vm673_vm7 = vweird.f32 %v591_v28 }
 0x3ea   :  { %v680_v46 = vor.u32 1.1754944e-38, %v679_v15  ;;  %vm678_vm9 = vcmp.eq.f32.partialorder %v677_v41, 8.507059e+37 }
 0x3ee   :  { %v11839_v29 = vpop.eup %11838 }
 0x3ef   :  { %v669_v33 = vmul.f32 %v11839_v29, %v591_v28  ;;  %v597_v51 = vpop.xlane.xlu1 %596  ;;  %vm674_vm6 = vweird.f32 %v11839_v29 }
 0x3f0   :  { %11840 = vrcp.f32 %v597_v51  ;;  %vm675_vm8 = vmor %vm673_vm7, %vm674_vm6  ;;  %v707_v58 = vand.u32 2147483648, %v597_v51  ;;  %v705_v60 = vand.u32 2147483647, %v597_v51  ;;  %vm701_vm11 = vweird.f32 %v597_v51 }
 0x3f1   :  { %v670_v35 = vsub.f32 1.0, %v669_v33 }
 0x3f2   :  { %v708_v63 = vor.u32 1.1754944e-38, %v707_v58  ;;  %vm706_vm13 = vcmp.eq.f32.partialorder %v705_v60, 8.507059e+37 }
 0x3f3   :  { %v671_v39 = vmul.f32 %v11839_v29, %v670_v35 }
 0x3f5   :  { %v672_v42 = vadd.f32 %v11839_v29, %v671_v39 }
 0x3f6   :  { %v11841_v44 = vpop.eup %11840 }
 0x3f7   :  { %v676_v48 = vsel %vm675_vm8, %v11839_v29, %v672_v42  ;;  %v697_v50 = vmul.f32 %v11841_v44, %v597_v51  ;;  %vm702_vm10 = vweird.f32 %v11841_v44 }
 0x3f8   :  { %v681_v31 = vsel %vm678_vm9, %v680_v46, %v676_v48  ;;  %vm703_vm12 = vmor %vm701_vm11, %vm702_vm10 }
 0x3f9   :  { %v698_v53 = vsub.f32 1.0, %v697_v50  ;;  %v715_v54 = vmul.f32 %v12774_v23, %v681_v31 }
 0x3fb   :  { %v699_v59 = vmul.f32 %v11841_v44, %v698_v53  ;;  %10975 = vmatmul.msk.f32.vlgmr.msra.gmra.mxu3 %vm304_vm2, %v715_v54 }
 0x3fc   :  { %10986 = vmatpush.xpose.msk.msra.mxu3 %vm304_vm2, %v12772_v2 }
 0x3fd   :  { %v700_v61 = vadd.f32 %v11841_v44, %v699_v59  ;;  %v1108_v23 = vpop.f32.mrf.mxu0 }
 0x3fe   :  { %v1232_v25 = vsel %vm304_vm2, %v1108_v23, -inf }
 0x3ff   :  { %v704_v0 = vsel %vm703_vm12, %v11841_v44, %v700_v61 }
 0x400   :  { %v709_v1 = vsel %vm706_vm13, %v708_v63, %v704_v0 }
 0x401   :  { %v717_v3 = vmul.f32 %v12778_v5, %v709_v1  ;;  %v11558_v1 = vpack.i.bf16 %v12681_v62, %v12625_v38 }
 0x403   :  { %10977 = vmatmul.msk.f32.vlgmr.msrb.gmra.mxu3 %vm304_vm2, %v717_v3  ;;  %v12867_v3 = vpack.i.bf16 %v12613_v32, %v12609_v30 }
 0x407   :  { %v1198_v4 = vpop.permute.xlu1 %1197  ;;  %v1192_v2 = vpop.f32.mrf.mxu0 }
 0x408   :  { %11000 = vmatpush.xpose.msk.msra.mxu1 %vm304_vm2, %v1198_v4  ;;  %v1241_v7 = vsel %vm304_vm2, %v1192_v2, -inf }
 0x40a   :  { %1233 = vmax.xlane.f32.xlu1 %v1232_v25 }
 0x40b   :  { %10987 = vmatmul.msk.f32.vlgmr.msra.gmra.mxu3 %vm304_vm2, %v12747_v37  ;;  %11001 = vmatmul.msk.f32.vlgmr.msra.gmra.mxu1 %vm304_vm2, %v1196_v26 }
 0x412   :  { %1242 = vmax.xlane.f32.xlu1 %v1241_v7 }
 0x431   :  { %v12825_v5 = vpop.f32.mrf.mxu1 }
 0x432   :  { %v546_v8 = vpop.xlane.xlu1 %545 }
 0x433   :  { %v556_v9 = vsub.f32 %v12789_v11, %v546_v8 }
 0x434   :  { %v588_v10 = vpop.xlane.xlu2 %587 }
 0x435   :  { %v570_v13 = vmul.f32 1.442695, %v556_v9  ;;  %11842 = vrcp.f32 %v588_v10  ;;  %v665_v24 = vand.u32 2147483648, %v588_v10  ;;  %vm659_vm15 = vweird.f32 %v588_v10 }
 0x436   :  { %v663_v27 = vand.u32 2147483647, %v588_v10 }
 0x437   :  { %11844 = vpow2.f32 %v570_v13  ;;  %v666_v29 = vor.u32 1.1754944e-38, %v665_v24 }
 0x438   :  { %vm664_vm4 = vcmp.eq.f32.partialorder %v663_v27, 8.507059e+37 }
 0x439   :  { %v12828_v14 = vpop.f32.mrf.mxu1 }
 0x43b   :  { %v11843_v16 = vpop.eup %11842 }
 0x43c   :  { %v655_v17 = vmul.f32 %v11843_v16, %v588_v10  ;;  %vm660_vm14 = vweird.f32 %v11843_v16  ;;  %v875_v39 = vpop.permute.xlu2 %874 }
 0x43d   :  { %v12830_v37 = vpop.eup %11844  ;;  %vm661_vm3 = vmor %vm659_vm15, %vm660_vm14 }
 0x43e   :  { %v656_v18 = vsub.f32 1.0, %v655_v17  ;;  %v592_v19 = vsel %vm304_vm2, %v12830_v37, 0.0 }
 0x43f   :  { %593 = vadd.xlane.f32.xlu0 %v592_v19 }
 0x440   :  { %v657_v22 = vmul.f32 %v11843_v16, %v656_v18 }
 0x441   :  { %v12834_v6 = vpop.f32.mrf.mxu1 }
 0x442   :  { %v658_v11 = vadd.f32 %v11843_v16, %v657_v22 }
 0x444   :  { %v662_v28 = vsel %vm661_vm3, %v11843_v16, %v658_v11  ;;  %v1140_v7 = vpop.permute.xlu2 %1139 }
 0x445   :  { %v667_v33 = vsel %vm664_vm4, %v666_v29, %v662_v28 }
 0x446   :  { %v714_v15 = vmul.f32 %v12796_v21, %v667_v33 }
 0x449   :  { %v12836_v51 = vpop.f32.mrf.mxu1 }
 0x44a   :  { %v823_v35 = vpop.permute.xlu1 %822 }
 0x44b   :  { %843 = vmatpush.msrb.mxu2 %v823_v35 }
 0x44c   :  { %10974 = vmatmul.msk.f32.vlgmr.msrb.gmra.mxu2 %vm304_vm2, %v714_v15 }
 0x44d   :  { %895 = vmatpush.msra.mxu2 %v875_v39 }
 0x44f   :  { %11533 = vmatpush.msrb.mxu2 %v12767_v20 }
 0x451   :  { %v1052_v41 = vpop.f32.mrf.mxu1 }
 0x452   :  { %v1226_v42 = vsel %vm304_vm2, %v1052_v41, -inf  ;;  %v1056_v21 = vpop.permute.xlu1 %1055 }
 0x453   :  { %1057 = vrot.lane.b32.xlu0 %v12617_v34, %s12491_s24  ;;  %1227 = vmax.xlane.f32.xlu2 %v1226_v42 }
 0x459   :  { %v12873_v16 = vpop.f32.mrf.mxu1 }
 0x45a   :  { %v1235_v39 = vsel %vm304_vm2, %v12873_v16, -inf }
 0x45b   :  { %1141 = vrot.lane.b32.xlu0 %v12629_v40, %s12491_s24 }
 0x46b   :  { %1493 = vrot.lane.b32.xlu2 %v12621_v36, %s12492_s25 }
 0x47d   :  { %v1234_v44 = vpop.xlane.xlu1 %1233 }
 0x47e   :  { %v1250_v46 = vsub.f32 %v1108_v23, %v1234_v44  ;;  %v871_v48 = vpop.f32.mrf.mxu3 }
 0x480   :  { %v1261_v50 = vmul.f32 1.442695, %v1250_v46 }
 0x482   :  { %11846 = vpow2.f32 %v1261_v50 }
 0x485   :  { %v1243_v20 = vpop.xlane.xlu1 %1242 }
 0x486   :  { %v1253_v31 = vsub.f32 %v1192_v2, %v1243_v20  ;;  %v12848_v53 = vpop.f32.mrf.mxu3 }
 0x488   :  { %v12850_v54 = vpop.eup %11846  ;;  %v1267_v58 = vmul.f32 1.442695, %v1253_v31  ;;  %v1220_v28 = vpop.f32.mrf.mxu1 }
 0x489   :  { %v1280_v59 = vsel %vm304_vm2, %v12850_v54, 0.0  ;;  %v1244_v33 = vsel %vm304_vm2, %v1220_v28, -inf }
 0x48a   :  { %11848 = vpow2.f32 %v1267_v58  ;;  %1281 = vadd.xlane.f32.xlu1 %v1280_v59 }
 0x48e   :  { %v12854_v60 = vpop.f32.mrf.mxu3 }
 0x48f   :  { %v1223_v61 = vsel %vm304_vm2, %v12854_v60, -inf }
 0x490   :  { %v12858_v63 = vpop.eup %11848  ;;  %1224 = vmax.xlane.f32.xlu0 %v1223_v61 }
 0x491   :  { %v1289_v0 = vsel %vm304_vm2, %v12858_v63, 0.0 }
 0x492   :  { %1290 = vadd.xlane.f32.xlu1 %v1289_v0 }
 0x4a4   :  { %11559 = vrot.lane.b32.xlu0 %v11558_v1, %s12492_s25 }
 0x4ab   :  { %11554 = vrot.lane.b32.xlu1 %v12867_v3, %s12492_s25 }
 0x4b2   :  { %v594_v23 = vpop.xlane.xlu0 %593 }
 0x4b3   :  { %11850 = vrcp.f32 %v594_v23  ;;  %1597 = vrot.lane.b32.xlu1 %v12633_v43, %s12492_s25  ;;  %v693_v2 = vand.u32 2147483648, %v594_v23  ;;  %v691_v9 = vand.u32 2147483647, %v594_v23  ;;  %vm687_vm6 = vweird.f32 %v594_v23 }
 0x4b5   :  { %v694_v13 = vor.u32 1.1754944e-38, %v693_v2  ;;  %vm692_vm8 = vcmp.eq.f32.partialorder %v691_v9, 8.507059e+37 }
 0x4b9   :  { %v11851_v4 = vpop.eup %11850 }
 0x4ba   :  { %v683_v25 = vmul.f32 %v11851_v4, %v594_v23  ;;  %vm688_vm5 = vweird.f32 %v11851_v4 }
 0x4bb   :  { %vm689_vm7 = vmor %vm687_vm6, %vm688_vm5 }
 0x4bc   :  { %v684_v26 = vsub.f32 1.0, %v683_v25 }
 0x4be   :  { %v685_v8 = vmul.f32 %v11851_v4, %v684_v26 }
 0x4c0   :  { %v686_v10 = vadd.f32 %v11851_v4, %v685_v8 }
 0x4c2   :  { %v690_v17 = vsel %vm689_vm7, %v11851_v4, %v686_v10 }
 0x4c3   :  { %v695_v18 = vsel %vm692_vm8, %v694_v13, %v690_v17 }
 0x4c4   :  { %v716_v19 = vmul.f32 %v12830_v37, %v695_v18 }
 0x4c5   :  { %v1058_v22 = vpop.permute.xlu0 %1057 }
 0x4c6   :  { %v1228_v24 = vpop.xlane.xlu2 %1227  ;;  %10976 = vmatmul.msk.f32.vlgmr.msra.gmra.mxu2 %vm304_vm2, %v716_v19  ;;  %10990 = vmatpush.xpose.msk.msrb.mxu3 %vm304_vm2, %v1058_v22 }
 0x4c7   :  { %v1248_v11 = vsub.f32 %v1052_v41, %v1228_v24 }
 0x4c9   :  { %v1257_v27 = vmul.f32 1.442695, %v1248_v11  ;;  %10991 = vmatmul.msk.f32.vlgmr.msrb.gmra.mxu3 %vm304_vm2, %v1056_v21 }
 0x4cb   :  { %11852 = vpow2.f32 %v1257_v27 }
 0x4cd   :  { %v1142_v29 = vpop.permute.xlu0 %1141 }
 0x4ce   :  { %1245 = vmax.xlane.f32.xlu0 %v1244_v33  ;;  %10996 = vmatpush.xpose.msk.msra.mxu3 %vm304_vm2, %v1142_v29  ;;  %v1494_v59 = vpop.permute.xlu2 %1493 }
 0x4cf   :  { %v845_v35 = vpop.f32.mrf.mxu2 }
 0x4d0   :  { %10982 = vmatmul.msk.f32.vlgmr.msrb.gmra.mxu2 %vm304_vm2, %v845_v35 }
 0x4d1   :  { %v12882_v37 = vpop.eup %11852  ;;  %10997 = vmatmul.msk.f32.vlgmr.msra.gmra.mxu3 %vm304_vm2, %v1140_v7 }
 0x4d2   :  { %v1274_v15 = vsel %vm304_vm2, %v12882_v37, 0.0 }
 0x4d3   :  { %1275 = vadd.xlane.f32.xlu2 %v1274_v15 }
 0x4d8   :  { %10983 = vmatmul.msk.f32.gmra.mxu2 %vm304_vm2, %v871_v48 }
 0x4dd   :  { %1236 = vmax.xlane.f32.xlu1 %v1235_v39 }
 0x4e2   :  { %1726 = vrot.lane.b32.xlu0 %v12613_v32, %s12493_s26 }
 0x4eb   :  { %1696 = vrot.lane.b32.xlu2 %v12639_v45, %s12494_s1 }
 0x4f3   :  { %1782 = vrot.lane.b32.xlu2 %v12621_v36, %s12493_s26 }
 0x4f6   :  { %1698 = vrot.lane.b32.xlu1 %v12609_v30, %s12493_s26 }
 0x4fb   :  { %1864 = vrot.lane.b32.xlu2 %v12699_v12, %s12494_s1 }
 0x4fd   :  { %v12902_v41 = vpop.xlane.xlu1 %1281 }
 0x4fe   :  { %vm1342_vm5 = vweird.f32 %v12902_v41 }
 0x503   :  { %1894 = vrot.lane.b32.xlu2 %v12633_v43, %s12493_s26  ;;  %v1225_v42 = vpop.xlane.xlu0 %1224 }
 0x504   :  { %v1247_v21 = vsub.f32 %v12854_v60, %v1225_v42 }
 0x505   :  { %v12905_v46 = vpop.xlane.xlu1 %1290 }
 0x506   :  { %v1255_v44 = vmul.f32 1.442695, %v1247_v21 }
 0x508   :  { %11854 = vpow2.f32 %v1255_v44 }
 0x50e   :  { %v12907_v48 = vpop.eup %11854 }
 0x50f   :  { %v1271_v0 = vsel %vm304_vm2, %v12907_v48, 0.0 }
 0x516   :  { %v12909_v50 = vpop.permute.xlu0 %11559 }
 0x517   :  { %v11561_v61 = vunpack.i.l.bf16 %v12909_v50 }
 0x51d   :  { %v11555_v20 = vpop.permute.xlu1 %11554 }
 0x51e   :  { %v11557_v31 = vunpack.i.h.bf16 %v11555_v20  ;;  %v11556_v58 = vunpack.i.l.bf16 %v11555_v20 }
 0x520   :  { %1436 = vmatpush.msrb.mxu3 %v11556_v58  ;;  %1462 = vmatpush.msrb.mxu0 %v11557_v31 }
 0x521   :  { %1272 = vadd.xlane.f32.xlu1 %v1271_v0 }
 0x522   :  { %1514 = vmatpush.msra.mxu3 %v1494_v59  ;;  %1540 = vmatpush.msra.mxu0 %v11561_v61 }
 0x525   :  { %v1598_v25 = vpop.permute.xlu1 %1597 }
 0x541   :  { %v1246_v60 = vpop.xlane.xlu0 %1245 }
 0x542   :  { %v1254_v1 = vsub.f32 %v1220_v28, %v1246_v60 }
 0x544   :  { %v1269_v23 = vmul.f32 1.442695, %v1254_v1 }
 0x546   :  { %11856 = vpow2.f32 %v1269_v23  ;;  %v1276_v4 = vpop.xlane.xlu2 %1275 }
 0x547   :  { %11858 = vrcp.f32 %v1276_v4  ;;  %v1320_v18 = vand.u32 2147483648, %v1276_v4  ;;  %v1318_v24 = vand.u32 2147483647, %v1276_v4  ;;  %vm1314_vm10 = vweird.f32 %v1276_v4 }
 0x549   :  { %v897_v26 = vpop.f32.mrf.mxu2  ;;  %v1321_v29 = vor.u32 1.1754944e-38, %v1320_v18  ;;  %vm1319_vm12 = vcmp.eq.f32.partialorder %v1318_v24, 8.507059e+37  ;;  %v11562_v24 = vunpack.i.h.bf16 %v12909_v50 }
 0x54a   :  { %10984 = vmatmul.msk.f32.gmra.mxu2 %vm304_vm2, %v897_v26 }
 0x54c   :  { %v12915_v2 = vpop.eup %11856  ;;  %v12917_v7 = vpop.f32.mrf.mxu3 }
 0x54d   :  { %v11859_v8 = vpop.eup %11858  ;;  %v1292_v9 = vsel %vm304_vm2, %v12915_v2, 0.0  ;;  %v1229_v50 = vsel %vm304_vm2, %v12917_v7, -inf }
 0x54e   :  { %v1310_v10 = vmul.f32 %v11859_v8, %v1276_v4  ;;  %1293 = vadd.xlane.f32.xlu0 %v1292_v9  ;;  %vm1315_vm9 = vweird.f32 %v11859_v8  ;;  %v1697_v26 = vpop.permute.xlu2 %1696 }
 0x54f   :  { %vm1316_vm11 = vmor %vm1314_vm10, %vm1315_vm9  ;;  %vm1384_vm9 = vweird.f32 %v12905_v46 }
 0x550   :  { %v1311_v13 = vsub.f32 1.0, %v1310_v10  ;;  %v1237_v17 = vpop.xlane.xlu1 %1236 }
 0x551   :  { %v1251_v19 = vsub.f32 %v12873_v16, %v1237_v17  ;;  %v1348_v17 = vand.u32 2147483648, %v12902_v41 }
 0x552   :  { %v1312_v22 = vmul.f32 %v11859_v8, %v1311_v13  ;;  %10985 = vmatmul.msk.f32.gmra.mxu2 %vm304_vm2, %v12848_v53 }
 0x553   :  { %v1263_v11 = vmul.f32 1.442695, %v1251_v19  ;;  %v1346_v19 = vand.u32 2147483647, %v12902_v41 }
 0x554   :  { %v1313_v27 = vadd.f32 %v11859_v8, %v1312_v22  ;;  %v12924_v28 = vpop.f32.mrf.mxu3 }
 0x555   :  { %11860 = vpow2.f32 %v1263_v11  ;;  %v1238_v33 = vsel %vm304_vm2, %v12924_v28, -inf  ;;  %vm1347_vm7 = vcmp.eq.f32.partialorder %v1346_v19, 8.507059e+37 }
 0x556   :  { %v1317_v35 = vsel %vm1316_vm11, %v11859_v8, %v1313_v27  ;;  %1239 = vmax.xlane.f32.xlu2 %v1238_v33  ;;  %11862 = vrcp.f32 %v12902_v41 }
 0x557   :  { %v1322_v16 = vsel %vm1319_vm12, %v1321_v29, %v1317_v35  ;;  %v1349_v29 = vor.u32 1.1754944e-38, %v1348_v17 }
 0x558   :  { %v1408_v15 = vmul.f32 %v12882_v37, %v1322_v16  ;;  %v1390_v16 = vand.u32 2147483648, %v12905_v46 }
 0x55a   :  { %11003 = vmatmul.msk.f32.vlgmr.msrb.gmra.mxu0 %vm304_vm2, %v1408_v15  ;;  %v12957_v15 = vpop.permute.xlu2 %1782 }
 0x55b   :  { %v12930_v53 = vpop.eup %11860  ;;  %1618 = vmatpush.msrb.mxu0 %v1598_v25 }
 0x55c   :  { %v1283_v39 = vsel %vm304_vm2, %v12930_v53, 0.0  ;;  %v11863_v42 = vpop.eup %11862 }
 0x55d   :  { %1284 = vadd.xlane.f32.xlu1 %v1283_v39  ;;  %v1338_v44 = vmul.f32 %v11863_v42, %v12902_v41  ;;  %vm1343_vm15 = vweird.f32 %v11863_v42  ;;  %v1388_v41 = vand.u32 2147483647, %v12905_v46 }
 0x55e   :  { %vm1344_vm6 = vmor %vm1342_vm5, %vm1343_vm15 }
 0x55f   :  { %v1339_v31 = vsub.f32 1.0, %v1338_v44  ;;  %vm1389_vm11 = vcmp.eq.f32.partialorder %v1388_v41, 8.507059e+37 }
 0x561   :  { %v1340_v0 = vmul.f32 %v11863_v42, %v1339_v31  ;;  %v11563_v31 = vpack.i.bf16 %v12629_v40, %v12617_v34 }
 0x562   :  { %1780 = vrot.lane.b32.xlu0 %v12657_v52, %s12494_s1 }
 0x563   :  { %v1341_v9 = vadd.f32 %v11863_v42, %v1340_v0 }
 0x565   :  { %v1345_v11 = vsel %vm1344_vm6, %v11863_v42, %v1341_v9  ;;  %v1391_v42 = vor.u32 1.1754944e-38, %v1390_v16 }
 0x566   :  { %v1350_v33 = vsel %vm1347_vm7, %v1349_v29, %v1345_v11 }
 0x568   :  { %v1699_v37 = vpop.permute.xlu1 %1698 }
 0x56a   :  { %1810 = vrot.lane.b32.xlu0 %v12625_v38, %s12493_s26 }
 0x572   :  { %1892 = vrot.lane.b32.xlu0 %v12675_v57, %s12494_s1 }
 0x576   :  { %1724 = vrot.lane.b32.xlu1 %v12645_v47, %s12494_s1 }
 0x57e   :  { %1866 = vrot.lane.b32.xlu1 %v12681_v62, %s12493_s26 }
 0x586   :  { %1808 = vrot.lane.b32.xlu1 %v12665_v55, %s12494_s1 }
 0x594   :  { %v1273_v21 = vpop.xlane.xlu1 %1272 }
 0x595   :  { %11864 = vrcp.f32 %v1273_v21  ;;  %v1306_v60 = vand.u32 2147483648, %v1273_v21  ;;  %v1304_v4 = vand.u32 2147483647, %v1273_v21  ;;  %vm1300_vm14 = vweird.f32 %v1273_v21 }
 0x596   :  { %11866 = vrcp.f32 %v12905_v46 }
 0x597   :  { %v1307_v8 = vor.u32 1.1754944e-38, %v1306_v60  ;;  %vm1305_vm4 = vcmp.eq.f32.partialorder %v1304_v4, 8.507059e+37 }
 0x59b   :  { %v11865_v20 = vpop.eup %11864 }
 0x59c   :  { %v1296_v58 = vmul.f32 %v11865_v20, %v1273_v21  ;;  %v11867_v59 = vpop.eup %11866  ;;  %vm1301_vm13 = vweird.f32 %v11865_v20 }
 0x59d   :  { %v1380_v1 = vmul.f32 %v11867_v59, %v12905_v46  ;;  %vm1302_vm3 = vmor %vm1300_vm14, %vm1301_vm13  ;;  %vm1385_vm8 = vweird.f32 %v11867_v59 }
 0x59e   :  { %v1297_v61 = vsub.f32 1.0, %v1296_v58  ;;  %vm1386_vm10 = vmor %vm1384_vm9, %vm1385_vm8 }
 0x59f   :  { %v1381_v10 = vsub.f32 1.0, %v1380_v1 }
 0x5a0   :  { %v1298_v23 = vmul.f32 %v11865_v20, %v1297_v61 }
 0x5a1   :  { %v1382_v27 = vmul.f32 %v11867_v59, %v1381_v10 }
 0x5a2   :  { %v1299_v25 = vadd.f32 %v11865_v20, %v1298_v23 }
 0x5a3   :  { %v1383_v35 = vadd.f32 %v11867_v59, %v1382_v27 }
 0x5a4   :  { %v1303_v13 = vsel %vm1302_vm3, %v11865_v20, %v1299_v25  ;;  %v12967_v20 = vpop.permute.xlu2 %1864 }
 0x5a5   :  { %v1308_v18 = vsel %vm1305_vm4, %v1307_v8, %v1303_v13  ;;  %v1387_v39 = vsel %vm1386_vm10, %v11867_v59, %v1383_v35 }
 0x5a6   :  { %v1407_v22 = vmul.f32 %v12907_v48, %v1308_v18  ;;  %v1410_v48 = vmul.f32 %v12850_v54, %v1350_v33  ;;  %v1392_v21 = vsel %vm1389_vm11, %v1391_v42, %v1387_v39  ;;  %v1727_v54 = vpop.permute.xlu0 %1726 }
 0x5a7   :  { %v1413_v44 = vmul.f32 %v12858_v63, %v1392_v21  ;;  %v11573_v63 = vpack.i.bf16 %v12613_v32, %v12681_v62 }
 0x5a8   :  { %11002 = vmatmul.msk.f32.vlgmr.msrb.gmra.mxu3 %vm304_vm2, %v1407_v22 }
 0x5a9   :  { %1592 = vmatpush.msrb.mxu3 %v11562_v24 }
 0x5ac   :  { %v1895_v46 = vpop.permute.xlu2 %1894 }
 0x5b0   :  { %11005 = vmatmul.msk.f32.vlgmr.msra.gmra.mxu3 %vm304_vm2, %v1410_v48  ;;  %1230 = vmax.xlane.f32.xlu1 %v1229_v50 }
 0x5b1   :  { %11018 = vmatpush.xpose.msk.msra.mxu3 %vm304_vm2, %v1699_v37 }
 0x5b8   :  { %11008 = vmatmul.msk.f32.vlgmr.msrb.gmra.mxu3 %vm304_vm2, %v1413_v44 }
 0x5c0   :  { %11019 = vmatmul.msk.f32.vlgmr.msra.gmra.mxu3 %vm304_vm2, %v1697_v26 }
 0x5c1   :  { %v1294_v58 = vpop.xlane.xlu0 %1293 }
 0x5c2   :  { %11868 = vrcp.f32 %v1294_v58  ;;  %vm1398_vm4 = vweird.f32 %v1294_v58  ;;  %v1402_v33 = vand.u32 2147483647, %v1294_v58 }
 0x5c4   :  { %vm1403_vm6 = vcmp.eq.f32.partialorder %v1402_v33, 8.507059e+37 }
 0x5c8   :  { %v11869_v60 = vpop.eup %11868 }
 0x5c9   :  { %v1240_v59 = vpop.xlane.xlu2 %1239  ;;  %11564 = vrot.lane.b32.xlu1 %v11563_v31, %s12492_s25  ;;  %v1394_v23 = vmul.f32 %v11869_v60, %v1294_v58  ;;  %vm1399_vm15 = vweird.f32 %v11869_v60 }
 0x5ca   :  { %v1252_v37 = vsub.f32 %v12924_v28, %v1240_v59  ;;  %vm1400_vm5 = vmor %vm1398_vm4, %vm1399_vm15 }
 0x5cb   :  { %v1395_v26 = vsub.f32 1.0, %v1394_v23 }
 0x5cc   :  { %v1265_v61 = vmul.f32 1.442695, %v1252_v37 }
 0x5cd   :  { %v1396_v13 = vmul.f32 %v11869_v60, %v1395_v26 }
 0x5ce   :  { %11870 = vpow2.f32 %v1265_v61 }
 0x5cf   :  { %v1397_v11 = vadd.f32 %v11869_v60, %v1396_v13 }
 0x5d0   :  { %v1285_v0 = vpop.xlane.xlu1 %1284 }
 0x5d1   :  { %11872 = vrcp.f32 %v1285_v0  ;;  %11574 = vrot.lane.b32.xlu1 %v11573_v63, %s12495_s3  ;;  %v1362_v10 = vand.u32 2147483648, %v1285_v0  ;;  %v1360_v18 = vand.u32 2147483647, %v1285_v0  ;;  %vm1356_vm13 = vweird.f32 %v1285_v0 }
 0x5d2   :  { %v1401_v16 = vsel %vm1400_vm5, %v11869_v60, %v1397_v11 }
 0x5d3   :  { %v1363_v24 = vor.u32 1.1754944e-38, %v1362_v10  ;;  %vm1361_vm3 = vcmp.eq.f32.partialorder %v1360_v18, 8.507059e+37 }
 0x5d4   :  { %v12978_v1 = vpop.eup %11870  ;;  %v1781_v4 = vpop.permute.xlu0 %1780 }
 0x5d5   :  { %v1286_v25 = vsel %vm304_vm2, %v12978_v1, 0.0 }
 0x5d6   :  { %1287 = vadd.xlane.f32.xlu2 %v1286_v25 }
 0x5d7   :  { %v11873_v28 = vpop.eup %11872 }
 0x5d8   :  { %v1352_v8 = vmul.f32 %v11873_v28, %v1285_v0  ;;  %vm1357_vm12 = vweird.f32 %v11873_v28 }
 0x5d9   :  { %2393 = vrot.lane.b32.xlu1 %v12639_v45, %s12496_s27  ;;  %vm1358_vm14 = vmor %vm1356_vm13, %vm1357_vm12  ;;  %v1404_v45 = vand.u32 2147483648, %v1294_v58 }
 0x5da   :  { %v1353_v9 = vsub.f32 1.0, %v1352_v8 }
 0x5db   :  { %v1405_v41 = vor.u32 1.1754944e-38, %v1404_v45 }
 0x5dc   :  { %v1354_v17 = vmul.f32 %v11873_v28, %v1353_v9  ;;  %v1811_v19 = vpop.permute.xlu0 %1810 }
 0x5dd   :  { %11026 = vmatpush.xpose.msk.msra.mxu2 %vm304_vm2, %v1811_v19  ;;  %v1406_v48 = vsel %vm1403_vm6, %v1405_v41, %v1401_v16 }
 0x5de   :  { %v1355_v22 = vadd.f32 %v11873_v28, %v1354_v17  ;;  %v1414_v39 = vmul.f32 %v12915_v2, %v1406_v48 }
 0x5e0   :  { %v1359_v27 = vsel %vm1358_vm14, %v11873_v28, %v1355_v22 }
 0x5e1   :  { %11032 = vmatpush.xpose.msk.msrb.mxu2 %vm304_vm2, %v1895_v46  ;;  %v1364_v29 = vsel %vm1361_vm3, %v1363_v24, %v1359_v27 }
 0x5e2   :  { %v1411_v35 = vmul.f32 %v12930_v53, %v1364_v29 }
 0x5e4   :  { %11006 = vmatmul.msk.f32.vlgmr.msra.gmra.mxu0 %vm304_vm2, %v1411_v35  ;;  %v1893_v21 = vpop.permute.xlu0 %1892 }
 0x5e5   :  { %11020 = vmatpush.xpose.msk.msra.mxu0 %vm304_vm2, %v1727_v54 }
 0x5e8   :  { %v1725_v50 = vpop.permute.xlu1 %1724 }
 0x5ec   :  { %11009 = vmatmul.msk.f32.vlgmr.msrb.gmra.mxu0 %vm304_vm2, %v1414_v39  ;;  %v1464_v39 = vpop.f32.mrf.mxu0 }
 0x5ed   :  { %11024 = vmatpush.xpose.msk.msrb.mxu0 %vm304_vm2, %v12957_v15 }
 0x5f0   :  { %v1867_v42 = vpop.permute.xlu1 %1866 }
 0x5f4   :  { %11021 = vmatmul.msk.f32.vlgmr.msra.gmra.mxu0 %vm304_vm2, %v1725_v50 }
 0x5f5   :  { %11030 = vmatpush.xpose.msk.msra.mxu0 %vm304_vm2, %v1867_v42 }
 0x5f8   :  { %v1809_v53 = vpop.permute.xlu1 %1808 }
 0x5f9   :  { %11027 = vmatmul.msk.f32.vlgmr.msra.gmra.mxu2 %vm304_vm2, %v1809_v53 }
 0x5fc   :  { %11025 = vmatmul.msk.f32.vlgmr.msrb.gmra.mxu0 %vm304_vm2, %v1781_v4 }
 0x601   :  { %11033 = vmatmul.msk.f32.vlgmr.msrb.gmra.mxu2 %vm304_vm2, %v1893_v21  ;;  %v216_v21 = vld [vmem:[#allocation10 + $0x8] sm:$0xff] }
 0x604   :  { %11031 = vmatmul.msk.f32.vlgmr.msra.gmra.mxu0 %vm304_vm2, %v12967_v20  ;;  %v13005_v20 = vpop.f32.mrf.mxu2 }
 0x60c   :  { %v13007_v63 = vpop.f32.mrf.mxu2 }
 0x623   :  { %v1231_v2 = vpop.xlane.xlu1 %1230 }
 0x624   :  { %v1249_v44 = vsub.f32 %v12917_v7, %v1231_v2  ;;  %v13009_v7 = vpop.f32.mrf.mxu2 }
 0x626   :  { %v1259_v15 = vmul.f32 1.442695, %v1249_v44 }
 0x628   :  { %11874 = vpow2.f32 %v1259_v15 }
 0x62b   :  { %v1438_v28 = vpop.f32.mrf.mxu3 }
 0x62c   :  { %v13011_v0 = vpop.f32.mrf.mxu2 }
 0x62e   :  { %v11875_v54 = vpop.eup %11874 }
 0x62f   :  { %v1277_v46 = vsel %vm304_vm2, %v11875_v54, 0.0 }
 0x630   :  { %1278 = vadd.xlane.f32.xlu0 %v1277_v46 }
 0x633   :  { %v13025_v10 = vpop.f32.mrf.mxu3 }
 0x63b   :  { %v11565_v31 = vpop.permute.xlu1 %11564  ;;  %v13029_v24 = vpop.f32.mrf.mxu3 }
 0x63c   :  { %v11567_v58 = vunpack.i.h.bf16 %v11565_v31  ;;  %v11566_v59 = vunpack.i.l.bf16 %v11565_v31 }
 0x63e   :  { %1488 = vmatpush.msrb.mxu1 %v11566_v59 }
 0x640   :  { %1566 = vmatpush.msra.mxu1 %v11567_v58 }
 0x643   :  { %v13002_v37 = vpop.permute.xlu1 %11574  ;;  %v1721_v44 = vpop.f32.mrf.mxu3 }
 0x644   :  { %v11577_v61 = vunpack.i.h.bf16 %v13002_v37  ;;  %v1920_v31 = vsel %vm304_vm2, %v1721_v44, -inf }
 0x646   :  { %2159 = vmatpush.msrb.mxu0 %v11577_v61 }
 0x649   :  { %v1288_v26 = vpop.xlane.xlu2 %1287 }
 0x64a   :  { %11876 = vrcp.f32 %v1288_v26  ;;  %v1376_v48 = vand.u32 2147483648, %v1288_v26  ;;  %vm1370_vm12 = vweird.f32 %v1288_v26  ;;  %v1374_v42 = vand.u32 2147483647, %v1288_v26 }
 0x64c   :  { %v1377_v15 = vor.u32 1.1754944e-38, %v1376_v48  ;;  %vm1375_vm14 = vcmp.eq.f32.partialorder %v1374_v42, 8.507059e+37 }
 0x650   :  { %v11877_v9 = vpop.eup %11876 }
 0x651   :  { %v1366_v13 = vmul.f32 %v11877_v9, %v1288_v26  ;;  %vm1371_vm10 = vweird.f32 %v11877_v9 }
 0x652   :  { %vm1372_vm13 = vmor %vm1370_vm12, %vm1371_vm10 }
 0x653   :  { %v1367_v18 = vsub.f32 1.0, %v1366_v13 }
 0x655   :  { %v1368_v27 = vmul.f32 %v11877_v9, %v1367_v18 }
 0x657   :  { %v1369_v16 = vadd.f32 %v11877_v9, %v1368_v27 }
 0x659   :  { %v1373_v2 = vsel %vm1372_vm13, %v11877_v9, %v1369_v16 }
 0x65a   :  { %v1378_v46 = vsel %vm1375_vm14, %v1377_v15, %v1373_v2 }
 0x65b   :  { %v1412_v59 = vmul.f32 %v12978_v1, %v1378_v46 }
 0x661   :  { %v1542_v58 = vpop.f32.mrf.mxu0 }
 0x669   :  { %v13037_v61 = vpop.f32.mrf.mxu0 }
 0x67c   :  { %v13013_v60 = vpop.f32.mrf.mxu2 }
 0x67d   :  { %v1932_v23 = vsel %vm304_vm2, %v13013_v60, -inf }
 0x67e   :  { %1933 = vmax.xlane.f32.xlu0 %v1932_v23 }
 0x684   :  { %v13017_v4 = vpop.f32.mrf.mxu2 }
 0x685   :  { %v1941_v25 = vsel %vm304_vm2, %v13017_v4, -inf }
 0x686   :  { %1942 = vmax.xlane.f32.xlu2 %v1941_v25 }
 0x692   :  { %1754 = vrot.lane.b32.xlu0 %v12617_v34, %s12493_s26 }
 0x69e   :  { %1752 = vrot.lane.b32.xlu2 %v12651_v49, %s12494_s1 }
 0x6a3   :  { %v1279_v8 = vpop.xlane.xlu0 %1278 }
 0x6a4   :  { %11878 = vrcp.f32 %v1279_v8  ;;  %v1334_v11 = vand.u32 2147483648, %v1279_v8  ;;  %v1332_v29 = vand.u32 2147483647, %v1279_v8  ;;  %vm1328_vm8 = vweird.f32 %v1279_v8 }
 0x6a6   :  { %1838 = vrot.lane.b32.xlu2 %v12629_v40, %s12493_s26  ;;  %v1335_v35 = vor.u32 1.1754944e-38, %v1334_v11  ;;  %vm1333_vm11 = vcmp.eq.f32.partialorder %v1332_v29, 8.507059e+37 }
 0x6aa   :  { %v11879_v17 = vpop.eup %11878 }
 0x6ab   :  { %v1324_v19 = vmul.f32 %v11879_v17, %v1279_v8  ;;  %vm1329_vm7 = vweird.f32 %v11879_v17  ;;  %v11568_v8 = vpack.i.bf16 %v12621_v36, %v12609_v30 }
 0x6ac   :  { %vm1330_vm9 = vmor %vm1328_vm8, %vm1329_vm7 }
 0x6ad   :  { %v1325_v22 = vsub.f32 1.0, %v1324_v19 }
 0x6ae   :  { %1836 = vrot.lane.b32.xlu2 %v12668_v56, %s12494_s1 }
 0x6af   :  { %v1326_v45 = vmul.f32 %v11879_v17, %v1325_v22 }
 0x6b1   :  { %v1327_v33 = vadd.f32 %v11879_v17, %v1326_v45 }
 0x6b3   :  { %v1331_v41 = vsel %vm1330_vm9, %v11879_v17, %v1327_v33 }
 0x6b4   :  { %v1336_v50 = vsel %vm1333_vm11, %v1335_v35, %v1331_v41 }
 0x6b5   :  { %v1409_v53 = vmul.f32 %v11875_v54, %v1336_v50  ;;  %v1749_v54 = vpop.f32.mrf.mxu0 }
 0x6b6   :  { %v1923_v23 = vsel %vm304_vm2, %v1749_v54, -inf }
 0x6b7   :  { %11004 = vmatmul.msk.f32.vlgmr.msrb.gmra.mxu1 %vm304_vm2, %v1409_v53 }
 0x6b8   :  { %1662 = vmatpush.msrb.mxu1 %v216_v21 }
 0x6bc   :  { %1921 = vmax.xlane.f32.xlu0 %v1920_v31 }
 0x6bd   :  { %v1805_v25 = vpop.f32.mrf.mxu0 }
 0x6be   :  { %v1929_v26 = vsel %vm304_vm2, %v1805_v25, -inf }
 0x6bf   :  { %11007 = vmatmul.msk.f32.vlgmr.msra.gmra.mxu1 %vm304_vm2, %v1412_v59 }
 0x6c5   :  { %v1889_v27 = vpop.f32.mrf.mxu0 }
 0x6c7   :  { %11010 = vmatmul.msk.f32.vlgmr.msrb.gmra.mxu1 %vm304_vm2, %v1438_v28 }
 0x6cf   :  { %11011 = vmatmul.msk.f32.gmra.mxu1 %vm304_vm2, %v1464_v39 }
 0x6d7   :  { %1924 = vmax.xlane.f32.xlu2 %v1923_v23 }
 0x6df   :  { %1930 = vmax.xlane.f32.xlu2 %v1929_v26 }
 0x6f1   :  { %v1934_v13 = vpop.xlane.xlu0 %1933 }
 0x6f2   :  { %v1948_v45 = vsub.f32 %v13013_v60, %v1934_v13 }
 0x6f4   :  { %v1960_v33 = vmul.f32 1.442695, %v1948_v45 }
 0x6f7   :  { %11569 = vrot.lane.b32.xlu2 %v11568_v8, %s12495_s3 }
 0x6f9   :  { %v1943_v1 = vpop.xlane.xlu2 %1942 }
 0x6fa   :  { %v1951_v9 = vsub.f32 %v13017_v4, %v1943_v1  ;;  %v1938_v4 = vsel %vm304_vm2, %v1889_v27, -inf }
 0x6fc   :  { %v1966_v28 = vmul.f32 1.442695, %v1951_v9 }
 0x6fe   :  { %11880 = vpow2.f32 %v1966_v28 }
 0x6ff   :  { %11882 = vpow2.f32 %v1960_v33 }
 0x701   :  { %v1753_v17 = vpop.permute.xlu2 %1752 }
 0x704   :  { %v13047_v18 = vpop.eup %11880  ;;  %v1755_v19 = vpop.permute.xlu0 %1754 }
 0x705   :  { %11022 = vmatpush.xpose.msk.msrb.mxu3 %vm304_vm2, %v1755_v19  ;;  %v1989_v22 = vsel %vm304_vm2, %v13047_v18, 0.0  ;;  %v13057_v35 = vpop.eup %11882 }
 0x706   :  { %1990 = vadd.xlane.f32.xlu0 %v1989_v22  ;;  %v1980_v16 = vsel %vm304_vm2, %v13057_v35, 0.0 }
 0x708   :  { %11023 = vmatmul.msk.f32.vlgmr.msrb.gmra.mxu3 %vm304_vm2, %v1753_v17 }
 0x709   :  { %v1839_v11 = vpop.permute.xlu2 %1838 }
 0x70a   :  { %11028 = vmatpush.xpose.msk.msra.mxu3 %vm304_vm2, %v1839_v11 }
 0x70e   :  { %1939 = vmax.xlane.f32.xlu0 %v1938_v4 }
 0x711   :  { %v1837_v29 = vpop.permute.xlu2 %1836 }
 0x712   :  { %11029 = vmatmul.msk.f32.vlgmr.msra.gmra.mxu3 %vm304_vm2, %v1837_v29  ;;  %v11576_v29 = vunpack.i.l.bf16 %v13002_v37 }
 0x720   :  { %1981 = vadd.xlane.f32.xlu2 %v1980_v16 }
 0x722   :  { %2395 = vrot.lane.b32.xlu0 %v12609_v30, %s12497_s28 }
 0x72f   :  { %v1922_v41 = vpop.xlane.xlu0 %1921 }
 0x730   :  { %v1944_v48 = vsub.f32 %v1721_v44, %v1922_v41 }
 0x732   :  { %v1952_v50 = vmul.f32 1.442695, %v1944_v48 }
 0x734   :  { %11884 = vpow2.f32 %v1952_v50  ;;  %v1490_v60 = vpop.f32.mrf.mxu1 }
 0x735   :  { %11012 = vmatmul.msk.f32.gmra.mxu1 %vm304_vm2, %v1490_v60 }
 0x738   :  { %2423 = vrot.lane.b32.xlu2 %v12613_v32, %s12497_s28 }
 0x73a   :  { %v13066_v39 = vpop.eup %11884 }
 0x73b   :  { %v1968_v42 = vsel %vm304_vm2, %v13066_v39, 0.0 }
 0x73c   :  { %1969 = vadd.xlane.f32.xlu1 %v1968_v42  ;;  %v1568_v32 = vpop.f32.mrf.mxu1 }
 0x73d   :  { %11013 = vmatmul.msk.f32.gmra.mxu1 %vm304_vm2, %v13025_v10 }
 0x740   :  { %2535 = vrot.lane.b32.xlu2 %v12629_v40, %s12497_s28 }
 0x745   :  { %11014 = vmatmul.msk.f32.gmra.mxu1 %vm304_vm2, %v1542_v58 }
 0x748   :  { %2563 = vrot.lane.b32.xlu2 %v12681_v62, %s12497_s28 }
 0x74a   :  { %v1925_v30 = vpop.xlane.xlu2 %1924 }
 0x74b   :  { %v1945_v53 = vsub.f32 %v1749_v54, %v1925_v30 }
 0x74d   :  { %v1954_v21 = vmul.f32 1.442695, %v1945_v53  ;;  %11015 = vmatmul.msk.f32.gmra.mxu1 %vm304_vm2, %v1568_v32 }
 0x74f   :  { %11886 = vpow2.f32 %v1954_v21 }
 0x750   :  { %2589 = vrot.lane.b32.xlu2 %v12675_v57, %s12496_s27 }
 0x752   :  { %v1931_v2 = vpop.xlane.xlu2 %1930 }
 0x753   :  { %v1947_v10 = vsub.f32 %v1805_v25, %v1931_v2 }
 0x755   :  { %v13080_v44 = vpop.eup %11886  ;;  %v1958_v15 = vmul.f32 1.442695, %v1947_v10  ;;  %11016 = vmatmul.msk.f32.gmra.mxu1 %vm304_vm2, %v13029_v24 }
 0x756   :  { %v1971_v46 = vsel %vm304_vm2, %v13080_v44, 0.0 }
 0x757   :  { %11888 = vpow2.f32 %v1958_v15  ;;  %1972 = vadd.xlane.f32.xlu1 %v1971_v46 }
 0x75a   :  { %v11570_v31 = vpop.permute.xlu2 %11569 }
 0x75b   :  { %v11572_v58 = vunpack.i.h.bf16 %v11570_v31  ;;  %v11571_v59 = vunpack.i.l.bf16 %v11570_v31 }
 0x75d   :  { %v13086_v54 = vpop.eup %11888  ;;  %11017 = vmatmul.msk.f32.gmra.mxu1 %vm304_vm2, %v13037_v61  ;;  %2133 = vmatpush.msrb.mxu3 %v11571_v59 }
 0x75e   :  { %v1977_v57 = vsel %vm304_vm2, %v13086_v54, 0.0 }
 0x75f   :  { %2211 = vmatpush.msra.mxu3 %v11572_v58  ;;  %1978 = vadd.xlane.f32.xlu0 %v1977_v57 }
 0x773   :  { %2216 = vrot.lane.b32.xlu0 %v12625_v38, %s12495_s3 }
 0x779   :  { %v13094_v24 = vpop.xlane.xlu0 %1990 }
 0x77b   :  { %2451 = vrot.lane.b32.xlu0 %v12617_v34, %s12497_s28 }
 0x781   :  { %v1940_v23 = vpop.xlane.xlu0 %1939 }
 0x782   :  { %v1950_v25 = vsub.f32 %v1889_v27, %v1940_v23 }
 0x783   :  { %2449 = vrot.lane.b32.xlu0 %v12651_v49, %s12496_s27 }
 0x784   :  { %v1964_v61 = vmul.f32 1.442695, %v1950_v25 }
 0x786   :  { %11890 = vpow2.f32 %v1964_v61 }
 0x78b   :  { %2477 = vrot.lane.b32.xlu0 %v12657_v52, %s12496_s27  ;;  %v13104_v8 = vpop.f32.mrf.mxu3  ;;  %v13116_v52 = vpop.permute.xlu1 %2393 }
 0x78c   :  { %v13102_v26 = vpop.eup %11890 }
 0x78d   :  { %v1986_v1 = vsel %vm304_vm2, %v13102_v26, 0.0 }
 0x78e   :  { %1987 = vadd.xlane.f32.xlu1 %v1986_v1 }
 0x793   :  { %2505 = vrot.lane.b32.xlu0 %v12665_v55, %s12496_s27  ;;  %v1982_v33 = vpop.xlane.xlu2 %1981 }
 0x794   :  { %v2396_v16 = vpop.permute.xlu0 %2395  ;;  %v2059_v57 = vand.u32 2147483648, %v1982_v33  ;;  %vm2053_vm11 = vweird.f32 %v1982_v33  ;;  %v2057_v61 = vand.u32 2147483647, %v1982_v33 }
 0x795   :  { %v13110_v9 = vpop.f32.mrf.mxu3 }
 0x796   :  { %v1935_v49 = vsel %vm304_vm2, %v13110_v9, -inf }
 0x797   :  { %1936 = vmax.xlane.f32.xlu2 %v1935_v49 }
 0x79b   :  { %2561 = vrot.lane.b32.xlu0 %v12699_v12, %s12496_s27 }
 0x7a7   :  { %2294 = vrot.lane.b32.xlu1 %v12633_v43, %s12495_s3 }
 0x7af   :  { %v1970_v13 = vpop.xlane.xlu1 %1969  ;;  %2421 = vrot.lane.b32.xlu1 %v12645_v47, %s12496_s27 }
 0x7b0   :  { %11892 = vrcp.f32 %v1970_v13  ;;  %v2003_v19 = vand.u32 2147483648, %v1970_v13  ;;  %v2001_v12 = vand.u32 2147483647, %v1970_v13  ;;  %vm1997_vm3 = vweird.f32 %v1970_v13 }
 0x7b1   :  { %11894 = vrcp.f32 %v1982_v33 }
 0x7b2   :  { %v2004_v27 = vor.u32 1.1754944e-38, %v2003_v19  ;;  %vm2002_vm5 = vcmp.eq.f32.partialorder %v2001_v12, 8.507059e+37 }
 0x7b6   :  { %v11893_v55 = vpop.eup %11892 }
 0x7b7   :  { %v1993_v28 = vmul.f32 %v11893_v55, %v1970_v13  ;;  %2479 = vrot.lane.b32.xlu1 %v12621_v36, %s12497_s28  ;;  %vm1998_vm15 = vweird.f32 %v11893_v55  ;;  %v11895_v48 = vpop.eup %11894 }
 0x7b8   :  { %vm1999_vm4 = vmor %vm1997_vm3, %vm1998_vm15  ;;  %v2049_v50 = vmul.f32 %v11895_v48, %v1982_v33  ;;  %vm2054_vm10 = vweird.f32 %v11895_v48  ;;  %vm2058_vm15 = vcmp.eq.f32.partialorder %v2057_v61, 8.507059e+37 }
 0x7b9   :  { %v1994_v17 = vsub.f32 1.0, %v1993_v28  ;;  %vm2055_vm12 = vmor %vm2053_vm11, %vm2054_vm10  ;;  %v2060_v28 = vor.u32 1.1754944e-38, %v2059_v57 }
 0x7ba   :  { %v2050_v37 = vsub.f32 1.0, %v2049_v50 }
 0x7bb   :  { %v1995_v22 = vmul.f32 %v11893_v55, %v1994_v17 }
 0x7bc   :  { %v2051_v2 = vmul.f32 %v11895_v48, %v2050_v37 }
 0x7bd   :  { %v1996_v11 = vadd.f32 %v11893_v55, %v1995_v22 }
 0x7be   :  { %v2052_v58 = vadd.f32 %v11895_v48, %v2051_v2 }
 0x7bf   :  { %v2000_v4 = vsel %vm1999_vm4, %v11893_v55, %v1996_v11  ;;  %2507 = vrot.lane.b32.xlu1 %v12625_v38, %s12497_s28 }
 0x7c0   :  { %v2005_v47 = vsel %vm2002_vm5, %v2004_v27, %v2000_v4  ;;  %v2056_v55 = vsel %vm2055_vm12, %v11895_v48, %v2052_v58 }
 0x7c1   :  { %v2104_v45 = vmul.f32 %v13066_v39, %v2005_v47  ;;  %v2061_v12 = vsel %vm2058_vm15, %v2060_v28, %v2056_v55  ;;  %v1926_v47 = vsel %vm304_vm2, %v13104_v8, -inf }
 0x7c2   :  { %v2108_v4 = vmul.f32 %v13057_v35, %v2061_v12 }
 0x7c3   :  { %11034 = vmatmul.msk.f32.vlgmr.msrb.gmra.mxu3 %vm304_vm2, %v2104_v45 }
 0x7c4   :  { %2289 = vmatpush.msrb.mxu3 %v11576_v29 }
 0x7c7   :  { %2533 = vrot.lane.b32.xlu1 %v12668_v56, %s12496_s27 }
 0x7ca   :  { %v1973_v41 = vpop.xlane.xlu1 %1972 }
 0x7cb   :  { %11896 = vrcp.f32 %v1973_v41  ;;  %v2017_v53 = vand.u32 2147483648, %v1973_v41  ;;  %v2015_v21 = vand.u32 2147483647, %v1973_v41  ;;  %vm2011_vm7 = vweird.f32 %v1973_v41 }
 0x7cd   :  { %v2018_v15 = vor.u32 1.1754944e-38, %v2017_v53  ;;  %vm2016_vm9 = vcmp.eq.f32.partialorder %v2015_v21, 8.507059e+37  ;;  %v2101_v53 = vand.u32 2147483648, %v13094_v24  ;;  %v2099_v21 = vand.u32 2147483647, %v13094_v24 }
 0x7cf   :  { %2591 = vrot.lane.b32.xlu1 %v12633_v43, %s12497_s28  ;;  %vm2100_vm12 = vcmp.eq.f32.partialorder %v2099_v21, 8.507059e+37 }
 0x7d1   :  { %v11897_v60 = vpop.eup %11896 }
 0x7d2   :  { %v2007_v39 = vmul.f32 %v11897_v60, %v1973_v41  ;;  %v1979_v42 = vpop.xlane.xlu0 %1978  ;;  %vm2012_vm6 = vweird.f32 %v11897_v60 }
 0x7d3   :  { %11898 = vrcp.f32 %v1979_v42  ;;  %vm2013_vm8 = vmor %vm2011_vm7, %vm2012_vm6  ;;  %v2045_v1 = vand.u32 2147483648, %v1979_v42  ;;  %v2043_v13 = vand.u32 2147483647, %v1979_v42  ;;  %vm2039_vm14 = vweird.f32 %v1979_v42 }
 0x7d4   :  { %v2008_v30 = vsub.f32 1.0, %v2007_v39  ;;  %11900 = vrcp.f32 %v13094_v24 }
 0x7d5   :  { %v2046_v19 = vor.u32 1.1754944e-38, %v2045_v1  ;;  %vm2044_vm4 = vcmp.eq.f32.partialorder %v2043_v13, 8.507059e+37 }
 0x7d6   :  { %v2009_v32 = vmul.f32 %v11897_v60, %v2008_v30 }
 0x7d8   :  { %v2010_v56 = vadd.f32 %v11897_v60, %v2009_v32 }
 0x7d9   :  { %v11899_v10 = vpop.eup %11898 }
 0x7da   :  { %v2014_v46 = vsel %vm2013_vm8, %v11897_v60, %v2010_v56  ;;  %v2035_v31 = vmul.f32 %v11899_v10, %v1979_v42  ;;  %vm2040_vm13 = vweird.f32 %v11899_v10  ;;  %v11901_v45 = vpop.eup %11900 }
 0x7db   :  { %v2019_v59 = vsel %vm2016_vm9, %v2018_v15, %v2014_v46  ;;  %vm2041_vm3 = vmor %vm2039_vm14, %vm2040_vm13  ;;  %vm2096_vm6 = vweird.f32 %v11901_v45  ;;  %vm2095_vm9 = vweird.f32 %v13094_v24  ;;  %v2424_v15 = vpop.permute.xlu2 %2423 }
 0x7dc   :  { %v2036_v23 = vsub.f32 1.0, %v2035_v31  ;;  %v2105_v25 = vmul.f32 %v13080_v44, %v2019_v59  ;;  %vm2097_vm11 = vmor %vm2095_vm9, %vm2096_vm6  ;;  %v2102_v31 = vor.u32 1.1754944e-38, %v2101_v53 }
 0x7de   :  { %v2037_v49 = vmul.f32 %v11899_v10, %v2036_v23  ;;  %11035 = vmatmul.msk.f32.vlgmr.msrb.gmra.mxu0 %vm304_vm2, %v2105_v25 }
 0x7e0   :  { %v2038_v17 = vadd.f32 %v11899_v10, %v2037_v49 }
 0x7e2   :  { %v2042_v22 = vsel %vm2041_vm3, %v11899_v10, %v2038_v17  ;;  %v13167_v17 = vpop.f32.mrf.mxu1 }
 0x7e3   :  { %v2047_v44 = vsel %vm2044_vm4, %v2046_v19, %v2042_v22 }
 0x7e4   :  { %v2107_v11 = vmul.f32 %v13086_v54, %v2047_v44  ;;  %v2091_v54 = vmul.f32 %v11901_v45, %v13094_v24  ;;  %v2536_v24 = vpop.permute.xlu2 %2535 }
 0x7e5   :  { %v2217_v27 = vpop.permute.xlu0 %2216 }
 0x7e6   :  { %11037 = vmatmul.msk.f32.vlgmr.msra.gmra.mxu3 %vm304_vm2, %v2107_v11  ;;  %2237 = vmatpush.msra.mxu0 %v2217_v27  ;;  %v2092_v33 = vsub.f32 1.0, %v2091_v54 }
 0x7e7   :  { %11050 = vmatpush.xpose.msk.msra.mxu3 %vm304_vm2, %v2396_v16  ;;  %11038 = vmatmul.msk.f32.vlgmr.msra.gmra.mxu0 %vm304_vm2, %v2108_v4 }
 0x7e8   :  { %v2093_v48 = vmul.f32 %v11901_v45, %v2092_v33 }
 0x7ea   :  { %v2094_v37 = vadd.f32 %v11901_v45, %v2093_v48  ;;  %v13170_v44 = vpop.f32.mrf.mxu1 }
 0x7ec   :  { %v2098_v10 = vsel %vm2097_vm11, %v11901_v45, %v2094_v37  ;;  %v2564_v1 = vpop.permute.xlu2 %2563 }
 0x7ed   :  { %v2452_v60 = vpop.permute.xlu0 %2451  ;;  %v2103_v59 = vsel %vm2100_vm12, %v2102_v31, %v2098_v10 }
 0x7ee   :  { %v2111_v23 = vmul.f32 %v13047_v18, %v2103_v59 }
 0x7f2   :  { %v13174_v27 = vpop.f32.mrf.mxu1 }
 0x7f4   :  { %v2590_v28 = vpop.permute.xlu2 %2589 }
 0x7f5   :  { %v2450_v58 = vpop.permute.xlu0 %2449 }
 0x7f9   :  { %1927 = vmax.xlane.f32.xlu1 %v1926_v47 }
 0x7fa   :  { %v13178_v47 = vpop.f32.mrf.mxu1 }
 0x801   :  { %v1988_v29 = vpop.xlane.xlu1 %1987 }
 0x802   :  { %11902 = vrcp.f32 %v1988_v29  ;;  %v2087_v16 = vand.u32 2147483648, %v1988_v29  ;;  %v2085_v42 = vand.u32 2147483647, %v1988_v29  ;;  %vm2081_vm7 = vweird.f32 %v1988_v29 }
 0x804   :  { %v2088_v32 = vor.u32 1.1754944e-38, %v2087_v16  ;;  %vm2086_vm10 = vcmp.eq.f32.partialorder %v2085_v42, 8.507059e+37 }
 0x808   :  { %v11903_v35 = vpop.eup %11902 }
 0x809   :  { %v2077_v41 = vmul.f32 %v11903_v35, %v1988_v29  ;;  %vm2082_vm5 = vweird.f32 %v11903_v35  ;;  %v13182_v29 = vpop.f32.mrf.mxu1 }
 0x80a   :  { %vm2083_vm8 = vmor %vm2081_vm7, %vm2082_vm5  ;;  %v1937_v37 = vpop.xlane.xlu2 %1936 }
 0x80b   :  { %v2078_v50 = vsub.f32 1.0, %v2077_v41 }
 0x80d   :  { %v2079_v39 = vmul.f32 %v11903_v35, %v2078_v50 }
 0x80f   :  { %v2080_v30 = vadd.f32 %v11903_v35, %v2079_v39 }
 0x811   :  { %v2084_v2 = vsel %vm2083_vm8, %v11903_v35, %v2080_v30  ;;  %v1949_v30 = vsub.f32 %v13110_v9, %v1937_v37 }
 0x812   :  { %v2089_v56 = vsel %vm2086_vm10, %v2088_v32, %v2084_v2 }
 0x813   :  { %v2110_v46 = vmul.f32 %v13102_v26, %v2089_v56  ;;  %v2478_v26 = vpop.permute.xlu0 %2477  ;;  %v1962_v21 = vmul.f32 1.442695, %v1949_v30 }
 0x815   :  { %11040 = vmatmul.msk.f32.vlgmr.msrb.gmra.mxu3 %vm304_vm2, %v2110_v46 }
 0x816   :  { %11054 = vmatpush.xpose.msk.msrb.mxu3 %vm304_vm2, %v2452_v60 }
 0x819   :  { %v2295_v57 = vpop.permute.xlu1 %2294 }
 0x81a   :  { %2315 = vmatpush.msrb.mxu0 %v2295_v57 }
 0x81b   :  { %11041 = vmatmul.msk.f32.vlgmr.msrb.gmra.mxu0 %vm304_vm2, %v2111_v23  ;;  %v2506_v18 = vpop.permute.xlu0 %2505  ;;  %v11583_v23 = vpack.i.bf16 %v12621_v36, %v12617_v34 }
 0x81c   :  { %11052 = vmatpush.xpose.msk.msra.mxu0 %vm304_vm2, %v2424_v15 }
 0x81d   :  { %11051 = vmatmul.msk.f32.vlgmr.msra.gmra.mxu3 %vm304_vm2, %v13116_v52 }
 0x81e   :  { %11060 = vmatpush.xpose.msk.msra.mxu3 %vm304_vm2, %v2536_v24 }
 0x821   :  { %v2422_v25 = vpop.permute.xlu1 %2421 }
 0x823   :  { %11053 = vmatmul.msk.f32.vlgmr.msra.gmra.mxu0 %vm304_vm2, %v2422_v25  ;;  %v2562_v52 = vpop.permute.xlu0 %2561 }
 0x825   :  { %11055 = vmatmul.msk.f32.vlgmr.msrb.gmra.mxu3 %vm304_vm2, %v2450_v58 }
 0x829   :  { %v2480_v61 = vpop.permute.xlu1 %2479 }
 0x82a   :  { %11056 = vmatpush.xpose.msk.msrb.mxu0 %vm304_vm2, %v2480_v61 }
 0x82d   :  { %11057 = vmatmul.msk.f32.vlgmr.msrb.gmra.mxu0 %vm304_vm2, %v2478_v26 }
 0x82e   :  { %11062 = vmatpush.xpose.msk.msra.mxu0 %vm304_vm2, %v2564_v1 }
 0x831   :  { %v2508_v49 = vpop.permute.xlu1 %2507 }
 0x832   :  { %11058 = vmatpush.xpose.msk.msra.mxu1 %vm304_vm2, %v2508_v49 }
 0x835   :  { %11059 = vmatmul.msk.f32.vlgmr.msra.gmra.mxu1 %vm304_vm2, %v2506_v18  ;;  %11063 = vmatmul.msk.f32.vlgmr.msra.gmra.mxu0 %vm304_vm2, %v2562_v52 }
 0x839   :  { %v2534_v13 = vpop.permute.xlu1 %2533 }
 0x83a   :  { %11061 = vmatmul.msk.f32.vlgmr.msra.gmra.mxu3 %vm304_vm2, %v2534_v13 }
 0x841   :  { %v2592_v55 = vpop.permute.xlu1 %2591 }
 0x842   :  { %11064 = vmatpush.xpose.msk.msrb.mxu1 %vm304_vm2, %v2592_v55 }
 0x845   :  { %11065 = vmatmul.msk.f32.vlgmr.msrb.gmra.mxu1 %vm304_vm2, %v2590_v28 }
 0x846   :  { %v13190_v35 = vpop.f32.mrf.mxu3 }
 0x85b   :  { %v13180_v45 = vpop.f32.mrf.mxu0 }
 0x864   :  { %v13184_v54 = vpop.f32.mrf.mxu0 }
 0x869   :  { %v13196_v50 = vpop.f32.mrf.mxu3 }
 0x86c   :  { %v1928_v19 = vpop.xlane.xlu1 %1927 }
 0x86d   :  { %v1946_v22 = vsub.f32 %v13104_v8, %v1928_v19  ;;  %v13186_v8 = vpop.f32.mrf.mxu1 }
 0x86f   :  { %v1956_v12 = vmul.f32 1.442695, %v1946_v22 }
 0x871   :  { %11904 = vpow2.f32 %v1956_v12 }
 0x872   :  { %11906 = vpow2.f32 %v1962_v21 }
 0x875   :  { %v13192_v41 = vpop.f32.mrf.mxu1 }
 0x877   :  { %v13172_v11 = vpop.eup %11904 }
 0x878   :  { %v1974_v4 = vsel %vm304_vm2, %v13172_v11, 0.0  ;;  %v13212_v10 = vpop.eup %11906 }
 0x879   :  { %1975 = vadd.xlane.f32.xlu1 %v1974_v4  ;;  %v1983_v46 = vsel %vm304_vm2, %v13212_v10, 0.0 }
 0x87d   :  { %v13198_v60 = vpop.f32.mrf.mxu1 }
 0x898   :  { %v13188_v33 = vpop.f32.mrf.mxu0  ;;  %v13204_v42 = vpop.f32.mrf.mxu3 }
 0x8a0   :  { %v13194_v48 = vpop.f32.mrf.mxu0  ;;  %v13208_v2 = vpop.f32.mrf.mxu3 }
 0x8a1   :  { %v2617_v56 = vsel %vm304_vm2, %v13208_v2, -inf  ;;  %v2620_v31 = vsel %vm304_vm2, %v13194_v48, -inf }
 0x8a8   :  { %v13224_v58 = vpop.f32.mrf.mxu3 }
 0x8a9   :  { %v2623_v4 = vsel %vm304_vm2, %v13224_v58, -inf }
 0x8aa   :  { %v13200_v16 = vpop.f32.mrf.mxu0 }
 0x8ab   :  { %v2626_v39 = vsel %vm304_vm2, %v13200_v16, -inf }
 0x8ac   :  { %2627 = vmax.xlane.f32.xlu1 %v2626_v39 }
 0x8b2   :  { %v2530_v53 = vpop.f32.mrf.mxu1 }
 0x8b3   :  { %v2629_v32 = vsel %vm304_vm2, %v2530_v53, -inf }
 0x8b4   :  { %2630 = vmax.xlane.f32.xlu0 %v2629_v32 }
 0x8bc   :  { %2618 = vmax.xlane.f32.xlu0 %v2617_v56 }
 0x8bd   :  { %v13228_v59 = vpop.f32.mrf.mxu3 }
 0x8be   :  { %v2632_v57 = vsel %vm304_vm2, %v13228_v59, -inf }
 0x8c2   :  { %v13214_v15 = vpop.f32.mrf.mxu1 }
 0x8c3   :  { %v2638_v9 = vsel %vm304_vm2, %v13214_v15, -inf }
 0x8c4   :  { %1984 = vadd.xlane.f32.xlu0 %v1983_v46  ;;  %2639 = vmax.xlane.f32.xlu2 %v2638_v9 }
 0x8c5   :  { %11579 = vrot.lane.b32.xlu1 %v12867_v3, %s12498_s29  ;;  %v13235_v3 = vpop.f32.mrf.mxu0 }
 0x8c6   :  { %v2635_v24 = vsel %vm304_vm2, %v13235_v3, -inf }
 0x8cc   :  { %2621 = vmax.xlane.f32.xlu2 %v2620_v31 }
 0x8e4   :  { %2164 = vrot.lane.b32.xlu2 %v12617_v34, %s12495_s3 }
 0x8ec   :  { %v1976_v26 = vpop.xlane.xlu1 %1975 }
 0x8ed   :  { %11908 = vrcp.f32 %v1976_v26  ;;  %v2031_v37 = vand.u32 2147483648, %v1976_v26  ;;  %vm2025_vm14 = vweird.f32 %v1976_v26  ;;  %v2029_v30 = vand.u32 2147483647, %v1976_v26 }
 0x8ef   :  { %2633 = vmax.xlane.f32.xlu1 %v2632_v57  ;;  %v2032_v46 = vor.u32 1.1754944e-38, %v2031_v37  ;;  %vm2030_vm3 = vcmp.eq.f32.partialorder %v2029_v30, 8.507059e+37 }
 0x8f3   :  { %v11909_v18 = vpop.eup %11908 }
 0x8f4   :  { %v2021_v13 = vmul.f32 %v11909_v18, %v1976_v26  ;;  %vm2026_vm13 = vweird.f32 %v11909_v18 }
 0x8f5   :  { %vm2027_vm15 = vmor %vm2025_vm14, %vm2026_vm13 }
 0x8f6   :  { %v2022_v36 = vsub.f32 1.0, %v2021_v13 }
 0x8f8   :  { %v2023_v12 = vmul.f32 %v11909_v18, %v2022_v36 }
 0x8fa   :  { %v2024_v39 = vadd.f32 %v11909_v18, %v2023_v12 }
 0x8fc   :  { %v2028_v56 = vsel %vm2027_vm15, %v11909_v18, %v2024_v39 }
 0x8fd   :  { %v2033_v57 = vsel %vm2030_vm3, %v2032_v46, %v2028_v56 }
 0x908   :  { %11584 = vrot.lane.b32.xlu1 %v11583_v23, %s12498_s29 }
 0x90d   :  { %2636 = vmax.xlane.f32.xlu2 %v2635_v24 }
 0x91f   :  { %v2628_v49 = vpop.xlane.xlu1 %2627 }
 0x927   :  { %v2631_v25 = vpop.xlane.xlu0 %2630 }
 0x928   :  { %v2645_v61 = vsub.f32 %v2530_v53, %v2631_v25  ;;  %v2106_v25 = vmul.f32 %v13172_v11, %v2033_v57 }
 0x92a   :  { %v2657_v1 = vmul.f32 1.442695, %v2645_v61  ;;  %v2644_v61 = vsub.f32 %v13200_v16, %v2628_v49  ;;  %v11588_v49 = vpack.i.bf16 %v12681_v62, %v12629_v40 }
 0x92c   :  { %11910 = vpow2.f32 %v2657_v1 }
 0x92f   :  { %v2619_v53 = vpop.xlane.xlu0 %2618 }
 0x930   :  { %v2641_v9 = vsub.f32 %v13208_v2, %v2619_v53  ;;  %v2655_v2 = vmul.f32 1.442695, %v2644_v61 }
 0x932   :  { %v13239_v52 = vpop.eup %11910  ;;  %v2649_v23 = vmul.f32 1.442695, %v2641_v9 }
 0x933   :  { %v2677_v34 = vsel %vm304_vm2, %v13239_v52, 0.0 }
 0x934   :  { %2678 = vadd.xlane.f32.xlu0 %v2677_v34 }
 0x937   :  { %v11580_v55 = vpop.permute.xlu1 %11579  ;;  %v13243_v22 = vpop.xlane.xlu2 %2639 }
 0x938   :  { %v11582_v28 = vunpack.i.h.bf16 %v11580_v55  ;;  %v11581_v19 = vunpack.i.l.bf16 %v11580_v55  ;;  %v13277_v30 = vpop.xlane.xlu0 %1984 }
 0x93a   :  { %2830 = vmatpush.msrb.mxu3 %v11581_v19  ;;  %2856 = vmatpush.msrb.mxu0 %v11582_v28 }
 0x93c   :  { %2624 = vmax.xlane.f32.xlu0 %v2623_v4 }
 0x93f   :  { %v2622_v32 = vpop.xlane.xlu2 %2621 }
 0x940   :  { %v2642_v21 = vsub.f32 %v13194_v48, %v2622_v32 }
 0x942   :  { %v2651_v31 = vmul.f32 1.442695, %v2642_v21 }
 0x944   :  { %11912 = vpow2.f32 %v2651_v31 }
 0x945   :  { %11914 = vpow2.f32 %v2649_v23 }
 0x946   :  { %11916 = vpow2.f32 %v2655_v2 }
 0x947   :  { %v2165_v24 = vpop.permute.xlu2 %2164 }
 0x948   :  { %2185 = vmatpush.msra.mxu2 %v2165_v24 }
 0x949   :  { %11036 = vmatmul.msk.f32.vlgmr.msra.gmra.mxu2 %vm304_vm2, %v2106_v25 }
 0x94a   :  { %v13251_v26 = vpop.eup %11912 }
 0x94b   :  { %v2668_v48 = vsel %vm304_vm2, %v13251_v26, 0.0  ;;  %v13256_v1 = vpop.eup %11914 }
 0x94c   :  { %2669 = vadd.xlane.f32.xlu0 %v2668_v48  ;;  %v2665_v18 = vsel %vm304_vm2, %v13256_v1, 0.0  ;;  %v13260_v11 = vpop.eup %11916 }
 0x94d   :  { %v2674_v13 = vsel %vm304_vm2, %v13260_v11, 0.0 }
 0x954   :  { %2666 = vadd.xlane.f32.xlu0 %v2665_v18 }
 0x95c   :  { %2675 = vadd.xlane.f32.xlu0 %v2674_v13 }
 0x962   :  { %v2634_v16 = vpop.xlane.xlu1 %2633 }
 0x963   :  { %v2646_v62 = vsub.f32 %v13228_v59, %v2634_v16 }
 0x965   :  { %v2659_v39 = vmul.f32 1.442695, %v2646_v62 }
 0x970   :  { %2913 = vrot.lane.b32.xlu0 %v12625_v38, %s12498_s29 }
 0x978   :  { %11589 = vrot.lane.b32.xlu0 %v11588_v49, %s12498_s29 }
 0x97a   :  { %v11585_v34 = vpop.permute.xlu1 %11584 }
 0x97b   :  { %v11587_v36 = vunpack.i.h.bf16 %v11585_v34  ;;  %v11586_v55 = vunpack.i.l.bf16 %v11585_v34 }
 0x97d   :  { %2882 = vmatpush.msra.mxu1 %v11586_v55  ;;  %2908 = vmatpush.msra.mxu3 %v11587_v36 }
 0x980   :  { %v2637_v28 = vpop.xlane.xlu2 %2636 }
 0x981   :  { %v2647_v19 = vsub.f32 %v13235_v3, %v2637_v28 }
 0x983   :  { %v2661_v12 = vmul.f32 1.442695, %v2647_v19 }
 0x985   :  { %11918 = vpow2.f32 %v2661_v12 }
 0x986   :  { %11920 = vpow2.f32 %v2659_v39 }
 0x98b   :  { %v13270_v4 = vpop.eup %11918 }
 0x98c   :  { %v2683_v38 = vsel %vm304_vm2, %v13270_v4, 0.0  ;;  %v13275_v37 = vpop.eup %11920 }
 0x98d   :  { %2684 = vadd.xlane.f32.xlu1 %v2683_v38  ;;  %v2680_v53 = vsel %vm304_vm2, %v13275_v37, 0.0 }
 0x9a2   :  { %2681 = vadd.xlane.f32.xlu0 %v2680_v53 }
 0x9a7   :  { %v13281_v3 = vpop.xlane.xlu0 %2678 }
 0x9a8   :  { %vm2750_vm13 = vweird.f32 %v13281_v3 }
 0x9af   :  { %v2625_v32 = vpop.xlane.xlu0 %2624 }
 0x9b0   :  { %v2643_v21 = vsub.f32 %v13224_v58, %v2625_v32 }
 0x9b2   :  { %v2653_v56 = vmul.f32 1.442695, %v2643_v21 }
 0x9b4   :  { %11922 = vpow2.f32 %v2653_v56 }
 0x9b6   :  { %2991 = vrot.lane.b32.xlu0 %v12633_v43, %s12498_s29 }
 0x9ba   :  { %v13286_v59 = vpop.eup %11922 }
 0x9bb   :  { %v2671_v46 = vsel %vm304_vm2, %v13286_v59, 0.0 }
 0x9bc   :  { %2672 = vadd.xlane.f32.xlu2 %v2671_v46 }
 0x9bf   :  { %v2670_v9 = vpop.xlane.xlu0 %2669 }
 0x9c0   :  { %11924 = vrcp.f32 %v2670_v9  ;;  %v2714_v25 = vand.u32 2147483648, %v2670_v9  ;;  %v2712_v43 = vand.u32 2147483647, %v2670_v9  ;;  %vm2708_vm5 = vweird.f32 %v2670_v9 }
 0x9c1   :  { %11926 = vrcp.f32 %v13281_v3 }
 0x9c2   :  { %v2715_v13 = vor.u32 1.1754944e-38, %v2714_v25  ;;  %vm2713_vm7 = vcmp.eq.f32.partialorder %v2712_v43, 8.507059e+37 }
 0x9c6   :  { %v11925_v31 = vpop.eup %11924 }
 0x9c7   :  { %v2704_v57 = vmul.f32 %v11925_v31, %v2670_v9  ;;  %v2667_v23 = vpop.xlane.xlu0 %2666  ;;  %v11927_v58 = vpop.eup %11926  ;;  %vm2709_vm4 = vweird.f32 %v11925_v31 }
 0x9c8   :  { %11928 = vrcp.f32 %v2667_v23  ;;  %v2746_v48 = vmul.f32 %v11927_v58, %v13281_v3  ;;  %vm2710_vm6 = vmor %vm2708_vm5, %vm2709_vm4  ;;  %v2700_v12 = vand.u32 2147483648, %v2667_v23  ;;  %v2698_v62 = vand.u32 2147483647, %v2667_v23 }
 0x9c9   :  { %v2705_v24 = vsub.f32 1.0, %v2704_v57  ;;  %vm2694_vm9 = vweird.f32 %v2667_v23  ;;  %vm2751_vm12 = vweird.f32 %v11927_v58 }
 0x9ca   :  { %v2747_v36 = vsub.f32 1.0, %v2746_v48  ;;  %v2701_v21 = vor.u32 1.1754944e-38, %v2700_v12  ;;  %vm2699_vm11 = vcmp.eq.f32.partialorder %v2698_v62, 8.507059e+37  ;;  %vm2752_vm14 = vmor %vm2750_vm13, %vm2751_vm12  ;;  %vm2067_vm12 = vweird.f32 %v13277_v30 }
 0x9cb   :  { %v2706_v61 = vmul.f32 %v11925_v31, %v2705_v24 }
 0x9cc   :  { %v2748_v39 = vmul.f32 %v11927_v58, %v2747_v36 }
 0x9cd   :  { %v2707_v2 = vadd.f32 %v11925_v31, %v2706_v61 }
 0x9ce   :  { %v11929_v18 = vpop.eup %11928 }
 0x9cf   :  { %v2711_v16 = vsel %vm2710_vm6, %v11925_v31, %v2707_v2  ;;  %v2690_v49 = vmul.f32 %v11929_v18, %v2667_v23  ;;  %v2676_v34 = vpop.xlane.xlu0 %2675  ;;  %vm2695_vm8 = vweird.f32 %v11929_v18  ;;  %v2756_v31 = vand.u32 2147483648, %v13281_v3 }
 0x9d0   :  { %v2716_v55 = vsel %vm2713_vm7, %v2715_v13, %v2711_v16  ;;  %11930 = vrcp.f32 %v2676_v34  ;;  %vm2696_vm10 = vmor %vm2694_vm9, %vm2695_vm8  ;;  %v2742_v25 = vand.u32 2147483648, %v2676_v34  ;;  %v2740_v61 = vand.u32 2147483647, %v2676_v34 }
 0x9d1   :  { %v2802_v28 = vmul.f32 %v13251_v26, %v2716_v55  ;;  %v2691_v19 = vsub.f32 1.0, %v2690_v49  ;;  %v2749_v26 = vadd.f32 %v11927_v58, %v2748_v39  ;;  %v2757_v48 = vor.u32 1.1754944e-38, %v2756_v31 }
 0x9d2   :  { %vm2736_vm3 = vweird.f32 %v2676_v34  ;;  %vm2741_vm6 = vcmp.eq.f32.partialorder %v2740_v61, 8.507059e+37  ;;  %v2073_v61 = vand.u32 2147483648, %v13277_v30 }
 0x9d3   :  { %v2692_v38 = vmul.f32 %v11929_v18, %v2691_v19  ;;  %11067 = vmatmul.msk.f32.vlgmr.msrb.gmra.mxu0 %vm304_vm2, %v2802_v28  ;;  %v2753_v43 = vsel %vm2752_vm14, %v11927_v58, %v2749_v26  ;;  %v2648_v58 = vsub.f32 %v13214_v15, %v13243_v22 }
 0x9d4   :  { %2242 = vrot.lane.b32.xlu2 %v12629_v40, %s12495_s3  ;;  %v2754_v40 = vand.u32 2147483647, %v13281_v3 }
 0x9d5   :  { %v2693_v53 = vadd.f32 %v11929_v18, %v2692_v38  ;;  %v2663_v19 = vmul.f32 1.442695, %v2648_v58 }
 0x9d6   :  { %v11931_v32 = vpop.eup %11930  ;;  %vm2755_vm4 = vcmp.eq.f32.partialorder %v2754_v40, 8.507059e+37 }
 0x9d7   :  { %v2697_v56 = vsel %vm2696_vm10, %v11929_v18, %v2693_v53  ;;  %v2732_v46 = vmul.f32 %v11931_v32, %v2676_v34  ;;  %vm2737_vm15 = vweird.f32 %v11931_v32  ;;  %v2743_v18 = vor.u32 1.1754944e-38, %v2742_v25 }
 0x9d8   :  { %v2702_v9 = vsel %vm2699_vm11, %v2701_v21, %v2697_v56  ;;  %vm2738_vm5 = vmor %vm2736_vm3, %vm2737_vm15  ;;  %v2758_v13 = vsel %vm2755_vm4, %v2757_v48, %v2753_v43  ;;  %11932 = vpow2.f32 %v2663_v19 }
 0x9d9   :  { %v2733_v57 = vsub.f32 1.0, %v2732_v46  ;;  %v2801_v24 = vmul.f32 %v13256_v1, %v2702_v9  ;;  %v2805_v49 = vmul.f32 %v13239_v52, %v2758_v13 }
 0x9db   :  { %v2734_v23 = vmul.f32 %v11931_v32, %v2733_v57  ;;  %11066 = vmatmul.msk.f32.vlgmr.msrb.gmra.mxu3 %vm304_vm2, %v2801_v24 }
 0x9dd   :  { %v2735_v2 = vadd.f32 %v11931_v32, %v2734_v23 }
 0x9de   :  { %v13307_v12 = vpop.eup %11932 }
 0x9df   :  { %v2739_v1 = vsel %vm2738_vm5, %v11931_v32, %v2735_v2  ;;  %v2686_v52 = vsel %vm304_vm2, %v13307_v12, 0.0 }
 0x9e0   :  { %v2744_v16 = vsel %vm2741_vm6, %v2743_v18, %v2739_v1  ;;  %v2074_v18 = vor.u32 1.1754944e-38, %v2073_v61 }
 0x9e1   :  { %v2804_v3 = vmul.f32 %v13260_v11, %v2744_v16 }
 0x9e2   :  { %v2914_v36 = vpop.permute.xlu0 %2913 }
 0x9e3   :  { %11069 = vmatmul.msk.f32.vlgmr.msra.gmra.mxu3 %vm304_vm2, %v2804_v3  ;;  %2934 = vmatpush.msra.mxu0 %v2914_v36 }
 0x9e4   :  { %11070 = vmatmul.msk.f32.vlgmr.msra.gmra.mxu0 %vm304_vm2, %v2805_v49 }
 0x9ea   :  { %v11590_v34 = vpop.permute.xlu0 %11589 }
 0x9eb   :  { %v11592_v55 = vunpack.i.h.bf16 %v11590_v34  ;;  %v11591_v28 = vunpack.i.l.bf16 %v11590_v34  ;;  %v217_v34 = vld [vmem:[#allocation10 + $0x10] sm:$0xff] }
 0x9ed   :  { %2960 = vmatpush.msrb.mxu1 %v11591_v28  ;;  %2986 = vmatpush.msrb.mxu3 %v11592_v55 }
 0x9fd   :  { %2687 = vadd.xlane.f32.xlu2 %v2686_v52 }
 0xa00   :  { %v2685_v11 = vpop.xlane.xlu1 %2684 }
 0xa01   :  { %11934 = vrcp.f32 %v2685_v11  ;;  %v2784_v53 = vand.u32 2147483648, %v2685_v11  ;;  %v2782_v22 = vand.u32 2147483647, %v2685_v11  ;;  %vm2778_vm8 = vweird.f32 %v2685_v11 }
 0xa02   :  { %11936 = vrcp.f32 %v13277_v30 }
 0xa03   :  { %v2785_v21 = vor.u32 1.1754944e-38, %v2784_v53  ;;  %vm2783_vm10 = vcmp.eq.f32.partialorder %v2782_v22, 8.507059e+37 }
 0xa07   :  { %v11935_v38 = vpop.eup %11934 }
 0xa08   :  { %v2774_v62 = vmul.f32 %v11935_v38, %v2685_v11  ;;  %vm2779_vm7 = vweird.f32 %v11935_v38  ;;  %v11937_v9 = vpop.eup %11936 }
 0xa09   :  { %vm2780_vm9 = vmor %vm2778_vm8, %vm2779_vm7  ;;  %v2063_v31 = vmul.f32 %v11937_v9, %v13277_v30  ;;  %vm2068_vm11 = vweird.f32 %v11937_v9 }
 0xa0a   :  { %v2775_v39 = vsub.f32 1.0, %v2774_v62  ;;  %vm2069_vm13 = vmor %vm2067_vm12, %vm2068_vm11 }
 0xa0b   :  { %v2064_v24 = vsub.f32 1.0, %v2063_v31 }
 0xa0c   :  { %v2776_v15 = vmul.f32 %v11935_v38, %v2775_v39 }
 0xa0d   :  { %v2065_v40 = vmul.f32 %v11937_v9, %v2064_v24 }
 0xa0e   :  { %v2777_v32 = vadd.f32 %v11935_v38, %v2776_v15 }
 0xa0f   :  { %v2066_v23 = vadd.f32 %v11937_v9, %v2065_v40 }
 0xa10   :  { %v2781_v56 = vsel %vm2780_vm9, %v11935_v38, %v2777_v32  ;;  %v218_v32 = vld [vmem:[#allocation10 + $0x18] sm:$0xff] }
 0xa11   :  { %v2786_v46 = vsel %vm2783_vm10, %v2785_v21, %v2781_v56  ;;  %v2070_v2 = vsel %vm2069_vm13, %v11937_v9, %v2066_v23 }
 0xa12   :  { %v2807_v26 = vmul.f32 %v13270_v4, %v2786_v46  ;;  %v2071_v4 = vand.u32 2147483647, %v13277_v30 }
 0xa14   :  { %11072 = vmatmul.msk.f32.vlgmr.msrb.gmra.mxu3 %vm304_vm2, %v2807_v26  ;;  %vm2072_vm14 = vcmp.eq.f32.partialorder %v2071_v4, 8.507059e+37 }
 0xa15   :  { %v2682_v57 = vpop.xlane.xlu0 %2681  ;;  %v2075_v1 = vsel %vm2072_vm14, %v2074_v18, %v2070_v2  ;;  %vm3413_vm14 = vcmask 130048  }
 0xa16   :  { %11938 = vrcp.f32 %v2682_v57  ;;  %v2109_v58 = vmul.f32 %v13212_v10, %v2075_v1  ;;  %v2770_v10 = vand.u32 2147483648, %v2682_v57  ;;  %vm2764_vm7 = vweird.f32 %v2682_v57 }
 0xa17   :  { %v2768_v15 = vand.u32 2147483647, %v2682_v57 }
 0xa18   :  { %v2771_v56 = vor.u32 1.1754944e-38, %v2770_v10 }
 0xa19   :  { %vm2769_vm9 = vcmp.eq.f32.partialorder %v2768_v15, 8.507059e+37 }
 0xa1c   :  { %v11939_v48 = vpop.eup %11938 }
 0xa1d   :  { %v2760_v13 = vmul.f32 %v11939_v48, %v2682_v57  ;;  %vm2765_vm5 = vweird.f32 %v11939_v48 }
 0xa1e   :  { %vm2766_vm8 = vmor %vm2764_vm7, %vm2765_vm5 }
 0xa1f   :  { %v2761_v3 = vsub.f32 1.0, %v2760_v13 }
 0xa21   :  { %v2762_v28 = vmul.f32 %v11939_v48, %v2761_v3 }
 0xa23   :  { %v2763_v62 = vadd.f32 %v11939_v48, %v2762_v28 }
 0xa25   :  { %v2767_v21 = vsel %vm2766_vm8, %v11939_v48, %v2763_v62 }
 0xa26   :  { %v2772_v46 = vsel %vm2769_vm9, %v2771_v56, %v2767_v21 }
 0xa27   :  { %v2806_v26 = vmul.f32 %v13275_v37, %v2772_v46 }
 0xa28   :  { %v2992_v25 = vpop.permute.xlu0 %2991 }
 0xa29   :  { %3012 = vmatpush.msrb.mxu0 %v2992_v25 }
 0xa2f   :  { %v2673_v43 = vpop.xlane.xlu2 %2672 }
 0xa30   :  { %11940 = vrcp.f32 %v2673_v43  ;;  %v2728_v30 = vand.u32 2147483648, %v2673_v43  ;;  %v2726_v52 = vand.u32 2147483647, %v2673_v43  ;;  %vm2722_vm3 = vweird.f32 %v2673_v43 }
 0xa32   :  { %v2729_v38 = vor.u32 1.1754944e-38, %v2728_v30  ;;  %vm2727_vm6 = vcmp.eq.f32.partialorder %v2726_v52, 8.507059e+37 }
 0xa36   :  { %v11941_v16 = vpop.eup %11940 }
 0xa37   :  { %v2718_v49 = vmul.f32 %v11941_v16, %v2673_v43  ;;  %v2243_v36 = vpop.permute.xlu2 %2242  ;;  %vm2723_vm15 = vweird.f32 %v11941_v16 }
 0xa38   :  { %2263 = vmatpush.msrb.mxu2 %v2243_v36  ;;  %vm2724_vm4 = vmor %vm2722_vm3, %vm2723_vm15 }
 0xa39   :  { %v2719_v55 = vsub.f32 1.0, %v2718_v49  ;;  %11039 = vmatmul.msk.f32.vlgmr.msrb.gmra.mxu2 %vm304_vm2, %v2109_v58 }
 0xa3a   :  { %2359 = vmatpush.msra.mxu2 %v217_v34 }
 0xa3b   :  { %v2720_v19 = vmul.f32 %v11941_v16, %v2719_v55 }
 0xa3d   :  { %v2721_v11 = vadd.f32 %v11941_v16, %v2720_v19 }
 0xa3f   :  { %v2725_v39 = vsel %vm2724_vm4, %v11941_v16, %v2721_v11 }
 0xa40   :  { %v2730_v53 = vsel %vm2727_vm6, %v2729_v38, %v2725_v39  ;;  %v11809_v38 = vld [vmem:[%s15897_s7] ss:$0 sm:$0xff] }
 0xa41   :  { %v2803_v22 = vmul.f32 %v13286_v59, %v2730_v53  ;;  %11042 = vmatmul.msk.f32.vlgmr.msra.gmra.mxu2 %vm304_vm2, %v13190_v35  ;;  %v2187_v59 = vpop.f32.mrf.mxu2  ;;  %v998_v62 = vadd.f32 %v11809_v38, %v13011_v0  ;;  %v997_v10 = vadd.f32 %v11809_v38, %v13009_v7  ;;  %v996_v15 = vadd.f32 %v11809_v38, %v13007_v63 }
 0xa42   :  { %v995_v56 = vadd.f32 %v11809_v38, %v13005_v20  ;;  %v992_v20 = vadd.f32 %v11809_v38, %v12828_v14 }
 0xa43   :  { %11068 = vmatmul.msk.f32.vlgmr.msra.gmra.mxu1 %vm304_vm2, %v2803_v22  ;;  %v1695_v53 = vadd.f32 %v13198_v60, %v998_v62  ;;  %v1694_v22 = vadd.f32 %v13192_v41, %v997_v10  ;;  %v1693_v46 = vadd.f32 %v13186_v8, %v996_v15  ;;  %v993_v60 = vadd.f32 %v11809_v38, %v12834_v6 }
 0xa44   :  { %3056 = vmatpush.msra.mxu1 %v218_v32  ;;  %v1692_v0 = vadd.f32 %v13182_v29, %v995_v56  ;;  %v1689_v29 = vadd.f32 %v13170_v44, %v992_v20  ;;  %v3092_v44 = vld [vmem:[#allocation6 + $0x10] sm:$0xff] }
 0xa45   :  { %v1690_v8 = vadd.f32 %v13174_v27, %v993_v60  ;;  %v3090_v27 = vld [vmem:[#allocation6] sm:$0xff] }
 0xa49   :  { %11043 = vmatmul.msk.f32.gmra.mxu2 %vm304_vm2, %v13180_v45 }
 0xa4b   :  { %11071 = vmatmul.msk.f32.vlgmr.msrb.gmra.mxu1 %vm304_vm2, %v2806_v26 }
 0xa50   :  { %v2858_v9 = vpop.f32.mrf.mxu0 }
 0xa51   :  { %11044 = vmatmul.msk.f32.gmra.mxu2 %vm304_vm2, %v2187_v59 }
 0xa59   :  { %11045 = vmatmul.msk.f32.gmra.mxu2 %vm304_vm2, %v13196_v50 }
 0xa5e   :  { %v2832_v35 = vpop.f32.mrf.mxu3 }
 0xa5f   :  { %11074 = vmatmul.msk.f32.vlgmr.msra.gmra.mxu1 %vm304_vm2, %v2832_v35  ;;  %v994_v35 = vadd.f32 %v11809_v38, %v12836_v51  ;;  %v991_v51 = vadd.f32 %v11809_v38, %v12825_v5  ;;  %v3091_v5 = vld [vmem:[#allocation6 + $0x8] sm:$0xff] }
 0xa61   :  { %11046 = vmatmul.msk.f32.gmra.mxu2 %vm304_vm2, %v13184_v54  ;;  %v2936_v18 = vpop.f32.mrf.mxu0  ;;  %v1691_v63 = vadd.f32 %v13178_v47, %v994_v35  ;;  %v1688_v6 = vadd.f32 %v13167_v17, %v991_v51  ;;  %v3167_v17 = vld [vmem:[#allocation9 + $0x38] sm:$0xff] }
 0xa62   :  { %3216 = vmatpush.msra.mxu0 %v3167_v17 }
 0xa66   :  { %v2910_v2 = vpop.f32.mrf.mxu3 }
 0xa67   :  { %11075 = vmatmul.msk.f32.gmra.mxu1 %vm304_vm2, %v2858_v9 }
 0xa70   :  { %v2688_v37 = vpop.xlane.xlu2 %2687 }
 0xa71   :  { %11942 = vrcp.f32 %v2688_v37  ;;  %v2798_v24 = vand.u32 2147483648, %v2688_v37  ;;  %v2796_v25 = vand.u32 2147483647, %v2688_v37  ;;  %vm2792_vm11 = vweird.f32 %v2688_v37 }
 0xa73   :  { %v2799_v50 = vor.u32 1.1754944e-38, %v2798_v24  ;;  %vm2797_vm13 = vcmp.eq.f32.partialorder %v2796_v25, 8.507059e+37 }
 0xa77   :  { %v11943_v45 = vpop.eup %11942 }
 0xa78   :  { %v2788_v31 = vmul.f32 %v11943_v45, %v2688_v37  ;;  %vm2793_vm10 = vweird.f32 %v11943_v45 }
 0xa79   :  { %vm2794_vm12 = vmor %vm2792_vm11, %vm2793_vm10 }
 0xa7a   :  { %v2789_v57 = vsub.f32 1.0, %v2788_v31 }
 0xa7c   :  { %v2790_v40 = vmul.f32 %v11943_v45, %v2789_v57 }
 0xa7e   :  { %v2791_v23 = vadd.f32 %v11943_v45, %v2790_v40 }
 0xa80   :  { %v2795_v61 = vsel %vm2794_vm12, %v11943_v45, %v2791_v23 }
 0xa81   :  { %v2800_v4 = vsel %vm2797_vm13, %v2799_v50, %v2795_v61  ;;  %v3093_v50 = vld [vmem:[#allocation6 + $0x18] sm:$0xff]  ;;  %v3166_v61 = vld [vmem:[#allocation9 + $0x30] sm:$0xff] }
 0xa82   :  { %v2808_v54 = vmul.f32 %v13307_v12, %v2800_v4  ;;  %v3165_v4 = vld [vmem:[#allocation9 + $0x28] sm:$0xff]  ;;  %3217 = vmatpush.msra.mxu0 %v3166_v61 }
 0xa84   :  { %11073 = vmatmul.msk.f32.vlgmr.msrb.gmra.mxu0 %vm304_vm2, %v2808_v54  ;;  %v3094_v54 = vld [vmem:[#allocation6 + $0x20] sm:$0xff] }
 0xa85   :  { %3218 = vmatpush.msra.mxu0 %v3165_v4 }
 0xa97   :  { %v2988_v13 = vpop.f32.mrf.mxu3 }
 0xabc   :  { %v2265_v43 = vpop.f32.mrf.mxu2 }
 0xabd   :  { %11047 = vmatmul.msk.f32.gmra.mxu2 %vm304_vm2, %v2265_v43  ;;  %v3095_v43 = vld [vmem:[#allocation6 + $0x28] sm:$0xff] }
 0xac0   :  { %v2884_v48 = vpop.f32.mrf.mxu1 }
 0xac1   :  { %11076 = vmatmul.msk.f32.gmra.mxu1 %vm304_vm2, %v2884_v48  ;;  %v3096_v48 = vld [vmem:[#allocation6 + $0x30] sm:$0xff] }
 0xac4   :  { %v2361_v16 = vpop.f32.mrf.mxu2 }
 0xac5   :  { %11048 = vmatmul.msk.f32.gmra.mxu2 %vm304_vm2, %v13204_v42  ;;  %v2385_v25 = vadd.f32 %v2361_v16, %v1688_v6 }
 0xac8   :  { %v2962_v12 = vpop.f32.mrf.mxu1 }
 0xac9   :  { %11077 = vmatmul.msk.f32.gmra.mxu1 %vm304_vm2, %v2910_v2  ;;  %v3097_v2 = vld [vmem:[#allocation6 + $0x38] sm:$0xff] }
 0xacc   :  { %v2364_v3 = vpop.f32.mrf.mxu2 }
 0xacd   :  { %11049 = vmatmul.msk.f32.gmra.mxu2 %vm304_vm2, %v13188_v33  ;;  %v2386_v47 = vadd.f32 %v2364_v3, %v1689_v29 }
 0xad1   :  { %11078 = vmatmul.msk.f32.gmra.mxu1 %vm304_vm2, %v2936_v18  ;;  %v3164_v18 = vld [vmem:[#allocation9 + $0x20] sm:$0xff] }
 0xad2   :  { %3219 = vmatpush.msra.mxu0 %v3164_v18 }
 0xad4   :  { %v2367_v36 = vpop.f32.mrf.mxu2 }
 0xad5   :  { %v2387_v57 = vadd.f32 %v2367_v36, %v1690_v8 }
 0xad9   :  { %11079 = vmatmul.msk.f32.gmra.mxu1 %vm304_vm2, %v2962_v12 }
 0xadc   :  { %v3058_v42 = vpop.f32.mrf.mxu1  ;;  %v2370_v34 = vpop.f32.mrf.mxu2 }
 0xadd   :  { %v2388_v45 = vadd.f32 %v2370_v34, %v1691_v63  ;;  %v3082_v14 = vadd.f32 %v3058_v42, %v2385_v25 }
 0xae1   :  { %11080 = vmatmul.msk.f32.gmra.mxu1 %vm304_vm2, %v2988_v13 }
 0xae4   :  { %v3061_v49 = vpop.f32.mrf.mxu1  ;;  %v2373_v55 = vpop.f32.mrf.mxu2 }
 0xae5   :  { %v2389_v41 = vadd.f32 %v2373_v55, %v1692_v0  ;;  %v3083_v23 = vadd.f32 %v3061_v49, %v2386_v47 }
 0xb01   :  { %v3014_v1 = vpop.f32.mrf.mxu0 }
 0xb02   :  { %11081 = vmatmul.msk.f32.gmra.mxu1 %vm304_vm2, %v3014_v1 }
 0xb3e   :  { %v3064_v58 = vpop.f32.mrf.mxu1 }
 0xb3f   :  { %v3084_v40 = vadd.f32 %v3064_v58, %v2387_v57  ;;  %v11810_v58 = vld [vmem:[%s15895_s5 + $0x1] ss:$0 sm:$0xff] }
 0xb40   :  { %v2376_v28 = vpop.f32.mrf.mxu2 }
 0xb41   :  { %v2390_v9 = vadd.f32 %v2376_v28, %v1693_v46 }
 0xb46   :  { %v3067_v33 = vpop.f32.mrf.mxu1 }
 0xb47   :  { %v3085_v24 = vadd.f32 %v3067_v33, %v2388_v45 }
 0xb48   :  { %v2379_v52 = vpop.f32.mrf.mxu2 }
 0xb49   :  { %v2391_v26 = vadd.f32 %v2379_v52, %v1694_v22 }
 0xb4e   :  { %v3070_v30 = vpop.f32.mrf.mxu1 }
 0xb4f   :  { %v3086_v31 = vadd.f32 %v3070_v30, %v2389_v41 }
 0xb50   :  { %v2382_v39 = vpop.f32.mrf.mxu2 }
 0xb51   :  { %v2392_v32 = vadd.f32 %v2382_v39, %v1695_v53 }
 0xb56   :  { %v3073_v19 = vpop.f32.mrf.mxu1 }
 0xb57   :  { %v3087_v37 = vadd.f32 %v3073_v19, %v2390_v9 }
 0xb5e   :  { %v3076_v11 = vpop.f32.mrf.mxu1 }
 0xb5f   :  { %v3088_v7 = vadd.f32 %v3076_v11, %v2391_v26 }
 0xb7f   :  { %v3079_v21 = vpop.f32.mrf.mxu1 }
 0xb80   :  { %v3089_v59 = vadd.f32 %v3079_v21, %v2392_v32 }
 0xb82   :  { %3130 = vmatpush.msra.mxu3 %v3089_v59 }
 0xb84   :  { %3131 = vmatpush.msra.mxu3 %v3088_v7 }
 0xb86   :  { %3132 = vmatpush.msra.mxu3 %v3087_v37 }
 0xb88   :  { %3133 = vmatpush.msra.mxu3 %v3086_v31 }
 0xb8a   :  { %3134 = vmatpush.msra.mxu3 %v3085_v24 }
 0xb8c   :  { %3135 = vmatpush.msra.mxu3 %v3084_v40 }
 0xb8e   :  { %3136 = vmatpush.msra.mxu3 %v3083_v23 }
 0xb90   :  { %3137 = vmatpush.msra.mxu3 %v3082_v14 }
 0xb91   :  { %11082 = vmatmul.msk.f32.vlgmr.msra.gmra.mxu3 %vm144_vm0, %v3090_v27 }
 0xb99   :  { %11083 = vmatmul.msk.f32.gmra.mxu3 %vm144_vm0, %v3091_v5 }
 0xba1   :  { %11084 = vmatmul.msk.f32.gmra.mxu3 %vm144_vm0, %v3092_v44 }
 0xba9   :  { %11085 = vmatmul.msk.f32.gmra.mxu3 %vm144_vm0, %v3093_v50 }
 0xbb1   :  { %11086 = vmatmul.msk.f32.gmra.mxu3 %vm144_vm0, %v3094_v54 }
 0xbb9   :  { %11087 = vmatmul.msk.f32.gmra.mxu3 %vm144_vm0, %v3095_v43 }
 0xbc1   :  { %11088 = vmatmul.msk.f32.gmra.mxu3 %vm144_vm0, %v3096_v48 }
 0xbc9   :  { %11089 = vmatmul.msk.f32.gmra.mxu3 %vm144_vm0, %v3097_v2 }
 0xc14   :  { %v3139_v12 = vpop.f32.mrf.mxu3 }
 0xc15   :  { %11092 = vmatmul.msk.f32.vlgmr.msra.gmra.mxu0 %vm223_vm1, %v3139_v12 }
 0xc1c   :  { %v3142_v13 = vpop.f32.mrf.mxu3 }
 0xc1d   :  { %11093 = vmatmul.msk.f32.gmra.mxu0 %vm223_vm1, %v3142_v13 }
 0xc24   :  { %v3145_v1 = vpop.f32.mrf.mxu3 }
 0xc25   :  { %11094 = vmatmul.msk.f32.gmra.mxu0 %vm223_vm1, %v3145_v1 }
 0xc2c   :  { %v3148_v16 = vpop.f32.mrf.mxu3 }
 0xc2d   :  { %11095 = vmatmul.msk.f32.gmra.mxu0 %vm223_vm1, %v3148_v16 }
 0xc34   :  { %v3151_v42 = vpop.f32.mrf.mxu3 }
 0xc35   :  { %11096 = vmatmul.msk.f32.gmra.mxu0 %vm223_vm1, %v3151_v42 }
 0xc3c   :  { %v3154_v3 = vpop.f32.mrf.mxu3 }
 0xc3d   :  { %11097 = vmatmul.msk.f32.gmra.mxu0 %vm223_vm1, %v3154_v3 }
 0xc44   :  { %v3157_v49 = vpop.f32.mrf.mxu3 }
 0xc45   :  { %11098 = vmatmul.msk.f32.gmra.mxu0 %vm223_vm1, %v3157_v49 }
 0xc4c   :  { %v3160_v36 = vpop.f32.mrf.mxu3 }
 0xc4d   :  { %11099 = vmatmul.msk.f32.gmra.mxu0 %vm223_vm1, %v3160_v36 }
 0xc92   :  { %v3221_v34 = vpop.f32.mrf.mxu0 }
 0xc93   :  { %v13386_v33 = vadd.f32 %v11810_v58, %v3221_v34 }
 0xc95   :  { %3259 = vrot.lane.b32.xlu2 %v13386_v33, %s12488_s21  ;;  %v13429_v35 = vmul.f32 0.35355338, %v13386_v33 }
 0xc9a   :  { %v3224_v55 = vpop.f32.mrf.mxu0 }
 0xc9b   :  { %v13394_v39 = vadd.f32 %v11810_v58, %v3224_v55 }
 0xc9d   :  { %v13440_v7 = vmul.f32 0.35355338, %v13394_v39 }
 0xca2   :  { %v3227_v30 = vpop.f32.mrf.mxu0 }
 0xca3   :  { %v13410_v22 = vadd.f32 %v11810_v58, %v3227_v30 }
 0xca5   :  { %v13452_v37 = vmul.f32 0.35355338, %v13410_v22 }
 0xcaa   :  { %v3230_v28 = vpop.f32.mrf.mxu0 }
 0xcab   :  { %v13402_v53 = vadd.f32 %v11810_v58, %v3230_v28 }
 0xcad   :  { %v13458_v8 = vmul.f32 0.35355338, %v13402_v53 }
 0xcb2   :  { %v3233_v19 = vpop.f32.mrf.mxu0 }
 0xcb3   :  { %v13414_v32 = vadd.f32 %v11810_v58, %v3233_v19 }
 0xcb5   :  { %v13463_v29 = vmul.f32 0.35355338, %v13414_v32 }
 0xcba   :  { %v3236_v52 = vpop.f32.mrf.mxu0 }
 0xcbb   :  { %v13404_v15 = vadd.f32 %v11810_v58, %v3236_v52 }
 0xcbd   :  { %v13468_v57 = vmul.f32 0.35355338, %v13404_v15 }
 0xcc2   :  { %v3239_v11 = vpop.f32.mrf.mxu0 }
 0xcc3   :  { %v13390_v38 = vadd.f32 %v11810_v58, %v3239_v11 }
 0xcc5   :  { %3376 = vrot.lane.b32.xlu0 %v13390_v38, %s12488_s21  ;;  %v13432_v0 = vmul.f32 0.35355338, %v13390_v38 }
 0xcca   :  { %v3242_v62 = vpop.f32.mrf.mxu0 }
 0xccb   :  { %v13396_v10 = vadd.f32 %v11810_v58, %v3242_v62 }
 0xccd   :  { %3261 = vrot.lane.b32.xlu0 %v13394_v39, %s12488_s21  ;;  %3378 = vrot.lane.b32.xlu1 %v13396_v10, %s12488_s21  ;;  %v13420_v21 = vpack.i.bf16 %v13390_v38, %v13396_v10  ;;  %v13443_v60 = vmul.f32 0.35355338, %v13396_v10 }
 0xcd5   :  { %3300 = vrot.lane.b32.xlu0 %v13402_v53, %s12488_s21  ;;  %3339 = vrot.lane.b32.xlu1 %v13404_v15, %s12488_s21 }
 0xcdd   :  { %3298 = vrot.lane.b32.xlu0 %v13410_v22, %s12488_s21 }
 0xce5   :  { %3337 = vrot.lane.b32.xlu0 %v13414_v32, %s12488_s21 }
 0xced   :  { %11594 = vrot.lane.b32.xlu0 %v13420_v21, %s12489_s22 }
 0xcef   :  { %v3260_v59 = vpop.permute.xlu2 %3259 }
 0xd37   :  { %v3377_v56 = vpop.permute.xlu0 %3376 }
 0xd3f   :  { %v3262_v46 = vpop.permute.xlu0 %3261  ;;  %v3379_v26 = vpop.permute.xlu1 %3378 }
 0xd40   :  { %11100 = vmatpush.xpose.msk.msrb.mxu2 %vm304_vm2, %v3262_v46  ;;  %11112 = vmatpush.xpose.msk.msrb.mxu1 %vm304_vm2, %v3379_v26 }
 0xd44   :  { %11101 = vmatpush.xpose.msk.msrb.mxu2 %vm304_vm2, %v3260_v59  ;;  %11113 = vmatpush.xpose.msk.msrb.mxu1 %vm304_vm2, %v3377_v56 }
 0xd47   :  { %11102 = vmatmul.msk.f32.vlgmr.msrb.gmra.mxu2 %vm304_vm2, %v13429_v35  ;;  %v3301_v9 = vpop.permute.xlu0 %3300  ;;  %11114 = vmatmul.msk.f32.vlgmr.msrb.gmra.mxu1 %vm304_vm2, %v13432_v0  ;;  %v3340_v41 = vpop.permute.xlu1 %3339 }
 0xd48   :  { %11104 = vmatpush.xpose.msk.msra.mxu2 %vm304_vm2, %v3301_v9 }
 0xd4f   :  { %11103 = vmatmul.msk.f32.gmra.mxu2 %vm304_vm2, %v13440_v7  ;;  %v3299_v63 = vpop.permute.xlu0 %3298  ;;  %11115 = vmatmul.msk.f32.gmra.mxu1 %vm304_vm2, %v13443_v60 }
 0xd50   :  { %11105 = vmatpush.xpose.msk.msra.mxu2 %vm304_vm2, %v3299_v63 }
 0xd54   :  { %11108 = vmatpush.xpose.msk.msrb.mxu2 %vm304_vm2, %v3340_v41  ;;  %v13520_v41 = vpack.i.bf16 %v13386_v33, %v13394_v39 }
 0xd57   :  { %11106 = vmatmul.msk.f32.vlgmr.msra.gmra.mxu2 %vm304_vm2, %v13452_v37  ;;  %v3338_v20 = vpop.permute.xlu0 %3337 }
 0xd58   :  { %11109 = vmatpush.xpose.msk.msrb.mxu2 %vm304_vm2, %v3338_v20  ;;  %v13526_v20 = vpack.i.bf16 %v13414_v32, %v13404_v15 }
 0xd5f   :  { %11107 = vmatmul.msk.f32.gmra.mxu2 %vm304_vm2, %v13458_v8  ;;  %v11595_v45 = vpop.permute.xlu0 %11594 }
 0xd60   :  { %v11596_v31 = vunpack.i.l.bf16 %v11595_v45  ;;  %v11597_v51 = vunpack.i.h.bf16 %v11595_v45 }
 0xd62   :  { %3737 = vmatpush.msra.mxu1 %v11596_v31 }
 0xd64   :  { %3738 = vmatpush.msra.mxu1 %v11597_v51 }
 0xd67   :  { %11110 = vmatmul.msk.f32.vlgmr.msrb.gmra.mxu2 %vm304_vm2, %v13463_v29 }
 0xd6f   :  { %11111 = vmatmul.msk.f32.gmra.mxu2 %vm304_vm2, %v13468_v57 }
 0xdc4   :  { %v3407_v24 = vpop.f32.mrf.mxu1 }
 0xdc5   :  { %v3432_v6 = vsel %vm3413_vm14, %v3407_v24, -inf }
 0xdc6   :  { %3433 = vmax.xlane.f32.xlu1 %v3432_v6 }
 0xdca   :  { %v3290_v47 = vpop.f32.mrf.mxu2 }
 0xdcb   :  { %v3414_v27 = vsel %vm3413_vm14, %v3290_v47, -inf }
 0xdcc   :  { %v3410_v40 = vpop.f32.mrf.mxu1 }
 0xdcd   :  { %v3435_v25 = vsel %vm3413_vm14, %v3410_v40, -inf }
 0xdce   :  { %3436 = vmax.xlane.f32.xlu2 %v3435_v25 }
 0xdd2   :  { %v3293_v23 = vpop.f32.mrf.mxu2 }
 0xdd3   :  { %v3417_v14 = vsel %vm3413_vm14, %v3293_v23, -inf }
 0xdd4   :  { %3418 = vmax.xlane.f32.xlu1 %v3417_v14 }
 0xdd6   :  { %3415 = vmax.xlane.f32.xlu2 %v3414_v27 }
 0xdda   :  { %v3329_v5 = vpop.f32.mrf.mxu2 }
 0xddb   :  { %v3420_v17 = vsel %vm3413_vm14, %v3329_v5, -inf }
 0xde2   :  { %v13478_v44 = vpop.f32.mrf.mxu2 }
 0xde3   :  { %v3423_v46 = vsel %vm3413_vm14, %v13478_v44, -inf }
 0xdea   :  { %v13480_v50 = vpop.f32.mrf.mxu2 }
 0xdeb   :  { %v3426_v62 = vsel %vm3413_vm14, %v13480_v50, -inf }
 0xdee   :  { %3903 = vrot.lane.b32.xlu2 %v13404_v15, %s12491_s24 }
 0xdf2   :  { %v13483_v61 = vpop.f32.mrf.mxu2 }
 0xdf3   :  { %v3429_v4 = vsel %vm3413_vm14, %v13483_v61, -inf }
 0xe17   :  { %3421 = vmax.xlane.f32.xlu2 %v3420_v17 }
 0xe1f   :  { %3430 = vmax.xlane.f32.xlu2 %v3429_v4 }
 0xe39   :  { %v3434_v54 = vpop.xlane.xlu1 %3433 }
 0xe3a   :  { %v3444_v43 = vsub.f32 %v3407_v24, %v3434_v54 }
 0xe3c   :  { %v3458_v48 = vmul.f32 1.442695, %v3444_v43 }
 0xe3e   :  { %11944 = vpow2.f32 %v3458_v48 }
 0xe41   :  { %v3437_v2 = vpop.xlane.xlu2 %3436 }
 0xe42   :  { %v3445_v18 = vsub.f32 %v3410_v40, %v3437_v2 }
 0xe44   :  { %v13487_v12 = vpop.eup %11944  ;;  %v3460_v13 = vmul.f32 1.442695, %v3445_v18 }
 0xe45   :  { %v3480_v1 = vsel %vm3413_vm14, %v13487_v12, 0.0 }
 0xe46   :  { %11946 = vpow2.f32 %v3460_v13  ;;  %3481 = vadd.xlane.f32.xlu0 %v3480_v1 }
 0xe47   :  { %v3419_v30 = vpop.xlane.xlu1 %3418 }
 0xe48   :  { %v3439_v28 = vsub.f32 %v3293_v23, %v3419_v30 }
 0xe49   :  { %v3416_v16 = vpop.xlane.xlu2 %3415 }
 0xe4a   :  { %v3438_v42 = vsub.f32 %v3290_v47, %v3416_v16  ;;  %v3448_v19 = vmul.f32 1.442695, %v3439_v28 }
 0xe4c   :  { %v13491_v3 = vpop.eup %11946  ;;  %v3446_v49 = vmul.f32 1.442695, %v3438_v42 }
 0xe4d   :  { %v3483_v36 = vsel %vm3413_vm14, %v13491_v3, 0.0 }
 0xe4e   :  { %11948 = vpow2.f32 %v3446_v49  ;;  %3484 = vadd.xlane.f32.xlu1 %v3483_v36 }
 0xe4f   :  { %11950 = vpow2.f32 %v3448_v19 }
 0xe51   :  { %v3904_v58 = vpop.permute.xlu2 %3903 }
 0xe52   :  { %11140 = vmatpush.xpose.msk.msrb.mxu1 %vm304_vm2, %v3904_v58 }
 0xe54   :  { %v13496_v34 = vpop.eup %11948 }
 0xe55   :  { %v3462_v55 = vsel %vm3413_vm14, %v13496_v34, 0.0  ;;  %v13510_v26 = vpop.eup %11950 }
 0xe56   :  { %3463 = vadd.xlane.f32.xlu2 %v3462_v55  ;;  %v3465_v63 = vsel %vm3413_vm14, %v13510_v26, 0.0 }
 0xe5a   :  { %3897 = vrot.lane.b32.xlu0 %v13463_v29, %s12490_s23 }
 0xe62   :  { %3899 = vrot.lane.b32.xlu0 %v13468_v57, %s12490_s23 }
 0xe67   :  { %3901 = vrot.lane.b32.xlu1 %v13414_v32, %s12491_s24 }
 0xe8a   :  { %v3422_v52 = vpop.xlane.xlu2 %3421 }
 0xe8b   :  { %v3440_v11 = vsub.f32 %v3329_v5, %v3422_v52 }
 0xe8c   :  { %3427 = vmax.xlane.f32.xlu0 %v3426_v62 }
 0xe8d   :  { %v3450_v56 = vmul.f32 1.442695, %v3440_v11 }
 0xe8f   :  { %11952 = vpow2.f32 %v3450_v56 }
 0xe91   :  { %3424 = vmax.xlane.f32.xlu1 %v3423_v46 }
 0xe92   :  { %v3431_v55 = vpop.xlane.xlu2 %3430 }
 0xe93   :  { %v3443_v62 = vsub.f32 %v13483_v61, %v3431_v55 }
 0xe95   :  { %v13512_v59 = vpop.eup %11952 }
 0xe96   :  { %v3468_v9 = vsel %vm3413_vm14, %v13512_v59, 0.0 }
 0xe97   :  { %3469 = vadd.xlane.f32.xlu2 %v3468_v9 }
 0xe99   :  { %3466 = vadd.xlane.f32.xlu1 %v3465_v63  ;;  %v3456_v63 = vmul.f32 1.442695, %v3443_v62 }
 0xea0   :  { %11599 = vrot.lane.b32.xlu0 %v13520_v41, %s12489_s22 }
 0xea8   :  { %11609 = vrot.lane.b32.xlu0 %v13526_v20, %s12489_s22 }
 0xeb0   :  { %3823 = vrot.lane.b32.xlu0 %v13386_v33, %s12491_s24 }
 0xeb8   :  { %3819 = vrot.lane.b32.xlu0 %v13429_v35, %s12490_s23 }
 0xeb9   :  { %v3482_v45 = vpop.xlane.xlu0 %3481 }
 0xeba   :  { %11954 = vrcp.f32 %v3482_v45  ;;  %v3581_v47 = vand.u32 2147483648, %v3482_v45  ;;  %v3579_v25 = vand.u32 2147483647, %v3482_v45  ;;  %vm3575_vm3 = vweird.f32 %v3482_v45 }
 0xebc   :  { %v3582_v27 = vor.u32 1.1754944e-38, %v3581_v47  ;;  %vm3580_vm5 = vcmp.eq.f32.partialorder %v3579_v25, 8.507059e+37 }
 0xec0   :  { %v11955_v31 = vpop.eup %11954  ;;  %3864 = vrot.lane.b32.xlu0 %v13402_v53, %s12491_s24 }
 0xec1   :  { %v3571_v51 = vmul.f32 %v11955_v31, %v3482_v45  ;;  %v3485_v24 = vpop.xlane.xlu1 %3484  ;;  %vm3576_vm15 = vweird.f32 %v11955_v31 }
 0xec2   :  { %11956 = vrcp.f32 %v3485_v24  ;;  %vm3577_vm4 = vmor %vm3575_vm3, %vm3576_vm15  ;;  %v3595_v48 = vand.u32 2147483648, %v3485_v24  ;;  %v3593_v18 = vand.u32 2147483647, %v3485_v24  ;;  %vm3589_vm7 = vweird.f32 %v3485_v24 }
 0xec3   :  { %v3572_v6 = vsub.f32 1.0, %v3571_v51 }
 0xec4   :  { %v3596_v1 = vor.u32 1.1754944e-38, %v3595_v48  ;;  %vm3594_vm9 = vcmp.eq.f32.partialorder %v3593_v18, 8.507059e+37 }
 0xec5   :  { %v3573_v40 = vmul.f32 %v11955_v31, %v3572_v6 }
 0xec7   :  { %v3574_v23 = vadd.f32 %v11955_v31, %v3573_v40 }
 0xec8   :  { %v11957_v14 = vpop.eup %11956  ;;  %3860 = vrot.lane.b32.xlu0 %v13458_v8, %s12490_s23 }
 0xec9   :  { %v3578_v5 = vsel %vm3577_vm4, %v11955_v31, %v3574_v23  ;;  %v3585_v17 = vmul.f32 %v11957_v14, %v3485_v24  ;;  %vm3590_vm6 = vweird.f32 %v11957_v14  ;;  %v3464_v30 = vpop.xlane.xlu2 %3463 }
 0xeca   :  { %v3583_v4 = vsel %vm3580_vm5, %v3582_v27, %v3578_v5  ;;  %vm3591_vm8 = vmor %vm3589_vm7, %vm3590_vm6  ;;  %11958 = vrcp.f32 %v3464_v30  ;;  %v3497_v47 = vand.u32 2147483648, %v3464_v30  ;;  %vm3491_vm11 = vweird.f32 %v3464_v30 }
 0xecb   :  { %v3604_v54 = vmul.f32 %v13487_v12, %v3583_v4  ;;  %v3586_v43 = vsub.f32 1.0, %v3585_v17  ;;  %v3495_v61 = vand.u32 2147483647, %v3464_v30 }
 0xecc   :  { %v3898_v36 = vpop.permute.xlu0 %3897 }
 0xecd   :  { %v3587_v2 = vmul.f32 %v11957_v14, %v3586_v43  ;;  %11122 = vmatmul.msk.f32.vlgmr.msra.gmra.mxu1 %vm3413_vm14, %v3604_v54  ;;  %vm3496_vm13 = vcmp.eq.f32.partialorder %v3495_v61, 8.507059e+37 }
 0xecf   :  { %v3588_v13 = vadd.f32 %v11957_v14, %v3587_v2 }
 0xed0   :  { %3936 = vrot.lane.b32.xlu0 %v13432_v0, %s12490_s23  ;;  %v11959_v28 = vpop.eup %11958 }
 0xed1   :  { %v3592_v16 = vsel %vm3591_vm8, %v11957_v14, %v3588_v13  ;;  %v3487_v52 = vmul.f32 %v11959_v28, %v3464_v30  ;;  %vm3492_vm10 = vweird.f32 %v11959_v28  ;;  %v3498_v14 = vor.u32 1.1754944e-38, %v3497_v47 }
 0xed2   :  { %v3597_v42 = vsel %vm3594_vm9, %v3596_v1, %v3592_v16  ;;  %vm3493_vm12 = vmor %vm3491_vm11, %vm3492_vm10 }
 0xed3   :  { %v3605_v49 = vmul.f32 %v13491_v3, %v3597_v42  ;;  %v3488_v56 = vsub.f32 1.0, %v3487_v52 }
 0xed4   :  { %v3900_v58 = vpop.permute.xlu0 %3899 }
 0xed5   :  { %11123 = vmatmul.msk.f32.gmra.mxu1 %vm3413_vm14, %v3605_v49  ;;  %v3489_v31 = vmul.f32 %v11959_v28, %v3488_v56 }
 0xed7   :  { %v3490_v24 = vadd.f32 %v11959_v28, %v3489_v31 }
 0xed9   :  { %v3902_v12 = vpop.permute.xlu1 %3901 }
 0xeda   :  { %11141 = vmatpush.xpose.msk.msrb.mxu1 %vm304_vm2, %v3902_v12 }
 0xedd   :  { %11142 = vmatmul.msk.f32.vlgmr.msrb.gmra.mxu1 %vm304_vm2, %v3898_v36 }
 0xee5   :  { %11143 = vmatmul.msk.f32.gmra.mxu1 %vm304_vm2, %v3900_v58 }
 0xeff   :  { %v3428_v19 = vpop.xlane.xlu0 %3427 }
 0xf00   :  { %v3442_v11 = vsub.f32 %v13480_v50, %v3428_v19  ;;  %v13570_v19 = vpack.i.bf16 %v13410_v22, %v13402_v53 }
 0xf02   :  { %v3454_v3 = vmul.f32 1.442695, %v3442_v11 }
 0xf04   :  { %11960 = vpow2.f32 %v3454_v3  ;;  %v3425_v46 = vpop.xlane.xlu1 %3424 }
 0xf05   :  { %v3441_v9 = vsub.f32 %v13478_v44, %v3425_v46  ;;  %v3494_v44 = vsel %vm3493_vm12, %v11959_v28, %v3490_v24 }
 0xf06   :  { %v3499_v17 = vsel %vm3496_vm13, %v3498_v14, %v3494_v44 }
 0xf07   :  { %v3452_v45 = vmul.f32 1.442695, %v3441_v9  ;;  %v3598_v2 = vmul.f32 %v13496_v34, %v3499_v17 }
 0xf09   :  { %11962 = vpow2.f32 %v3452_v45  ;;  %v3171_v45 = vld [vmem:[#allocation10 + $0x20] sm:$0xff] }
 0xf0a   :  { %v13550_v51 = vpop.eup %11960  ;;  %11964 = vpow2.f32 %v3456_v63  ;;  %v13607_v63 = vpop.xlane.xlu2 %3469 }
 0xf0b   :  { %v3474_v50 = vsel %vm3413_vm14, %v13550_v51, 0.0 }
 0xf0c   :  { %v3467_v6 = vpop.xlane.xlu1 %3466  ;;  %3475 = vadd.xlane.f32.xlu2 %v3474_v50 }
 0xf0d   :  { %11966 = vrcp.f32 %v3467_v6  ;;  %v3511_v13 = vand.u32 2147483648, %v3467_v6  ;;  %v3509_v16 = vand.u32 2147483647, %v3467_v6  ;;  %vm3505_vm3 = vweird.f32 %v3467_v6 }
 0xf0e   :  { %11968 = vrcp.f32 %v13607_v63 }
 0xf0f   :  { %v13554_v40 = vpop.eup %11962  ;;  %v3512_v12 = vor.u32 1.1754944e-38, %v3511_v13  ;;  %vm3510_vm5 = vcmp.eq.f32.partialorder %v3509_v16, 8.507059e+37 }
 0xf10   :  { %v3471_v25 = vsel %vm3413_vm14, %v13554_v40, 0.0  ;;  %v13558_v23 = vpop.eup %11964 }
 0xf11   :  { %3472 = vadd.xlane.f32.xlu1 %v3471_v25  ;;  %v3477_v43 = vsel %vm3413_vm14, %v13558_v23, 0.0 }
 0xf12   :  { %v11600_v27 = vpop.permute.xlu0 %11599 }
 0xf13   :  { %v11967_v5 = vpop.eup %11966  ;;  %v11601_v4 = vunpack.i.l.bf16 %v11600_v27  ;;  %v11602_v48 = vunpack.i.h.bf16 %v11600_v27 }
 0xf14   :  { %v3501_v54 = vmul.f32 %v11967_v5, %v3467_v6  ;;  %3478 = vadd.xlane.f32.xlu2 %v3477_v43  ;;  %vm3506_vm15 = vweird.f32 %v11967_v5  ;;  %v11969_v6 = vpop.eup %11968 }
 0xf15   :  { %3632 = vmatpush.msra.mxu2 %v11601_v4  ;;  %vm3507_vm4 = vmor %vm3505_vm3, %vm3506_vm15  ;;  %v3515_v44 = vmul.f32 %v11969_v6, %v13607_v63  ;;  %vm3520_vm11 = vweird.f32 %v11969_v6  ;;  %vm3519_vm15 = vweird.f32 %v13607_v63 }
 0xf16   :  { %v3502_v18 = vsub.f32 1.0, %v3501_v54 }
 0xf17   :  { %3633 = vmatpush.msra.mxu2 %v11602_v48  ;;  %v3516_v4 = vsub.f32 1.0, %v3515_v44 }
 0xf18   :  { %v3503_v1 = vmul.f32 %v11967_v5, %v3502_v18  ;;  %11116 = vmatmul.msk.f32.vlgmr.msra.gmra.mxu2 %vm3413_vm14, %v3598_v2 }
 0xf19   :  { %3785 = vmatpush.msrb.mxu2 %v3171_v45 }
 0xf1a   :  { %v11610_v42 = vpop.permute.xlu0 %11609  ;;  %v3504_v49 = vadd.f32 %v11967_v5, %v3503_v1  ;;  %v3517_v1 = vmul.f32 %v11969_v6, %v3516_v4 }
 0xf1b   :  { %v11611_v36 = vunpack.i.l.bf16 %v11610_v42  ;;  %v11612_v55 = vunpack.i.h.bf16 %v11610_v42 }
 0xf1c   :  { %v3508_v58 = vsel %vm3507_vm4, %v11967_v5, %v3504_v49  ;;  %vm3521_vm4 = vmor %vm3519_vm15, %vm3520_vm11 }
 0xf1d   :  { %3702 = vmatpush.msrb.mxu3 %v11611_v36  ;;  %v3513_v30 = vsel %vm3510_vm5, %v3512_v12, %v3508_v58 }
 0xf1e   :  { %v3599_v34 = vmul.f32 %v13510_v26, %v3513_v30 }
 0xf1f   :  { %3703 = vmatpush.msrb.mxu3 %v11612_v55  ;;  %v3518_v55 = vadd.f32 %v11969_v6, %v3517_v1 }
 0xf20   :  { %11117 = vmatmul.msk.f32.gmra.mxu2 %vm3413_vm14, %v3599_v34 }
 0xf22   :  { %v13566_v28 = vpop.permute.xlu0 %3823 }
 0xf2a   :  { %v13572_v52 = vpop.permute.xlu0 %3819  ;;  %11604 = vrot.lane.b32.xlu1 %v13570_v19, %s12489_s22 }
 0xf2c   :  { %3825 = vrot.lane.b32.xlu2 %v13394_v39, %s12491_s24 }
 0xf32   :  { %v3865_v11 = vpop.permute.xlu0 %3864  ;;  %3821 = vrot.lane.b32.xlu1 %v13440_v7, %s12490_s23 }
 0xf33   :  { %11136 = vmatpush.xpose.msk.msra.mxu3 %vm304_vm2, %v3865_v11 }
 0xf34   :  { %3858 = vrot.lane.b32.xlu2 %v13452_v37, %s12490_s23 }
 0xf3a   :  { %3862 = vrot.lane.b32.xlu1 %v13410_v22, %s12491_s24 }
 0xf3c   :  { %3940 = vrot.lane.b32.xlu2 %v13390_v38, %s12491_s24 }
 0xf42   :  { %3942 = vrot.lane.b32.xlu1 %v13396_v10, %s12491_s24 }
 0xf44   :  { %3938 = vrot.lane.b32.xlu2 %v13443_v60, %s12490_s23 }
 0xf4a   :  { %v13591_v26 = vpop.f32.mrf.mxu1 }
 0xf4c   :  { %4462 = vrot.lane.b32.xlu2 %v13414_v32, %s12493_s26 }
 0xf52   :  { %v13595_v3 = vpop.f32.mrf.mxu1 }
 0xf54   :  { %4380 = vrot.lane.b32.xlu2 %v13429_v35, %s12494_s1 }
 0xf5a   :  { %v13599_v62 = vpop.f32.mrf.mxu1 }
 0xf5b   :  { %v3987_v9 = vsel %vm3413_vm14, %v13599_v62, -inf }
 0xf62   :  { %v13601_v56 = vpop.f32.mrf.mxu1 }
 0xf63   :  { %v3990_v46 = vsel %vm3413_vm14, %v13601_v56, -inf }
 0xf64   :  { %3991 = vmax.xlane.f32.xlu0 %v3990_v46  ;;  %v3523_v46 = vand.u32 2147483647, %v13607_v63 }
 0xf66   :  { %vm3524_vm5 = vcmp.eq.f32.partialorder %v3523_v46, 8.507059e+37 }
 0xf6c   :  { %3988 = vmax.xlane.f32.xlu1 %v3987_v9 }
 0xf78   :  { %11614 = vrot.lane.b32.xlu0 %v13526_v20, %s12492_s25 }
 0xf7f   :  { %v3476_v31 = vpop.xlane.xlu2 %3475 }
 0xf80   :  { %4386 = vrot.lane.b32.xlu0 %v13394_v39, %s12493_s26  ;;  %11970 = vrcp.f32 %v3476_v31  ;;  %v3553_v14 = vand.u32 2147483648, %v3476_v31  ;;  %v3551_v5 = vand.u32 2147483647, %v3476_v31  ;;  %vm3547_vm7 = vweird.f32 %v3476_v31 }
 0xf82   :  { %v3554_v48 = vor.u32 1.1754944e-38, %v3553_v14  ;;  %vm3552_vm9 = vcmp.eq.f32.partialorder %v3551_v5, 8.507059e+37 }
 0xf84   :  { %v13614_v24 = vpop.xlane.xlu1 %3472 }
 0xf85   :  { %4464 = vrot.lane.b32.xlu1 %v13404_v15, %s12493_s26  ;;  %11972 = vrcp.f32 %v13614_v24  ;;  %v3537_v4 = vand.u32 2147483647, %v13614_v24 }
 0xf86   :  { %v11971_v50 = vpop.eup %11970 }
 0xf87   :  { %v3543_v47 = vmul.f32 %v11971_v50, %v3476_v31  ;;  %v3479_v61 = vpop.xlane.xlu2 %3478  ;;  %vm3548_vm6 = vweird.f32 %v11971_v50  ;;  %v3522_v31 = vsel %vm3521_vm4, %v11969_v6, %v3518_v55 }
 0xf88   :  { %4384 = vrot.lane.b32.xlu0 %v13386_v33, %s12493_s26  ;;  %11974 = vrcp.f32 %v3479_v61  ;;  %vm3549_vm8 = vmor %vm3547_vm7, %vm3548_vm6  ;;  %v3567_v12 = vand.u32 2147483648, %v3479_v61  ;;  %v3565_v58 = vand.u32 2147483647, %v3479_v61  ;;  %vm3561_vm12 = vweird.f32 %v3479_v61 }
 0xf89   :  { %v3544_v25 = vsub.f32 1.0, %v3543_v47  ;;  %vm3533_vm7 = vweird.f32 %v13614_v24 }
 0xf8a   :  { %v3568_v11 = vor.u32 1.1754944e-38, %v3567_v12  ;;  %vm3566_vm3 = vcmp.eq.f32.partialorder %v3565_v58, 8.507059e+37 }
 0xf8b   :  { %v3545_v27 = vmul.f32 %v11971_v50, %v3544_v25  ;;  %v13624_v17 = vpop.eup %11972 }
 0xf8c   :  { %v3529_v42 = vmul.f32 %v13624_v17, %v13614_v24  ;;  %vm3534_vm6 = vweird.f32 %v13624_v17 }
 0xf8d   :  { %4458 = vrot.lane.b32.xlu1 %v13463_v29, %s12494_s1  ;;  %v3546_v54 = vadd.f32 %v11971_v50, %v3545_v27  ;;  %v3539_v27 = vand.u32 2147483648, %v13614_v24 }
 0xf8e   :  { %v11975_v43 = vpop.eup %11974  ;;  %v3530_v30 = vsub.f32 1.0, %v3529_v42 }
 0xf8f   :  { %v3550_v2 = vsel %vm3549_vm8, %v11971_v50, %v3546_v54  ;;  %v3557_v18 = vmul.f32 %v11975_v43, %v3479_v61  ;;  %vm3562_vm10 = vweird.f32 %v11975_v43  ;;  %vm3535_vm8 = vmor %vm3533_vm7, %vm3534_vm6  ;;  %v3826_v54 = vpop.permute.xlu2 %3825 }
 0xf90   :  { %4382 = vrot.lane.b32.xlu0 %v13440_v7, %s12494_s1  ;;  %v3555_v13 = vsel %vm3552_vm9, %v3554_v48, %v3550_v2  ;;  %vm3563_vm13 = vmor %vm3561_vm12, %vm3562_vm10  ;;  %v3531_v50 = vmul.f32 %v13624_v17, %v3530_v30  ;;  %v3540_v48 = vor.u32 1.1754944e-38, %v3539_v27  ;;  %vm3538_vm9 = vcmp.eq.f32.partialorder %v3537_v4, 8.507059e+37 }
 0xf91   :  { %v3602_v16 = vmul.f32 %v13550_v51, %v3555_v13  ;;  %v3558_v49 = vsub.f32 1.0, %v3557_v18  ;;  %v3525_v51 = vand.u32 2147483648, %v13607_v63 }
 0xf92   :  { %v3532_v6 = vadd.f32 %v13624_v17, %v3531_v50 }
 0xf93   :  { %v3559_v36 = vmul.f32 %v11975_v43, %v3558_v49  ;;  %11120 = vmatmul.msk.f32.vlgmr.msrb.gmra.mxu3 %vm3413_vm14, %v3602_v16  ;;  %v3526_v61 = vor.u32 1.1754944e-38, %v3525_v51  ;;  %v3861_v16 = vpop.permute.xlu0 %3860 }
 0xf95   :  { %4460 = vrot.lane.b32.xlu1 %v13468_v57, %s12494_s1  ;;  %v3560_v34 = vadd.f32 %v11975_v43, %v3559_v36  ;;  %v3527_v63 = vsel %vm3524_vm5, %v3526_v61, %v3522_v31 }
 0xf96   :  { %v3600_v5 = vmul.f32 %v13512_v59, %v3527_v63 }
 0xf97   :  { %v3564_v9 = vsel %vm3563_vm13, %v11975_v43, %v3560_v34  ;;  %v3536_v43 = vsel %vm3535_vm8, %v13624_v17, %v3532_v6  ;;  %v3859_v17 = vpop.permute.xlu2 %3858 }
 0xf98   :  { %4497 = vrot.lane.b32.xlu0 %v13432_v0, %s12494_s1  ;;  %v3569_v45 = vsel %vm3566_vm3, %v3568_v11, %v3564_v9  ;;  %v3541_v59 = vsel %vm3538_vm9, %v3540_v48, %v3536_v43 }
 0xf99   :  { %v3603_v47 = vmul.f32 %v13558_v23, %v3569_v45  ;;  %v3601_v24 = vmul.f32 %v13554_v40, %v3541_v59 }
 0xf9b   :  { %v3635_v44 = vpop.f32.mrf.mxu2  ;;  %11121 = vmatmul.msk.f32.gmra.mxu3 %vm3413_vm14, %v3603_v47  ;;  %v3937_v40 = vpop.permute.xlu0 %3936 }
 0xf9c   :  { %v11605_v25 = vpop.permute.xlu1 %11604  ;;  %11124 = vmatmul.msk.f32.vlgmr.msrb.gmra.mxu2 %vm304_vm2, %v3635_v44 }
 0xf9d   :  { %v11606_v14 = vunpack.i.l.bf16 %v11605_v25  ;;  %4501 = vrot.lane.b32.xlu1 %v13390_v38, %s12493_s26  ;;  %v11607_v23 = vunpack.i.h.bf16 %v11605_v25 }
 0xf9f   :  { %3667 = vmatpush.msrb.mxu0 %v11606_v14  ;;  %v3941_v42 = vpop.permute.xlu2 %3940 }
 0xfa1   :  { %3668 = vmatpush.msrb.mxu0 %v11607_v23 }
 0xfa2   :  { %11118 = vmatmul.msk.f32.vlgmr.msrb.gmra.mxu0 %vm3413_vm14, %v3600_v5 }
 0xfa3   :  { %11132 = vmatpush.xpose.msk.msra.mxu0 %vm304_vm2, %v3826_v54  ;;  %v3638_v2 = vpop.f32.mrf.mxu2 }
 0xfa4   :  { %v3822_v18 = vpop.permute.xlu1 %3821  ;;  %11125 = vmatmul.msk.f32.gmra.mxu2 %vm304_vm2, %v3638_v2 }
 0xfa7   :  { %11133 = vmatpush.xpose.msk.msra.mxu0 %vm304_vm2, %v13566_v28  ;;  %v3939_v28 = vpop.permute.xlu2 %3938 }
 0xfaa   :  { %11119 = vmatmul.msk.f32.gmra.mxu0 %vm3413_vm14, %v3601_v24 }
 0xfac   :  { %v3863_v13 = vpop.permute.xlu1 %3862 }
 0xfad   :  { %11137 = vmatpush.xpose.msk.msra.mxu3 %vm304_vm2, %v3863_v13 }
 0xfaf   :  { %v4463_v50 = vpop.permute.xlu2 %4462 }
 0xfb0   :  { %11138 = vmatmul.msk.f32.vlgmr.msra.gmra.mxu3 %vm304_vm2, %v3859_v17 }
 0xfb2   :  { %11134 = vmatmul.msk.f32.vlgmr.msra.gmra.mxu0 %vm304_vm2, %v13572_v52 }
 0xfb4   :  { %v3943_v1 = vpop.permute.xlu1 %3942 }
 0xfb5   :  { %11144 = vmatpush.xpose.msk.msrb.mxu0 %vm304_vm2, %v3943_v1 }
 0xfb7   :  { %v4381_v17 = vpop.permute.xlu2 %4380 }
 0xfb8   :  { %11139 = vmatmul.msk.f32.gmra.mxu3 %vm304_vm2, %v3861_v16 }
 0xfb9   :  { %11145 = vmatpush.xpose.msk.msrb.mxu0 %vm304_vm2, %v3941_v42 }
 0xfba   :  { %11135 = vmatmul.msk.f32.gmra.mxu0 %vm304_vm2, %v3822_v18 }
 0xfc2   :  { %11146 = vmatmul.msk.f32.vlgmr.msrb.gmra.mxu0 %vm304_vm2, %v3937_v40 }
 0xfca   :  { %11147 = vmatmul.msk.f32.gmra.mxu0 %vm304_vm2, %v3939_v28 }
 0xfd7   :  { %v3992_v49 = vpop.xlane.xlu0 %3991 }
 0xfd8   :  { %v4004_v52 = vsub.f32 %v13601_v56, %v3992_v49 }
 0xfda   :  { %v4017_v12 = vmul.f32 1.442695, %v4004_v52 }
 0xfdc   :  { %11976 = vpow2.f32 %v4017_v12 }
 0xfdf   :  { %v3989_v36 = vpop.xlane.xlu1 %3988 }
 0xfe0   :  { %v4003_v58 = vsub.f32 %v13599_v62, %v3989_v36 }
 0xfe2   :  { %v13671_v55 = vpop.eup %11976  ;;  %v4015_v30 = vmul.f32 1.442695, %v4003_v58 }
 0xfe3   :  { %v4038_v34 = vsel %vm3413_vm14, %v13671_v55, 0.0 }
 0xfe4   :  { %11978 = vpow2.f32 %v4015_v30  ;;  %4039 = vadd.xlane.f32.xlu1 %v4038_v34 }
 0xfea   :  { %v13675_v51 = vpop.eup %11978  ;;  %v11615_v11 = vpop.permute.xlu0 %11614 }
 0xfeb   :  { %v11616_v46 = vunpack.i.l.bf16 %v11615_v11  ;;  %v4035_v56 = vsel %vm3413_vm14, %v13675_v51, 0.0  ;;  %v11617_v9 = vunpack.i.h.bf16 %v11615_v11 }
 0xfec   :  { %4036 = vadd.xlane.f32.xlu2 %v4035_v56 }
 0xfed   :  { %4263 = vmatpush.msra.mxu0 %v11616_v46 }
 0xfef   :  { %4264 = vmatpush.msra.mxu0 %v11617_v9 }
 0xff2   :  { %v4387_v62 = vpop.permute.xlu0 %4386 }
 0xff3   :  { %11164 = vmatpush.xpose.msk.msrb.mxu0 %vm304_vm2, %v4387_v62 }
 0xff7   :  { %v4465_v45 = vpop.permute.xlu1 %4464 }
 0xff8   :  { %11172 = vmatpush.xpose.msk.msra.mxu2 %vm304_vm2, %v4465_v45 }
 0xffa   :  { %v4385_v31 = vpop.permute.xlu0 %4384 }
 0xffb   :  { %11165 = vmatpush.xpose.msk.msrb.mxu0 %vm304_vm2, %v4385_v31 }
 0xffc   :  { %11173 = vmatpush.xpose.msk.msra.mxu2 %vm304_vm2, %v4463_v50 }
 0xffd   :  { %4499 = vrot.lane.b32.xlu1 %v13443_v60, %s12494_s1 }
 0xfff   :  { %v4459_v4 = vpop.permute.xlu1 %4458 }
0x1004   :  { %4503 = vrot.lane.b32.xlu2 %v13396_v10, %s12493_s26 }
0x1007   :  { %v4461_v18 = vpop.permute.xlu1 %4460 }
0x100f   :  { %v4502_v13 = vpop.permute.xlu1 %4501 }
0x1016   :  { %v3705_v61 = vpop.f32.mrf.mxu3 }
0x101e   :  { %v3708_v25 = vpop.f32.mrf.mxu3 }
0x101f   :  { %v3670_v47 = vpop.f32.mrf.mxu0 }
0x1020   :  { %11126 = vmatmul.msk.f32.gmra.mxu2 %vm304_vm2, %v3670_v47 }
0x1027   :  { %v3673_v44 = vpop.f32.mrf.mxu0 }
0x1028   :  { %11127 = vmatmul.msk.f32.gmra.mxu2 %vm304_vm2, %v3673_v44 }
0x102f   :  { %v13689_v63 = vpop.f32.mrf.mxu0 }
0x1030   :  { %11128 = vmatmul.msk.f32.gmra.mxu2 %vm304_vm2, %v3705_v61  ;;  %v3975_v14 = vsel %vm3413_vm14, %v13689_v63, -inf }
0x1031   :  { %3976 = vmax.xlane.f32.xlu2 %v3975_v14 }
0x1033   :  { %v13694_v6 = vpop.f32.mrf.mxu3 }
0x1034   :  { %v3981_v27 = vsel %vm3413_vm14, %v13694_v6, -inf }
0x1035   :  { %3982 = vmax.xlane.f32.xlu1 %v3981_v27 }
0x1037   :  { %v13698_v23 = vpop.f32.mrf.mxu0 }
0x1038   :  { %11129 = vmatmul.msk.f32.gmra.mxu2 %vm304_vm2, %v3708_v25  ;;  %v3978_v5 = vsel %vm3413_vm14, %v13698_v23, -inf }
0x1039   :  { %3979 = vmax.xlane.f32.xlu0 %v3978_v5 }
0x103b   :  { %v13703_v54 = vpop.f32.mrf.mxu3 }
0x103c   :  { %v3984_v43 = vsel %vm3413_vm14, %v13703_v54, -inf }
0x103d   :  { %3985 = vmax.xlane.f32.xlu2 %v3984_v43  ;;  %v13732_v43 = vpop.f32.mrf.mxu2 }
0x103f   :  { %v13707_v48 = vpop.f32.mrf.mxu0 }
0x1040   :  { %11130 = vmatmul.msk.f32.gmra.mxu2 %vm304_vm2, %v13591_v26  ;;  %v3993_v2 = vsel %vm3413_vm14, %v13707_v48, -inf }
0x1041   :  { %3994 = vmax.xlane.f32.xlu0 %v3993_v2 }
0x1047   :  { %v13713_v59 = vpop.f32.mrf.mxu0 }
0x1048   :  { %11131 = vmatmul.msk.f32.gmra.mxu2 %vm304_vm2, %v13595_v3  ;;  %v3996_v24 = vsel %vm3413_vm14, %v13713_v59, -inf }
0x1049   :  { %3997 = vmax.xlane.f32.xlu1 %v3996_v24 }
0x1050   :  { %11174 = vmatmul.msk.f32.vlgmr.msra.gmra.mxu2 %vm304_vm2, %v4459_v4 }
0x1057   :  { %v4040_v1 = vpop.xlane.xlu1 %4039 }
0x1058   :  { %11175 = vmatmul.msk.f32.gmra.mxu2 %vm304_vm2, %v4461_v18  ;;  %11980 = vrcp.f32 %v4040_v1  ;;  %v4128_v56 = vand.u32 2147483648, %v4040_v1  ;;  %vm4122_vm3 = vweird.f32 %v4040_v1  ;;  %v4126_v45 = vand.u32 2147483647, %v4040_v1 }
0x105a   :  { %v4129_v47 = vor.u32 1.1754944e-38, %v4128_v56  ;;  %vm4127_vm5 = vcmp.eq.f32.partialorder %v4126_v45, 8.507059e+37 }
0x105e   :  { %v11981_v16 = vpop.eup %11980 }
0x105f   :  { %v4037_v26 = vpop.xlane.xlu2 %4036  ;;  %v4118_v42 = vmul.f32 %v11981_v16, %v4040_v1  ;;  %vm4123_vm13 = vweird.f32 %v11981_v16 }
0x1060   :  { %11982 = vrcp.f32 %v4037_v26  ;;  %v4114_v52 = vand.u32 2147483648, %v4037_v26  ;;  %v4112_v58 = vand.u32 2147483647, %v4037_v26  ;;  %vm4108_vm11 = vweird.f32 %v4037_v26  ;;  %vm4124_vm4 = vmor %vm4122_vm3, %vm4123_vm13 }
0x1061   :  { %v4119_v28 = vsub.f32 1.0, %v4118_v42  ;;  %v13741_v42 = vpop.f32.mrf.mxu2 }
0x1062   :  { %v4115_v34 = vor.u32 1.1754944e-38, %v4114_v52  ;;  %vm4113_vm15 = vcmp.eq.f32.partialorder %v4112_v58, 8.507059e+37 }
0x1063   :  { %v4120_v12 = vmul.f32 %v11981_v16, %v4119_v28 }
0x1065   :  { %v4121_v46 = vadd.f32 %v11981_v16, %v4120_v12 }
0x1066   :  { %v11983_v40 = vpop.eup %11982 }
0x1067   :  { %v4104_v49 = vmul.f32 %v11983_v40, %v4037_v26  ;;  %vm4109_vm10 = vweird.f32 %v11983_v40  ;;  %v4504_v31 = vpop.permute.xlu2 %4503  ;;  %v4125_v50 = vsel %vm4124_vm4, %v11981_v16, %v4121_v46 }
0x1068   :  { %vm4110_vm12 = vmor %vm4108_vm11, %vm4109_vm10  ;;  %v4130_v61 = vsel %vm4127_vm5, %v4129_v47, %v4125_v50  ;;  %v11638_v47 = vpack.i.bf16 %v13414_v32, %v13386_v33 }
0x1069   :  { %v4105_v3 = vsub.f32 1.0, %v4104_v49  ;;  %v4164_v44 = vmul.f32 %v13671_v55, %v4130_v61 }
0x106b   :  { %v4106_v36 = vmul.f32 %v11983_v40, %v4105_v3 }
0x106d   :  { %v4107_v30 = vadd.f32 %v11983_v40, %v4106_v36 }
0x106f   :  { %v4111_v11 = vsel %vm4110_vm12, %v11983_v40, %v4107_v30  ;;  %v4500_v14 = vpop.permute.xlu1 %4499 }
0x1070   :  { %v4116_v9 = vsel %vm4113_vm15, %v4115_v34, %v4111_v11 }
0x1071   :  { %v4163_v62 = vmul.f32 %v13675_v51, %v4116_v9  ;;  %v4383_v51 = vpop.permute.xlu0 %4382 }
0x1073   :  { %11152 = vmatmul.msk.f32.vlgmr.msra.gmra.mxu0 %vm3413_vm14, %v4163_v62 }
0x1074   :  { %11176 = vmatpush.xpose.msk.msra.mxu0 %vm304_vm2, %v4504_v31  ;;  %v11633_v31 = vpack.i.bf16 %v13404_v15, %v13394_v39 }
0x1078   :  { %11177 = vmatpush.xpose.msk.msra.mxu0 %vm304_vm2, %v4502_v13 }
0x1079   :  { %v4498_v25 = vpop.permute.xlu0 %4497 }
0x107b   :  { %11153 = vmatmul.msk.f32.gmra.mxu0 %vm3413_vm14, %v4164_v44 }
0x1083   :  { %11166 = vmatmul.msk.f32.vlgmr.msrb.gmra.mxu0 %vm304_vm2, %v4381_v17 }
0x108b   :  { %11167 = vmatmul.msk.f32.gmra.mxu0 %vm304_vm2, %v4383_v51 }
0x1093   :  { %11178 = vmatmul.msk.f32.vlgmr.msra.gmra.mxu0 %vm304_vm2, %v4498_v25 }
0x109b   :  { %11179 = vmatmul.msk.f32.gmra.mxu0 %vm304_vm2, %v4500_v14 }
0x10a4   :  { %v3977_v27 = vpop.xlane.xlu2 %3976 }
0x10a5   :  { %v3999_v5 = vsub.f32 %v13689_v63, %v3977_v27 }
0x10a7   :  { %v4007_v4 = vmul.f32 1.442695, %v3999_v5 }
0x10a8   :  { %v3983_v55 = vpop.xlane.xlu1 %3982 }
0x10a9   :  { %11984 = vpow2.f32 %v4007_v4  ;;  %v4001_v2 = vsub.f32 %v13694_v6, %v3983_v55 }
0x10ab   :  { %v4011_v18 = vmul.f32 1.442695, %v4001_v2 }
0x10ac   :  { %v3980_v24 = vpop.xlane.xlu0 %3979 }
0x10ad   :  { %11986 = vpow2.f32 %v4011_v18  ;;  %v4000_v13 = vsub.f32 %v13698_v23, %v3980_v24 }
0x10af   :  { %v13736_v17 = vpop.eup %11984  ;;  %v4009_v1 = vmul.f32 1.442695, %v4000_v13 }
0x10b0   :  { %v3986_v26 = vpop.xlane.xlu2 %3985  ;;  %v4023_v16 = vsel %vm3413_vm14, %v13736_v17, 0.0 }
0x10b1   :  { %11988 = vpow2.f32 %v4009_v1  ;;  %v4002_v63 = vsub.f32 %v13703_v54, %v3986_v26  ;;  %4024 = vadd.xlane.f32.xlu2 %v4023_v16  ;;  %v13752_v54 = vpop.f32.mrf.mxu2 }
0x10b3   :  { %v13743_v40 = vpop.eup %11986  ;;  %v4013_v6 = vmul.f32 1.442695, %v4002_v63 }
0x10b4   :  { %v3995_v28 = vpop.xlane.xlu0 %3994  ;;  %v4029_v23 = vsel %vm3413_vm14, %v13743_v40, 0.0 }
0x10b5   :  { %4030 = vadd.xlane.f32.xlu1 %v4029_v23  ;;  %11990 = vpow2.f32 %v4013_v6  ;;  %v4005_v3 = vsub.f32 %v13707_v48, %v3995_v28 }
0x10b7   :  { %v13747_v49 = vpop.eup %11988  ;;  %v4019_v12 = vmul.f32 1.442695, %v4005_v3 }
0x10b8   :  { %v4026_v52 = vsel %vm3413_vm14, %v13747_v49, 0.0 }
0x10b9   :  { %4027 = vadd.xlane.f32.xlu0 %v4026_v52  ;;  %11992 = vpow2.f32 %v4019_v12  ;;  %v13759_v46 = vpop.f32.mrf.mxu2 }
0x10bb   :  { %v13754_v58 = vpop.eup %11990 }
0x10bc   :  { %v3998_v36 = vpop.xlane.xlu1 %3997  ;;  %v4032_v34 = vsel %vm3413_vm14, %v13754_v58, 0.0 }
0x10bd   :  { %v4006_v30 = vsub.f32 %v13713_v59, %v3998_v36 }
0x10bf   :  { %v4021_v11 = vmul.f32 1.442695, %v4006_v30  ;;  %v13761_v48 = vpop.eup %11992 }
0x10c0   :  { %v4041_v56 = vsel %vm3413_vm14, %v13761_v48, 0.0 }
0x10c1   :  { %4033 = vadd.xlane.f32.xlu0 %v4032_v34  ;;  %11994 = vpow2.f32 %v4021_v11  ;;  %v13769_v59 = vpop.f32.mrf.mxu2 }
0x10c7   :  { %v13767_v9 = vpop.eup %11994 }
0x10c8   :  { %v4044_v62 = vsel %vm3413_vm14, %v13767_v9, 0.0 }
0x10c9   :  { %11619 = vrot.lane.b32.xlu2 %v13520_v41, %s12492_s25  ;;  %4042 = vadd.xlane.f32.xlu0 %v4041_v56  ;;  %v13779_v45 = vpop.f32.mrf.mxu2 }
0x10ce   :  { %11624 = vrot.lane.b32.xlu1 %v13570_v19, %s12492_s25 }
0x10d1   :  { %11629 = vrot.lane.b32.xlu2 %v13420_v21, %s12492_s25  ;;  %4045 = vadd.xlane.f32.xlu0 %v4044_v62  ;;  %v13784_v50 = vpop.f32.mrf.mxu2 }
0x10d6   :  { %4421 = vrot.lane.b32.xlu1 %v13458_v8, %s12494_s1 }
0x10d9   :  { %v13791_v61 = vpop.f32.mrf.mxu2 }
0x10de   :  { %11634 = vrot.lane.b32.xlu1 %v11633_v31, %s12495_s3 }
0x10e1   :  { %v13799_v44 = vpop.f32.mrf.mxu2 }
0x10e2   :  { %v4548_v51 = vsel %vm3413_vm14, %v13799_v44, -inf }
0x10e5   :  { %4425 = vrot.lane.b32.xlu0 %v13402_v53, %s12493_s26 }
0x10e6   :  { %11639 = vrot.lane.b32.xlu1 %v11638_v47, %s12495_s3 }
0x10e9   :  { %v13805_v25 = vpop.f32.mrf.mxu2 }
0x10ea   :  { %v4551_v14 = vsel %vm3413_vm14, %v13805_v25, -inf }
0x10ed   :  { %4419 = vrot.lane.b32.xlu0 %v13452_v37, %s12494_s1 }
0x10ee   :  { %4947 = vrot.lane.b32.xlu1 %v13394_v39, %s12497_s28 }
0x10f5   :  { %11644 = vrot.lane.b32.xlu0 %v13420_v21, %s12495_s3 }
0x10fa   :  { %4549 = vmax.xlane.f32.xlu2 %v4548_v51 }
0x1112   :  { %4423 = vrot.lane.b32.xlu2 %v13410_v22, %s12493_s26 }
0x1118   :  { %4552 = vmax.xlane.f32.xlu1 %v4551_v14 }
0x1124   :  { %v4025_v27 = vpop.xlane.xlu2 %4024 }
0x1125   :  { %11996 = vrcp.f32 %v4025_v27  ;;  %v4056_v1 = vand.u32 2147483647, %v4025_v27  ;;  %v4058_v26 = vand.u32 2147483648, %v4025_v27  ;;  %vm4052_vm7 = vweird.f32 %v4025_v27 }
0x1127   :  { %v4059_v52 = vor.u32 1.1754944e-38, %v4058_v26  ;;  %vm4057_vm9 = vcmp.eq.f32.partialorder %v4056_v1, 8.507059e+37 }
0x1128   :  { %v13809_v39 = vpop.xlane.xlu1 %4030 }
0x1129   :  { %11998 = vrcp.f32 %v13809_v39  ;;  %vm4080_vm13 = vweird.f32 %v13809_v39 }
0x112b   :  { %v11997_v5 = vpop.eup %11996 }
0x112c   :  { %v4048_v4 = vmul.f32 %v11997_v5, %v4025_v27  ;;  %v4028_v55 = vpop.xlane.xlu0 %4027  ;;  %v11620_v2 = vpop.permute.xlu2 %11619  ;;  %vm4053_vm6 = vweird.f32 %v11997_v5 }
0x112d   :  { %12000 = vrcp.f32 %v4028_v55  ;;  %v11621_v24 = vunpack.i.l.bf16 %v11620_v2  ;;  %v11622_v6 = vunpack.i.h.bf16 %v11620_v2  ;;  %vm4054_vm8 = vmor %vm4052_vm7, %vm4053_vm6  ;;  %v4072_v51 = vand.u32 2147483648, %v4028_v55 }
0x112e   :  { %v4049_v18 = vsub.f32 1.0, %v4048_v4  ;;  %v4070_v27 = vand.u32 2147483647, %v4028_v55  ;;  %vm4066_vm12 = vweird.f32 %v4028_v55 }
0x112f   :  { %v11999_v13 = vpop.eup %11998  ;;  %4193 = vmatpush.msrb.mxu3 %v11621_v24  ;;  %v4073_v24 = vor.u32 1.1754944e-38, %v4072_v51 }
0x1130   :  { %v4050_v16 = vmul.f32 %v11997_v5, %v4049_v18  ;;  %v4076_v63 = vmul.f32 %v11999_v13, %v13809_v39  ;;  %vm4081_vm11 = vweird.f32 %v11999_v13  ;;  %v4084_v18 = vand.u32 2147483647, %v13809_v39 }
0x1131   :  { %4945 = vrot.lane.b32.xlu1 %v13386_v33, %s12497_s28  ;;  %4194 = vmatpush.msrb.mxu3 %v11622_v6  ;;  %vm4082_vm3 = vmor %vm4080_vm13, %vm4081_vm11  ;;  %vm4071_vm4 = vcmp.eq.f32.partialorder %v4070_v27, 8.507059e+37 }
0x1132   :  { %v4051_v28 = vadd.f32 %v11997_v5, %v4050_v16  ;;  %v4077_v23 = vsub.f32 1.0, %v4076_v63  ;;  %vm4085_vm5 = vcmp.eq.f32.partialorder %v4084_v18, 8.507059e+37 }
0x1133   :  { %v12001_v3 = vpop.eup %12000 }
0x1134   :  { %v4055_v12 = vsel %vm4054_vm8, %v11997_v5, %v4051_v28  ;;  %v4062_v36 = vmul.f32 %v12001_v3, %v4028_v55  ;;  %v13815_v30 = vpop.xlane.xlu0 %4033  ;;  %v11630_v34 = vpop.permute.xlu2 %11629  ;;  %v4078_v62 = vmul.f32 %v11999_v13, %v4077_v23  ;;  %vm4067_vm10 = vweird.f32 %v12001_v3 }
0x1135   :  { %v4060_v11 = vsel %vm4057_vm9, %v4059_v52, %v4055_v12  ;;  %12002 = vrcp.f32 %v13815_v30  ;;  %v11631_v31 = vunpack.i.l.bf16 %v11630_v34  ;;  %v11632_v14 = vunpack.i.h.bf16 %v11630_v34  ;;  %vm4068_vm15 = vmor %vm4066_vm12, %vm4067_vm10 }
0x1136   :  { %v4159_v56 = vmul.f32 %v13736_v17, %v4060_v11  ;;  %v4063_v33 = vsub.f32 1.0, %v4062_v36  ;;  %v4079_v5 = vadd.f32 %v11999_v13, %v4078_v62  ;;  %v4086_v17 = vand.u32 2147483648, %v13809_v39 }
0x1137   :  { %4298 = vmatpush.msra.mxu3 %v11631_v31  ;;  %vm4094_vm7 = vweird.f32 %v13815_v30 }
0x1138   :  { %v4064_v47 = vmul.f32 %v12001_v3, %v4063_v33  ;;  %11148 = vmatmul.msk.f32.vlgmr.msrb.gmra.mxu3 %vm3413_vm14, %v4159_v56  ;;  %v4083_v63 = vsel %vm4082_vm3, %v11999_v13, %v4079_v5  ;;  %v4087_v28 = vor.u32 1.1754944e-38, %v4086_v17  ;;  %v4098_v33 = vand.u32 2147483647, %v13815_v30 }
0x1139   :  { %4299 = vmatpush.msra.mxu3 %v11632_v14 }
0x113a   :  { %v4065_v4 = vadd.f32 %v12001_v3, %v4064_v47  ;;  %v4088_v36 = vsel %vm4085_vm5, %v4087_v28, %v4083_v63  ;;  %vm4099_vm10 = vcmp.eq.f32.partialorder %v4098_v33, 8.507059e+37 }
0x113b   :  { %v12003_v2 = vpop.eup %12002  ;;  %v4161_v13 = vmul.f32 %v13743_v40, %v4088_v36 }
0x113c   :  { %v4090_v1 = vmul.f32 %v12003_v2, %v13815_v30  ;;  %v4043_v26 = vpop.xlane.xlu0 %4042  ;;  %v4069_v16 = vsel %vm4068_vm15, %v12001_v3, %v4065_v4  ;;  %vm4095_vm6 = vweird.f32 %v12003_v2  ;;  %v4100_v3 = vand.u32 2147483648, %v13815_v30 }
0x113d   :  { %12004 = vrcp.f32 %v4043_v26  ;;  %v4074_v6 = vsel %vm4071_vm4, %v4073_v24, %v4069_v16  ;;  %vm4096_vm8 = vmor %vm4094_vm7, %vm4095_vm6  ;;  %v4142_v14 = vand.u32 2147483648, %v4043_v26  ;;  %v4140_v5 = vand.u32 2147483647, %v4043_v26 }
0x113e   :  { %v4091_v55 = vsub.f32 1.0, %v4090_v1  ;;  %v4160_v23 = vmul.f32 %v13747_v49, %v4074_v6  ;;  %v4101_v51 = vor.u32 1.1754944e-38, %v4100_v3  ;;  %vm4136_vm11 = vweird.f32 %v4043_v26 }
0x113f   :  { %v4143_v30 = vor.u32 1.1754944e-38, %v4142_v14  ;;  %vm4141_vm13 = vcmp.eq.f32.partialorder %v4140_v5, 8.507059e+37 }
0x1140   :  { %v4092_v52 = vmul.f32 %v12003_v2, %v4091_v55  ;;  %v11625_v12 = vpop.permute.xlu1 %11624  ;;  %11149 = vmatmul.msk.f32.gmra.mxu3 %vm3413_vm14, %v4160_v23 }
0x1141   :  { %v11626_v34 = vunpack.i.l.bf16 %v11625_v12  ;;  %v11627_v56 = vunpack.i.h.bf16 %v11625_v12 }
0x1142   :  { %v4093_v39 = vadd.f32 %v12003_v2, %v4092_v52 }
0x1143   :  { %v12005_v11 = vpop.eup %12004  ;;  %4228 = vmatpush.msra.mxu1 %v11626_v34 }
0x1144   :  { %v4132_v62 = vmul.f32 %v12005_v11, %v4043_v26  ;;  %v4046_v49 = vpop.xlane.xlu0 %4045  ;;  %v4097_v47 = vsel %vm4096_vm8, %v12003_v2, %v4093_v39  ;;  %vm4137_vm9 = vweird.f32 %v12005_v11 }
0x1145   :  { %12006 = vrcp.f32 %v4046_v49  ;;  %4229 = vmatpush.msra.mxu1 %v11627_v56  ;;  %v4102_v40 = vsel %vm4099_vm10, %v4101_v51, %v4097_v47  ;;  %vm4138_vm12 = vmor %vm4136_vm11, %vm4137_vm9  ;;  %v4156_v6 = vand.u32 2147483648, %v4046_v49  ;;  %v4154_v26 = vand.u32 2147483647, %v4046_v49 }
0x1146   :  { %v4133_v31 = vsub.f32 1.0, %v4132_v62  ;;  %11150 = vmatmul.msk.f32.vlgmr.msra.gmra.mxu1 %vm3413_vm14, %v4161_v13  ;;  %v4162_v16 = vmul.f32 %v13754_v58, %v4102_v40  ;;  %vm4150_vm3 = vweird.f32 %v4046_v49  ;;  %v4266_v40 = vpop.f32.mrf.mxu0 }
0x1147   :  { %v4157_v36 = vor.u32 1.1754944e-38, %v4156_v6  ;;  %vm4155_vm5 = vcmp.eq.f32.partialorder %v4154_v26, 8.507059e+37 }
0x1148   :  { %v4134_v27 = vmul.f32 %v12005_v11, %v4133_v31  ;;  %v4422_v4 = vpop.permute.xlu1 %4421 }
0x114a   :  { %v4135_v17 = vadd.f32 %v12005_v11, %v4134_v27 }
0x114b   :  { %v12007_v18 = vpop.eup %12006 }
0x114c   :  { %v4139_v24 = vsel %vm4138_vm12, %v12005_v11, %v4135_v17  ;;  %v4146_v1 = vmul.f32 %v12007_v18, %v4046_v49  ;;  %vm4151_vm15 = vweird.f32 %v12007_v18 }
0x114d   :  { %v4144_v63 = vsel %vm4141_vm13, %v4143_v30, %v4139_v24  ;;  %vm4152_vm4 = vmor %vm4150_vm3, %vm4151_vm15 }
0x114e   :  { %v4165_v2 = vmul.f32 %v13761_v48, %v4144_v63  ;;  %v4147_v55 = vsub.f32 1.0, %v4146_v1  ;;  %11151 = vmatmul.msk.f32.gmra.mxu1 %vm3413_vm14, %v4162_v16 }
0x1150   :  { %v4148_v28 = vmul.f32 %v12007_v18, %v4147_v55  ;;  %v11635_v23 = vpop.permute.xlu1 %11634  ;;  %11154 = vmatmul.msk.f32.vlgmr.msra.gmra.mxu3 %vm3413_vm14, %v4165_v2  ;;  %v3172_v2 = vld [vmem:[#allocation10 + $0x28] sm:$0xff] }
0x1151   :  { %v11637_v52 = vunpack.i.h.bf16 %v11635_v23  ;;  %v11636_v31 = vunpack.i.l.bf16 %v11635_v23  ;;  %4346 = vmatpush.msrb.mxu1 %v3172_v2 }
0x1152   :  { %v4149_v12 = vadd.f32 %v12007_v18, %v4148_v28 }
0x1153   :  { %4824 = vmatpush.msrb.mxu0 %v11637_v52 }
0x1154   :  { %v4153_v58 = vsel %vm4152_vm4, %v12007_v18, %v4149_v12  ;;  %v4269_v18 = vpop.f32.mrf.mxu0 }
0x1155   :  { %v4158_v34 = vsel %vm4155_vm5, %v4157_v36, %v4153_v58 }
0x1156   :  { %v4166_v48 = vmul.f32 %v13767_v9, %v4158_v34 }
0x1157   :  { %v4426_v39 = vpop.permute.xlu0 %4425 }
0x1158   :  { %v11640_v11 = vpop.permute.xlu1 %11639  ;;  %11155 = vmatmul.msk.f32.gmra.mxu3 %vm3413_vm14, %v4166_v48 }
0x1159   :  { %v11642_v3 = vunpack.i.h.bf16 %v11640_v11  ;;  %11168 = vmatpush.xpose.msk.msrb.mxu3 %vm304_vm2, %v4426_v39  ;;  %v11641_v14 = vunpack.i.l.bf16 %v11640_v11 }
0x115b   :  { %4825 = vmatpush.msrb.mxu0 %v11642_v3 }
0x115c   :  { %v4413_v16 = vpop.f32.mrf.mxu0 }
0x115d   :  { %v4536_v55 = vsel %vm3413_vm14, %v4413_v16, -inf }
0x115f   :  { %v4420_v13 = vpop.permute.xlu0 %4419 }
0x1160   :  { %v4948_v56 = vpop.permute.xlu1 %4947 }
0x1161   :  { %11196 = vmatpush.xpose.msk.msra.mxu0 %vm304_vm2, %v4948_v56 }
0x1164   :  { %v13853_v6 = vpop.f32.mrf.mxu0 }
0x1167   :  { %v11645_v9 = vpop.permute.xlu0 %11644 }
0x1168   :  { %v11646_v27 = vunpack.i.l.bf16 %v11645_v9 }
0x116c   :  { %v13858_v28 = vpop.f32.mrf.mxu0 }
0x116d   :  { %v4550_v62 = vpop.xlane.xlu2 %4549  ;;  %v4554_v23 = vsel %vm3413_vm14, %v13858_v28, -inf }
0x116e   :  { %v4564_v49 = vsub.f32 %v13799_v44, %v4550_v62  ;;  %v11647_v44 = vunpack.i.h.bf16 %v11645_v9 }
0x1170   :  { %v4576_v33 = vmul.f32 1.442695, %v4564_v49 }
0x1172   :  { %12008 = vpow2.f32 %v4576_v33 }
0x1174   :  { %v13862_v26 = vpop.f32.mrf.mxu0 }
0x1175   :  { %v4424_v47 = vpop.permute.xlu2 %4423  ;;  %v4557_v52 = vsel %vm3413_vm14, %v13862_v26, -inf }
0x1176   :  { %11169 = vmatpush.xpose.msk.msrb.mxu3 %vm304_vm2, %v4424_v47 }
0x1178   :  { %v13841_v51 = vpop.eup %12008 }
0x1179   :  { %11170 = vmatmul.msk.f32.vlgmr.msrb.gmra.mxu3 %vm304_vm2, %v4420_v13  ;;  %v4596_v5 = vsel %vm3413_vm14, %v13841_v51, 0.0 }
0x117a   :  { %4754 = vmatpush.msra.mxu3 %v11636_v31  ;;  %4597 = vadd.xlane.f32.xlu1 %v4596_v5 }
0x117c   :  { %4755 = vmatpush.msra.mxu3 %v11641_v14 }
0x117e   :  { %4859 = vmatpush.msrb.mxu3 %v11646_v27 }
0x1180   :  { %4860 = vmatpush.msrb.mxu3 %v11647_v44 }
0x1181   :  { %11171 = vmatmul.msk.f32.gmra.mxu3 %vm304_vm2, %v4422_v4 }
0x118b   :  { %v4553_v17 = vpop.xlane.xlu1 %4552 }
0x118c   :  { %v4565_v30 = vsub.f32 %v13805_v25, %v4553_v17  ;;  %v4539_v25 = vsel %vm3413_vm14, %v13853_v6, -inf }
0x118e   :  { %v4578_v24 = vmul.f32 1.442695, %v4565_v30 }
0x1190   :  { %12010 = vpow2.f32 %v4578_v24 }
0x1196   :  { %v13848_v1 = vpop.eup %12010 }
0x1197   :  { %v4599_v63 = vsel %vm3413_vm14, %v13848_v1, 0.0 }
0x1198   :  { %4600 = vadd.xlane.f32.xlu0 %v4599_v63 }
0x11a0   :  { %4537 = vmax.xlane.f32.xlu0 %v4536_v55 }
0x11a3   :  { %v4946_v4 = vpop.permute.xlu1 %4945 }
0x11a4   :  { %11197 = vmatpush.xpose.msk.msra.mxu0 %vm304_vm2, %v4946_v4 }
0x11a8   :  { %4540 = vmax.xlane.f32.xlu0 %v4539_v25 }
0x11b0   :  { %4555 = vmax.xlane.f32.xlu0 %v4554_v23 }
0x11b8   :  { %4558 = vmax.xlane.f32.xlu0 %v4557_v52 }
0x11bb   :  { %v4196_v12 = vpop.f32.mrf.mxu3 }
0x11bc   :  { %11156 = vmatmul.msk.f32.vlgmr.msrb.gmra.mxu1 %vm304_vm2, %v4196_v12 }
0x11c3   :  { %v4199_v36 = vpop.f32.mrf.mxu3  ;;  %v4231_v58 = vpop.f32.mrf.mxu1 }
0x11c4   :  { %11157 = vmatmul.msk.f32.gmra.mxu1 %vm304_vm2, %v4199_v36 }
0x11cb   :  { %v4234_v34 = vpop.f32.mrf.mxu1 }
0x11cc   :  { %4986 = vrot.lane.b32.xlu0 %v13402_v53, %s12497_s28  ;;  %11158 = vmatmul.msk.f32.gmra.mxu1 %vm304_vm2, %v4231_v58 }
0x11d3   :  { %v4301_v48 = vpop.f32.mrf.mxu3 }
0x11d4   :  { %11159 = vmatmul.msk.f32.gmra.mxu1 %vm304_vm2, %v4234_v34 }
0x11db   :  { %v4304_v3 = vpop.f32.mrf.mxu3 }
0x11dc   :  { %11160 = vmatmul.msk.f32.gmra.mxu1 %vm304_vm2, %v4266_v40 }
0x11e4   :  { %11161 = vmatmul.msk.f32.gmra.mxu1 %vm304_vm2, %v4269_v18 }
0x11ec   :  { %11162 = vmatmul.msk.f32.gmra.mxu1 %vm304_vm2, %v4301_v48 }
0x11ed   :  { %v4598_v39 = vpop.xlane.xlu1 %4597 }
0x11ee   :  { %12012 = vrcp.f32 %v4598_v39  ;;  %v4675_v13 = vand.u32 2147483648, %v4598_v39  ;;  %v4673_v49 = vand.u32 2147483647, %v4598_v39  ;;  %vm4669_vm7 = vweird.f32 %v4598_v39 }
0x11f0   :  { %v4676_v31 = vor.u32 1.1754944e-38, %v4675_v13  ;;  %vm4674_vm9 = vcmp.eq.f32.partialorder %v4673_v49, 8.507059e+37 }
0x11f4   :  { %v12013_v11 = vpop.eup %12012  ;;  %11163 = vmatmul.msk.f32.gmra.mxu1 %vm304_vm2, %v4304_v3 }
0x11f5   :  { %v4665_v56 = vmul.f32 %v12013_v11, %v4598_v39  ;;  %vm4670_vm6 = vweird.f32 %v12013_v11 }
0x11f6   :  { %vm4671_vm8 = vmor %vm4669_vm7, %vm4670_vm6 }
0x11f7   :  { %v4666_v53 = vsub.f32 1.0, %v4665_v56 }
0x11f9   :  { %v4667_v62 = vmul.f32 %v12013_v11, %v4666_v53 }
0x11fb   :  { %v4668_v33 = vadd.f32 %v12013_v11, %v4667_v62 }
0x11fd   :  { %v4672_v47 = vsel %vm4671_vm8, %v12013_v11, %v4668_v33 }
0x11fe   :  { %v4677_v9 = vsel %vm4674_vm9, %v4676_v31, %v4672_v47 }
0x11ff   :  { %v4724_v14 = vmul.f32 %v13841_v51, %v4677_v9 }
0x1201   :  { %11184 = vmatmul.msk.f32.vlgmr.msrb.gmra.mxu0 %vm3413_vm14, %v4724_v14 }
0x120b   :  { %v4601_v27 = vpop.xlane.xlu0 %4600 }
0x120c   :  { %12014 = vrcp.f32 %v4601_v27  ;;  %v4689_v30 = vand.u32 2147483648, %v4601_v27  ;;  %v4687_v2 = vand.u32 2147483647, %v4601_v27  ;;  %vm4683_vm11 = vweird.f32 %v4601_v27 }
0x120e   :  { %v4690_v4 = vor.u32 1.1754944e-38, %v4689_v30  ;;  %vm4688_vm13 = vcmp.eq.f32.partialorder %v4687_v2, 8.507059e+37 }
0x1212   :  { %v12015_v5 = vpop.eup %12014 }
0x1213   :  { %v4679_v44 = vmul.f32 %v12015_v5, %v4601_v27  ;;  %v4538_v40 = vpop.xlane.xlu0 %4537  ;;  %vm4684_vm10 = vweird.f32 %v12015_v5 }
0x1214   :  { %v4560_v17 = vsub.f32 %v4413_v16, %v4538_v40  ;;  %vm4685_vm12 = vmor %vm4683_vm11, %vm4684_vm10 }
0x1215   :  { %v4680_v18 = vsub.f32 1.0, %v4679_v44 }
0x1216   :  { %v4568_v24 = vmul.f32 1.442695, %v4560_v17 }
0x1217   :  { %v4681_v63 = vmul.f32 %v12015_v5, %v4680_v18 }
0x1218   :  { %12016 = vpow2.f32 %v4568_v24 }
0x1219   :  { %v4682_v55 = vadd.f32 %v12015_v5, %v4681_v63 }
0x121b   :  { %v4541_v51 = vpop.xlane.xlu0 %4540  ;;  %v4686_v25 = vsel %vm4685_vm12, %v12015_v5, %v4682_v55 }
0x121c   :  { %v4561_v23 = vsub.f32 %v13853_v6, %v4541_v51  ;;  %v4691_v52 = vsel %vm4688_vm13, %v4690_v4, %v4686_v25 }
0x121d   :  { %v4725_v12 = vmul.f32 %v13848_v1, %v4691_v52 }
0x121e   :  { %v13880_v16 = vpop.eup %12016  ;;  %v4570_v36 = vmul.f32 1.442695, %v4561_v23 }
0x121f   :  { %11185 = vmatmul.msk.f32.gmra.mxu0 %vm3413_vm14, %v4725_v12  ;;  %v4584_v58 = vsel %vm3413_vm14, %v13880_v16, 0.0 }
0x1220   :  { %12018 = vpow2.f32 %v4570_v36  ;;  %4585 = vadd.xlane.f32.xlu2 %v4584_v58 }
0x1223   :  { %v4556_v34 = vpop.xlane.xlu0 %4555 }
0x1224   :  { %v4566_v48 = vsub.f32 %v13858_v28, %v4556_v34 }
0x1226   :  { %v13886_v39 = vpop.eup %12018  ;;  %v4580_v11 = vmul.f32 1.442695, %v4566_v48 }
0x1227   :  { %v4587_v6 = vsel %vm3413_vm14, %v13886_v39, 0.0 }
0x1228   :  { %12020 = vpow2.f32 %v4580_v11  ;;  %4588 = vadd.xlane.f32.xlu1 %v4587_v6 }
0x122b   :  { %v4559_v1 = vpop.xlane.xlu0 %4558 }
0x122c   :  { %v4567_v3 = vsub.f32 %v13862_v26, %v4559_v1 }
0x122e   :  { %v13891_v56 = vpop.eup %12020  ;;  %v4582_v53 = vmul.f32 1.442695, %v4567_v3 }
0x122f   :  { %v4602_v13 = vsel %vm3413_vm14, %v13891_v56, 0.0 }
0x1230   :  { %12022 = vpow2.f32 %v4582_v53  ;;  %4603 = vadd.xlane.f32.xlu2 %v4602_v13 }
0x1236   :  { %v13895_v28 = vpop.eup %12022 }
0x1237   :  { %v4605_v62 = vsel %vm3413_vm14, %v13895_v28, 0.0 }
0x1238   :  { %4606 = vadd.xlane.f32.xlu0 %v4605_v62 }
0x123e   :  { %v4987_v33 = vpop.permute.xlu0 %4986 }
0x1241   :  { %4943 = vrot.lane.b32.xlu1 %v13440_v7, %s12496_s27 }
0x1248   :  { %4941 = vrot.lane.b32.xlu2 %v13429_v35, %s12496_s27 }
0x1249   :  { %4984 = vrot.lane.b32.xlu1 %v13410_v22, %s12497_s28 }
0x124c   :  { %4980 = vrot.lane.b32.xlu0 %v13452_v37, %s12496_s27 }
0x1250   :  { %5025 = vrot.lane.b32.xlu2 %v13404_v15, %s12497_s28  ;;  %v13925_v15 = vpop.f32.mrf.mxu3 }
0x1251   :  { %4982 = vrot.lane.b32.xlu1 %v13458_v8, %s12496_s27 }
0x1254   :  { %5023 = vrot.lane.b32.xlu0 %v13414_v32, %s12497_s28 }
0x1258   :  { %5064 = vrot.lane.b32.xlu2 %v13396_v10, %s12497_s28  ;;  %v4542_v10 = vsel %vm3413_vm14, %v13925_v15, -inf  ;;  %v13929_v22 = vpop.f32.mrf.mxu3 }
0x1259   :  { %5019 = vrot.lane.b32.xlu1 %v13463_v29, %s12496_s27 }
0x125c   :  { %5062 = vrot.lane.b32.xlu0 %v13390_v38, %s12497_s28  ;;  %v4545_v38 = vsel %vm3413_vm14, %v13929_v22, -inf }
0x1260   :  { %5058 = vrot.lane.b32.xlu2 %v13432_v0, %s12496_s27 }
0x1261   :  { %5021 = vrot.lane.b32.xlu1 %v13468_v57, %s12496_s27 }
0x1264   :  { %5060 = vrot.lane.b32.xlu0 %v13443_v60, %s12496_s27 }
0x1289   :  { %4543 = vmax.xlane.f32.xlu2 %v4542_v10 }
0x1291   :  { %4546 = vmax.xlane.f32.xlu2 %v4545_v38 }
0x1293   :  { %v4586_v32 = vpop.xlane.xlu2 %4585 }
0x1294   :  { %12024 = vrcp.f32 %v4586_v32  ;;  %v4619_v60 = vand.u32 2147483648, %v4586_v32  ;;  %v4617_v29 = vand.u32 2147483647, %v4586_v32  ;;  %vm4613_vm3 = vweird.f32 %v4586_v32 }
0x1296   :  { %v4620_v49 = vor.u32 1.1754944e-38, %v4619_v60  ;;  %vm4618_vm5 = vcmp.eq.f32.partialorder %v4617_v29, 8.507059e+37 }
0x129a   :  { %v12025_v35 = vpop.eup %12024 }
0x129b   :  { %v4609_v0 = vmul.f32 %v12025_v35, %v4586_v32  ;;  %v4589_v7 = vpop.xlane.xlu1 %4588  ;;  %vm4614_vm15 = vweird.f32 %v12025_v35 }
0x129c   :  { %12026 = vrcp.f32 %v4589_v7  ;;  %vm4615_vm4 = vmor %vm4613_vm3, %vm4614_vm15  ;;  %v4633_v44 = vand.u32 2147483648, %v4589_v7  ;;  %v4631_v17 = vand.u32 2147483647, %v4589_v7  ;;  %vm4627_vm7 = vweird.f32 %v4589_v7 }
0x129d   :  { %v4610_v37 = vsub.f32 1.0, %v4609_v0 }
0x129e   :  { %v4634_v24 = vor.u32 1.1754944e-38, %v4633_v44  ;;  %vm4632_vm9 = vcmp.eq.f32.partialorder %v4631_v17, 8.507059e+37 }
0x129f   :  { %v4611_v8 = vmul.f32 %v12025_v35, %v4610_v37 }
0x12a1   :  { %v4612_v57 = vadd.f32 %v12025_v35, %v4611_v8 }
0x12a2   :  { %v12027_v26 = vpop.eup %12026 }
0x12a3   :  { %v4616_v31 = vsel %vm4615_vm4, %v12025_v35, %v4612_v57  ;;  %v4623_v47 = vmul.f32 %v12027_v26, %v4589_v7  ;;  %v4604_v9 = vpop.xlane.xlu2 %4603  ;;  %vm4628_vm6 = vweird.f32 %v12027_v26 }
0x12a4   :  { %v4621_v14 = vsel %vm4618_vm5, %v4620_v49, %v4616_v31  ;;  %12028 = vrcp.f32 %v4604_v9  ;;  %vm4629_vm8 = vmor %vm4627_vm7, %vm4628_vm6  ;;  %v4703_v52 = vand.u32 2147483648, %v4604_v9  ;;  %vm4697_vm11 = vweird.f32 %v4604_v9  ;;  %v13955_v31 = vpop.f32.mrf.mxu1 }
0x12a5   :  { %v4720_v27 = vmul.f32 %v13880_v16, %v4621_v14  ;;  %v4624_v5 = vsub.f32 1.0, %v4623_v47  ;;  %v4701_v16 = vand.u32 2147483647, %v4604_v9 }
0x12a6   :  { %v4704_v34 = vor.u32 1.1754944e-38, %v4703_v52 }
0x12a7   :  { %v4625_v40 = vmul.f32 %v12027_v26, %v4624_v5  ;;  %11180 = vmatmul.msk.f32.vlgmr.msra.gmra.mxu3 %vm3413_vm14, %v4720_v27  ;;  %vm4702_vm13 = vcmp.eq.f32.partialorder %v4701_v16, 8.507059e+37  ;;  %v13963_v27 = vpop.f32.mrf.mxu0 }
0x12a8   :  { %11200 = vmatpush.xpose.msk.msra.mxu3 %vm304_vm2, %v4987_v33 }
0x12a9   :  { %v4626_v18 = vadd.f32 %v12027_v26, %v4625_v40 }
0x12aa   :  { %v12029_v30 = vpop.eup %12028 }
0x12ab   :  { %v4693_v63 = vmul.f32 %v12029_v30, %v4604_v9  ;;  %v4607_v2 = vpop.xlane.xlu0 %4606  ;;  %v4942_v55 = vpop.permute.xlu2 %4941  ;;  %v4630_v4 = vsel %vm4629_vm8, %v12027_v26, %v4626_v18  ;;  %vm4698_vm10 = vweird.f32 %v12029_v30 }
0x12ac   :  { %12030 = vrcp.f32 %v4607_v2  ;;  %11198 = vmatmul.msk.f32.vlgmr.msra.gmra.mxu0 %vm304_vm2, %v4942_v55  ;;  %v4635_v51 = vsel %vm4632_vm9, %v4634_v24, %v4630_v4  ;;  %vm4699_vm12 = vmor %vm4697_vm11, %vm4698_vm10  ;;  %v4717_v13 = vand.u32 2147483648, %v4607_v2  ;;  %v4715_v10 = vand.u32 2147483647, %v4607_v2  ;;  %v13957_v47 = vpop.f32.mrf.mxu1 }
0x12ad   :  { %v4694_v25 = vsub.f32 1.0, %v4693_v63  ;;  %v4721_v23 = vmul.f32 %v13886_v39, %v4635_v51  ;;  %vm4711_vm3 = vweird.f32 %v4607_v2 }
0x12ae   :  { %v4718_v32 = vor.u32 1.1754944e-38, %v4717_v13  ;;  %vm4716_vm5 = vcmp.eq.f32.partialorder %v4715_v10, 8.507059e+37 }
0x12af   :  { %v4695_v12 = vmul.f32 %v12029_v30, %v4694_v25  ;;  %11181 = vmatmul.msk.f32.gmra.mxu3 %vm3413_vm14, %v4721_v23  ;;  %v13965_v5 = vpop.f32.mrf.mxu0 }
0x12b1   :  { %v4696_v36 = vadd.f32 %v12029_v30, %v4695_v12 }
0x12b2   :  { %v12031_v58 = vpop.eup %12030 }
0x12b3   :  { %v4700_v48 = vsel %vm4699_vm12, %v12029_v30, %v4696_v36  ;;  %v4707_v11 = vmul.f32 %v12031_v58, %v4607_v2  ;;  %v4944_v6 = vpop.permute.xlu1 %4943  ;;  %v5026_v1 = vpop.permute.xlu2 %5025  ;;  %vm4712_vm15 = vweird.f32 %v12031_v58 }
0x12b4   :  { %v4705_v3 = vsel %vm4702_vm13, %v4704_v34, %v4700_v48  ;;  %11199 = vmatmul.msk.f32.gmra.mxu0 %vm304_vm2, %v4944_v6  ;;  %11204 = vmatpush.xpose.msk.msra.mxu1 %vm304_vm2, %v5026_v1  ;;  %vm4713_vm4 = vmor %vm4711_vm3, %vm4712_vm15  ;;  %v13959_v9 = vpop.f32.mrf.mxu1 }
0x12b5   :  { %v4726_v39 = vmul.f32 %v13891_v56, %v4705_v3  ;;  %v4708_v53 = vsub.f32 1.0, %v4707_v11 }
0x12b7   :  { %v4709_v62 = vmul.f32 %v12031_v58, %v4708_v53  ;;  %11186 = vmatmul.msk.f32.vlgmr.msrb.gmra.mxu3 %vm3413_vm14, %v4726_v39 }
0x12b9   :  { %v4710_v38 = vadd.f32 %v12031_v58, %v4709_v62 }
0x12bb   :  { %v4985_v35 = vpop.permute.xlu1 %4984  ;;  %v5065_v0 = vpop.permute.xlu2 %5064  ;;  %v4714_v7 = vsel %vm4713_vm4, %v12031_v58, %v4710_v38 }
0x12bc   :  { %11201 = vmatpush.xpose.msk.msra.mxu3 %vm304_vm2, %v4985_v35  ;;  %11208 = vmatpush.xpose.msk.msrb.mxu0 %vm304_vm2, %v5065_v0  ;;  %v4719_v56 = vsel %vm4716_vm5, %v4718_v32, %v4714_v7  ;;  %v13961_v14 = vpop.f32.mrf.mxu1 }
0x12bd   :  { %v4727_v37 = vmul.f32 %v13895_v28, %v4719_v56 }
0x12be   :  { %v4981_v60 = vpop.permute.xlu0 %4980 }
0x12bf   :  { %11187 = vmatmul.msk.f32.gmra.mxu3 %vm3413_vm14, %v4727_v37 }
0x12c3   :  { %v4983_v8 = vpop.permute.xlu1 %4982  ;;  %v5059_v49 = vpop.permute.xlu2 %5058 }
0x12c4   :  { %v13967_v44 = vpop.f32.mrf.mxu1 }
0x12c6   :  { %v5024_v29 = vpop.permute.xlu0 %5023 }
0x12c7   :  { %11202 = vmatmul.msk.f32.vlgmr.msra.gmra.mxu3 %vm304_vm2, %v4981_v60  ;;  %11205 = vmatpush.xpose.msk.msra.mxu1 %vm304_vm2, %v5024_v29 }
0x12cb   :  { %v5020_v57 = vpop.permute.xlu1 %5019 }
0x12cc   :  { %11206 = vmatmul.msk.f32.vlgmr.msra.gmra.mxu1 %vm304_vm2, %v5020_v57  ;;  %v13972_v30 = vpop.f32.mrf.mxu1 }
0x12ce   :  { %v5063_v26 = vpop.permute.xlu0 %5062 }
0x12cf   :  { %11203 = vmatmul.msk.f32.gmra.mxu3 %vm304_vm2, %v4983_v8  ;;  %11209 = vmatpush.xpose.msk.msrb.mxu0 %vm304_vm2, %v5063_v26 }
0x12d2   :  { %11210 = vmatmul.msk.f32.vlgmr.msrb.gmra.mxu0 %vm304_vm2, %v5059_v49 }
0x12d3   :  { %v5022_v28 = vpop.permute.xlu1 %5021 }
0x12d4   :  { %11207 = vmatmul.msk.f32.gmra.mxu1 %vm304_vm2, %v5022_v28  ;;  %v13977_v55 = vpop.f32.mrf.mxu1 }
0x12d6   :  { %v5061_v33 = vpop.permute.xlu0 %5060 }
0x12da   :  { %11211 = vmatmul.msk.f32.gmra.mxu0 %vm304_vm2, %v5061_v33 }
0x12dc   :  { %v13981_v51 = vpop.f32.mrf.mxu1 }
0x12fc   :  { %v4544_v25 = vpop.xlane.xlu2 %4543 }
0x12fd   :  { %v4562_v23 = vsub.f32 %v13925_v15, %v4544_v25 }
0x12ff   :  { %v4572_v36 = vmul.f32 1.442695, %v4562_v23 }
0x1301   :  { %12032 = vpow2.f32 %v4572_v36 }
0x1304   :  { %v4547_v1 = vpop.xlane.xlu2 %4546 }
0x1305   :  { %v4563_v39 = vsub.f32 %v13929_v22, %v4547_v1 }
0x1307   :  { %v13995_v6 = vpop.eup %12032  ;;  %v4574_v13 = vmul.f32 1.442695, %v4563_v39 }
0x1308   :  { %v4590_v3 = vsel %vm3413_vm14, %v13995_v6, 0.0 }
0x1309   :  { %12034 = vpow2.f32 %v4574_v13 }
0x130f   :  { %v14006_v35 = vpop.eup %12034 }
0x1310   :  { %v4593_v22 = vsel %vm3413_vm14, %v14006_v35, 0.0 }
0x1329   :  { %v4974_v40 = vpop.f32.mrf.mxu0 }
0x132a   :  { %v5097_v17 = vsel %vm3413_vm14, %v4974_v40, -inf  ;;  %v13970_v18 = vpop.f32.mrf.mxu3 }
0x132b   :  { %5098 = vmax.xlane.f32.xlu1 %v5097_v17 }
0x1331   :  { %v4977_v24 = vpop.f32.mrf.mxu0 }
0x1332   :  { %v5100_v63 = vsel %vm3413_vm14, %v4977_v24, -inf  ;;  %v13975_v2 = vpop.f32.mrf.mxu3 }
0x1333   :  { %5101 = vmax.xlane.f32.xlu0 %v5100_v63 }
0x133a   :  { %v13979_v4 = vpop.f32.mrf.mxu3 }
0x1342   :  { %v13984_v52 = vpop.f32.mrf.mxu3 }
0x1349   :  { %v13986_v12 = vpop.f32.mrf.mxu1 }
0x134a   :  { %v5109_v16 = vsel %vm3413_vm14, %v13986_v12, -inf  ;;  %v5013_v15 = vpop.f32.mrf.mxu3 }
0x134b   :  { %5110 = vmax.xlane.f32.xlu2 %v5109_v16  ;;  %v5103_v53 = vsel %vm3413_vm14, %v5013_v15, -inf }
0x134f   :  { %v5091_v58 = vpop.f32.mrf.mxu0 }
0x1350   :  { %v5115_v34 = vsel %vm3413_vm14, %v5091_v58, -inf }
0x1351   :  { %5116 = vmax.xlane.f32.xlu0 %v5115_v34  ;;  %v13991_v48 = vpop.f32.mrf.mxu1 }
0x1352   :  { %v5112_v11 = vsel %vm3413_vm14, %v13991_v48, -inf  ;;  %v5016_v62 = vpop.f32.mrf.mxu3 }
0x1353   :  { %5113 = vmax.xlane.f32.xlu1 %v5112_v11  ;;  %v5106_v38 = vsel %vm3413_vm14, %v5016_v62, -inf }
0x1357   :  { %v14001_v10 = vpop.f32.mrf.mxu0 }
0x1358   :  { %v5118_v32 = vsel %vm3413_vm14, %v14001_v10, -inf }
0x1359   :  { %4591 = vadd.xlane.f32.xlu0 %v4590_v3 }
0x135b   :  { %5104 = vmax.xlane.f32.xlu1 %v5103_v53 }
0x1361   :  { %5107 = vmax.xlane.f32.xlu0 %v5106_v38 }
0x1363   :  { %5119 = vmax.xlane.f32.xlu1 %v5118_v32 }
0x136b   :  { %4594 = vadd.xlane.f32.xlu1 %v4593_v22 }
0x1375   :  { %11649 = vrot.lane.b32.xlu0 %v13520_v41, %s12498_s29 }
0x137d   :  { %11659 = vrot.lane.b32.xlu0 %v13570_v19, %s12498_s29 }
0x1384   :  { %11654 = vrot.lane.b32.xlu1 %v13570_v19, %s12495_s3 }
0x1385   :  { %11664 = vrot.lane.b32.xlu0 %v13526_v20, %s12498_s29 }
0x138d   :  { %11669 = vrot.lane.b32.xlu0 %v13420_v21, %s12498_s29 }
0x139e   :  { %v5099_v0 = vpop.xlane.xlu1 %5098 }
0x139f   :  { %v5121_v7 = vsub.f32 %v4974_v40, %v5099_v0 }
0x13a1   :  { %v5129_v56 = vmul.f32 1.442695, %v5121_v7 }
0x13a3   :  { %12036 = vpow2.f32 %v5129_v56 }
0x13a6   :  { %v5102_v37 = vpop.xlane.xlu0 %5101 }
0x13a7   :  { %v5122_v60 = vsub.f32 %v4977_v24, %v5102_v37 }
0x13a9   :  { %v14020_v8 = vpop.eup %12036  ;;  %v5131_v41 = vmul.f32 1.442695, %v5122_v60 }
0x13aa   :  { %v5145_v29 = vsel %vm3413_vm14, %v14020_v8, 0.0 }
0x13ab   :  { %12038 = vpow2.f32 %v5131_v41  ;;  %5146 = vadd.xlane.f32.xlu2 %v5145_v29 }
0x13b1   :  { %v14024_v19 = vpop.eup %12038 }
0x13b2   :  { %v5148_v20 = vsel %vm3413_vm14, %v14024_v19, 0.0 }
0x13b3   :  { %5149 = vadd.xlane.f32.xlu2 %v5148_v20 }
0x13be   :  { %v5111_v16 = vpop.xlane.xlu2 %5110 }
0x13bf   :  { %v5125_v11 = vsub.f32 %v13986_v12, %v5111_v16 }
0x13c1   :  { %v5137_v1 = vmul.f32 1.442695, %v5125_v11 }
0x13c4   :  { %v5117_v21 = vpop.xlane.xlu0 %5116 }
0x13c5   :  { %v5127_v57 = vsub.f32 %v5091_v58, %v5117_v21 }
0x13c6   :  { %v5114_v26 = vpop.xlane.xlu1 %5113 }
0x13c7   :  { %v5141_v49 = vmul.f32 1.442695, %v5127_v57  ;;  %v5126_v13 = vsub.f32 %v13991_v48, %v5114_v26 }
0x13c9   :  { %12040 = vpow2.f32 %v5141_v49  ;;  %v5139_v38 = vmul.f32 1.442695, %v5126_v13 }
0x13cc   :  { %v14028_v28 = vpop.xlane.xlu0 %4591 }
0x13cd   :  { %v4647_v49 = vand.u32 2147483648, %v14028_v28  ;;  %vm4641_vm7 = vweird.f32 %v14028_v28 }
0x13ce   :  { %v5105_v33 = vpop.xlane.xlu1 %5104 }
0x13cf   :  { %v14030_v40 = vpop.eup %12040  ;;  %v5123_v17 = vsub.f32 %v5013_v15, %v5105_v33 }
0x13d0   :  { %v5163_v24 = vsel %vm3413_vm14, %v14030_v40, 0.0 }
0x13d1   :  { %v5133_v63 = vmul.f32 1.442695, %v5123_v17  ;;  %5164 = vadd.xlane.f32.xlu1 %v5163_v24  ;;  %v4645_v17 = vand.u32 2147483647, %v14028_v28 }
0x13d3   :  { %12042 = vpow2.f32 %v5133_v63  ;;  %vm4646_vm9 = vcmp.eq.f32.partialorder %v4645_v17, 8.507059e+37 }
0x13d4   :  { %v5108_v25 = vpop.xlane.xlu0 %5107 }
0x13d5   :  { %v5124_v23 = vsub.f32 %v5016_v62, %v5108_v25 }
0x13d6   :  { %v5120_v36 = vpop.xlane.xlu1 %5119 }
0x13d7   :  { %v5135_v58 = vmul.f32 1.442695, %v5124_v23  ;;  %v5128_v37 = vsub.f32 %v14001_v10, %v5120_v36  ;;  %v4648_v23 = vor.u32 1.1754944e-38, %v4647_v49 }
0x13d9   :  { %v14034_v34 = vpop.eup %12042  ;;  %12044 = vpow2.f32 %v5135_v58  ;;  %v5143_v20 = vmul.f32 1.442695, %v5128_v37 }
0x13da   :  { %12046 = vrcp.f32 %v14028_v28  ;;  %v5151_v15 = vsel %vm3413_vm14, %v14034_v34, 0.0 }
0x13db   :  { %5152 = vadd.xlane.f32.xlu2 %v5151_v15  ;;  %12048 = vpow2.f32 %v5137_v1 }
0x13de   :  { %v14042_v53 = vpop.xlane.xlu1 %4594 }
0x13df   :  { %v14040_v3 = vpop.eup %12044  ;;  %12050 = vrcp.f32 %v14042_v53  ;;  %vm4655_vm11 = vweird.f32 %v14042_v53 }
0x13e0   :  { %v12047_v39 = vpop.eup %12046  ;;  %v5154_v62 = vsel %vm3413_vm14, %v14040_v3, 0.0  ;;  %12052 = vpow2.f32 %v5139_v38 }
0x13e1   :  { %v4637_v12 = vmul.f32 %v12047_v39, %v14028_v28  ;;  %v14049_v32 = vpop.eup %12048  ;;  %vm4642_vm6 = vweird.f32 %v12047_v39  ;;  %12054 = vpow2.f32 %v5143_v20 }
0x13e2   :  { %v5157_v48 = vsel %vm3413_vm14, %v14049_v32, 0.0  ;;  %vm4643_vm8 = vmor %vm4641_vm7, %vm4642_vm6 }
0x13e3   :  { %5155 = vadd.xlane.f32.xlu2 %v5154_v62  ;;  %v4638_v22 = vsub.f32 1.0, %v4637_v12  ;;  %v4661_v12 = vand.u32 2147483648, %v14042_v53 }
0x13e5   :  { %v12051_v56 = vpop.eup %12050  ;;  %v4639_v41 = vmul.f32 %v12047_v39, %v4638_v22  ;;  %v4662_v37 = vor.u32 1.1754944e-38, %v4661_v12 }
0x13e6   :  { %v4651_v29 = vmul.f32 %v12051_v56, %v14042_v53  ;;  %v14055_v21 = vpop.eup %12052  ;;  %vm4656_vm10 = vweird.f32 %v12051_v56 }
0x13e7   :  { %v11650_v0 = vpop.permute.xlu0 %11649  ;;  %v4640_v57 = vadd.f32 %v12047_v39, %v4639_v41  ;;  %v5160_v63 = vsel %vm3413_vm14, %v14055_v21, 0.0  ;;  %v14062_v11 = vpop.eup %12054  ;;  %vm4657_vm12 = vmor %vm4655_vm11, %vm4656_vm10 }
0x13e8   :  { %v11651_v7 = vunpack.i.l.bf16 %v11650_v0  ;;  %v11652_v60 = vunpack.i.h.bf16 %v11650_v0  ;;  %v4652_v33 = vsub.f32 1.0, %v4651_v29  ;;  %v5166_v22 = vsel %vm3413_vm14, %v14062_v11, 0.0 }
0x13e9   :  { %v4644_v25 = vsel %vm4643_vm8, %v12047_v39, %v4640_v57  ;;  %v4659_v0 = vand.u32 2147483647, %v14042_v53 }
0x13ea   :  { %5315 = vmatpush.msrb.mxu3 %v11651_v7  ;;  %v4653_v16 = vmul.f32 %v12051_v56, %v4652_v33  ;;  %v4649_v36 = vsel %vm4646_vm9, %v4648_v23, %v4644_v25  ;;  %v3173_v7 = vld [vmem:[#allocation10 + $0x30] sm:$0xff] }
0x13eb   :  { %5158 = vadd.xlane.f32.xlu2 %v5157_v48  ;;  %v4722_v62 = vmul.f32 %v13995_v6, %v4649_v36  ;;  %vm4660_vm13 = vcmp.eq.f32.partialorder %v4659_v0, 8.507059e+37 }
0x13ec   :  { %5316 = vmatpush.msrb.mxu3 %v11652_v60  ;;  %v4654_v13 = vadd.f32 %v12051_v56, %v4653_v16 }
0x13ee   :  { %v4658_v6 = vsel %vm4657_vm12, %v12051_v56, %v4654_v13 }
0x13ef   :  { %v11660_v26 = vpop.permute.xlu0 %11659  ;;  %v4663_v48 = vsel %vm4660_vm13, %v4662_v37, %v4658_v6 }
0x13f0   :  { %v11661_v10 = vunpack.i.l.bf16 %v11660_v26  ;;  %v11662_v24 = vunpack.i.h.bf16 %v11660_v26  ;;  %v4723_v20 = vmul.f32 %v14006_v35, %v4663_v48 }
0x13f2   :  { %5350 = vmatpush.msrb.mxu1 %v11661_v10 }
0x13f3   :  { %5161 = vadd.xlane.f32.xlu2 %v5160_v63 }
0x13f4   :  { %5351 = vmatpush.msrb.mxu1 %v11662_v24 }
0x13f6   :  { %v11655_v58 = vpop.permute.xlu1 %11654 }
0x13f7   :  { %v11656_v15 = vunpack.i.l.bf16 %v11655_v58  ;;  %v11665_v1 = vpop.permute.xlu0 %11664  ;;  %v11657_v38 = vunpack.i.h.bf16 %v11655_v58 }
0x13f8   :  { %v11666_v28 = vunpack.i.l.bf16 %v11665_v1  ;;  %v11667_v39 = vunpack.i.h.bf16 %v11665_v1 }
0x13f9   :  { %4789 = vmatpush.msrb.mxu2 %v11656_v15 }
0x13fa   :  { %5385 = vmatpush.msra.mxu0 %v11666_v28 }
0x13fb   :  { %5167 = vadd.xlane.f32.xlu2 %v5166_v22  ;;  %4790 = vmatpush.msrb.mxu2 %v11657_v38 }
0x13fc   :  { %11182 = vmatmul.msk.f32.vlgmr.msrb.gmra.mxu2 %vm3413_vm14, %v4722_v62  ;;  %5386 = vmatpush.msra.mxu0 %v11667_v39 }
0x13fd   :  { %4907 = vmatpush.msra.mxu2 %v3173_v7 }
0x13ff   :  { %v11670_v60 = vpop.permute.xlu0 %11669 }
0x1400   :  { %v11671_v41 = vunpack.i.l.bf16 %v11670_v60  ;;  %v11672_v29 = vunpack.i.h.bf16 %v11670_v60 }
0x1402   :  { %5420 = vmatpush.msra.mxu3 %v11671_v41 }
0x1404   :  { %11183 = vmatmul.msk.f32.gmra.mxu2 %vm3413_vm14, %v4723_v20  ;;  %5421 = vmatpush.msra.mxu3 %v11672_v29 }
0x140c   :  { %11188 = vmatmul.msk.f32.vlgmr.msra.gmra.mxu2 %vm304_vm2, %v13970_v18 }
0x1414   :  { %11189 = vmatmul.msk.f32.gmra.mxu2 %vm304_vm2, %v13975_v2 }
0x141e   :  { %v5147_v53 = vpop.xlane.xlu2 %5146 }
0x141f   :  { %12056 = vrcp.f32 %v5147_v53  ;;  %v5180_v33 = vand.u32 2147483648, %v5147_v53  ;;  %v5178_v35 = vand.u32 2147483647, %v5147_v53  ;;  %vm5174_vm3 = vweird.f32 %v5147_v53 }
0x1421   :  { %v5181_v63 = vor.u32 1.1754944e-38, %v5180_v33  ;;  %vm5179_vm5 = vcmp.eq.f32.partialorder %v5178_v35, 8.507059e+37 }
0x1425   :  { %v12057_v56 = vpop.eup %12056 }
0x1426   :  { %v5170_v57 = vmul.f32 %v12057_v56, %v5147_v53  ;;  %v5150_v26 = vpop.xlane.xlu2 %5149  ;;  %vm5175_vm15 = vweird.f32 %v12057_v56 }
0x1427   :  { %12058 = vrcp.f32 %v5150_v26  ;;  %vm5176_vm4 = vmor %vm5174_vm3, %vm5175_vm15  ;;  %v5194_v36 = vand.u32 2147483648, %v5150_v26  ;;  %v5192_v15 = vand.u32 2147483647, %v5150_v26  ;;  %vm5188_vm7 = vweird.f32 %v5150_v26 }
0x1428   :  { %v5171_v49 = vsub.f32 1.0, %v5170_v57 }
0x1429   :  { %v5195_v28 = vor.u32 1.1754944e-38, %v5194_v36  ;;  %vm5193_vm9 = vcmp.eq.f32.partialorder %v5192_v15, 8.507059e+37 }
0x142a   :  { %v5172_v10 = vmul.f32 %v12057_v56, %v5171_v49 }
0x142c   :  { %v5173_v17 = vadd.f32 %v12057_v56, %v5172_v10 }
0x142d   :  { %v12059_v24 = vpop.eup %12058 }
0x142e   :  { %v5177_v18 = vsel %vm5176_vm4, %v12057_v56, %v5173_v17  ;;  %v5184_v25 = vmul.f32 %v12059_v24, %v5150_v26  ;;  %vm5189_vm6 = vweird.f32 %v12059_v24 }
0x142f   :  { %v5182_v2 = vsel %vm5179_vm5, %v5181_v63, %v5177_v18  ;;  %vm5190_vm8 = vmor %vm5188_vm7, %vm5189_vm6 }
0x1430   :  { %v5281_v23 = vmul.f32 %v14020_v8, %v5182_v2  ;;  %v5185_v16 = vsub.f32 1.0, %v5184_v25 }
0x1432   :  { %v5186_v58 = vmul.f32 %v12059_v24, %v5185_v16  ;;  %11212 = vmatmul.msk.f32.vlgmr.msrb.gmra.mxu3 %vm3413_vm14, %v5281_v23 }
0x1434   :  { %v5187_v1 = vadd.f32 %v12059_v24, %v5186_v58 }
0x1436   :  { %v5191_v13 = vsel %vm5190_vm8, %v12059_v24, %v5187_v1 }
0x1437   :  { %v5196_v62 = vsel %vm5193_vm9, %v5195_v28, %v5191_v13 }
0x1438   :  { %v5282_v12 = vmul.f32 %v14024_v19, %v5196_v62 }
0x143a   :  { %11213 = vmatmul.msk.f32.gmra.mxu3 %vm3413_vm14, %v5282_v12 }
0x1444   :  { %v5165_v38 = vpop.xlane.xlu1 %5164 }
0x1445   :  { %12060 = vrcp.f32 %v5165_v38  ;;  %v5264_v7 = vand.u32 2147483648, %v5165_v38  ;;  %v5262_v37 = vand.u32 2147483647, %v5165_v38  ;;  %vm5258_vm11 = vweird.f32 %v5165_v38 }
0x1447   :  { %v5265_v48 = vor.u32 1.1754944e-38, %v5264_v7  ;;  %vm5263_vm13 = vcmp.eq.f32.partialorder %v5262_v37, 8.507059e+37 }
0x144b   :  { %v12061_v8 = vpop.eup %12060 }
0x144c   :  { %v5254_v39 = vmul.f32 %v12061_v8, %v5165_v38  ;;  %vm5259_vm10 = vweird.f32 %v12061_v8 }
0x144d   :  { %vm5260_vm12 = vmor %vm5258_vm11, %vm5259_vm10 }
0x144e   :  { %v5255_v22 = vsub.f32 1.0, %v5254_v39  ;;  %v5153_v0 = vpop.xlane.xlu2 %5152 }
0x144f   :  { %12062 = vrcp.f32 %v5153_v0  ;;  %v5208_v26 = vand.u32 2147483648, %v5153_v0  ;;  %v5206_v33 = vand.u32 2147483647, %v5153_v0  ;;  %vm5202_vm3 = vweird.f32 %v5153_v0 }
0x1450   :  { %v5256_v6 = vmul.f32 %v12061_v8, %v5255_v22 }
0x1451   :  { %v5209_v17 = vor.u32 1.1754944e-38, %v5208_v26  ;;  %vm5207_vm5 = vcmp.eq.f32.partialorder %v5206_v33, 8.507059e+37 }
0x1452   :  { %v5257_v60 = vadd.f32 %v12061_v8, %v5256_v6 }
0x1454   :  { %v5261_v41 = vsel %vm5260_vm12, %v12061_v8, %v5257_v60 }
0x1455   :  { %v12063_v19 = vpop.eup %12062  ;;  %v5266_v29 = vsel %vm5263_vm13, %v5265_v48, %v5261_v41 }
0x1456   :  { %v5287_v20 = vmul.f32 %v14030_v40, %v5266_v29  ;;  %v5198_v53 = vmul.f32 %v12063_v19, %v5153_v0  ;;  %v5156_v56 = vpop.xlane.xlu2 %5155  ;;  %vm5203_vm15 = vweird.f32 %v12063_v19 }
0x1457   :  { %12064 = vrcp.f32 %v5156_v56  ;;  %vm5204_vm4 = vmor %vm5202_vm3, %vm5203_vm15  ;;  %v5222_v23 = vand.u32 2147483648, %v5156_v56  ;;  %v5220_v36 = vand.u32 2147483647, %v5156_v56  ;;  %vm5216_vm7 = vweird.f32 %v5156_v56 }
0x1458   :  { %v5199_v57 = vsub.f32 1.0, %v5198_v53  ;;  %11218 = vmatmul.msk.f32.vlgmr.msra.gmra.mxu3 %vm3413_vm14, %v5287_v20 }
0x1459   :  { %v5223_v1 = vor.u32 1.1754944e-38, %v5222_v23  ;;  %vm5221_vm9 = vcmp.eq.f32.partialorder %v5220_v36, 8.507059e+37  ;;  %v3174_v36 = vld [vmem:[#allocation10 + $0x38] sm:$0xff] }
0x145a   :  { %v5200_v49 = vmul.f32 %v12063_v19, %v5199_v57  ;;  %5468 = vmatpush.msra.mxu1 %v3174_v36  ;;  %v5577_v36 = vld [vmem:[#allocation9 + $0x48] sm:$0xff] }
0x145c   :  { %v5201_v10 = vadd.f32 %v12063_v19, %v5200_v49 }
0x145d   :  { %v12065_v35 = vpop.eup %12064 }
0x145e   :  { %v5205_v24 = vsel %vm5204_vm4, %v12063_v19, %v5201_v10  ;;  %v5212_v63 = vmul.f32 %v12065_v35, %v5156_v56  ;;  %v5159_v18 = vpop.xlane.xlu2 %5158  ;;  %vm5217_vm6 = vweird.f32 %v12065_v35 }
0x145f   :  { %v5210_v40 = vsel %vm5207_vm5, %v5209_v17, %v5205_v24  ;;  %12066 = vrcp.f32 %v5159_v18  ;;  %vm5218_vm8 = vmor %vm5216_vm7, %vm5217_vm6  ;;  %v5236_v8 = vand.u32 2147483648, %v5159_v18  ;;  %v5234_v22 = vand.u32 2147483647, %v5159_v18 }
0x1460   :  { %v5283_v25 = vmul.f32 %v14034_v34, %v5210_v40  ;;  %v5213_v2 = vsub.f32 1.0, %v5212_v63  ;;  %vm5230_vm11 = vweird.f32 %v5159_v18 }
0x1461   :  { %v5237_v6 = vor.u32 1.1754944e-38, %v5236_v8  ;;  %vm5235_vm13 = vcmp.eq.f32.partialorder %v5234_v22, 8.507059e+37 }
0x1462   :  { %v5214_v16 = vmul.f32 %v12065_v35, %v5213_v2  ;;  %11214 = vmatmul.msk.f32.vlgmr.msrb.gmra.mxu1 %vm3413_vm14, %v5283_v25 }
0x1464   :  { %v5215_v58 = vadd.f32 %v12065_v35, %v5214_v16 }
0x1465   :  { %v12067_v15 = vpop.eup %12066 }
0x1466   :  { %v5226_v28 = vmul.f32 %v12067_v15, %v5159_v18  ;;  %v5162_v13 = vpop.xlane.xlu2 %5161  ;;  %v5219_v62 = vsel %vm5218_vm8, %v12065_v35, %v5215_v58  ;;  %vm5231_vm10 = vweird.f32 %v12067_v15 }
0x1467   :  { %12068 = vrcp.f32 %v5162_v13  ;;  %v5224_v12 = vsel %vm5221_vm9, %v5223_v1, %v5219_v62  ;;  %vm5232_vm12 = vmor %vm5230_vm11, %vm5231_vm10  ;;  %v5250_v29 = vand.u32 2147483648, %v5162_v13  ;;  %v5248_v53 = vand.u32 2147483647, %v5162_v13 }
0x1468   :  { %v5227_v38 = vsub.f32 1.0, %v5226_v28  ;;  %v5284_v34 = vmul.f32 %v14040_v3, %v5224_v12  ;;  %vm5244_vm3 = vweird.f32 %v5162_v13 }
0x1469   :  { %v5251_v26 = vor.u32 1.1754944e-38, %v5250_v29  ;;  %vm5249_vm5 = vcmp.eq.f32.partialorder %v5248_v53, 8.507059e+37 }
0x146a   :  { %v5228_v39 = vmul.f32 %v12067_v15, %v5227_v38  ;;  %11215 = vmatmul.msk.f32.gmra.mxu1 %vm3413_vm14, %v5284_v34 }
0x146c   :  { %v5229_v0 = vadd.f32 %v12067_v15, %v5228_v39 }
0x146d   :  { %v12069_v7 = vpop.eup %12068 }
0x146e   :  { %v5233_v37 = vsel %vm5232_vm12, %v12067_v15, %v5229_v0  ;;  %v5240_v60 = vmul.f32 %v12069_v7, %v5162_v13  ;;  %v5168_v48 = vpop.xlane.xlu2 %5167  ;;  %vm5245_vm15 = vweird.f32 %v12069_v7 }
0x146f   :  { %v5238_v41 = vsel %vm5235_vm13, %v5237_v6, %v5233_v37  ;;  %12070 = vrcp.f32 %v5168_v48  ;;  %vm5246_vm4 = vmor %vm5244_vm3, %vm5245_vm15  ;;  %v5276_v63 = vand.u32 2147483647, %v5168_v48  ;;  %vm5272_vm7 = vweird.f32 %v5168_v48 }
0x1470   :  { %v5285_v19 = vmul.f32 %v14049_v32, %v5238_v41  ;;  %v5241_v3 = vsub.f32 1.0, %v5240_v60  ;;  %v5278_v32 = vand.u32 2147483648, %v5168_v48 }
0x1471   :  { %vm5277_vm9 = vcmp.eq.f32.partialorder %v5276_v63, 8.507059e+37 }
0x1472   :  { %v5242_v20 = vmul.f32 %v12069_v7, %v5241_v3  ;;  %11216 = vmatmul.msk.f32.vlgmr.msra.gmra.mxu0 %vm3413_vm14, %v5285_v19  ;;  %v5279_v40 = vor.u32 1.1754944e-38, %v5278_v32 }
0x1474   :  { %v5243_v56 = vadd.f32 %v12069_v7, %v5242_v20 }
0x1475   :  { %v12071_v57 = vpop.eup %12070 }
0x1476   :  { %v5268_v49 = vmul.f32 %v12071_v57, %v5168_v48  ;;  %v5247_v33 = vsel %vm5246_vm4, %v12069_v7, %v5243_v56  ;;  %vm5273_vm6 = vweird.f32 %v12071_v57  ;;  %v11811_v48 = vld [vmem:[%s15897_s7 + $0x1] ss:$0 sm:$0xff] }
0x1477   :  { %v5252_v10 = vsel %vm5249_vm5, %v5251_v26, %v5247_v33  ;;  %vm5274_vm8 = vmor %vm5272_vm7, %vm5273_vm6  ;;  %v3818_v41 = vadd.f32 %v11811_v48, %v13791_v61  ;;  %v3817_v3 = vadd.f32 %v11811_v48, %v13784_v50  ;;  %v3816_v20 = vadd.f32 %v11811_v48, %v13779_v45 }
0x1478   :  { %v5269_v35 = vsub.f32 1.0, %v5268_v49  ;;  %v5286_v17 = vmul.f32 %v14055_v21, %v5252_v10  ;;  %v3815_v26 = vadd.f32 %v11811_v48, %v13769_v59  ;;  %v3812_v59 = vadd.f32 %v11811_v48, %v13741_v42 }
0x1479   :  { %v4379_v29 = vadd.f32 %v13981_v51, %v3818_v41  ;;  %v4378_v53 = vadd.f32 %v13977_v55, %v3817_v3  ;;  %v4377_v49 = vadd.f32 %v13972_v30, %v3816_v20  ;;  %v3813_v51 = vadd.f32 %v11811_v48, %v13752_v54 }
0x147a   :  { %v5270_v24 = vmul.f32 %v12071_v57, %v5269_v35  ;;  %11217 = vmatmul.msk.f32.gmra.mxu0 %vm3413_vm14, %v5286_v17  ;;  %v3814_v35 = vadd.f32 %v11811_v48, %v13759_v46  ;;  %v4376_v61 = vadd.f32 %v13967_v44, %v3815_v26  ;;  %v3811_v46 = vadd.f32 %v11811_v48, %v13732_v43  ;;  %v5503_v43 = vld [vmem:[#allocation7 + $0x8] sm:$0xff] }
0x147b   :  { %v4374_v30 = vadd.f32 %v13959_v9, %v3813_v51  ;;  %v4373_v44 = vadd.f32 %v13957_v47, %v3812_v59  ;;  %v5502_v9 = vld [vmem:[#allocation7] sm:$0xff]  ;;  %v5504_v47 = vld [vmem:[#allocation7 + $0x10] sm:$0xff] }
0x147c   :  { %v5271_v18 = vadd.f32 %v12071_v57, %v5270_v24  ;;  %v4375_v45 = vadd.f32 %v13961_v14, %v3814_v35  ;;  %v4372_v54 = vadd.f32 %v13955_v31, %v3811_v46  ;;  %v5579_v31 = vld [vmem:[#allocation9 + $0x58] sm:$0xff] }
0x147d   :  { %5628 = vmatpush.msrb.mxu3 %v5579_v31 }
0x147e   :  { %v5275_v25 = vsel %vm5274_vm8, %v12071_v57, %v5271_v18 }
0x147f   :  { %v4792_v2 = vpop.f32.mrf.mxu2  ;;  %v5280_v23 = vsel %vm5277_vm9, %v5279_v40, %v5275_v25 }
0x1480   :  { %11190 = vmatmul.msk.f32.gmra.mxu2 %vm304_vm2, %v4792_v2  ;;  %v5288_v16 = vmul.f32 %v14062_v11, %v5280_v23 }
0x1482   :  { %11219 = vmatmul.msk.f32.gmra.mxu3 %vm3413_vm14, %v5288_v16  ;;  %v5505_v16 = vld [vmem:[#allocation7 + $0x18] sm:$0xff] }
0x1487   :  { %v4795_v21 = vpop.f32.mrf.mxu2 }
0x1488   :  { %11191 = vmatmul.msk.f32.gmra.mxu2 %vm304_vm2, %v4795_v21  ;;  %v5578_v21 = vld [vmem:[#allocation9 + $0x50] sm:$0xff] }
0x1489   :  { %5629 = vmatpush.msrb.mxu3 %v5578_v21 }
0x148b   :  { %5630 = vmatpush.msrb.mxu3 %v5577_v36 }
0x148f   :  { %v4909_v28 = vpop.f32.mrf.mxu2 }
0x1490   :  { %11192 = vmatmul.msk.f32.gmra.mxu2 %vm304_vm2, %v13963_v27  ;;  %v4933_v2 = vadd.f32 %v4909_v28, %v4372_v54 }
0x1497   :  { %v4912_v13 = vpop.f32.mrf.mxu2 }
0x1498   :  { %11193 = vmatmul.msk.f32.gmra.mxu2 %vm304_vm2, %v13965_v5  ;;  %v4934_v14 = vadd.f32 %v4912_v13, %v4373_v44 }
0x14a0   :  { %11194 = vmatmul.msk.f32.gmra.mxu2 %vm304_vm2, %v13979_v4 }
0x14a8   :  { %11195 = vmatmul.msk.f32.gmra.mxu2 %vm304_vm2, %v13984_v52 }
0x14b5   :  { %v5318_v11 = vpop.f32.mrf.mxu3 }
0x14b6   :  { %11220 = vmatmul.msk.f32.vlgmr.msra.gmra.mxu1 %vm304_vm2, %v5318_v11  ;;  %v5506_v11 = vld [vmem:[#allocation7 + $0x20] sm:$0xff] }
0x14bd   :  { %v5321_v58 = vpop.f32.mrf.mxu3 }
0x14be   :  { %11221 = vmatmul.msk.f32.gmra.mxu1 %vm304_vm2, %v5321_v58  ;;  %v5507_v58 = vld [vmem:[#allocation7 + $0x28] sm:$0xff] }
0x14db   :  { %v5423_v4 = vpop.f32.mrf.mxu3 }
0x14df   :  { %v5353_v15 = vpop.f32.mrf.mxu1 }
0x14e0   :  { %11222 = vmatmul.msk.f32.gmra.mxu1 %vm304_vm2, %v5353_v15  ;;  %v5508_v15 = vld [vmem:[#allocation7 + $0x30] sm:$0xff] }
0x14e7   :  { %v5356_v27 = vpop.f32.mrf.mxu1 }
0x14e8   :  { %11223 = vmatmul.msk.f32.gmra.mxu1 %vm304_vm2, %v5356_v27  ;;  %v5509_v27 = vld [vmem:[#allocation7 + $0x38] sm:$0xff] }
0x14ef   :  { %v5388_v1 = vpop.f32.mrf.mxu0 }
0x14f0   :  { %11224 = vmatmul.msk.f32.gmra.mxu1 %vm304_vm2, %v5388_v1  ;;  %v5576_v1 = vld [vmem:[#allocation9 + $0x40] sm:$0xff] }
0x14f1   :  { %5631 = vmatpush.msrb.mxu3 %v5576_v1 }
0x14f7   :  { %v5391_v5 = vpop.f32.mrf.mxu0 }
0x14f8   :  { %11225 = vmatmul.msk.f32.gmra.mxu1 %vm304_vm2, %v5391_v5 }
0x1500   :  { %11226 = vmatmul.msk.f32.gmra.mxu1 %vm304_vm2, %v5423_v4 }
0x1503   :  { %v4915_v12 = vpop.f32.mrf.mxu2 }
0x1504   :  { %v4935_v18 = vadd.f32 %v4915_v12, %v4374_v30 }
0x1505   :  { %v5426_v52 = vpop.f32.mrf.mxu3 }
0x1508   :  { %11227 = vmatmul.msk.f32.gmra.mxu1 %vm304_vm2, %v5426_v52 }
0x150b   :  { %v4918_v34 = vpop.f32.mrf.mxu2 }
0x150c   :  { %v4936_v24 = vadd.f32 %v4918_v34, %v4375_v45  ;;  %v11812_v34 = vld [vmem:[%s15895_s5 + $0x2] ss:$0 sm:$0xff] }
0x1513   :  { %v4921_v39 = vpop.f32.mrf.mxu2 }
0x1514   :  { %v4937_v55 = vadd.f32 %v4921_v39, %v4376_v61 }
0x151b   :  { %v4924_v0 = vpop.f32.mrf.mxu2 }
0x151c   :  { %v4938_v17 = vadd.f32 %v4924_v0, %v4377_v49 }
0x1523   :  { %v4927_v37 = vpop.f32.mrf.mxu2 }
0x1524   :  { %v4939_v33 = vadd.f32 %v4927_v37, %v4378_v53 }
0x152b   :  { %v4930_v19 = vpop.f32.mrf.mxu2 }
0x152c   :  { %v4940_v56 = vadd.f32 %v4930_v19, %v4379_v29 }
0x1533   :  { %v5470_v62 = vpop.f32.mrf.mxu1 }
0x1534   :  { %v5494_v42 = vadd.f32 %v5470_v62, %v4933_v2 }
0x153b   :  { %v5473_v38 = vpop.f32.mrf.mxu1 }
0x153c   :  { %v5495_v23 = vadd.f32 %v5473_v38, %v4934_v14 }
0x155d   :  { %v5476_v8 = vpop.f32.mrf.mxu1 }
0x155e   :  { %v5496_v25 = vadd.f32 %v5476_v8, %v4935_v18 }
0x1565   :  { %v5479_v22 = vpop.f32.mrf.mxu1 }
0x1566   :  { %v5497_v40 = vadd.f32 %v5479_v22, %v4936_v24 }
0x156d   :  { %v5482_v7 = vpop.f32.mrf.mxu1 }
0x156e   :  { %v5498_v63 = vadd.f32 %v5482_v7, %v4937_v55 }
0x1575   :  { %v5485_v6 = vpop.f32.mrf.mxu1 }
0x1576   :  { %v5499_v32 = vadd.f32 %v5485_v6, %v4938_v17 }
0x157d   :  { %v5488_v60 = vpop.f32.mrf.mxu1 }
0x157e   :  { %v5500_v50 = vadd.f32 %v5488_v60, %v4939_v33 }
0x1585   :  { %v5491_v57 = vpop.f32.mrf.mxu1 }
0x1586   :  { %v5501_v10 = vadd.f32 %v5491_v57, %v4940_v56 }
0x1588   :  { %5542 = vmatpush.msrb.mxu0 %v5501_v10 }
0x158a   :  { %5543 = vmatpush.msrb.mxu0 %v5500_v50 }
0x158c   :  { %5544 = vmatpush.msrb.mxu0 %v5499_v32 }
0x158e   :  { %5545 = vmatpush.msrb.mxu0 %v5498_v63 }
0x1590   :  { %5546 = vmatpush.msrb.mxu0 %v5497_v40 }
0x1592   :  { %5547 = vmatpush.msrb.mxu0 %v5496_v25 }
0x1594   :  { %5548 = vmatpush.msrb.mxu0 %v5495_v23 }
0x1596   :  { %5549 = vmatpush.msrb.mxu0 %v5494_v42 }
0x1597   :  { %11228 = vmatmul.msk.f32.vlgmr.msrb.gmra.mxu0 %vm144_vm0, %v5502_v9 }
0x159f   :  { %11229 = vmatmul.msk.f32.gmra.mxu0 %vm144_vm0, %v5503_v43 }
0x15a7   :  { %11230 = vmatmul.msk.f32.gmra.mxu0 %vm144_vm0, %v5504_v47 }
0x15af   :  { %11231 = vmatmul.msk.f32.gmra.mxu0 %vm144_vm0, %v5505_v16 }
0x15b7   :  { %11232 = vmatmul.msk.f32.gmra.mxu0 %vm144_vm0, %v5506_v11 }
0x15bf   :  { %11233 = vmatmul.msk.f32.gmra.mxu0 %vm144_vm0, %v5507_v58 }
0x15c7   :  { %11234 = vmatmul.msk.f32.gmra.mxu0 %vm144_vm0, %v5508_v15 }
0x15cf   :  { %11235 = vmatmul.msk.f32.gmra.mxu0 %vm144_vm0, %v5509_v27 }
0x1614   :  { %v5551_v5 = vpop.f32.mrf.mxu0 }
0x1615   :  { %11238 = vmatmul.msk.f32.vlgmr.msrb.gmra.mxu3 %vm223_vm1, %v5551_v5 }
0x161c   :  { %v5554_v4 = vpop.f32.mrf.mxu0 }
0x161d   :  { %11239 = vmatmul.msk.f32.gmra.mxu3 %vm223_vm1, %v5554_v4 }
0x1624   :  { %v5557_v52 = vpop.f32.mrf.mxu0 }
0x1625   :  { %11240 = vmatmul.msk.f32.gmra.mxu3 %vm223_vm1, %v5557_v52 }
0x162c   :  { %v5560_v28 = vpop.f32.mrf.mxu0 }
0x162d   :  { %11241 = vmatmul.msk.f32.gmra.mxu3 %vm223_vm1, %v5560_v28 }
0x1634   :  { %v5563_v13 = vpop.f32.mrf.mxu0 }
0x1635   :  { %11242 = vmatmul.msk.f32.gmra.mxu3 %vm223_vm1, %v5563_v13 }
0x163c   :  { %v5566_v62 = vpop.f32.mrf.mxu0 }
0x163d   :  { %11243 = vmatmul.msk.f32.gmra.mxu3 %vm223_vm1, %v5566_v62 }
0x1644   :  { %v5569_v12 = vpop.f32.mrf.mxu0 }
0x1645   :  { %11244 = vmatmul.msk.f32.gmra.mxu3 %vm223_vm1, %v5569_v12 }
0x164c   :  { %v5572_v38 = vpop.f32.mrf.mxu0 }
0x164d   :  { %11245 = vmatmul.msk.f32.gmra.mxu3 %vm223_vm1, %v5572_v38 }
0x1698   :  { %v5633_v8 = vpop.f32.mrf.mxu3 }
0x1699   :  { %v14149_v39 = vadd.f32 %v11812_v34, %v5633_v8 }
0x169b   :  { %5670 = vrot.lane.b32.xlu2 %v14149_v39, %s12488_s21  ;;  %v14183_v26 = vmul.f32 0.35355338, %v14149_v39 }
0x16a0   :  { %v5636_v22 = vpop.f32.mrf.mxu3 }
0x16a1   :  { %v14153_v0 = vadd.f32 %v11812_v34, %v5636_v22 }
0x16a3   :  { %5698 = vrot.lane.b32.xlu0 %v14153_v0, %s12488_s21  ;;  %v14189_v33 = vmul.f32 0.35355338, %v14153_v0 }
0x16a8   :  { %v5639_v7 = vpop.f32.mrf.mxu3 }
0x16a9   :  { %v14157_v6 = vadd.f32 %v11812_v34, %v5639_v7 }
0x16ab   :  { %5726 = vrot.lane.b32.xlu0 %v14157_v6, %s12488_s21  ;;  %v14195_v35 = vmul.f32 0.35355338, %v14157_v6  ;;  %v11673_v42 = vpack.i.bf16 %v14157_v6, %v14153_v0 }
0x16b0   :  { %v5642_v37 = vpop.f32.mrf.mxu3 }
0x16b1   :  { %v14161_v60 = vadd.f32 %v11812_v34, %v5642_v37 }
0x16b3   :  { %5754 = vrot.lane.b32.xlu0 %v14161_v60, %s12488_s21  ;;  %v14201_v50 = vmul.f32 0.35355338, %v14161_v60 }
0x16b8   :  { %v5645_v48 = vpop.f32.mrf.mxu3 }
0x16b9   :  { %v14165_v41 = vadd.f32 %v11812_v34, %v5645_v48 }
0x16bb   :  { %5782 = vrot.lane.b32.xlu2 %v14165_v41, %s12488_s21  ;;  %v14207_v51 = vmul.f32 0.35355338, %v14165_v41 }
0x16c0   :  { %v5648_v19 = vpop.f32.mrf.mxu3 }
0x16c1   :  { %v14169_v3 = vadd.f32 %v11812_v34, %v5648_v19 }
0x16c3   :  { %5810 = vrot.lane.b32.xlu0 %v14169_v3, %s12488_s21  ;;  %v14213_v55 = vmul.f32 0.35355338, %v14169_v3 }
0x16c8   :  { %v5651_v29 = vpop.f32.mrf.mxu3 }
0x16c9   :  { %v14173_v20 = vadd.f32 %v11812_v34, %v5651_v29 }
0x16cb   :  { %5838 = vrot.lane.b32.xlu1 %v14173_v20, %s12488_s21  ;;  %v14219_v59 = vmul.f32 0.35355338, %v14173_v20  ;;  %v11678_v2 = vpack.i.bf16 %v14173_v20, %v14169_v3 }
0x16d0   :  { %v5654_v53 = vpop.f32.mrf.mxu3 }
0x16d1   :  { %v14177_v56 = vadd.f32 %v11812_v34, %v5654_v53  ;;  %v14286_v34 = vpack.i.bf16 %v14153_v0, %v14149_v39 }
0x16d3   :  { %5866 = vrot.lane.b32.xlu2 %v14177_v56, %s12488_s21  ;;  %v14225_v24 = vmul.f32 0.35355338, %v14177_v56  ;;  %v11683_v62 = vpack.i.bf16 %v14177_v56, %v14161_v60 }
0x16f5   :  { %v5671_v57 = vpop.permute.xlu2 %5670 }
0x16f6   :  { %11246 = vmatpush.xpose.msk.msrb.mxu2 %vm304_vm2, %v5671_v57 }
0x16f9   :  { %11247 = vmatmul.msk.f32.vlgmr.msrb.gmra.mxu2 %vm304_vm2, %v14183_v26 }
0x1715   :  { %v5699_v49 = vpop.permute.xlu0 %5698  ;;  %v5783_v61 = vpop.permute.xlu2 %5782 }
0x1716   :  { %11248 = vmatpush.xpose.msk.msra.mxu2 %vm304_vm2, %v5699_v49 }
0x1719   :  { %11249 = vmatmul.msk.f32.vlgmr.msra.gmra.mxu2 %vm304_vm2, %v14189_v33 }
0x171d   :  { %v5727_v10 = vpop.permute.xlu0 %5726 }
0x171e   :  { %11250 = vmatpush.xpose.msk.msrb.mxu2 %vm304_vm2, %v5727_v10 }
0x1721   :  { %11251 = vmatmul.msk.f32.vlgmr.msrb.gmra.mxu2 %vm304_vm2, %v14195_v35 }
0x1725   :  { %v5755_v17 = vpop.permute.xlu0 %5754 }
0x1726   :  { %11252 = vmatpush.xpose.msk.msra.mxu2 %vm304_vm2, %v5755_v17 }
0x1729   :  { %11253 = vmatmul.msk.f32.vlgmr.msra.gmra.mxu2 %vm304_vm2, %v14201_v50 }
0x172a   :  { %11254 = vmatpush.xpose.msk.msrb.mxu2 %vm304_vm2, %v5783_v61 }
0x172d   :  { %v5867_v30 = vpop.permute.xlu2 %5866 }
0x1731   :  { %11255 = vmatmul.msk.f32.vlgmr.msrb.gmra.mxu2 %vm304_vm2, %v14207_v51 }
0x1735   :  { %v5811_v45 = vpop.permute.xlu0 %5810 }
0x1736   :  { %11256 = vmatpush.xpose.msk.msra.mxu2 %vm304_vm2, %v5811_v45 }
0x1739   :  { %11257 = vmatmul.msk.f32.vlgmr.msra.gmra.mxu2 %vm304_vm2, %v14213_v55 }
0x173a   :  { %11260 = vmatpush.xpose.msk.msrb.mxu2 %vm304_vm2, %v5867_v30 }
0x173d   :  { %v5839_v32 = vpop.permute.xlu1 %5838 }
0x173e   :  { %11258 = vmatpush.xpose.msk.msrb.mxu1 %vm304_vm2, %v5839_v32 }
0x1741   :  { %11259 = vmatmul.msk.f32.vlgmr.msrb.gmra.mxu1 %vm304_vm2, %v14219_v59  ;;  %11261 = vmatmul.msk.f32.vlgmr.msrb.gmra.mxu2 %vm304_vm2, %v14225_v24 }
0x177c   :  { %v14229_v63 = vpop.f32.mrf.mxu2 }
0x179c   :  { %v5722_v46 = vpop.f32.mrf.mxu2 }
0x179d   :  { %v5896_v44 = vsel %vm304_vm2, %v5722_v46, -inf }
0x179e   :  { %5897 = vmax.xlane.f32.xlu0 %v5896_v44 }
0x17a4   :  { %v5750_v18 = vpop.f32.mrf.mxu2 }
0x17a5   :  { %v5899_v40 = vsel %vm304_vm2, %v5750_v18, -inf }
0x17a6   :  { %5900 = vmax.xlane.f32.xlu2 %v5899_v40 }
0x17ac   :  { %v14233_v54 = vpop.f32.mrf.mxu2 }
0x17b2   :  { %6368 = vrot.lane.b32.xlu0 %v14149_v39, %s12491_s24 }
0x17b4   :  { %v14237_v14 = vpop.f32.mrf.mxu2 }
0x17ba   :  { %6394 = vrot.lane.b32.xlu0 %v14189_v33, %s12490_s23 }
0x17bc   :  { %v5834_v25 = vpop.f32.mrf.mxu2 }
0x17bd   :  { %v5908_v23 = vsel %vm304_vm2, %v5834_v25, -inf }
0x17be   :  { %5909 = vmax.xlane.f32.xlu1 %v5908_v23  ;;  %11679 = vrot.lane.b32.xlu2 %v11678_v2, %s12489_s22  ;;  %v5862_v9 = vpop.f32.mrf.mxu1 }
0x17bf   :  { %v5911_v43 = vsel %vm304_vm2, %v5862_v9, -inf }
0x17c2   :  { %6450 = vrot.lane.b32.xlu0 %v14201_v50, %s12490_s23 }
0x17c4   :  { %v14265_v11 = vpop.f32.mrf.mxu2 }
0x17c5   :  { %v5914_v1 = vsel %vm304_vm2, %v14265_v11, -inf }
0x17c6   :  { %6366 = vrot.lane.b32.xlu2 %v14183_v26, %s12490_s23 }
0x17ce   :  { %6480 = vrot.lane.b32.xlu2 %v14165_v41, %s12491_s24 }
0x17d6   :  { %6536 = vrot.lane.b32.xlu2 %v14173_v20, %s12491_s24 }
0x17d7   :  { %11674 = vrot.lane.b32.xlu1 %v11673_v42, %s12489_s22 }
0x17df   :  { %6396 = vrot.lane.b32.xlu1 %v14153_v0, %s12491_s24 }
0x17e7   :  { %6452 = vrot.lane.b32.xlu1 %v14161_v60, %s12491_s24 }
0x17ec   :  { %5912 = vmax.xlane.f32.xlu0 %v5911_v43 }
0x17ef   :  { %6478 = vrot.lane.b32.xlu1 %v14207_v51, %s12490_s23 }
0x17f7   :  { %6534 = vrot.lane.b32.xlu1 %v14219_v59, %s12490_s23 }
0x1811   :  { %v5898_v47 = vpop.xlane.xlu0 %5897 }
0x1812   :  { %v5918_v16 = vsub.f32 %v5722_v46, %v5898_v47 }
0x1814   :  { %v5927_v31 = vmul.f32 1.442695, %v5918_v16 }
0x1816   :  { %12072 = vpow2.f32 %v5927_v31 }
0x1819   :  { %v5901_v21 = vpop.xlane.xlu2 %5900 }
0x181a   :  { %v5919_v36 = vsub.f32 %v5750_v18, %v5901_v21 }
0x181c   :  { %v14267_v58 = vpop.eup %12072  ;;  %v5929_v15 = vmul.f32 1.442695, %v5919_v36 }
0x181d   :  { %v5944_v27 = vsel %vm304_vm2, %v14267_v58, 0.0 }
0x181e   :  { %12074 = vpow2.f32 %v5929_v15  ;;  %5945 = vadd.xlane.f32.xlu2 %v5944_v27 }
0x1821   :  { %5915 = vmax.xlane.f32.xlu1 %v5914_v1  ;;  %v11680_v22 = vpop.permute.xlu2 %11679 }
0x1822   :  { %v11682_v19 = vunpack.i.h.bf16 %v11680_v22  ;;  %v11681_v29 = vunpack.i.l.bf16 %v11680_v22 }
0x1824   :  { %v14273_v5 = vpop.eup %12074  ;;  %v6369_v8 = vpop.permute.xlu0 %6368 }
0x1825   :  { %v5947_v4 = vsel %vm304_vm2, %v14273_v5, 0.0 }
0x1826   :  { %5948 = vadd.xlane.f32.xlu0 %v5947_v4 }
0x1829   :  { %v14302_v32 = vpop.permute.xlu2 %6366 }
0x182c   :  { %v14292_v53 = vpop.permute.xlu0 %6394 }
0x1831   :  { %v5910_v52 = vpop.xlane.xlu1 %5909  ;;  %v14304_v46 = vpop.permute.xlu2 %6480 }
0x1832   :  { %v5922_v28 = vsub.f32 %v5834_v25, %v5910_v52 }
0x1834   :  { %v5935_v13 = vmul.f32 1.442695, %v5922_v28  ;;  %v14296_v57 = vpop.permute.xlu0 %6450 }
0x1836   :  { %12076 = vpow2.f32 %v5935_v13 }
0x1839   :  { %v14310_v18 = vpop.permute.xlu2 %6536 }
0x183a   :  { %11684 = vrot.lane.b32.xlu1 %v11683_v62, %s12489_s22 }
0x183c   :  { %v14280_v12 = vpop.eup %12076 }
0x183d   :  { %v5956_v38 = vsel %vm304_vm2, %v14280_v12, 0.0 }
0x183e   :  { %5957 = vadd.xlane.f32.xlu2 %v5956_v38 }
0x1842   :  { %11689 = vrot.lane.b32.xlu1 %v14286_v34, %s12492_s25 }
0x1849   :  { %v11675_v7 = vpop.permute.xlu1 %11674 }
0x184a   :  { %v11677_v37 = vunpack.i.h.bf16 %v11675_v7  ;;  %v11676_v48 = vunpack.i.l.bf16 %v11675_v7  ;;  %7065 = vrot.lane.b32.xlu1 %v14149_v39, %s12493_s26 }
0x184c   :  { %6132 = vmatpush.msra.mxu1 %v11676_v48  ;;  %6158 = vmatpush.msra.mxu2 %v11677_v37 }
0x184e   :  { %6236 = vmatpush.msrb.mxu1 %v11681_v29  ;;  %6262 = vmatpush.msrb.mxu2 %v11682_v19  ;;  %v5902_v19 = vsel %vm304_vm2, %v14233_v54, -inf }
0x1851   :  { %v6397_v30 = vpop.permute.xlu1 %6396 }
0x1856   :  { %6562 = vrot.lane.b32.xlu2 %v14225_v24, %s12490_s23 }
0x1859   :  { %v14308_v44 = vpop.permute.xlu1 %6452 }
0x185f   :  { %v5913_v49 = vpop.xlane.xlu0 %5912 }
0x1860   :  { %v5923_v10 = vsub.f32 %v5862_v9, %v5913_v49 }
0x1861   :  { %v14312_v25 = vpop.permute.xlu1 %6478 }
0x1862   :  { %v5937_v61 = vmul.f32 1.442695, %v5923_v10 }
0x1864   :  { %12078 = vpow2.f32 %v5937_v61 }
0x1869   :  { %v14314_v43 = vpop.permute.xlu1 %6534 }
0x186a   :  { %v14298_v17 = vpop.eup %12078 }
0x186b   :  { %v5959_v45 = vsel %vm304_vm2, %v14298_v17, 0.0 }
0x186c   :  { %5960 = vadd.xlane.f32.xlu0 %v5959_v45 }
0x1880   :  { %6564 = vrot.lane.b32.xlu0 %v14177_v56, %s12491_s24 }
0x1891   :  { %v5946_v40 = vpop.xlane.xlu2 %5945 }
0x1892   :  { %12080 = vrcp.f32 %v5946_v40  ;;  %v5990_v47 = vand.u32 2147483648, %v5946_v40  ;;  %v5988_v31 = vand.u32 2147483647, %v5946_v40  ;;  %vm5984_vm11 = vweird.f32 %v5946_v40 }
0x1894   :  { %v5991_v15 = vor.u32 1.1754944e-38, %v5990_v47  ;;  %vm5989_vm13 = vcmp.eq.f32.partialorder %v5988_v31, 8.507059e+37  ;;  %v5916_v13 = vpop.xlane.xlu1 %5915 }
0x1898   :  { %v12081_v2 = vpop.eup %12080 }
0x1899   :  { %v5980_v23 = vmul.f32 %v12081_v2, %v5946_v40  ;;  %v5949_v42 = vpop.xlane.xlu0 %5948  ;;  %vm5985_vm10 = vweird.f32 %v12081_v2 }
0x189a   :  { %12082 = vrcp.f32 %v5949_v42  ;;  %vm5986_vm12 = vmor %vm5984_vm11, %vm5985_vm10  ;;  %v6004_v62 = vand.u32 2147483648, %v5949_v42  ;;  %v6002_v22 = vand.u32 2147483647, %v5949_v42  ;;  %vm5998_vm3 = vweird.f32 %v5949_v42 }
0x189b   :  { %v5981_v9 = vsub.f32 1.0, %v5980_v23 }
0x189c   :  { %v6005_v37 = vor.u32 1.1754944e-38, %v6004_v62  ;;  %vm6003_vm5 = vcmp.eq.f32.partialorder %v6002_v22, 8.507059e+37 }
0x189d   :  { %v5982_v16 = vmul.f32 %v12081_v2, %v5981_v9 }
0x189f   :  { %v5983_v21 = vadd.f32 %v12081_v2, %v5982_v16 }
0x18a0   :  { %v12083_v36 = vpop.eup %12082 }
0x18a1   :  { %v5987_v27 = vsel %vm5986_vm12, %v12081_v2, %v5983_v21  ;;  %v5994_v1 = vmul.f32 %v12083_v36, %v5949_v42  ;;  %vm5999_vm15 = vweird.f32 %v12083_v36 }
0x18a2   :  { %v5992_v4 = vsel %vm5989_vm13, %v5991_v15, %v5987_v27  ;;  %vm6000_vm4 = vmor %vm5998_vm3, %vm5999_vm15 }
0x18a3   :  { %v6078_v52 = vmul.f32 %v14267_v58, %v5992_v4  ;;  %v5995_v28 = vsub.f32 1.0, %v5994_v1 }
0x18a5   :  { %v5996_v38 = vmul.f32 %v12083_v36, %v5995_v28  ;;  %11263 = vmatmul.msk.f32.vlgmr.msra.gmra.mxu1 %vm304_vm2, %v6078_v52 }
0x18a6   :  { %11278 = vmatpush.xpose.msk.msra.mxu1 %vm304_vm2, %v6369_v8 }
0x18a7   :  { %v5997_v7 = vadd.f32 %v12083_v36, %v5996_v38 }
0x18a9   :  { %v6001_v48 = vsel %vm6000_vm4, %v12083_v36, %v5997_v7  ;;  %v11698_v7 = vpack.i.bf16 %v14177_v56, %v14173_v20 }
0x18aa   :  { %v6006_v58 = vsel %vm6003_vm5, %v6005_v37, %v6001_v48  ;;  %5903 = vmax.xlane.f32.xlu0 %v5902_v19 }
0x18ab   :  { %v6079_v29 = vmul.f32 %v14273_v5, %v6006_v58 }
0x18ac   :  { %v11685_v49 = vpop.permute.xlu1 %11684 }
0x18ad   :  { %v11687_v10 = vunpack.i.h.bf16 %v11685_v49  ;;  %v11686_v61 = vunpack.i.l.bf16 %v11685_v49  ;;  %11264 = vmatmul.msk.f32.vlgmr.msra.gmra.mxu2 %vm304_vm2, %v6079_v29 }
0x18ae   :  { %11280 = vmatpush.xpose.msk.msra.mxu2 %vm304_vm2, %v6397_v30 }
0x18af   :  { %6184 = vmatpush.msra.mxu3 %v11686_v61 }
0x18b1   :  { %6288 = vmatpush.msrb.mxu3 %v11687_v10  ;;  %v5958_v8 = vpop.xlane.xlu2 %5957  ;;  %v5893_v10 = vsel %vm304_vm2, %v14229_v63, -inf }
0x18b2   :  { %12084 = vrcp.f32 %v5958_v8  ;;  %v6046_v23 = vand.u32 2147483648, %v5958_v8  ;;  %v6044_v9 = vand.u32 2147483647, %v5958_v8  ;;  %vm6040_vm7 = vweird.f32 %v5958_v8 }
0x18b4   :  { %v6047_v47 = vor.u32 1.1754944e-38, %v6046_v23  ;;  %vm6045_vm9 = vcmp.eq.f32.partialorder %v6044_v9, 8.507059e+37  ;;  %v14336_v21 = vpop.permute.xlu1 %11689 }
0x18b5   :  { %v11692_v36 = vunpack.i.h.bf16 %v14336_v21 }
0x18b8   :  { %v12085_v45 = vpop.eup %12084 }
0x18b9   :  { %v6036_v40 = vmul.f32 %v12085_v45, %v5958_v8  ;;  %vm6041_vm6 = vweird.f32 %v12085_v45 }
0x18ba   :  { %vm6042_vm8 = vmor %vm6040_vm7, %vm6041_vm6 }
0x18bb   :  { %v6037_v2 = vsub.f32 1.0, %v6036_v40 }
0x18bd   :  { %v6038_v42 = vmul.f32 %v12085_v45, %v6037_v2 }
0x18be   :  { %6422 = vrot.lane.b32.xlu0 %v14195_v35, %s12490_s23 }
0x18bf   :  { %v6039_v5 = vadd.f32 %v12085_v45, %v6038_v42 }
0x18c1   :  { %v6043_v16 = vsel %vm6042_vm8, %v12085_v45, %v6039_v5 }
0x18c2   :  { %v6048_v30 = vsel %vm6045_vm9, %v6047_v47, %v6043_v16  ;;  %v11693_v47 = vpack.i.bf16 %v14165_v41, %v14161_v60 }
0x18c3   :  { %v6082_v31 = vmul.f32 %v14280_v12, %v6048_v30  ;;  %v5924_v12 = vsub.f32 %v14265_v11, %v5916_v13 }
0x18c5   :  { %11267 = vmatmul.msk.f32.vlgmr.msrb.gmra.mxu1 %vm304_vm2, %v6082_v31  ;;  %v5939_v15 = vmul.f32 1.442695, %v5924_v12 }
0x18c6   :  { %11284 = vmatpush.xpose.msk.msrb.mxu1 %vm304_vm2, %v14308_v44  ;;  %6508 = vrot.lane.b32.xlu0 %v14169_v3, %s12491_s24 }
0x18cd   :  { %11279 = vmatmul.msk.f32.vlgmr.msra.gmra.mxu1 %vm304_vm2, %v14302_v32 }
0x18ce   :  { %11290 = vmatpush.xpose.msk.msra.mxu1 %vm304_vm2, %v14310_v18 }
0x18d5   :  { %11285 = vmatmul.msk.f32.vlgmr.msrb.gmra.mxu1 %vm304_vm2, %v14296_v57 }
0x18d6   :  { %6829 = vmatpush.msrb.mxu1 %v11692_v36 }
0x18dd   :  { %11291 = vmatmul.msk.f32.vlgmr.msra.gmra.mxu1 %vm304_vm2, %v14314_v43 }
0x18df   :  { %v5961_v44 = vpop.xlane.xlu0 %5960 }
0x18e0   :  { %12086 = vrcp.f32 %v5961_v44  ;;  %v6060_v1 = vand.u32 2147483648, %v5961_v44  ;;  %v6058_v52 = vand.u32 2147483647, %v5961_v44  ;;  %vm6054_vm11 = vweird.f32 %v5961_v44 }
0x18e1   :  { %12088 = vpow2.f32 %v5939_v15 }
0x18e2   :  { %v6061_v62 = vor.u32 1.1754944e-38, %v6060_v1  ;;  %vm6059_vm13 = vcmp.eq.f32.partialorder %v6058_v52, 8.507059e+37 }
0x18e6   :  { %v12087_v32 = vpop.eup %12086 }
0x18e7   :  { %v6050_v27 = vmul.f32 %v12087_v32, %v5961_v44  ;;  %vm6055_vm10 = vweird.f32 %v12087_v32  ;;  %v14344_v28 = vpop.eup %12088 }
0x18e8   :  { %vm6056_vm12 = vmor %vm6054_vm11, %vm6055_vm10  ;;  %v5962_v11 = vsel %vm304_vm2, %v14344_v28, 0.0 }
0x18e9   :  { %v6051_v18 = vsub.f32 1.0, %v6050_v27 }
0x18eb   :  { %v6052_v4 = vmul.f32 %v12087_v32, %v6051_v18 }
0x18ed   :  { %v6053_v57 = vadd.f32 %v12087_v32, %v6052_v4 }
0x18ef   :  { %v6057_v43 = vsel %vm6056_vm12, %v12087_v32, %v6053_v57 }
0x18f0   :  { %v6062_v13 = vsel %vm6059_vm13, %v6061_v62, %v6057_v43  ;;  %5963 = vadd.xlane.f32.xlu0 %v5962_v11 }
0x18f1   :  { %v6083_v38 = vmul.f32 %v14298_v17, %v6062_v13  ;;  %v6563_v17 = vpop.permute.xlu2 %6562 }
0x18f2   :  { %v6565_v22 = vpop.permute.xlu0 %6564 }
0x18f3   :  { %11268 = vmatmul.msk.f32.vlgmr.msrb.gmra.mxu2 %vm304_vm2, %v6083_v38 }
0x18f4   :  { %11286 = vmatpush.xpose.msk.msrb.mxu2 %vm304_vm2, %v14304_v46 }
0x18fb   :  { %11281 = vmatmul.msk.f32.vlgmr.msra.gmra.mxu2 %vm304_vm2, %v14292_v53 }
0x18fc   :  { %11292 = vmatpush.xpose.msk.msra.mxu2 %vm304_vm2, %v6565_v22 }
0x1903   :  { %11287 = vmatmul.msk.f32.vlgmr.msrb.gmra.mxu2 %vm304_vm2, %v14312_v25 }
0x1904   :  { %11699 = vrot.lane.b32.xlu0 %v11698_v7, %s12492_s25 }
0x190b   :  { %11293 = vmatmul.msk.f32.vlgmr.msra.gmra.mxu2 %vm304_vm2, %v6563_v17 }
0x191d   :  { %v5904_v37 = vpop.xlane.xlu0 %5903 }
0x191e   :  { %v5920_v46 = vsub.f32 %v14233_v54, %v5904_v37 }
0x1920   :  { %v5931_v48 = vmul.f32 1.442695, %v5920_v46 }
0x1922   :  { %12090 = vpow2.f32 %v5931_v48  ;;  %v14363_v58 = vpop.f32.mrf.mxu1 }
0x1928   :  { %v12091_v19 = vpop.eup %12090 }
0x1929   :  { %v5950_v53 = vsel %vm304_vm2, %v12091_v19, 0.0 }
0x192a   :  { %5951 = vadd.xlane.f32.xlu2 %v5950_v53 }
0x1930   :  { %v14375_v49 = vpop.f32.mrf.mxu2  ;;  %v6423_v2 = vpop.permute.xlu0 %6422 }
0x1938   :  { %v6509_v16 = vpop.permute.xlu0 %6508 }
0x1942   :  { %v14365_v29 = vpop.f32.mrf.mxu1  ;;  %6424 = vrot.lane.b32.xlu2 %v14157_v6, %s12491_s24 }
0x194a   :  { %v14369_v25 = vpop.f32.mrf.mxu1  ;;  %6506 = vrot.lane.b32.xlu2 %v14213_v55, %s12490_s23 }
0x194b   :  { %v6590_v54 = vsel %vm304_vm2, %v14369_v25, -inf }
0x194c   :  { %6591 = vmax.xlane.f32.xlu1 %v6590_v54  ;;  %v14402_v54 = vpop.permute.xlu1 %7065 }
0x1952   :  { %v14381_v8 = vpop.f32.mrf.mxu1 }
0x1953   :  { %v6599_v48 = vsel %vm304_vm2, %v14381_v8, -inf }
0x195a   :  { %v14387_v23 = vpop.f32.mrf.mxu1 }
0x195b   :  { %v6608_v5 = vsel %vm304_vm2, %v14387_v23, -inf }
0x1963   :  { %v5964_v30 = vpop.xlane.xlu0 %5963 }
0x1964   :  { %12092 = vrcp.f32 %v5964_v30  ;;  %v6074_v13 = vand.u32 2147483648, %v5964_v30  ;;  %vm6068_vm7 = vweird.f32 %v5964_v30  ;;  %v6072_v22 = vand.u32 2147483647, %v5964_v30 }
0x1966   :  { %v6075_v46 = vor.u32 1.1754944e-38, %v6074_v13  ;;  %vm6073_vm9 = vcmp.eq.f32.partialorder %v6072_v22, 8.507059e+37 }
0x196a   :  { %v12093_v36 = vpop.eup %12092 }
0x196b   :  { %v6064_v12 = vmul.f32 %v12093_v36, %v5964_v30  ;;  %vm6069_vm5 = vweird.f32 %v12093_v36 }
0x196c   :  { %vm6070_vm8 = vmor %vm6068_vm7, %vm6069_vm5 }
0x196d   :  { %v6065_v15 = vsub.f32 1.0, %v6064_v12 }
0x196f   :  { %v6066_v1 = vmul.f32 %v12093_v36, %v6065_v15 }
0x1971   :  { %v6067_v43 = vadd.f32 %v12093_v36, %v6066_v1 }
0x1973   :  { %5894 = vmax.xlane.f32.xlu2 %v5893_v10  ;;  %v6071_v17 = vsel %vm6070_vm8, %v12093_v36, %v6067_v43 }
0x1974   :  { %v6076_v53 = vsel %vm6073_vm9, %v6075_v46, %v6071_v17 }
0x1975   :  { %v6084_v10 = vmul.f32 %v14344_v28, %v6076_v53 }
0x1976   :  { %v14379_v61 = vpop.f32.mrf.mxu2 }
0x197e   :  { %v14383_v45 = vpop.f32.mrf.mxu2 }
0x197f   :  { %v6593_v40 = vsel %vm304_vm2, %v14383_v45, -inf }
0x1980   :  { %6594 = vmax.xlane.f32.xlu0 %v6593_v40 }
0x1986   :  { %v14389_v42 = vpop.f32.mrf.mxu2 }
0x1987   :  { %v6602_v9 = vsel %vm304_vm2, %v14389_v42, -inf }
0x1988   :  { %6603 = vmax.xlane.f32.xlu1 %v6602_v9  ;;  %6609 = vmax.xlane.f32.xlu0 %v6608_v5  ;;  %v11691_v5 = vunpack.i.l.bf16 %v14336_v21 }
0x198b   :  { %11694 = vrot.lane.b32.xlu2 %v11693_v47, %s12492_s25 }
0x198e   :  { %v14405_v40 = vpop.f32.mrf.mxu2 }
0x199d   :  { %v5952_v31 = vpop.xlane.xlu2 %5951 }
0x199e   :  { %12094 = vrcp.f32 %v5952_v31  ;;  %v6018_v18 = vand.u32 2147483648, %v5952_v31  ;;  %v6016_v52 = vand.u32 2147483647, %v5952_v31  ;;  %vm6012_vm3 = vweird.f32 %v5952_v31 }
0x19a0   :  { %v6019_v62 = vor.u32 1.1754944e-38, %v6018_v18  ;;  %vm6017_vm6 = vcmp.eq.f32.partialorder %v6016_v52, 8.507059e+37 }
0x19a4   :  { %v12095_v44 = vpop.eup %12094 }
0x19a5   :  { %v6008_v32 = vmul.f32 %v12095_v44, %v5952_v31  ;;  %vm6013_vm15 = vweird.f32 %v12095_v44  ;;  %v6425_v37 = vpop.permute.xlu2 %6424 }
0x19a6   :  { %vm6014_vm4 = vmor %vm6012_vm3, %vm6013_vm15 }
0x19a7   :  { %v6009_v27 = vsub.f32 1.0, %v6008_v32 }
0x19a9   :  { %v6010_v4 = vmul.f32 %v12095_v44, %v6009_v27 }
0x19ab   :  { %v6011_v57 = vadd.f32 %v12095_v44, %v6010_v4 }
0x19ad   :  { %v6015_v11 = vsel %vm6014_vm4, %v12095_v44, %v6011_v57  ;;  %v6507_v28 = vpop.permute.xlu2 %6506 }
0x19ae   :  { %v6020_v38 = vsel %vm6017_vm6, %v6019_v62, %v6015_v11 }
0x19af   :  { %v6080_v7 = vmul.f32 %v12091_v19, %v6020_v38  ;;  %v6611_v19 = vsel %vm304_vm2, %v14405_v40, -inf }
0x19b1   :  { %11265 = vmatmul.msk.f32.vlgmr.msra.gmra.mxu3 %vm304_vm2, %v6080_v7 }
0x19b2   :  { %11282 = vmatpush.xpose.msk.msra.mxu3 %vm304_vm2, %v6425_v37 }
0x19b4   :  { %6600 = vmax.xlane.f32.xlu2 %v6599_v48 }
0x19b9   :  { %11269 = vmatmul.msk.f32.vlgmr.msrb.gmra.mxu3 %vm304_vm2, %v6084_v10 }
0x19ba   :  { %11288 = vmatpush.xpose.msk.msrb.mxu3 %vm304_vm2, %v6509_v16 }
0x19bc   :  { %6612 = vmax.xlane.f32.xlu2 %v6611_v19 }
0x19bf   :  { %v6592_v9 = vpop.xlane.xlu1 %6591 }
0x19c0   :  { %v6614_v47 = vsub.f32 %v14369_v25, %v6592_v9  ;;  %v14423_v25 = vpop.permute.xlu0 %11699 }
0x19c1   :  { %11283 = vmatmul.msk.f32.vlgmr.msra.gmra.mxu3 %vm304_vm2, %v6423_v2 }
0x19c2   :  { %v6622_v30 = vmul.f32 1.442695, %v6614_v47  ;;  %6803 = vmatpush.msra.mxu3 %v11691_v5 }
0x19c4   :  { %12096 = vpow2.f32 %v6622_v30 }
0x19c9   :  { %11289 = vmatmul.msk.f32.vlgmr.msrb.gmra.mxu3 %vm304_vm2, %v6507_v28 }
0x19ca   :  { %v14415_v31 = vpop.eup %12096 }
0x19cb   :  { %v6638_v16 = vsel %vm304_vm2, %v14415_v31, 0.0 }
0x19cc   :  { %6639 = vadd.xlane.f32.xlu1 %v6638_v16 }
0x19e5   :  { %7121 = vrot.lane.b32.xlu1 %v14157_v6, %s12493_s26 }
0x19e6   :  { %v14421_v21 = vpop.xlane.xlu2 %5894 }
0x19ed   :  { %7119 = vrot.lane.b32.xlu1 %v14195_v35, %s12494_s1 }
0x19ee   :  { %v11695_v2 = vpop.permute.xlu2 %11694 }
0x19ef   :  { %v11697_v36 = vunpack.i.h.bf16 %v11695_v2  ;;  %v11696_v12 = vunpack.i.l.bf16 %v11695_v2 }
0x19f1   :  { %6881 = vmatpush.msrb.mxu3 %v11696_v12  ;;  %6907 = vmatpush.msra.mxu1 %v11697_v36 }
0x19f3   :  { %v6595_v44 = vpop.xlane.xlu0 %6594 }
0x19f4   :  { %v6615_v15 = vsub.f32 %v14383_v45, %v6595_v44 }
0x19f5   :  { %7177 = vrot.lane.b32.xlu1 %v14165_v41, %s12493_s26 }
0x19f6   :  { %v6624_v32 = vmul.f32 1.442695, %v6615_v15 }
0x19f8   :  { %12098 = vpow2.f32 %v6624_v32  ;;  %v5917_v32 = vsub.f32 %v14229_v63, %v14421_v21 }
0x19fb   :  { %v6604_v1 = vpop.xlane.xlu1 %6603 }
0x19fc   :  { %v6618_v4 = vsub.f32 %v14389_v42, %v6604_v1  ;;  %v5925_v1 = vmul.f32 1.442695, %v5917_v32 }
0x19fe   :  { %v14430_v27 = vpop.eup %12098  ;;  %v6630_v52 = vmul.f32 1.442695, %v6618_v4 }
0x19ff   :  { %v6641_v18 = vsel %vm304_vm2, %v14430_v27, 0.0 }
0x1a00   :  { %6642 = vadd.xlane.f32.xlu0 %v6641_v18  ;;  %12100 = vpow2.f32 %v6630_v52  ;;  %v5905_v52 = vsel %vm304_vm2, %v14237_v14, -inf }
0x1a06   :  { %v14437_v45 = vpop.eup %12100 }
0x1a07   :  { %v6650_v57 = vsel %vm304_vm2, %v14437_v45, 0.0 }
0x1a14   :  { %7093 = vrot.lane.b32.xlu0 %v14153_v0, %s12493_s26 }
0x1a1c   :  { %7091 = vrot.lane.b32.xlu0 %v14189_v33, %s12494_s1 }
0x1a1f   :  { %6651 = vadd.xlane.f32.xlu1 %v6650_v57 }
0x1a24   :  { %7149 = vrot.lane.b32.xlu0 %v14161_v60, %s12493_s26 }
0x1a27   :  { %v6601_v62 = vpop.xlane.xlu2 %6600 }
0x1a28   :  { %v6617_v42 = vsub.f32 %v14381_v8, %v6601_v62  ;;  %v6610_v8 = vpop.xlane.xlu0 %6609 }
0x1a29   :  { %v6620_v22 = vsub.f32 %v14387_v23, %v6610_v8 }
0x1a2a   :  { %v6628_v43 = vmul.f32 1.442695, %v6617_v42 }
0x1a2b   :  { %v6634_v37 = vmul.f32 1.442695, %v6620_v22 }
0x1a2c   :  { %12102 = vpow2.f32 %v6628_v43  ;;  %7147 = vrot.lane.b32.xlu0 %v14201_v50, %s12494_s1 }
0x1a2f   :  { %v6613_v46 = vpop.xlane.xlu2 %6612 }
0x1a30   :  { %v6621_v9 = vsub.f32 %v14405_v40, %v6613_v46  ;;  %v11701_v40 = vunpack.i.l.bf16 %v14423_v25 }
0x1a32   :  { %v14448_v11 = vpop.eup %12102  ;;  %v6636_v30 = vmul.f32 1.442695, %v6621_v9 }
0x1a33   :  { %v6647_v13 = vsel %vm304_vm2, %v14448_v11, 0.0 }
0x1a34   :  { %6648 = vadd.xlane.f32.xlu2 %v6647_v13  ;;  %v14471_v12 = vpop.f32.mrf.mxu3 }
0x1a38   :  { %7175 = vrot.lane.b32.xlu1 %v14207_v51, %s12494_s1 }
0x1a3f   :  { %v6640_v38 = vpop.xlane.xlu1 %6639 }
0x1a40   :  { %12104 = vrcp.f32 %v6640_v38  ;;  %7261 = vrot.lane.b32.xlu1 %v14177_v56, %s12493_s26  ;;  %v6673_v53 = vand.u32 2147483648, %v6640_v38  ;;  %v6671_v19 = vand.u32 2147483647, %v6640_v38  ;;  %vm6667_vm11 = vweird.f32 %v6640_v38 }
0x1a41   :  { %12106 = vpow2.f32 %v6634_v37 }
0x1a42   :  { %v6674_v23 = vor.u32 1.1754944e-38, %v6673_v53  ;;  %vm6672_vm13 = vcmp.eq.f32.partialorder %v6671_v19, 8.507059e+37  ;;  %12108 = vpow2.f32 %v6636_v30  ;;  %v11702_v19 = vunpack.i.h.bf16 %v14423_v25 }
0x1a43   :  { %12110 = vpow2.f32 %v5925_v1 }
0x1a46   :  { %v12105_v7 = vpop.eup %12104 }
0x1a47   :  { %v6663_v17 = vmul.f32 %v12105_v7, %v6640_v38  ;;  %vm6668_vm10 = vweird.f32 %v12105_v7  ;;  %v14465_v2 = vpop.eup %12106 }
0x1a48   :  { %7259 = vrot.lane.b32.xlu1 %v14225_v24, %s12494_s1  ;;  %vm6669_vm12 = vmor %vm6667_vm11, %vm6668_vm10  ;;  %v6656_v36 = vsel %vm304_vm2, %v14465_v2, 0.0  ;;  %v14473_v44 = vpop.eup %12108 }
0x1a49   :  { %v6664_v48 = vsub.f32 1.0, %v6663_v17  ;;  %v6659_v15 = vsel %vm304_vm2, %v14473_v44, 0.0  ;;  %v14491_v42 = vpop.eup %12110 }
0x1a4a   :  { %v5941_v13 = vsel %vm304_vm2, %v14491_v42, 0.0 }
0x1a4b   :  { %v6665_v10 = vmul.f32 %v12105_v7, %v6664_v48 }
0x1a4c   :  { %7063 = vrot.lane.b32.xlu2 %v14183_v26, %s12494_s1 }
0x1a4d   :  { %v6666_v5 = vadd.f32 %v12105_v7, %v6665_v10 }
0x1a4f   :  { %v6670_v47 = vsel %vm6669_vm12, %v12105_v7, %v6666_v5 }
0x1a50   :  { %v6675_v28 = vsel %vm6672_vm13, %v6674_v23, %v6670_v47  ;;  %6085 = vrot.lane.b32.xlu1 %v14149_v39, %s12489_s22 }
0x1a51   :  { %v6774_v16 = vmul.f32 %v14415_v31, %v6675_v28  ;;  %v14477_v31 = vpop.f32.mrf.mxu3 }
0x1a53   :  { %11294 = vmatmul.msk.f32.vlgmr.msra.gmra.mxu3 %vm304_vm2, %v6774_v16 }
0x1a54   :  { %6959 = vmatpush.msra.mxu3 %v11701_v40 }
0x1a56   :  { %6657 = vadd.xlane.f32.xlu0 %v6656_v36 }
0x1a57   :  { %v14489_v62 = vpop.permute.xlu1 %7121 }
0x1a59   :  { %v14481_v18 = vpop.f32.mrf.mxu3 }
0x1a5a   :  { %v6596_v1 = vsel %vm304_vm2, %v14481_v18, -inf }
0x1a5e   :  { %6660 = vadd.xlane.f32.xlu0 %v6659_v15 }
0x1a5f   :  { %v14499_v17 = vpop.permute.xlu1 %7119 }
0x1a61   :  { %v14487_v57 = vpop.f32.mrf.mxu3 }
0x1a62   :  { %v6605_v63 = vsel %vm304_vm2, %v14487_v57, -inf }
0x1a67   :  { %v14504_v9 = vpop.permute.xlu1 %7177 }
0x1a72   :  { %7233 = vrot.lane.b32.xlu0 %v14173_v20, %s12493_s26 }
0x1a73   :  { %v6643_v4 = vpop.xlane.xlu0 %6642 }
0x1a74   :  { %12112 = vrcp.f32 %v6643_v4  ;;  %v6687_v8 = vand.u32 2147483648, %v6643_v4  ;;  %v6685_v7 = vand.u32 2147483647, %v6643_v4  ;;  %vm6681_vm3 = vweird.f32 %v6643_v4 }
0x1a75   :  { %5906 = vmax.xlane.f32.xlu2 %v5905_v52 }
0x1a76   :  { %v6688_v46 = vor.u32 1.1754944e-38, %v6687_v8  ;;  %vm6686_vm5 = vcmp.eq.f32.partialorder %v6685_v7, 8.507059e+37 }
0x1a7a   :  { %v12113_v21 = vpop.eup %12112  ;;  %7231 = vrot.lane.b32.xlu0 %v14219_v59, %s12494_s1  ;;  %6606 = vmax.xlane.f32.xlu1 %v6605_v63 }
0x1a7b   :  { %v6677_v43 = vmul.f32 %v12113_v21, %v6643_v4  ;;  %vm6682_vm15 = vweird.f32 %v12113_v21 }
0x1a7c   :  { %vm6683_vm4 = vmor %vm6681_vm3, %vm6682_vm15 }
0x1a7d   :  { %v6678_v38 = vsub.f32 1.0, %v6677_v43  ;;  %5942 = vadd.xlane.f32.xlu2 %v5941_v13 }
0x1a7f   :  { %v6679_v22 = vmul.f32 %v12113_v21, %v6678_v38 }
0x1a81   :  { %v6680_v37 = vadd.f32 %v12113_v21, %v6679_v22 }
0x1a83   :  { %v6684_v48 = vsel %vm6683_vm4, %v12113_v21, %v6680_v37 }
0x1a84   :  { %v6689_v53 = vsel %vm6686_vm5, %v6688_v46, %v6684_v48 }
0x1a85   :  { %v6775_v10 = vmul.f32 %v14430_v27, %v6689_v53 }
0x1a86   :  { %v7094_v25 = vpop.permute.xlu0 %7093 }
0x1a87   :  { %11295 = vmatmul.msk.f32.vlgmr.msrb.gmra.mxu1 %vm304_vm2, %v6775_v10 }
0x1a88   :  { %6985 = vmatpush.msrb.mxu1 %v11702_v19 }
0x1a8e   :  { %v14513_v21 = vpop.permute.xlu0 %7091 }
0x1a92   :  { %v6652_v5 = vpop.xlane.xlu1 %6651 }
0x1a93   :  { %12114 = vrcp.f32 %v6652_v5  ;;  %v6729_v28 = vand.u32 2147483648, %v6652_v5  ;;  %v6727_v40 = vand.u32 2147483647, %v6652_v5  ;;  %vm6723_vm7 = vweird.f32 %v6652_v5 }
0x1a95   :  { %v6730_v27 = vor.u32 1.1754944e-38, %v6729_v28  ;;  %vm6728_vm9 = vcmp.eq.f32.partialorder %v6727_v40, 8.507059e+37 }
0x1a96   :  { %v7150_v48 = vpop.permute.xlu0 %7149 }
0x1a99   :  { %v12115_v23 = vpop.eup %12114 }
0x1a9a   :  { %v6719_v47 = vmul.f32 %v12115_v23, %v6652_v5  ;;  %vm6724_vm6 = vweird.f32 %v12115_v23 }
0x1a9b   :  { %vm6725_vm8 = vmor %vm6723_vm7, %vm6724_vm6 }
0x1a9c   :  { %v6720_v30 = vsub.f32 1.0, %v6719_v47 }
0x1a9e   :  { %v6721_v16 = vmul.f32 %v12115_v23, %v6720_v30 }
0x1aa0   :  { %v6722_v36 = vadd.f32 %v12115_v23, %v6721_v16 }
0x1aa2   :  { %v6726_v15 = vsel %vm6725_vm8, %v12115_v23, %v6722_v36  ;;  %v14527_v23 = vpop.permute.xlu0 %7147 }
0x1aa3   :  { %v6731_v32 = vsel %vm6728_vm9, %v6730_v27, %v6726_v15 }
0x1aa4   :  { %v6778_v4 = vmul.f32 %v14437_v45, %v6731_v32  ;;  %6597 = vmax.xlane.f32.xlu0 %v6596_v1 }
0x1aa6   :  { %11298 = vmatmul.msk.f32.vlgmr.msra.gmra.mxu1 %vm304_vm2, %v6778_v4 }
0x1aa7   :  { %11312 = vmatpush.xpose.msk.msra.mxu1 %vm304_vm2, %v7094_v25  ;;  %v6649_v52 = vpop.xlane.xlu2 %6648 }
0x1aa8   :  { %12116 = vrcp.f32 %v6649_v52  ;;  %v6715_v8 = vand.u32 2147483648, %v6649_v52  ;;  %v6713_v45 = vand.u32 2147483647, %v6649_v52  ;;  %vm6709_vm11 = vweird.f32 %v6649_v52 }
0x1aaa   :  { %v14511_v63 = vpop.permute.xlu1 %7175  ;;  %v6716_v46 = vor.u32 1.1754944e-38, %v6715_v8  ;;  %vm6714_vm13 = vcmp.eq.f32.partialorder %v6713_v45, 8.507059e+37 }
0x1aae   :  { %v12117_v43 = vpop.eup %12116 }
0x1aaf   :  { %v6705_v13 = vmul.f32 %v12117_v43, %v6649_v52  ;;  %vm6710_vm10 = vweird.f32 %v12117_v43 }
0x1ab0   :  { %vm6711_vm12 = vmor %vm6709_vm11, %vm6710_vm10 }
0x1ab1   :  { %v6706_v38 = vsub.f32 1.0, %v6705_v13 }
0x1ab2   :  { %v14515_v22 = vpop.permute.xlu1 %7261 }
0x1ab3   :  { %v6707_v7 = vmul.f32 %v12117_v43, %v6706_v38 }
0x1ab5   :  { %v6708_v37 = vadd.f32 %v12117_v43, %v6707_v7 }
0x1ab7   :  { %v6712_v53 = vsel %vm6711_vm12, %v12117_v43, %v6708_v37 }
0x1ab8   :  { %v6717_v10 = vsel %vm6714_vm13, %v6716_v46, %v6712_v53  ;;  %6834 = vrot.lane.b32.xlu0 %v14157_v6, %s12492_s25  ;;  %v7064_v46 = vpop.permute.xlu2 %7063 }
0x1ab9   :  { %v6777_v19 = vmul.f32 %v14448_v11, %v6717_v10  ;;  %v11708_v11 = vpack.i.bf16 %v14173_v20, %v14165_v41 }
0x1aba   :  { %v14520_v5 = vpop.permute.xlu1 %7259 }
0x1abb   :  { %11297 = vmatmul.msk.f32.vlgmr.msrb.gmra.mxu3 %vm304_vm2, %v6777_v19 }
0x1abc   :  { %11310 = vmatpush.xpose.msk.msrb.mxu3 %vm304_vm2, %v14402_v54 }
0x1ac0   :  { %7203 = vrot.lane.b32.xlu0 %v14213_v55, %s12494_s1 }
0x1ac2   :  { %v6086_v47 = vpop.permute.xlu1 %6085 }
0x1ac3   :  { %6106 = vmatpush.msra.mxu0 %v6086_v47 }
0x1ac8   :  { %11704 = vrot.lane.b32.xlu0 %v14286_v34, %s12495_s3 }
0x1ac9   :  { %v6658_v30 = vpop.xlane.xlu0 %6657 }
0x1aca   :  { %12118 = vrcp.f32 %v6658_v30  ;;  %v6757_v36 = vand.u32 2147483648, %v6658_v30  ;;  %v6755_v15 = vand.u32 2147483647, %v6658_v30  ;;  %vm6751_vm3 = vweird.f32 %v6658_v30 }
0x1acc   :  { %v6758_v1 = vor.u32 1.1754944e-38, %v6757_v36  ;;  %vm6756_vm5 = vcmp.eq.f32.partialorder %v6755_v15, 8.507059e+37 }
0x1ad0   :  { %v12119_v28 = vpop.eup %12118  ;;  %11709 = vrot.lane.b32.xlu0 %v11708_v11, %s12495_s3 }
0x1ad1   :  { %v6747_v16 = vmul.f32 %v12119_v28, %v6658_v30  ;;  %v6661_v54 = vpop.xlane.xlu0 %6660  ;;  %vm6752_vm15 = vweird.f32 %v12119_v28 }
0x1ad2   :  { %12120 = vrcp.f32 %v6661_v54  ;;  %vm6753_vm4 = vmor %vm6751_vm3, %vm6752_vm15  ;;  %v6771_v8 = vand.u32 2147483648, %v6661_v54  ;;  %v6769_v45 = vand.u32 2147483647, %v6661_v54  ;;  %vm6765_vm7 = vweird.f32 %v6661_v54 }
0x1ad3   :  { %v6748_v40 = vsub.f32 1.0, %v6747_v16 }
0x1ad4   :  { %v6772_v53 = vor.u32 1.1754944e-38, %v6771_v8  ;;  %vm6770_vm9 = vcmp.eq.f32.partialorder %v6769_v45, 8.507059e+37 }
0x1ad5   :  { %v6749_v27 = vmul.f32 %v12119_v28, %v6748_v40 }
0x1ad7   :  { %v6750_v25 = vadd.f32 %v12119_v28, %v6749_v27 }
0x1ad8   :  { %v12121_v32 = vpop.eup %12120 }
0x1ad9   :  { %v6754_v4 = vsel %vm6753_vm4, %v12119_v28, %v6750_v25  ;;  %v6761_v52 = vmul.f32 %v12121_v32, %v6661_v54  ;;  %vm6766_vm6 = vweird.f32 %v12121_v32 }
0x1ada   :  { %v6759_v43 = vsel %vm6756_vm5, %v6758_v1, %v6754_v4  ;;  %vm6767_vm8 = vmor %vm6765_vm7, %vm6766_vm6 }
0x1adb   :  { %v6780_v13 = vmul.f32 %v14465_v2, %v6759_v43  ;;  %v6762_v38 = vsub.f32 1.0, %v6761_v52 }
0x1add   :  { %v6763_v7 = vmul.f32 %v12121_v32, %v6762_v38  ;;  %11300 = vmatmul.msk.f32.vlgmr.msra.gmra.mxu3 %vm304_vm2, %v6780_v13 }
0x1ade   :  { %11314 = vmatpush.xpose.msk.msra.mxu3 %vm304_vm2, %v14489_v62 }
0x1adf   :  { %v6764_v37 = vadd.f32 %v12121_v32, %v6763_v7 }
0x1ae1   :  { %v6768_v10 = vsel %vm6767_vm8, %v12121_v32, %v6764_v37  ;;  %v14589_v37 = vpop.f32.mrf.mxu3 }
0x1ae2   :  { %v6773_v19 = vsel %vm6770_vm9, %v6772_v53, %v6768_v10 }
0x1ae3   :  { %v6781_v2 = vmul.f32 %v14473_v44, %v6773_v19 }
0x1ae4   :  { %v7234_v11 = vpop.permute.xlu0 %7233 }
0x1ae5   :  { %11301 = vmatmul.msk.f32.vlgmr.msrb.gmra.mxu1 %vm304_vm2, %v6781_v2  ;;  %11311 = vmatmul.msk.f32.vlgmr.msrb.gmra.mxu3 %vm304_vm2, %v7064_v46 }
0x1ae6   :  { %11316 = vmatpush.xpose.msk.msrb.mxu1 %vm304_vm2, %v7150_v48  ;;  %11318 = vmatpush.xpose.msk.msrb.mxu3 %vm304_vm2, %v14504_v9 }
0x1ae8   :  { %v5907_v62 = vpop.xlane.xlu2 %5906 }
0x1ae9   :  { %v5921_v47 = vsub.f32 %v14237_v14, %v5907_v62 }
0x1aeb   :  { %v5933_v30 = vmul.f32 1.442695, %v5921_v47 }
0x1aec   :  { %v7232_v36 = vpop.permute.xlu0 %7231 }
0x1aed   :  { %12122 = vpow2.f32 %v5933_v30  ;;  %11313 = vmatmul.msk.f32.vlgmr.msra.gmra.mxu1 %vm304_vm2, %v14513_v21  ;;  %11315 = vmatmul.msk.f32.vlgmr.msra.gmra.mxu3 %vm304_vm2, %v14499_v17  ;;  %v6607_v44 = vpop.xlane.xlu1 %6606 }
0x1aee   :  { %11322 = vmatpush.xpose.msk.msra.mxu1 %vm304_vm2, %v7234_v11  ;;  %11324 = vmatpush.xpose.msk.msra.mxu3 %vm304_vm2, %v14515_v22  ;;  %v6619_v9 = vsub.f32 %v14487_v57, %v6607_v44 }
0x1af0   :  { %v6632_v48 = vmul.f32 1.442695, %v6619_v9  ;;  %v5943_v28 = vpop.xlane.xlu2 %5942  ;;  %v5583_v9 = vld [vmem:[#allocation10 + $0x40] sm:$0xff] }
0x1af1   :  { %12124 = vrcp.f32 %v5943_v28  ;;  %v5976_v40 = vand.u32 2147483648, %v5943_v28  ;;  %v5974_v15 = vand.u32 2147483647, %v5943_v28  ;;  %vm5970_vm11 = vweird.f32 %v5943_v28 }
0x1af2   :  { %12126 = vpow2.f32 %v6632_v48 }
0x1af3   :  { %v14553_v14 = vpop.eup %12122  ;;  %vm5975_vm13 = vcmp.eq.f32.partialorder %v5974_v15, 8.507059e+37 }
0x1af4   :  { %v5953_v21 = vsel %vm304_vm2, %v14553_v14, 0.0 }
0x1af5   :  { %5954 = vadd.xlane.f32.xlu2 %v5953_v21  ;;  %11317 = vmatmul.msk.f32.vlgmr.msrb.gmra.mxu1 %vm304_vm2, %v14527_v23 }
0x1af6   :  { %11319 = vmatmul.msk.f32.vlgmr.msrb.gmra.mxu3 %vm304_vm2, %v14511_v63  ;;  %v5977_v63 = vor.u32 1.1754944e-38, %v5976_v40 }
0x1af7   :  { %v12125_v17 = vpop.eup %12124 }
0x1af8   :  { %v14561_v22 = vpop.eup %12126  ;;  %v5966_v57 = vmul.f32 %v12125_v17, %v5943_v28  ;;  %vm5971_vm10 = vweird.f32 %v12125_v17 }
0x1af9   :  { %v6653_v16 = vsel %vm304_vm2, %v14561_v22, 0.0  ;;  %vm5972_vm12 = vmor %vm5970_vm11, %vm5971_vm10 }
0x1afa   :  { %v5967_v54 = vsub.f32 1.0, %v5966_v57  ;;  %6654 = vadd.xlane.f32.xlu1 %v6653_v16 }
0x1afc   :  { %v5968_v27 = vmul.f32 %v12125_v17, %v5967_v54 }
0x1afd   :  { %11323 = vmatmul.msk.f32.vlgmr.msra.gmra.mxu1 %vm304_vm2, %v7232_v36 }
0x1afe   :  { %v5969_v23 = vadd.f32 %v12125_v17, %v5968_v27  ;;  %11325 = vmatmul.msk.f32.vlgmr.msra.gmra.mxu3 %vm304_vm2, %v14520_v5 }
0x1b00   :  { %v5973_v25 = vsel %vm5972_vm12, %v12125_v17, %v5969_v23 }
0x1b01   :  { %v5978_v32 = vsel %vm5975_vm13, %v5977_v63, %v5973_v25 }
0x1b02   :  { %v6077_v1 = vmul.f32 %v14491_v42, %v5978_v32 }
0x1b04   :  { %11262 = vmatmul.msk.f32.vlgmr.msra.gmra.mxu0 %vm304_vm2, %v6077_v1  ;;  %v14591_v46 = vpop.f32.mrf.mxu1 }
0x1b0d   :  { %6189 = vrot.lane.b32.xlu2 %v14165_v41, %s12489_s22 }
0x1b13   :  { %6912 = vrot.lane.b32.xlu1 %v14169_v3, %s12492_s25 }
0x1b17   :  { %v6598_v4 = vpop.xlane.xlu0 %6597 }
0x1b18   :  { %v6616_v52 = vsub.f32 %v14481_v18, %v6598_v4 }
0x1b1a   :  { %v6626_v43 = vmul.f32 1.442695, %v6616_v52 }
0x1b1c   :  { %12128 = vpow2.f32 %v6626_v43 }
0x1b22   :  { %v14575_v13 = vpop.eup %12128 }
0x1b23   :  { %v6644_v42 = vsel %vm304_vm2, %v14575_v13, 0.0  ;;  %v14597_v10 = vpop.f32.mrf.mxu1 }
0x1b2a   :  { %v6835_v5 = vpop.permute.xlu0 %6834 }
0x1b2b   :  { %6855 = vmatpush.msrb.mxu2 %v6835_v5 }
0x1b32   :  { %v14577_v38 = vpop.permute.xlu0 %7203 }
0x1b36   :  { %6645 = vadd.xlane.f32.xlu2 %v6644_v42 }
0x1b3a   :  { %v14581_v8 = vpop.permute.xlu0 %11704 }
0x1b3b   :  { %v11707_v7 = vunpack.i.h.bf16 %v14581_v8 }
0x1b3d   :  { %7526 = vmatpush.msrb.mxu1 %v11707_v7 }
0x1b3e   :  { %v14595_v53 = vpop.f32.mrf.mxu3 }
0x1b42   :  { %v14584_v45 = vpop.permute.xlu0 %11709 }
0x1b43   :  { %v11711_v18 = vunpack.i.l.bf16 %v14584_v45 }
0x1b45   :  { %7604 = vmatpush.msra.mxu1 %v11711_v18 }
0x1b4e   :  { %7205 = vrot.lane.b32.xlu2 %v14169_v3, %s12493_s26 }
0x1b56   :  { %7557 = vrot.lane.b32.xlu2 %v14161_v60, %s12495_s3 }
0x1b60   :  { %v14599_v19 = vpop.f32.mrf.mxu3 }
0x1b62   :  { %v14601_v2 = vpop.f32.mrf.mxu1 }
0x1b68   :  { %v5955_v62 = vpop.xlane.xlu2 %5954  ;;  %v14603_v47 = vpop.f32.mrf.mxu3 }
0x1b69   :  { %12130 = vrcp.f32 %v5955_v62  ;;  %v7287_v11 = vsel %vm304_vm2, %v14603_v47, -inf  ;;  %v6032_v57 = vand.u32 2147483648, %v5955_v62  ;;  %v6030_v40 = vand.u32 2147483647, %v5955_v62 }
0x1b6a   :  { %v14605_v30 = vpop.f32.mrf.mxu1  ;;  %7288 = vmax.xlane.f32.xlu0 %v7287_v11  ;;  %vm6026_vm3 = vweird.f32 %v5955_v62  ;;  %v11706_v11 = vunpack.i.l.bf16 %v14581_v8 }
0x1b6b   :  { %v6033_v27 = vor.u32 1.1754944e-38, %v6032_v57  ;;  %vm6031_vm5 = vcmp.eq.f32.partialorder %v6030_v40, 8.507059e+37  ;;  %v7290_v1 = vsel %vm304_vm2, %v14605_v30, -inf }
0x1b6d   :  { %v6655_v32 = vpop.xlane.xlu1 %6654 }
0x1b6e   :  { %12132 = vrcp.f32 %v6655_v32  ;;  %v6743_v8 = vand.u32 2147483648, %v6655_v32  ;;  %vm6737_vm11 = vweird.f32 %v6655_v32 }
0x1b6f   :  { %v12131_v44 = vpop.eup %12130 }
0x1b70   :  { %v6022_v48 = vmul.f32 %v12131_v44, %v5955_v62  ;;  %v6190_v28 = vpop.permute.xlu2 %6189  ;;  %vm6027_vm15 = vweird.f32 %v12131_v44  ;;  %v14613_v63 = vpop.f32.mrf.mxu3 }
0x1b71   :  { %6210 = vmatpush.msrb.mxu0 %v6190_v28  ;;  %vm6028_vm4 = vmor %vm6026_vm3, %vm6027_vm15 }
0x1b72   :  { %v6023_v21 = vsub.f32 1.0, %v6022_v48  ;;  %v14609_v17 = vpop.f32.mrf.mxu1 }
0x1b73   :  { %6332 = vmatpush.msra.mxu0 %v5583_v9  ;;  %v7296_v16 = vsel %vm304_vm2, %v14609_v17, -inf }
0x1b74   :  { %v6024_v54 = vmul.f32 %v12131_v44, %v6023_v21  ;;  %7297 = vmax.xlane.f32.xlu1 %v7296_v16  ;;  %v12133_v18 = vpop.eup %12132 }
0x1b75   :  { %vm6738_vm9 = vweird.f32 %v12133_v18 }
0x1b76   :  { %v6025_v36 = vadd.f32 %v12131_v44, %v6024_v54  ;;  %vm6739_vm12 = vmor %vm6737_vm11, %vm6738_vm9 }
0x1b78   :  { %v6029_v15 = vsel %vm6028_vm4, %v12131_v44, %v6025_v36 }
0x1b79   :  { %v6034_v23 = vsel %vm6031_vm5, %v6033_v27, %v6029_v15  ;;  %v14621_v4 = vpop.f32.mrf.mxu3  ;;  %v6741_v15 = vand.u32 2147483647, %v6655_v32 }
0x1b7a   :  { %v6081_v25 = vmul.f32 %v14553_v14, %v6034_v23  ;;  %v7299_v14 = vsel %vm304_vm2, %v14621_v4, -inf  ;;  %v14626_v5 = vpop.f32.mrf.mxu1 }
0x1b7b   :  { %vm6742_vm13 = vcmp.eq.f32.partialorder %v6741_v15, 8.507059e+37 }
0x1b7c   :  { %11266 = vmatmul.msk.f32.vlgmr.msrb.gmra.mxu0 %vm304_vm2, %v6081_v25  ;;  %v5584_v25 = vld [vmem:[#allocation10 + $0x48] sm:$0xff] }
0x1b7e   :  { %7760 = vrot.lane.b32.xlu0 %v14183_v26, %s12496_s27  ;;  %v7305_v26 = vsel %vm304_vm2, %v14626_v5, -inf }
0x1b7f   :  { %7291 = vmax.xlane.f32.xlu2 %v7290_v1 }
0x1b81   :  { %v6108_v52 = vpop.f32.mrf.mxu0  ;;  %v14634_v42 = vpop.f32.mrf.mxu3 }
0x1b82   :  { %v7308_v7 = vsel %vm304_vm2, %v14634_v42, -inf }
0x1b84   :  { %11270 = vmatmul.msk.f32.vlgmr.msra.gmra.mxu0 %vm304_vm2, %v6108_v52  ;;  %v6744_v52 = vor.u32 1.1754944e-38, %v6743_v8 }
0x1b85   :  { %v6913_v43 = vpop.permute.xlu1 %6912 }
0x1b86   :  { %6933 = vmatpush.msra.mxu2 %v6913_v43 }
0x1b87   :  { %7300 = vmax.xlane.f32.xlu2 %v7299_v14 }
0x1b8c   :  { %11271 = vmatmul.msk.f32.gmra.mxu0 %vm304_vm2, %v14363_v58 }
0x1b8d   :  { %7762 = vrot.lane.b32.xlu1 %v14149_v39, %s12497_s28  ;;  %v6733_v39 = vmul.f32 %v12133_v18, %v6655_v32 }
0x1b8f   :  { %7306 = vmax.xlane.f32.xlu2 %v7305_v26  ;;  %v6734_v44 = vsub.f32 1.0, %v6733_v39 }
0x1b94   :  { %11272 = vmatmul.msk.f32.gmra.mxu0 %vm304_vm2, %v14375_v49 }
0x1b97   :  { %7309 = vmax.xlane.f32.xlu2 %v7308_v7 }
0x1b9c   :  { %11273 = vmatmul.msk.f32.gmra.mxu0 %vm304_vm2, %v14471_v12  ;;  %v6735_v12 = vmul.f32 %v12133_v18, %v6734_v44 }
0x1b9e   :  { %v6736_v40 = vadd.f32 %v12133_v18, %v6735_v12 }
0x1ba0   :  { %v6740_v1 = vsel %vm6739_vm12, %v12133_v18, %v6736_v40 }
0x1ba1   :  { %v6745_v43 = vsel %vm6742_vm13, %v6744_v52, %v6740_v1 }
0x1ba2   :  { %v6779_v14 = vmul.f32 %v14561_v22, %v6745_v43 }
0x1ba9   :  { %v6646_v58 = vpop.xlane.xlu2 %6645 }
0x1baa   :  { %12134 = vrcp.f32 %v6646_v58  ;;  %v6701_v28 = vand.u32 2147483648, %v6646_v58  ;;  %v6699_v57 = vand.u32 2147483647, %v6646_v58  ;;  %vm6695_vm7 = vweird.f32 %v6646_v58 }
0x1bac   :  { %v6702_v54 = vor.u32 1.1754944e-38, %v6701_v28  ;;  %vm6700_vm10 = vcmp.eq.f32.partialorder %v6699_v57, 8.507059e+37 }
0x1baf   :  { %7661 = vrot.lane.b32.xlu2 %v14177_v56, %s12495_s3 }
0x1bb0   :  { %v12135_v62 = vpop.eup %12134 }
0x1bb1   :  { %v6691_v49 = vmul.f32 %v12135_v62, %v6646_v58  ;;  %v7206_v9 = vpop.permute.xlu2 %7205  ;;  %vm6696_vm6 = vweird.f32 %v12135_v62 }
0x1bb2   :  { %11320 = vmatpush.xpose.msk.msrb.mxu0 %vm304_vm2, %v7206_v9  ;;  %vm6697_vm8 = vmor %vm6695_vm7, %vm6696_vm6 }
0x1bb3   :  { %v6692_v48 = vsub.f32 1.0, %v6691_v49 }
0x1bb5   :  { %v6693_v21 = vmul.f32 %v12135_v62, %v6692_v48 }
0x1bb6   :  { %7500 = vmatpush.msra.mxu0 %v11706_v11 }
0x1bb7   :  { %v6694_v16 = vadd.f32 %v12135_v62, %v6693_v21 }
0x1bb9   :  { %v6698_v36 = vsel %vm6697_vm8, %v12135_v62, %v6694_v16  ;;  %v7558_v39 = vpop.permute.xlu2 %7557 }
0x1bba   :  { %v6703_v27 = vsel %vm6700_vm10, %v6702_v54, %v6698_v36 }
0x1bbb   :  { %v6776_v23 = vmul.f32 %v14575_v13, %v6703_v27 }
0x1bbd   :  { %11296 = vmatmul.msk.f32.vlgmr.msrb.gmra.mxu2 %vm304_vm2, %v6776_v23 }
0x1bbe   :  { %7029 = vmatpush.msrb.mxu2 %v5584_v25 }
0x1bc5   :  { %11299 = vmatmul.msk.f32.vlgmr.msra.gmra.mxu2 %vm304_vm2, %v6779_v14 }
0x1bcd   :  { %11302 = vmatmul.msk.f32.vlgmr.msrb.gmra.mxu2 %vm304_vm2, %v14589_v37 }
0x1bd5   :  { %11303 = vmatmul.msk.f32.gmra.mxu2 %vm304_vm2, %v14591_v46 }
0x1bdd   :  { %v7289_v13 = vpop.xlane.xlu0 %7288 }
0x1bde   :  { %v7311_v32 = vsub.f32 %v14603_v47, %v7289_v13 }
0x1be0   :  { %v7319_v26 = vmul.f32 1.442695, %v7311_v32 }
0x1be2   :  { %12136 = vpow2.f32 %v7319_v26 }
0x1be7   :  { %v7298_v7 = vpop.xlane.xlu1 %7297 }
0x1be8   :  { %v7314_v58 = vsub.f32 %v14609_v17, %v7298_v7  ;;  %v14656_v18 = vpop.eup %12136 }
0x1be9   :  { %v7335_v62 = vsel %vm304_vm2, %v14656_v18, 0.0 }
0x1bea   :  { %v7325_v22 = vmul.f32 1.442695, %v7314_v58  ;;  %7336 = vadd.xlane.f32.xlu0 %v7335_v62 }
0x1bec   :  { %12138 = vpow2.f32 %v7325_v22 }
0x1bf2   :  { %v14660_v37 = vpop.eup %12138  ;;  %v7292_v46 = vpop.xlane.xlu2 %7291 }
0x1bf3   :  { %v7312_v11 = vsub.f32 %v14605_v30, %v7292_v46  ;;  %v7344_v47 = vsel %vm304_vm2, %v14660_v37, 0.0 }
0x1bf4   :  { %7345 = vadd.xlane.f32.xlu0 %v7344_v47 }
0x1bf5   :  { %v7321_v44 = vmul.f32 1.442695, %v7312_v11 }
0x1bf7   :  { %12140 = vpow2.f32 %v7321_v44 }
0x1bf9   :  { %v6212_v17 = vpop.f32.mrf.mxu0 }
0x1bfa   :  { %11274 = vmatmul.msk.f32.gmra.mxu0 %vm304_vm2, %v6212_v17  ;;  %v7301_v49 = vpop.xlane.xlu2 %7300 }
0x1bfb   :  { %v7315_v9 = vsub.f32 %v14621_v4, %v7301_v49 }
0x1bfd   :  { %v14667_v48 = vpop.eup %12140  ;;  %v7327_v28 = vmul.f32 1.442695, %v7315_v9 }
0x1bfe   :  { %v7338_v12 = vsel %vm304_vm2, %v14667_v48, 0.0 }
0x1bff   :  { %12142 = vpow2.f32 %v7327_v28  ;;  %7339 = vadd.xlane.f32.xlu2 %v7338_v12 }
0x1c02   :  { %11275 = vmatmul.msk.f32.gmra.mxu0 %vm304_vm2, %v14365_v29  ;;  %v7307_v30 = vpop.xlane.xlu2 %7306 }
0x1c03   :  { %v7317_v21 = vsub.f32 %v14626_v5, %v7307_v30 }
0x1c05   :  { %v14674_v57 = vpop.eup %12142  ;;  %v7331_v16 = vmul.f32 1.442695, %v7317_v21 }
0x1c06   :  { %v7347_v4 = vsel %vm304_vm2, %v14674_v57, 0.0 }
0x1c07   :  { %12144 = vpow2.f32 %v7331_v16  ;;  %7348 = vadd.xlane.f32.xlu1 %v7347_v4 }
0x1c08   :  { %7818 = vrot.lane.b32.xlu0 %v14157_v6, %s12497_s28 }
0x1c0a   :  { %11276 = vmatmul.msk.f32.gmra.mxu0 %vm304_vm2, %v14379_v61  ;;  %v7310_v54 = vpop.xlane.xlu2 %7309 }
0x1c0b   :  { %v7318_v29 = vsub.f32 %v14634_v42, %v7310_v54 }
0x1c0d   :  { %v14683_v40 = vpop.eup %12144  ;;  %v7333_v5 = vmul.f32 1.442695, %v7318_v29 }
0x1c0e   :  { %v7353_v36 = vsel %vm304_vm2, %v14683_v40, 0.0 }
0x1c0f   :  { %12146 = vpow2.f32 %v7333_v5  ;;  %7354 = vadd.xlane.f32.xlu1 %v7353_v36 }
0x1c10   :  { %7816 = vrot.lane.b32.xlu0 %v14195_v35, %s12496_s27  ;;  %v7293_v35 = vsel %vm304_vm2, %v14613_v63, -inf }
0x1c12   :  { %11277 = vmatmul.msk.f32.gmra.mxu0 %vm304_vm2, %v14477_v31  ;;  %v14741_v27 = vpop.permute.xlu2 %7661 }
0x1c15   :  { %v14691_v8 = vpop.eup %12146 }
0x1c16   :  { %v7356_v61 = vsel %vm304_vm2, %v14691_v8, 0.0 }
0x1c17   :  { %7790 = vrot.lane.b32.xlu2 %v14153_v0, %s12497_s28  ;;  %7357 = vadd.xlane.f32.xlu1 %v7356_v61 }
0x1c18   :  { %7844 = vrot.lane.b32.xlu0 %v14201_v50, %s12496_s27  ;;  %v14730_v50 = vpop.permute.xlu0 %7760 }
0x1c1a   :  { %11321 = vmatmul.msk.f32.vlgmr.msrb.gmra.mxu0 %vm304_vm2, %v14577_v38 }
0x1c1b   :  { %7578 = vmatpush.msrb.mxu0 %v7558_v39  ;;  %v7763_v39 = vpop.permute.xlu1 %7762 }
0x1c1f   :  { %7788 = vrot.lane.b32.xlu2 %v14189_v33, %s12496_s27  ;;  %v14724_v33 = vpop.f32.mrf.mxu0 }
0x1c20   :  { %7900 = vrot.lane.b32.xlu0 %v14213_v55, %s12496_s27 }
0x1c27   :  { %7874 = vrot.lane.b32.xlu2 %v14165_v41, %s12497_s28  ;;  %v14733_v55 = vpop.f32.mrf.mxu0 }
0x1c28   :  { %7928 = vrot.lane.b32.xlu0 %v14219_v59, %s12496_s27 }
0x1c2f   :  { %7902 = vrot.lane.b32.xlu2 %v14169_v3, %s12497_s28  ;;  %v14737_v31 = vpop.f32.mrf.mxu0 }
0x1c30   :  { %7846 = vrot.lane.b32.xlu1 %v14161_v60, %s12497_s28 }
0x1c37   :  { %7958 = vrot.lane.b32.xlu2 %v14177_v56, %s12497_s28  ;;  %v14743_v43 = vpop.f32.mrf.mxu0 }
0x1c38   :  { %7872 = vrot.lane.b32.xlu1 %v14207_v51, %s12496_s27 }
0x1c40   :  { %v6857_v0 = vpop.f32.mrf.mxu2  ;;  %7930 = vrot.lane.b32.xlu1 %v14173_v20, %s12497_s28 }
0x1c41   :  { %11304 = vmatmul.msk.f32.gmra.mxu2 %vm304_vm2, %v6857_v0 }
0x1c48   :  { %7956 = vrot.lane.b32.xlu1 %v14225_v24, %s12496_s27  ;;  %v6935_v51 = vpop.f32.mrf.mxu2 }
0x1c49   :  { %11305 = vmatmul.msk.f32.gmra.mxu2 %vm304_vm2, %v14595_v53 }
0x1c51   :  { %11306 = vmatmul.msk.f32.gmra.mxu2 %vm304_vm2, %v14597_v10 }
0x1c52   :  { %7294 = vmax.xlane.f32.xlu0 %v7293_v35 }
0x1c59   :  { %11307 = vmatmul.msk.f32.gmra.mxu2 %vm304_vm2, %v6935_v51 }
0x1c5d   :  { %v7337_v59 = vpop.xlane.xlu0 %7336 }
0x1c5e   :  { %12148 = vrcp.f32 %v7337_v59  ;;  %v7370_v42 = vand.u32 2147483648, %v7337_v59  ;;  %v7368_v23 = vand.u32 2147483647, %v7337_v59  ;;  %vm7364_vm3 = vweird.f32 %v7337_v59 }
0x1c60   :  { %vm7369_vm5 = vcmp.eq.f32.partialorder %v7368_v23, 8.507059e+37 }
0x1c61   :  { %11308 = vmatmul.msk.f32.gmra.mxu2 %vm304_vm2, %v14599_v19  ;;  %v7371_v19 = vor.u32 1.1754944e-38, %v7370_v42 }
0x1c64   :  { %v12149_v24 = vpop.eup %12148 }
0x1c65   :  { %v7360_v38 = vmul.f32 %v12149_v24, %v7337_v59  ;;  %vm7365_vm15 = vweird.f32 %v12149_v24 }
0x1c66   :  { %vm7366_vm4 = vmor %vm7364_vm3, %vm7365_vm15 }
0x1c67   :  { %v7346_v53 = vpop.xlane.xlu0 %7345  ;;  %v7361_v10 = vsub.f32 1.0, %v7360_v38 }
0x1c68   :  { %12150 = vrcp.f32 %v7346_v53  ;;  %v7412_v7 = vand.u32 2147483648, %v7346_v53  ;;  %v7410_v62 = vand.u32 2147483647, %v7346_v53  ;;  %vm7406_vm7 = vweird.f32 %v7346_v53 }
0x1c69   :  { %11309 = vmatmul.msk.f32.gmra.mxu2 %vm304_vm2, %v14601_v2  ;;  %v7362_v15 = vmul.f32 %v12149_v24, %v7361_v10  ;;  %v11712_v2 = vunpack.i.h.bf16 %v14584_v45 }
0x1c6a   :  { %v7413_v11 = vor.u32 1.1754944e-38, %v7412_v7  ;;  %vm7411_vm9 = vcmp.eq.f32.partialorder %v7410_v62, 8.507059e+37 }
0x1c6b   :  { %v7363_v25 = vadd.f32 %v12149_v24, %v7362_v15 }
0x1c6d   :  { %v7367_v52 = vsel %vm7366_vm4, %v12149_v24, %v7363_v25 }
0x1c6e   :  { %v12151_v1 = vpop.eup %12150  ;;  %v7372_v14 = vsel %vm7369_vm5, %v7371_v19, %v7367_v52 }
0x1c6f   :  { %v7402_v13 = vmul.f32 %v12151_v1, %v7346_v53  ;;  %v7471_v32 = vmul.f32 %v14656_v18, %v7372_v14  ;;  %vm7407_vm6 = vweird.f32 %v12151_v1 }
0x1c70   :  { %vm7408_vm8 = vmor %vm7406_vm7, %vm7407_vm6 }
0x1c71   :  { %v7403_v26 = vsub.f32 1.0, %v7402_v13  ;;  %11326 = vmatmul.msk.f32.vlgmr.msra.gmra.mxu0 %vm304_vm2, %v7471_v32 }
0x1c72   :  { %v7340_v58 = vpop.xlane.xlu2 %7339  ;;  %7656 = vmatpush.msra.mxu0 %v11712_v2 }
0x1c73   :  { %v7404_v22 = vmul.f32 %v12151_v1, %v7403_v26  ;;  %12152 = vrcp.f32 %v7340_v58  ;;  %v7384_v30 = vand.u32 2147483648, %v7340_v58  ;;  %v7382_v16 = vand.u32 2147483647, %v7340_v58 }
0x1c74   :  { %vm7378_vm11 = vweird.f32 %v7340_v58 }
0x1c75   :  { %v7405_v46 = vadd.f32 %v12151_v1, %v7404_v22  ;;  %v7385_v29 = vor.u32 1.1754944e-38, %v7384_v30  ;;  %vm7383_vm13 = vcmp.eq.f32.partialorder %v7382_v16, 8.507059e+37 }
0x1c77   :  { %v7409_v47 = vsel %vm7408_vm8, %v12151_v1, %v7405_v46  ;;  %v14748_v18 = vpop.f32.mrf.mxu0 }
0x1c78   :  { %v7414_v45 = vsel %vm7411_vm9, %v7413_v11, %v7409_v47 }
0x1c79   :  { %v12153_v44 = vpop.eup %12152  ;;  %v7474_v17 = vmul.f32 %v14660_v37, %v7414_v45 }
0x1c7a   :  { %v7374_v49 = vmul.f32 %v12153_v44, %v7340_v58  ;;  %v7791_v9 = vpop.permute.xlu2 %7790  ;;  %v7349_v28 = vpop.xlane.xlu1 %7348  ;;  %vm7379_vm10 = vweird.f32 %v12153_v44 }
0x1c7b   :  { %11329 = vmatmul.msk.f32.vlgmr.msrb.gmra.mxu0 %vm304_vm2, %v7474_v17  ;;  %12154 = vrcp.f32 %v7349_v28  ;;  %vm7380_vm12 = vmor %vm7378_vm11, %vm7379_vm10  ;;  %v7426_v24 = vand.u32 2147483648, %v7349_v28  ;;  %v7424_v53 = vand.u32 2147483647, %v7349_v28  ;;  %vm7420_vm3 = vweird.f32 %v7349_v28 }
0x1c7c   :  { %v7375_v12 = vsub.f32 1.0, %v7374_v49  ;;  %11342 = vmatpush.xpose.msk.msrb.mxu0 %vm304_vm2, %v7763_v39 }
0x1c7d   :  { %v7427_v23 = vor.u32 1.1754944e-38, %v7426_v24  ;;  %vm7425_vm5 = vcmp.eq.f32.partialorder %v7424_v53, 8.507059e+37  ;;  %v14796_v53 = vpop.f32.mrf.mxu2 }
0x1c7e   :  { %v7376_v21 = vmul.f32 %v12153_v44, %v7375_v12 }
0x1c7f   :  { %v14753_v4 = vpop.f32.mrf.mxu0 }
0x1c80   :  { %v7377_v54 = vadd.f32 %v12153_v44, %v7376_v21 }
0x1c81   :  { %v12155_v37 = vpop.eup %12154 }
0x1c82   :  { %v7381_v5 = vsel %vm7380_vm12, %v12153_v44, %v7377_v54  ;;  %v14755_v36 = vpop.permute.xlu2 %7788  ;;  %v7416_v0 = vmul.f32 %v12155_v37, %v7349_v28  ;;  %v7355_v35 = vpop.xlane.xlu1 %7354  ;;  %vm7421_vm15 = vweird.f32 %v12155_v37 }
0x1c83   :  { %v7386_v61 = vsel %vm7383_vm13, %v7385_v29, %v7381_v5  ;;  %12156 = vrcp.f32 %v7355_v35  ;;  %vm7422_vm4 = vmor %vm7420_vm3, %vm7421_vm15  ;;  %v7454_v32 = vand.u32 2147483648, %v7355_v35  ;;  %v7452_v26 = vand.u32 2147483647, %v7355_v35 }
0x1c84   :  { %v7472_v51 = vmul.f32 %v14667_v48, %v7386_v61  ;;  %v7417_v59 = vsub.f32 1.0, %v7416_v0  ;;  %vm7448_vm7 = vweird.f32 %v7355_v35 }
0x1c85   :  { %v7455_v22 = vor.u32 1.1754944e-38, %v7454_v32  ;;  %vm7453_vm9 = vcmp.eq.f32.partialorder %v7452_v26, 8.507059e+37 }
0x1c86   :  { %11327 = vmatmul.msk.f32.vlgmr.msrb.gmra.mxu1 %vm304_vm2, %v7472_v51  ;;  %v7418_v38 = vmul.f32 %v12155_v37, %v7417_v59 }
0x1c87   :  { %7682 = vmatpush.msrb.mxu1 %v14741_v27  ;;  %v14760_v10 = vpop.f32.mrf.mxu0  ;;  %v7819_v27 = vpop.permute.xlu0 %7818 }
0x1c88   :  { %v7419_v42 = vadd.f32 %v12155_v37, %v7418_v38 }
0x1c89   :  { %v12157_v15 = vpop.eup %12156 }
0x1c8a   :  { %v7875_v25 = vpop.permute.xlu2 %7874  ;;  %v7423_v19 = vsel %vm7422_vm4, %v12155_v37, %v7419_v42  ;;  %v7444_v48 = vmul.f32 %v12157_v15, %v7355_v35  ;;  %v7358_v1 = vpop.xlane.xlu1 %7357  ;;  %vm7449_vm6 = vweird.f32 %v12157_v15 }
0x1c8b   :  { %11350 = vmatpush.xpose.msk.msra.mxu2 %vm304_vm2, %v7875_v25  ;;  %v7428_v52 = vsel %vm7425_vm5, %v7427_v23, %v7423_v19  ;;  %12158 = vrcp.f32 %v7358_v1  ;;  %vm7450_vm8 = vmor %vm7448_vm7, %vm7449_vm6  ;;  %v7468_v44 = vand.u32 2147483648, %v7358_v1  ;;  %v7466_v49 = vand.u32 2147483647, %v7358_v1  ;;  %v14798_v42 = vpop.f32.mrf.mxu2 }
0x1c8c   :  { %v7475_v14 = vmul.f32 %v14674_v57, %v7428_v52  ;;  %v7445_v13 = vsub.f32 1.0, %v7444_v48  ;;  %vm7462_vm11 = vweird.f32 %v7358_v1 }
0x1c8d   :  { %vm7467_vm13 = vcmp.eq.f32.partialorder %v7466_v49, 8.507059e+37 }
0x1c8e   :  { %v7446_v2 = vmul.f32 %v12157_v15, %v7445_v13  ;;  %11330 = vmatmul.msk.f32.vlgmr.msra.gmra.mxu1 %vm304_vm2, %v7475_v14 }
0x1c8f   :  { %v14765_v7 = vpop.f32.mrf.mxu0  ;;  %11344 = vmatpush.xpose.msk.msra.mxu1 %vm304_vm2, %v7791_v9  ;;  %v7817_v28 = vpop.permute.xlu0 %7816 }
0x1c90   :  { %v7447_v58 = vadd.f32 %v12157_v15, %v7446_v2 }
0x1c91   :  { %v12159_v39 = vpop.eup %12158 }
0x1c92   :  { %v7903_v62 = vpop.permute.xlu2 %7902  ;;  %v7451_v46 = vsel %vm7450_vm8, %v12157_v15, %v7447_v58  ;;  %v7458_v57 = vmul.f32 %v12159_v39, %v7358_v1  ;;  %vm7463_vm10 = vweird.f32 %v12159_v39 }
0x1c93   :  { %v7456_v11 = vsel %vm7453_vm9, %v7455_v22, %v7451_v46  ;;  %vm7464_vm12 = vmor %vm7462_vm11, %vm7463_vm10 }
0x1c94   :  { %v7477_v47 = vmul.f32 %v14683_v40, %v7456_v11  ;;  %v7459_v45 = vsub.f32 1.0, %v7458_v57  ;;  %v7469_v40 = vor.u32 1.1754944e-38, %v7468_v44 }
0x1c96   :  { %v7460_v17 = vmul.f32 %v12159_v39, %v7459_v45  ;;  %11332 = vmatmul.msk.f32.vlgmr.msra.gmra.mxu0 %vm304_vm2, %v7477_v47 }
0x1c97   :  { %v14770_v9 = vpop.f32.mrf.mxu0  ;;  %11346 = vmatpush.xpose.msk.msra.mxu0 %vm304_vm2, %v7819_v27  ;;  %v7845_v37 = vpop.permute.xlu0 %7844 }
0x1c98   :  { %v7302_v12 = vsel %vm304_vm2, %v14770_v9, -inf  ;;  %v7461_v30 = vadd.f32 %v12159_v39, %v7460_v17 }
0x1c99   :  { %7303 = vmax.xlane.f32.xlu1 %v7302_v12 }
0x1c9a   :  { %v7959_v21 = vpop.permute.xlu2 %7958  ;;  %v7465_v16 = vsel %vm7464_vm12, %v12159_v39, %v7461_v30  ;;  %v11718_v30 = vpack.i.bf16 %v14161_v60, %v14157_v6 }
0x1c9b   :  { %11356 = vmatpush.xpose.msk.msrb.mxu2 %vm304_vm2, %v7959_v21  ;;  %v7470_v54 = vsel %vm7467_vm13, %v7469_v40, %v7465_v16 }
0x1c9c   :  { %v7478_v29 = vmul.f32 %v14691_v8, %v7470_v54 }
0x1c9e   :  { %11333 = vmatmul.msk.f32.vlgmr.msrb.gmra.mxu1 %vm304_vm2, %v7478_v29  ;;  %11343 = vmatmul.msk.f32.vlgmr.msrb.gmra.mxu0 %vm304_vm2, %v14730_v50 }
0x1c9f   :  { %11352 = vmatpush.xpose.msk.msrb.mxu0 %vm304_vm2, %v7903_v62  ;;  %v7901_v8 = vpop.permute.xlu0 %7900 }
0x1ca2   :  { %v7847_v5 = vpop.permute.xlu1 %7846 }
0x1ca3   :  { %11348 = vmatpush.xpose.msk.msrb.mxu1 %vm304_vm2, %v7847_v5 }
0x1ca6   :  { %11345 = vmatmul.msk.f32.vlgmr.msra.gmra.mxu1 %vm304_vm2, %v14755_v36  ;;  %11347 = vmatmul.msk.f32.vlgmr.msra.gmra.mxu0 %vm304_vm2, %v7817_v28 }
0x1ca7   :  { %v7929_v0 = vpop.permute.xlu0 %7928 }
0x1caa   :  { %v7873_v61 = vpop.permute.xlu1 %7872 }
0x1cab   :  { %11351 = vmatmul.msk.f32.vlgmr.msra.gmra.mxu2 %vm304_vm2, %v7873_v61 }
0x1cae   :  { %11349 = vmatmul.msk.f32.vlgmr.msrb.gmra.mxu1 %vm304_vm2, %v7845_v37  ;;  %11353 = vmatmul.msk.f32.vlgmr.msrb.gmra.mxu0 %vm304_vm2, %v7901_v8 }
0x1cb2   :  { %v7931_v50 = vpop.permute.xlu1 %7930 }
0x1cb3   :  { %11354 = vmatpush.xpose.msk.msra.mxu1 %vm304_vm2, %v7931_v50 }
0x1cb6   :  { %11355 = vmatmul.msk.f32.vlgmr.msra.gmra.mxu1 %vm304_vm2, %v7929_v0 }
0x1cba   :  { %v7957_v35 = vpop.permute.xlu1 %7956 }
0x1cbb   :  { %11357 = vmatmul.msk.f32.vlgmr.msrb.gmra.mxu2 %vm304_vm2, %v7957_v35 }
0x1cc4   :  { %v14800_v15 = vpop.f32.mrf.mxu2 }
0x1cc5   :  { %v7295_v36 = vpop.xlane.xlu0 %7294 }
0x1cc6   :  { %v7313_v51 = vsub.f32 %v14613_v63, %v7295_v36 }
0x1cc8   :  { %v7323_v59 = vmul.f32 1.442695, %v7313_v51 }
0x1cca   :  { %12160 = vpow2.f32 %v7323_v59 }
0x1ccc   :  { %v14802_v23 = vpop.f32.mrf.mxu2 }
0x1cd0   :  { %v14792_v24 = vpop.eup %12160 }
0x1cd1   :  { %v7341_v38 = vsel %vm304_vm2, %v14792_v24, 0.0 }
0x1cd2   :  { %7342 = vadd.xlane.f32.xlu1 %v7341_v38 }
0x1cd4   :  { %v14804_v25 = vpop.f32.mrf.mxu2 }
0x1cdc   :  { %v14808_v63 = vpop.f32.mrf.mxu2 }
0x1ce4   :  { %v14814_v52 = vpop.f32.mrf.mxu2 }
0x1cec   :  { %v14821_v2 = vpop.f32.mrf.mxu2 }
0x1cee   :  { %v14812_v1 = vpop.f32.mrf.mxu0 }
0x1cf8   :  { %v14818_v13 = vpop.f32.mrf.mxu0 }
0x1d03   :  { %v14806_v19 = vpop.f32.mrf.mxu1 }
0x1d0b   :  { %v14810_v48 = vpop.f32.mrf.mxu1 }
0x1d0c   :  { %v7304_v40 = vpop.xlane.xlu1 %7303 }
0x1d0d   :  { %v7316_v21 = vsub.f32 %v14770_v9, %v7304_v40 }
0x1d0f   :  { %v7329_v16 = vmul.f32 1.442695, %v7316_v21 }
0x1d11   :  { %12162 = vpow2.f32 %v7329_v16 }
0x1d13   :  { %v14823_v26 = vpop.f32.mrf.mxu0 }
0x1d17   :  { %v14846_v54 = vpop.eup %12162 }
0x1d1b   :  { %v14816_v14 = vpop.f32.mrf.mxu1  ;;  %v7785_v62 = vpop.f32.mrf.mxu0 }
0x1d1c   :  { %v7984_v11 = vsel %vm304_vm2, %v7785_v62, -inf }
0x1d23   :  { %v7813_v27 = vpop.f32.mrf.mxu1  ;;  %v7841_v47 = vpop.f32.mrf.mxu0 }
0x1d24   :  { %v7987_v32 = vsel %vm304_vm2, %v7813_v27, -inf  ;;  %v7990_v17 = vsel %vm304_vm2, %v7841_v47, -inf }
0x1d25   :  { %7988 = vmax.xlane.f32.xlu1 %v7987_v32 }
0x1d2b   :  { %v14825_v58 = vpop.f32.mrf.mxu1  ;;  %v14834_v28 = vpop.f32.mrf.mxu0 }
0x1d2c   :  { %v7993_v49 = vsel %vm304_vm2, %v14825_v58, -inf  ;;  %v7999_v12 = vsel %vm304_vm2, %v14834_v28, -inf }
0x1d2e   :  { %v7897_v39 = vpop.f32.mrf.mxu2 }
0x1d2f   :  { %v7996_v22 = vsel %vm304_vm2, %v7897_v39, -inf }
0x1d30   :  { %7997 = vmax.xlane.f32.xlu2 %v7996_v22 }
0x1d33   :  { %v7953_v46 = vpop.f32.mrf.mxu1 }
0x1d34   :  { %v8002_v57 = vsel %vm304_vm2, %v7953_v46, -inf }
0x1d35   :  { %8003 = vmax.xlane.f32.xlu1 %v8002_v57 }
0x1d38   :  { %7985 = vmax.xlane.f32.xlu2 %v7984_v11 }
0x1d3e   :  { %v7981_v45 = vpop.f32.mrf.mxu2 }
0x1d3f   :  { %v8005_v44 = vsel %vm304_vm2, %v7981_v45, -inf }
0x1d40   :  { %8006 = vmax.xlane.f32.xlu0 %v8005_v44  ;;  %7991 = vmax.xlane.f32.xlu2 %v7990_v17 }
0x1d45   :  { %v14850_v29 = vpop.xlane.xlu1 %7342 }
0x1d46   :  { %vm7392_vm3 = vweird.f32 %v14850_v29 }
0x1d48   :  { %7994 = vmax.xlane.f32.xlu0 %v7993_v49 }
0x1d4e   :  { %11714 = vrot.lane.b32.xlu1 %v14286_v34, %s12498_s29  ;;  %v7350_v34 = vsel %vm304_vm2, %v14846_v54, 0.0 }
0x1d50   :  { %8000 = vmax.xlane.f32.xlu0 %v7999_v12 }
0x1d58   :  { %11719 = vrot.lane.b32.xlu2 %v11718_v30, %s12498_s29 }
0x1d64   :  { %7531 = vrot.lane.b32.xlu0 %v14157_v6, %s12495_s3 }
0x1d78   :  { %7351 = vadd.xlane.f32.xlu1 %v7350_v34 }
0x1d98   :  { %v7989_v61 = vpop.xlane.xlu1 %7988 }
0x1d99   :  { %v8009_v9 = vsub.f32 %v7813_v27, %v7989_v61 }
0x1d9b   :  { %v8018_v36 = vmul.f32 1.442695, %v8009_v9 }
0x1da3   :  { %v7998_v37 = vpop.xlane.xlu2 %7997 }
0x1da4   :  { %v8012_v60 = vsub.f32 %v7897_v39, %v7998_v37 }
0x1da6   :  { %v8024_v5 = vmul.f32 1.442695, %v8012_v60 }
0x1da8   :  { %12164 = vpow2.f32 %v8024_v5  ;;  %v8004_v51 = vpop.xlane.xlu1 %8003 }
0x1da9   :  { %v8014_v57 = vsub.f32 %v7953_v46, %v8004_v51 }
0x1dab   :  { %v7986_v8 = vpop.xlane.xlu2 %7985  ;;  %v8028_v44 = vmul.f32 1.442695, %v8014_v57 }
0x1dac   :  { %v8008_v50 = vsub.f32 %v7785_v62, %v7986_v8 }
0x1dae   :  { %v14852_v6 = vpop.eup %12164  ;;  %v8016_v0 = vmul.f32 1.442695, %v8008_v50 }
0x1daf   :  { %v8044_v35 = vsel %vm304_vm2, %v14852_v6, 0.0 }
0x1db0   :  { %12166 = vpow2.f32 %v8016_v0  ;;  %8045 = vadd.xlane.f32.xlu0 %v8044_v35 }
0x1db1   :  { %12168 = vpow2.f32 %v8018_v36 }
0x1db2   :  { %12170 = vrcp.f32 %v14850_v29 }
0x1db3   :  { %v8007_v59 = vpop.xlane.xlu0 %8006  ;;  %v7992_v38 = vpop.xlane.xlu2 %7991 }
0x1db4   :  { %v8015_v32 = vsub.f32 %v7981_v45, %v8007_v59  ;;  %v8010_v39 = vsub.f32 %v7841_v47, %v7992_v38 }
0x1db6   :  { %v14856_v22 = vpop.eup %12166  ;;  %v8030_v62 = vmul.f32 1.442695, %v8015_v32  ;;  %v8020_v11 = vmul.f32 1.442695, %v8010_v39 }
0x1db7   :  { %v8032_v27 = vsel %vm304_vm2, %v14856_v22, 0.0  ;;  %v14861_v12 = vpop.eup %12168 }
0x1db8   :  { %12172 = vpow2.f32 %v8030_v62  ;;  %8033 = vadd.xlane.f32.xlu2 %v8032_v27  ;;  %v12171_v30 = vpop.eup %12170  ;;  %v8035_v34 = vsel %vm304_vm2, %v14861_v12, 0.0  ;;  %v7396_v62 = vand.u32 2147483647, %v14850_v29 }
0x1db9   :  { %12174 = vpow2.f32 %v8020_v11  ;;  %v7388_v37 = vmul.f32 %v12171_v30, %v14850_v29  ;;  %vm7393_vm15 = vweird.f32 %v12171_v30 }
0x1dba   :  { %12176 = vpow2.f32 %v8028_v44  ;;  %vm7394_vm4 = vmor %vm7392_vm3, %vm7393_vm15  ;;  %vm7397_vm5 = vcmp.eq.f32.partialorder %v7396_v62, 8.507059e+37 }
0x1dbb   :  { %v7995_v17 = vpop.xlane.xlu0 %7994  ;;  %v11720_v49 = vpop.permute.xlu2 %11719  ;;  %v7389_v0 = vsub.f32 1.0, %v7388_v37 }
0x1dbc   :  { %v8011_v47 = vsub.f32 %v14825_v58, %v7995_v17  ;;  %v11721_v45 = vunpack.i.l.bf16 %v11720_v49  ;;  %v11722_v8 = vunpack.i.h.bf16 %v11720_v49 }
0x1dbd   :  { %v7390_v32 = vmul.f32 %v12171_v30, %v7389_v0 }
0x1dbe   :  { %v14864_v46 = vpop.eup %12172  ;;  %v8022_v40 = vmul.f32 1.442695, %v8011_v47  ;;  %8249 = vmatpush.msra.mxu2 %v11721_v45 }
0x1dbf   :  { %v14866_v21 = vpop.eup %12174  ;;  %v8053_v16 = vsel %vm304_vm2, %v14864_v46, 0.0  ;;  %v7391_v39 = vadd.f32 %v12171_v30, %v7390_v32 }
0x1dc0   :  { %12178 = vpow2.f32 %v8022_v40  ;;  %v8038_v58 = vsel %vm304_vm2, %v14866_v21, 0.0  ;;  %8054 = vadd.xlane.f32.xlu1 %v8053_v16  ;;  %8036 = vadd.xlane.f32.xlu2 %v8035_v34  ;;  %v11715_v60 = vpop.permute.xlu1 %11714  ;;  %v14875_v9 = vpop.eup %12176 }
0x1dc1   :  { %8039 = vadd.xlane.f32.xlu0 %v8038_v58  ;;  %v11717_v5 = vunpack.i.h.bf16 %v11715_v60  ;;  %v11716_v61 = vunpack.i.l.bf16 %v11715_v60  ;;  %v8050_v38 = vsel %vm304_vm2, %v14875_v9, 0.0  ;;  %v7395_v27 = vsel %vm7394_vm4, %v12171_v30, %v7391_v39 }
0x1dc3   :  { %v8001_v50 = vpop.xlane.xlu0 %8000  ;;  %8197 = vmatpush.msra.mxu0 %v11716_v61  ;;  %8223 = vmatpush.msrb.mxu1 %v11717_v5 }
0x1dc4   :  { %v8013_v35 = vsub.f32 %v14834_v28, %v8001_v50  ;;  %v7398_v28 = vand.u32 2147483648, %v14850_v29  ;;  %v11723_v29 = vpack.i.bf16 %v14169_v3, %v14165_v41 }
0x1dc5   :  { %8275 = vmatpush.msrb.mxu0 %v11722_v8 }
0x1dc6   :  { %v14878_v36 = vpop.eup %12178  ;;  %v8026_v51 = vmul.f32 1.442695, %v8013_v35  ;;  %v7399_v44 = vor.u32 1.1754944e-38, %v7398_v28 }
0x1dc7   :  { %v8041_v59 = vsel %vm304_vm2, %v14878_v36, 0.0 }
0x1dc8   :  { %12180 = vpow2.f32 %v8026_v51  ;;  %8042 = vadd.xlane.f32.xlu2 %v8041_v59  ;;  %8051 = vadd.xlane.f32.xlu1 %v8050_v38  ;;  %v7400_v17 = vsel %vm7397_vm5, %v7399_v44, %v7395_v27 }
0x1dc9   :  { %v7473_v49 = vmul.f32 %v14792_v24, %v7400_v17 }
0x1dce   :  { %v14885_v57 = vpop.eup %12180 }
0x1dcf   :  { %v8047_v11 = vsel %vm304_vm2, %v14885_v57, 0.0 }
0x1dd0   :  { %8048 = vadd.xlane.f32.xlu2 %v8047_v11 }
0x1dd5   :  { %7609 = vrot.lane.b32.xlu0 %v14169_v3, %s12495_s3 }
0x1dd6   :  { %v7532_v47 = vpop.permute.xlu0 %7531 }
0x1dd7   :  { %7552 = vmatpush.msrb.mxu3 %v7532_v47 }
0x1dd8   :  { %11328 = vmatmul.msk.f32.vlgmr.msrb.gmra.mxu3 %vm304_vm2, %v7473_v49 }
0x1ddd   :  { %8358 = vrot.lane.b32.xlu0 %v14177_v56, %s12498_s29 }
0x1de1   :  { %8332 = vrot.lane.b32.xlu1 %v14173_v20, %s12498_s29 }
0x1de8   :  { %11724 = vrot.lane.b32.xlu2 %v11723_v29, %s12498_s29 }
0x1deb   :  { %v7352_v45 = vpop.xlane.xlu1 %7351 }
0x1dec   :  { %12182 = vrcp.f32 %v7352_v45  ;;  %vm7434_vm7 = vweird.f32 %v7352_v45  ;;  %v7440_v61 = vand.u32 2147483648, %v7352_v45  ;;  %v7438_v0 = vand.u32 2147483647, %v7352_v45 }
0x1dee   :  { %v7441_v28 = vor.u32 1.1754944e-38, %v7440_v61  ;;  %vm7439_vm10 = vcmp.eq.f32.partialorder %v7438_v0, 8.507059e+37 }
0x1df2   :  { %v12183_v30 = vpop.eup %12182 }
0x1df3   :  { %v7430_v24 = vmul.f32 %v12183_v30, %v7352_v45  ;;  %vm7435_vm6 = vweird.f32 %v12183_v30 }
0x1df4   :  { %vm14916_vm8 = vmor %vm7434_vm7, %vm7435_vm6 }
0x1df5   :  { %v7431_v16 = vsub.f32 1.0, %v7430_v24 }
0x1df7   :  { %v7432_v37 = vmul.f32 %v12183_v30, %v7431_v16 }
0x1df9   :  { %v7433_v3 = vadd.f32 %v12183_v30, %v7432_v37 }
0x1dfb   :  { %v7437_v59 = vsel %vm14916_vm8, %v12183_v30, %v7433_v3 }
0x1dfc   :  { %v14925_v44 = vsel %vm7439_vm10, %v7441_v28, %v7437_v59 }
0x1e23   :  { %v14902_v40 = vpop.xlane.xlu0 %8045 }
0x1e24   :  { %12184 = vrcp.f32 %v14902_v40  ;;  %vm8117_vm12 = vweird.f32 %v14902_v40  ;;  %v8121_v47 = vand.u32 2147483647, %v14902_v40  ;;  %v8123_v24 = vand.u32 2147483648, %v14902_v40 }
0x1e26   :  { %vm14955_vm6 = vcmp.eq.f32.partialorder %v8121_v47, 8.507059e+37 }
0x1e2a   :  { %v14905_v56 = vpop.eup %12184 }
0x1e2b   :  { %v8034_v34 = vpop.xlane.xlu2 %8033  ;;  %v8113_v20 = vmul.f32 %v14905_v56, %v14902_v40  ;;  %vm8118_vm3 = vweird.f32 %v14905_v56 }
0x1e2c   :  { %12186 = vrcp.f32 %v8034_v34  ;;  %v8067_v38 = vand.u32 2147483648, %v8034_v34  ;;  %v8065_v39 = vand.u32 2147483647, %v8034_v34  ;;  %vm8061_vm11 = vweird.f32 %v8034_v34  ;;  %vm14951_vm5 = vmor %vm8117_vm12, %vm8118_vm3 }
0x1e2d   :  { %v8114_v35 = vsub.f32 1.0, %v8113_v20 }
0x1e2e   :  { %v8068_v17 = vor.u32 1.1754944e-38, %v8067_v38  ;;  %vm8066_vm15 = vcmp.eq.f32.partialorder %v8065_v39, 8.507059e+37 }
0x1e2f   :  { %v8115_v62 = vmul.f32 %v14905_v56, %v8114_v35 }
0x1e31   :  { %v8116_v3 = vadd.f32 %v14905_v56, %v8115_v62  ;;  %v8124_v62 = vor.u32 1.1754944e-38, %v8123_v24 }
0x1e32   :  { %v12187_v41 = vpop.eup %12186 }
0x1e33   :  { %v8057_v58 = vmul.f32 %v12187_v41, %v8034_v34  ;;  %v14909_v60 = vpop.xlane.xlu2 %8036  ;;  %v14911_v5 = vpop.xlane.xlu1 %8054  ;;  %vm8062_vm9 = vweird.f32 %v12187_v41  ;;  %v8120_v28 = vsel %vm14951_vm5, %v14905_v56, %v8116_v3 }
0x1e34   :  { %v14913_v8 = vpop.xlane.xlu0 %8039  ;;  %12188 = vrcp.f32 %v14909_v60  ;;  %vm8063_vm13 = vmor %vm8061_vm11, %vm8062_vm9  ;;  %v8079_v0 = vand.u32 2147483647, %v14909_v60  ;;  %v8081_v35 = vand.u32 2147483648, %v14909_v60  ;;  %vm8075_vm8 = vweird.f32 %v14909_v60 }
0x1e35   :  { %v8058_v51 = vsub.f32 1.0, %v8057_v58  ;;  %12190 = vrcp.f32 %v14913_v8  ;;  %v8095_v50 = vand.u32 2147483648, %v14913_v8  ;;  %v8093_v39 = vand.u32 2147483647, %v14913_v8 }
0x1e36   :  { %12192 = vrcp.f32 %v14911_v5  ;;  %vm8089_vm9 = vweird.f32 %v14913_v8  ;;  %vm8080_vm11 = vcmp.eq.f32.partialorder %v8079_v0, 8.507059e+37  ;;  %v8082_v47 = vor.u32 1.1754944e-38, %v8081_v35 }
0x1e37   :  { %v8059_v32 = vmul.f32 %v12187_v41, %v8058_v51  ;;  %v7476_v35 = vmul.f32 %v14846_v54, %v14925_v44 }
0x1e39   :  { %v8060_v11 = vadd.f32 %v12187_v41, %v8059_v32 }
0x1e3a   :  { %v12189_v27 = vpop.eup %12188 }
0x1e3b   :  { %v12191_v49 = vpop.eup %12190  ;;  %v8064_v29 = vsel %vm8063_vm13, %v12187_v41, %v8060_v11  ;;  %v8071_v45 = vmul.f32 %v12189_v27, %v14909_v60  ;;  %v14930_v30 = vpop.xlane.xlu2 %8042  ;;  %vm8076_vm4 = vweird.f32 %v12189_v27  ;;  %vm8094_vm13 = vcmp.eq.f32.partialorder %v8093_v39, 8.507059e+37 }
0x1e3c   :  { %v8069_v16 = vsel %vm8066_vm15, %v8068_v17, %v8064_v29  ;;  %v8085_v34 = vmul.f32 %v12191_v49, %v14913_v8  ;;  %12194 = vrcp.f32 %v14930_v30  ;;  %v14935_v37 = vpop.xlane.xlu1 %8051  ;;  %v14937_v20 = vpop.eup %12192  ;;  %vm8090_vm7 = vweird.f32 %v12191_v49  ;;  %vm8077_vm10 = vmor %vm8075_vm8, %vm8076_vm4 }
0x1e3d   :  { %v8168_v41 = vmul.f32 %v14856_v22, %v8069_v16  ;;  %v8072_v58 = vsub.f32 1.0, %v8071_v45  ;;  %v8155_v59 = vmul.f32 %v14937_v20, %v14911_v5  ;;  %12196 = vrcp.f32 %v14935_v37  ;;  %vm8091_vm12 = vmor %vm8089_vm9, %vm8090_vm7 }
0x1e3e   :  { %v8086_v61 = vsub.f32 1.0, %v8085_v34  ;;  %v8096_v29 = vor.u32 1.1754944e-38, %v8095_v50  ;;  %v8125_v8 = vsel %vm14955_vm6, %v8124_v62, %v8120_v28  ;;  %v8107_v50 = vand.u32 2147483647, %v14930_v30 }
0x1e3f   :  { %v8073_v51 = vmul.f32 %v12189_v27, %v8072_v58  ;;  %11358 = vmatmul.msk.f32.vlgmr.msra.gmra.mxu0 %vm304_vm2, %v8168_v41  ;;  %v8156_v16 = vsub.f32 1.0, %v8155_v59  ;;  %v8109_v0 = vand.u32 2147483648, %v14930_v30  ;;  %vm8160_vm3 = vweird.f32 %v14937_v20 }
0x1e40   :  { %v8087_v32 = vmul.f32 %v12191_v49, %v8086_v61  ;;  %vm8103_vm4 = vweird.f32 %v14930_v30  ;;  %vm8108_vm6 = vcmp.eq.f32.partialorder %v8107_v50, 8.507059e+37  ;;  %vm8145_vm8 = vweird.f32 %v14935_v37 }
0x1e41   :  { %v8074_v11 = vadd.f32 %v12189_v27, %v8073_v51  ;;  %v8157_v51 = vmul.f32 %v14937_v20, %v8156_v16  ;;  %v8110_v44 = vor.u32 1.1754944e-38, %v8109_v0  ;;  %vm8159_vm9 = vweird.f32 %v14911_v5 }
0x1e42   :  { %v12195_v40 = vpop.eup %12194  ;;  %v8088_v17 = vadd.f32 %v12191_v49, %v8087_v32  ;;  %v8165_v32 = vand.u32 2147483648, %v14911_v5 }
0x1e43   :  { %v8078_v45 = vsel %vm8077_vm10, %v12189_v27, %v8074_v11  ;;  %v8099_v34 = vmul.f32 %v12195_v40, %v14930_v30  ;;  %v14967_v41 = vpop.xlane.xlu2 %8048  ;;  %v14970_v60 = vpop.eup %12196  ;;  %vm8104_vm15 = vweird.f32 %v12195_v40  ;;  %v8158_v62 = vadd.f32 %v14937_v20, %v8157_v51 }
0x1e44   :  { %v8092_v56 = vsel %vm8091_vm12, %v12191_v49, %v8088_v17  ;;  %v8083_v24 = vsel %vm8080_vm11, %v8082_v47, %v8078_v45  ;;  %12198 = vrcp.f32 %v14967_v41  ;;  %v8141_v49 = vmul.f32 %v14970_v60, %v14935_v37  ;;  %vm8105_vm5 = vmor %vm8103_vm4, %vm8104_vm15 }
0x1e45   :  { %v8097_v3 = vsel %vm8094_vm13, %v8096_v29, %v8092_v56  ;;  %v8169_v58 = vmul.f32 %v14861_v12, %v8083_v24  ;;  %v8100_v61 = vsub.f32 1.0, %v8099_v34  ;;  %v5585_v12 = vld [vmem:[#allocation10 + $0x50] sm:$0xff]  ;;  %vm8146_vm7 = vweird.f32 %v14970_v60  ;;  %vm15008_vm11 = vmor %vm8159_vm9, %vm8160_vm3 }
0x1e46   :  { %v8170_v27 = vmul.f32 %v14866_v21, %v8097_v3  ;;  %v8172_v21 = vmul.f32 %v14852_v6, %v8125_v8  ;;  %v8142_v38 = vsub.f32 1.0, %v8141_v49  ;;  %v8151_v6 = vand.u32 2147483648, %v14935_v37  ;;  %vm15001_vm10 = vmor %vm8145_vm8, %vm8146_vm7 }
0x1e47   :  { %v8101_v59 = vmul.f32 %v12195_v40, %v8100_v61  ;;  %v7610_v22 = vpop.permute.xlu0 %7609  ;;  %11359 = vmatmul.msk.f32.vlgmr.msrb.gmra.mxu1 %vm304_vm2, %v8169_v58  ;;  %v8149_v56 = vand.u32 2147483647, %v14935_v37  ;;  %v8137_v3 = vand.u32 2147483648, %v14967_v41  ;;  %v8166_v0 = vor.u32 1.1754944e-38, %v8165_v32 }
0x1e48   :  { %7630 = vmatpush.msra.mxu3 %v7610_v22  ;;  %11360 = vmatmul.msk.f32.vlgmr.msra.gmra.mxu2 %vm304_vm2, %v8170_v27  ;;  %v8143_v28 = vmul.f32 %v14970_v60, %v8142_v38  ;;  %v8162_v27 = vsel %vm15008_vm11, %v14937_v20, %v8158_v62  ;;  %v8152_v50 = vor.u32 1.1754944e-38, %v8151_v6  ;;  %vm8131_vm15 = vweird.f32 %v14967_v41 }
0x1e49   :  { %v8102_v39 = vadd.f32 %v12195_v40, %v8101_v59  ;;  %11331 = vmatmul.msk.f32.vlgmr.msra.gmra.mxu3 %vm304_vm2, %v7476_v35  ;;  %vm8150_vm13 = vcmp.eq.f32.partialorder %v8149_v56, 8.507059e+37  ;;  %v8138_v35 = vor.u32 1.1754944e-38, %v8137_v3  ;;  %v11813_v56 = vld [vmem:[%s15897_s7 + $0x2] ss:$0 sm:$0xff] }
0x1e4a   :  { %v12199_v54 = vpop.eup %12198  ;;  %7726 = vmatpush.msrb.mxu3 %v5585_v12  ;;  %v8144_v29 = vadd.f32 %v14970_v60, %v8143_v28  ;;  %v6364_v8 = vadd.f32 %v11813_v56, %v14760_v10 }
0x1e4b   :  { %v8106_v11 = vsel %vm8105_vm5, %v12195_v40, %v8102_v39  ;;  %v8127_v17 = vmul.f32 %v12199_v54, %v14967_v41  ;;  %v11725_v47 = vpop.permute.xlu2 %11724  ;;  %v8163_v40 = vand.u32 2147483647, %v14911_v5  ;;  %vm8132_vm12 = vweird.f32 %v12199_v54 }
0x1e4c   :  { %v8111_v30 = vsel %vm8108_vm6, %v8110_v44, %v8106_v11  ;;  %v11727_v45 = vunpack.i.h.bf16 %v11725_v47  ;;  %v11726_v16 = vunpack.i.l.bf16 %v11725_v47  ;;  %v8148_v37 = vsel %vm15001_vm10, %v14970_v60, %v8144_v29  ;;  %vm8133_vm4 = vmor %vm8131_vm15, %vm8132_vm12 }
0x1e4d   :  { %v8171_v34 = vmul.f32 %v14878_v36, %v8111_v30  ;;  %v8128_v24 = vsub.f32 1.0, %v8127_v17  ;;  %v8135_v5 = vand.u32 2147483647, %v14967_v41  ;;  %vm8164_vm3 = vcmp.eq.f32.partialorder %v8163_v40, 8.507059e+37 }
0x1e4e   :  { %8301 = vmatpush.msra.mxu1 %v11726_v16  ;;  %8327 = vmatpush.msrb.mxu2 %v11727_v45  ;;  %v8153_v60 = vsel %vm8150_vm13, %v8152_v50, %v8148_v37  ;;  %v8167_v51 = vsel %vm8164_vm3, %v8166_v0, %v8162_v27  ;;  %v6363_v36 = vadd.f32 %v11813_v56, %v14753_v4 }
0x1e4f   :  { %v8129_v58 = vmul.f32 %v12199_v54, %v8128_v24  ;;  %v8359_v61 = vpop.permute.xlu0 %8358  ;;  %11361 = vmatmul.msk.f32.vlgmr.msrb.gmra.mxu0 %vm304_vm2, %v8171_v34  ;;  %11362 = vmatmul.msk.f32.vlgmr.msra.gmra.mxu1 %vm304_vm2, %v8172_v21  ;;  %vm8136_vm5 = vcmp.eq.f32.partialorder %v8135_v5, 8.507059e+37  ;;  %v8174_v12 = vmul.f32 %v14875_v9, %v8153_v60  ;;  %v8175_v41 = vmul.f32 %v14864_v46, %v8167_v51  ;;  %v5586_v9 = vld [vmem:[#allocation10 + $0x58] sm:$0xff] }
0x1e50   :  { %8379 = vmatpush.msrb.mxu1 %v8359_v61  ;;  %8423 = vmatpush.msra.mxu2 %v5586_v9  ;;  %v6365_v24 = vadd.f32 %v11813_v56, %v14765_v7  ;;  %v7061_v37 = vadd.f32 %v14814_v52, %v6364_v8  ;;  %v6362_v61 = vadd.f32 %v11813_v56, %v14748_v18  ;;  %v8533_v9 = vld [vmem:[#allocation9 + $0x70] sm:$0xff] }
0x1e51   :  { %v8130_v49 = vadd.f32 %v12199_v54, %v8129_v58  ;;  %11334 = vmatmul.msk.f32.vlgmr.msrb.gmra.mxu3 %vm304_vm2, %v14812_v1  ;;  %v7060_v27 = vadd.f32 %v14808_v63, %v6363_v36  ;;  %v6359_v18 = vadd.f32 %v11813_v56, %v14733_v55 }
0x1e52   :  { %v7062_v3 = vadd.f32 %v14821_v2, %v6365_v24  ;;  %v7059_v7 = vadd.f32 %v14804_v25, %v6362_v61  ;;  %v6360_v2 = vadd.f32 %v11813_v56, %v14737_v31 }
0x1e53   :  { %v8134_v59 = vsel %vm8133_vm4, %v12199_v54, %v8130_v49  ;;  %v8333_v22 = vpop.permute.xlu1 %8332  ;;  %v6361_v49 = vadd.f32 %v11813_v56, %v14743_v43  ;;  %v6358_v43 = vadd.f32 %v11813_v56, %v14724_v33  ;;  %v7056_v25 = vadd.f32 %v14798_v42, %v6359_v18  ;;  %v8458_v33 = vld [vmem:[#allocation6 + $0x8] sm:$0xff]  ;;  %v8459_v42 = vld [vmem:[#allocation6 + $0x10] sm:$0xff] }
0x1e54   :  { %v8139_v20 = vsel %vm8136_vm5, %v8138_v35, %v8134_v59  ;;  %8353 = vmatpush.msra.mxu0 %v8333_v22  ;;  %v7057_v63 = vadd.f32 %v14800_v15, %v6360_v2  ;;  %v8457_v15 = vld [vmem:[#allocation6] sm:$0xff] }
0x1e55   :  { %v8173_v21 = vmul.f32 %v14885_v57, %v8139_v20  ;;  %v7058_v4 = vadd.f32 %v14802_v23, %v6361_v49  ;;  %v7055_v31 = vadd.f32 %v14796_v53, %v6358_v43  ;;  %v8534_v53 = vld [vmem:[#allocation9 + $0x78] sm:$0xff] }
0x1e56   :  { %8583 = vmatpush.msra.mxu1 %v8534_v53 }
0x1e57   :  { %11363 = vmatmul.msk.f32.vlgmr.msrb.gmra.mxu2 %vm304_vm2, %v8173_v21  ;;  %11364 = vmatmul.msk.f32.vlgmr.msra.gmra.mxu0 %vm304_vm2, %v8174_v12 }
0x1e58   :  { %11365 = vmatmul.msk.f32.vlgmr.msrb.gmra.mxu1 %vm304_vm2, %v8175_v41 }
0x1e59   :  { %11335 = vmatmul.msk.f32.gmra.mxu3 %vm304_vm2, %v14806_v19  ;;  %8584 = vmatpush.msra.mxu1 %v8533_v9 }
0x1e5b   :  { %v7554_v1 = vpop.f32.mrf.mxu3 }
0x1e61   :  { %11336 = vmatmul.msk.f32.gmra.mxu3 %vm304_vm2, %v7554_v1  ;;  %v8460_v1 = vld [vmem:[#allocation6 + $0x18] sm:$0xff] }
0x1e69   :  { %11337 = vmatmul.msk.f32.gmra.mxu3 %vm304_vm2, %v14818_v13 }
0x1e71   :  { %11338 = vmatmul.msk.f32.gmra.mxu3 %vm304_vm2, %v14810_v48 }
0x1ebc   :  { %v8199_v46 = vpop.f32.mrf.mxu0 }
0x1ebd   :  { %11366 = vmatmul.msk.f32.vlgmr.msra.gmra.mxu2 %vm304_vm2, %v8199_v46  ;;  %v8532_v46 = vld [vmem:[#allocation9 + $0x68] sm:$0xff] }
0x1ebe   :  { %8585 = vmatpush.msra.mxu1 %v8532_v46 }
0x1ec4   :  { %v8225_v57 = vpop.f32.mrf.mxu1 }
0x1ec5   :  { %11367 = vmatmul.msk.f32.gmra.mxu2 %vm304_vm2, %v8225_v57  ;;  %v8461_v57 = vld [vmem:[#allocation6 + $0x20] sm:$0xff] }
0x1ecb   :  { %v8251_v38 = vpop.f32.mrf.mxu2 }
0x1ecc   :  { %v7632_v32 = vpop.f32.mrf.mxu3  ;;  %v8277_v19 = vpop.f32.mrf.mxu0 }
0x1ecd   :  { %11339 = vmatmul.msk.f32.gmra.mxu3 %vm304_vm2, %v7632_v32  ;;  %11368 = vmatmul.msk.f32.gmra.mxu2 %vm304_vm2, %v8251_v38  ;;  %v8303_v48 = vpop.f32.mrf.mxu1  ;;  %v8462_v38 = vld [vmem:[#allocation6 + $0x28] sm:$0xff]  ;;  %v8463_v32 = vld [vmem:[#allocation6 + $0x30] sm:$0xff] }
0x1ed4   :  { %v8355_v39 = vpop.f32.mrf.mxu0  ;;  %v7728_v44 = vpop.f32.mrf.mxu3 }
0x1ed5   :  { %11340 = vmatmul.msk.f32.gmra.mxu3 %vm304_vm2, %v14823_v26  ;;  %11369 = vmatmul.msk.f32.gmra.mxu2 %vm304_vm2, %v8277_v19  ;;  %v8381_v54 = vpop.f32.mrf.mxu1  ;;  %v7752_v21 = vadd.f32 %v7728_v44, %v7055_v31  ;;  %v8464_v19 = vld [vmem:[#allocation6 + $0x38] sm:$0xff] }
0x1eda   :  { %v8329_v13 = vpop.f32.mrf.mxu2 }
0x1edc   :  { %v7731_v28 = vpop.f32.mrf.mxu3 }
0x1edd   :  { %11341 = vmatmul.msk.f32.gmra.mxu3 %vm304_vm2, %v14816_v14  ;;  %11370 = vmatmul.msk.f32.gmra.mxu2 %vm304_vm2, %v8303_v48  ;;  %v7753_v23 = vadd.f32 %v7731_v28, %v7056_v25  ;;  %v8531_v48 = vld [vmem:[#allocation9 + $0x60] sm:$0xff] }
0x1ede   :  { %8586 = vmatpush.msra.mxu1 %v8531_v48 }
0x1ee4   :  { %v7734_v6 = vpop.f32.mrf.mxu3 }
0x1ee5   :  { %11371 = vmatmul.msk.f32.gmra.mxu2 %vm304_vm2, %v8329_v13  ;;  %v7754_v22 = vadd.f32 %v7734_v6, %v7057_v63 }
0x1eec   :  { %v7737_v11 = vpop.f32.mrf.mxu3 }
0x1eed   :  { %11372 = vmatmul.msk.f32.gmra.mxu2 %vm304_vm2, %v8355_v39  ;;  %v7755_v51 = vadd.f32 %v7737_v11, %v7058_v4 }
0x1ef4   :  { %v7740_v47 = vpop.f32.mrf.mxu3 }
0x1ef5   :  { %11373 = vmatmul.msk.f32.gmra.mxu2 %vm304_vm2, %v8381_v54  ;;  %v7756_v52 = vadd.f32 %v7740_v47, %v7059_v7 }
0x1f40   :  { %v8425_v26 = vpop.f32.mrf.mxu2 }
0x1f41   :  { %v8449_v55 = vadd.f32 %v8425_v26, %v7752_v21 }
0x1f48   :  { %v8428_v62 = vpop.f32.mrf.mxu2 }
0x1f49   :  { %v8450_v41 = vadd.f32 %v8428_v62, %v7753_v23 }
0x1f50   :  { %v8431_v17 = vpop.f32.mrf.mxu2  ;;  %v7743_v30 = vpop.f32.mrf.mxu3 }
0x1f51   :  { %v7757_v60 = vadd.f32 %v7743_v30, %v7060_v27  ;;  %v8451_v12 = vadd.f32 %v8431_v17, %v7754_v22 }
0x1f58   :  { %v8434_v14 = vpop.f32.mrf.mxu2  ;;  %v7746_v16 = vpop.f32.mrf.mxu3 }
0x1f59   :  { %v7758_v50 = vadd.f32 %v7746_v16, %v7061_v37  ;;  %v8452_v20 = vadd.f32 %v8434_v14, %v7755_v51  ;;  %v11814_v14 = vld [vmem:[%s15895_s5 + $0x3] ss:$0 sm:$0xff] }
0x1f60   :  { %v8437_v29 = vpop.f32.mrf.mxu2  ;;  %v7749_v40 = vpop.f32.mrf.mxu3 }
0x1f61   :  { %v7759_v58 = vadd.f32 %v7749_v40, %v7062_v3  ;;  %v8453_v59 = vadd.f32 %v8437_v29, %v7756_v52 }
0x1f68   :  { %v8440_v45 = vpop.f32.mrf.mxu2 }
0x1f69   :  { %v8454_v35 = vadd.f32 %v8440_v45, %v7757_v60 }
0x1f70   :  { %v8443_v34 = vpop.f32.mrf.mxu2 }
0x1f71   :  { %v8455_v10 = vadd.f32 %v8443_v34, %v7758_v50 }
0x1f78   :  { %v8446_v5 = vpop.f32.mrf.mxu2 }
0x1f79   :  { %v8456_v0 = vadd.f32 %v8446_v5, %v7759_v58 }
0x1f7b   :  { %8497 = vmatpush.msrb.mxu0 %v8456_v0 }
0x1f7d   :  { %8498 = vmatpush.msrb.mxu0 %v8455_v10 }
0x1f7f   :  { %8499 = vmatpush.msrb.mxu0 %v8454_v35 }
0x1f81   :  { %8500 = vmatpush.msrb.mxu0 %v8453_v59 }
0x1f83   :  { %8501 = vmatpush.msrb.mxu0 %v8452_v20 }
0x1f85   :  { %8502 = vmatpush.msrb.mxu0 %v8451_v12 }
0x1f87   :  { %8503 = vmatpush.msrb.mxu0 %v8450_v41 }
0x1f89   :  { %8504 = vmatpush.msrb.mxu0 %v8449_v55 }
0x1f8a   :  { %11374 = vmatmul.msk.f32.vlgmr.msrb.gmra.mxu0 %vm144_vm0, %v8457_v15 }
0x1f92   :  { %11375 = vmatmul.msk.f32.gmra.mxu0 %vm144_vm0, %v8458_v33 }
0x1f9a   :  { %11376 = vmatmul.msk.f32.gmra.mxu0 %vm144_vm0, %v8459_v42 }
0x1fa2   :  { %11377 = vmatmul.msk.f32.gmra.mxu0 %vm144_vm0, %v8460_v1 }
0x1faa   :  { %11378 = vmatmul.msk.f32.gmra.mxu0 %vm144_vm0, %v8461_v57 }
0x1fb2   :  { %11379 = vmatmul.msk.f32.gmra.mxu0 %vm144_vm0, %v8462_v38 }
0x1fba   :  { %11380 = vmatmul.msk.f32.gmra.mxu0 %vm144_vm0, %v8463_v32 }
0x1fc2   :  { %11381 = vmatmul.msk.f32.gmra.mxu0 %vm144_vm0, %v8464_v19 }
0x2007   :  { %v8506_v13 = vpop.f32.mrf.mxu0 }
0x2008   :  { %11384 = vmatmul.msk.f32.vlgmr.msra.gmra.mxu1 %vm223_vm1, %v8506_v13 }
0x200f   :  { %v8509_v39 = vpop.f32.mrf.mxu0 }
0x2010   :  { %11385 = vmatmul.msk.f32.gmra.mxu1 %vm223_vm1, %v8509_v39 }
0x2017   :  { %v8512_v54 = vpop.f32.mrf.mxu0 }
0x2018   :  { %11386 = vmatmul.msk.f32.gmra.mxu1 %vm223_vm1, %v8512_v54 }
0x201f   :  { %v8515_v44 = vpop.f32.mrf.mxu0 }
0x2020   :  { %11387 = vmatmul.msk.f32.gmra.mxu1 %vm223_vm1, %v8515_v44 }
0x2027   :  { %v8518_v28 = vpop.f32.mrf.mxu0 }
0x2028   :  { %11388 = vmatmul.msk.f32.gmra.mxu1 %vm223_vm1, %v8518_v28 }
0x202f   :  { %v8521_v26 = vpop.f32.mrf.mxu0 }
0x2030   :  { %11389 = vmatmul.msk.f32.gmra.mxu1 %vm223_vm1, %v8521_v26 }
0x2037   :  { %v8524_v6 = vpop.f32.mrf.mxu0 }
0x2038   :  { %11390 = vmatmul.msk.f32.gmra.mxu1 %vm223_vm1, %v8524_v6 }
0x203f   :  { %v8527_v62 = vpop.f32.mrf.mxu0 }
0x2040   :  { %11391 = vmatmul.msk.f32.gmra.mxu1 %vm223_vm1, %v8527_v62 }
0x2085   :  { %v8588_v11 = vpop.f32.mrf.mxu1 }
0x2086   :  { %v15101_v8 = vadd.f32 %v11814_v14, %v8588_v11 }
0x2088   :  { %v15132_v7 = vmul.f32 0.35355338, %v15101_v8 }
0x208d   :  { %v8591_v17 = vpop.f32.mrf.mxu1 }
0x208e   :  { %v15109_v36 = vadd.f32 %v11814_v14, %v8591_v17 }
0x2090   :  { %v15144_v52 = vmul.f32 0.35355338, %v15109_v36 }
0x2095   :  { %v8594_v47 = vpop.f32.mrf.mxu1 }
0x2096   :  { %v15117_v58 = vadd.f32 %v11814_v14, %v8594_v47 }
0x2098   :  { %v15150_v35 = vmul.f32 0.35355338, %v15117_v58 }
0x209d   :  { %v8597_v30 = vpop.f32.mrf.mxu1 }
0x209e   :  { %v15089_v29 = vadd.f32 %v11814_v14, %v8597_v30 }
0x20a0   :  { %8667 = vrot.lane.b32.xlu1 %v15089_v29, %s12488_s21  ;;  %v15155_v18 = vmul.f32 0.35355338, %v15089_v29 }
0x20a5   :  { %v8600_v45 = vpop.f32.mrf.mxu1 }
0x20a6   :  { %v15093_v16 = vadd.f32 %v11814_v14, %v8600_v45 }
0x20a8   :  { %8704 = vrot.lane.b32.xlu1 %v15093_v16, %s12488_s21  ;;  %v15160_v63 = vmul.f32 0.35355338, %v15093_v16 }
0x20ad   :  { %v8603_v34 = vpop.f32.mrf.mxu1 }
0x20ae   :  { %v15111_v37 = vadd.f32 %v11814_v14, %v8603_v34 }
0x20b0   :  { %v15165_v51 = vmul.f32 0.35355338, %v15111_v37 }
0x20b5   :  { %v8606_v56 = vpop.f32.mrf.mxu1 }
0x20b6   :  { %v15097_v24 = vadd.f32 %v11814_v14, %v8606_v56 }
0x20b8   :  { %8743 = vrot.lane.b32.xlu2 %v15097_v24, %s12488_s21  ;;  %v15124_v27 = vmul.f32 0.35355338, %v15097_v24 }
0x20bd   :  { %v8609_v40 = vpop.f32.mrf.mxu1 }
0x20be   :  { %v15103_v3 = vadd.f32 %v11814_v14, %v8609_v40 }
0x20c0   :  { %8626 = vrot.lane.b32.xlu2 %v15101_v8, %s12488_s21  ;;  %8745 = vrot.lane.b32.xlu0 %v15103_v3, %s12488_s21  ;;  %v15135_v60 = vmul.f32 0.35355338, %v15103_v3  ;;  %v15178_v23 = vpack.i.bf16 %v15097_v24, %v15103_v3 }
0x20c8   :  { %8706 = vrot.lane.b32.xlu2 %v15111_v37, %s12488_s21  ;;  %8628 = vrot.lane.b32.xlu0 %v15109_v36, %s12488_s21 }
0x20d0   :  { %8665 = vrot.lane.b32.xlu0 %v15117_v58, %s12488_s21 }
0x2112   :  { %v8744_v5 = vpop.permute.xlu2 %8743  ;;  %v8668_v49 = vpop.permute.xlu1 %8667 }
0x211a   :  { %v8627_v50 = vpop.permute.xlu2 %8626  ;;  %v8705_v4 = vpop.permute.xlu1 %8704 }
0x2122   :  { %v8707_v2 = vpop.permute.xlu2 %8706 }
0x2132   :  { %v8746_v61 = vpop.permute.xlu0 %8745 }
0x2133   :  { %11404 = vmatpush.xpose.msk.msrb.mxu2 %vm304_vm2, %v8746_v61  ;;  %v15222_v61 = vpack.i.bf16 %v15101_v8, %v15109_v36 }
0x2137   :  { %11405 = vmatpush.xpose.msk.msrb.mxu2 %vm304_vm2, %v8744_v5 }
0x213a   :  { %11406 = vmatmul.msk.f32.vlgmr.msrb.gmra.mxu2 %vm304_vm2, %v15124_v27  ;;  %v8629_v0 = vpop.permute.xlu0 %8628 }
0x213b   :  { %11392 = vmatpush.xpose.msk.msra.mxu3 %vm304_vm2, %v8629_v0 }
0x213f   :  { %11393 = vmatpush.xpose.msk.msra.mxu3 %vm304_vm2, %v8627_v50  ;;  %v15228_v50 = vpack.i.bf16 %v15093_v16, %v15111_v37 }
0x2142   :  { %11394 = vmatmul.msk.f32.vlgmr.msra.gmra.mxu3 %vm304_vm2, %v15132_v7  ;;  %v8666_v10 = vpop.permute.xlu0 %8665  ;;  %11407 = vmatmul.msk.f32.gmra.mxu2 %vm304_vm2, %v15135_v60 }
0x2143   :  { %11396 = vmatpush.xpose.msk.msrb.mxu3 %vm304_vm2, %v8668_v49 }
0x2147   :  { %11397 = vmatpush.xpose.msk.msrb.mxu3 %vm304_vm2, %v8666_v10 }
0x214a   :  { %11395 = vmatmul.msk.f32.gmra.mxu3 %vm304_vm2, %v15144_v52 }
0x214b   :  { %11400 = vmatpush.xpose.msk.msra.mxu3 %vm304_vm2, %v8707_v2 }
0x214f   :  { %11401 = vmatpush.xpose.msk.msra.mxu3 %vm304_vm2, %v8705_v4 }
0x2152   :  { %11398 = vmatmul.msk.f32.vlgmr.msrb.gmra.mxu3 %vm304_vm2, %v15150_v35 }
0x215a   :  { %11399 = vmatmul.msk.f32.gmra.mxu3 %vm304_vm2, %v15155_v18 }
0x2162   :  { %11402 = vmatmul.msk.f32.vlgmr.msra.gmra.mxu3 %vm304_vm2, %v15160_v63 }
0x216a   :  { %11403 = vmatmul.msk.f32.gmra.mxu3 %vm304_vm2, %v15165_v51 }
0x21bd   :  { %v8774_v59 = vpop.f32.mrf.mxu2 }
0x21be   :  { %v8798_v43 = vsel %vm3413_vm14, %v8774_v59, -inf }
0x21bf   :  { %8799 = vmax.xlane.f32.xlu0 %v8798_v43 }
0x21c5   :  { %v8657_v25 = vpop.f32.mrf.mxu3  ;;  %v8777_v22 = vpop.f32.mrf.mxu2 }
0x21c6   :  { %v8780_v20 = vsel %vm3413_vm14, %v8657_v25, -inf  ;;  %v8801_v31 = vsel %vm3413_vm14, %v8777_v22, -inf }
0x21c7   :  { %8781 = vmax.xlane.f32.xlu1 %v8780_v20  ;;  %8802 = vmax.xlane.f32.xlu2 %v8801_v31 }
0x21cd   :  { %v8660_v12 = vpop.f32.mrf.mxu3 }
0x21ce   :  { %v8783_v55 = vsel %vm3413_vm14, %v8660_v12, -inf }
0x21d3   :  { %9269 = vrot.lane.b32.xlu0 %v15111_v37, %s12491_s24 }
0x21d5   :  { %v15182_v21 = vpop.f32.mrf.mxu3 }
0x21d6   :  { %v8786_v30 = vsel %vm3413_vm14, %v15182_v21, -inf }
0x21db   :  { %9263 = vrot.lane.b32.xlu0 %v15160_v63, %s12490_s23 }
0x21dd   :  { %v15184_v41 = vpop.f32.mrf.mxu3 }
0x21de   :  { %v8789_v34 = vsel %vm3413_vm14, %v15184_v41, -inf }
0x21df   :  { %11729 = vrot.lane.b32.xlu2 %v15178_v23, %s12489_s22 }
0x21e5   :  { %v15187_v15 = vpop.f32.mrf.mxu3 }
0x21e6   :  { %v8792_v33 = vsel %vm3413_vm14, %v15187_v15, -inf }
0x21ed   :  { %v15191_v42 = vpop.f32.mrf.mxu3 }
0x21ee   :  { %v8795_v1 = vsel %vm3413_vm14, %v15191_v42, -inf }
0x2208   :  { %8784 = vmax.xlane.f32.xlu2 %v8783_v55 }
0x2210   :  { %8793 = vmax.xlane.f32.xlu2 %v8792_v33 }
0x2218   :  { %8796 = vmax.xlane.f32.xlu2 %v8795_v1 }
0x2232   :  { %v8800_v53 = vpop.xlane.xlu0 %8799 }
0x2233   :  { %v8810_v9 = vsub.f32 %v8774_v59, %v8800_v53 }
0x2235   :  { %v8824_v46 = vmul.f32 1.442695, %v8810_v9 }
0x2237   :  { %12200 = vpow2.f32 %v8824_v46 }
0x223a   :  { %v8803_v57 = vpop.xlane.xlu2 %8802  ;;  %v8782_v6 = vpop.xlane.xlu1 %8781 }
0x223b   :  { %v8811_v38 = vsub.f32 %v8777_v22, %v8803_v57  ;;  %v8804_v62 = vsub.f32 %v8657_v25, %v8782_v6 }
0x223d   :  { %v15195_v32 = vpop.eup %12200  ;;  %v8826_v19 = vmul.f32 1.442695, %v8811_v38  ;;  %v8812_v11 = vmul.f32 1.442695, %v8804_v62 }
0x223e   :  { %v8846_v48 = vsel %vm3413_vm14, %v15195_v32, 0.0 }
0x223f   :  { %8847 = vadd.xlane.f32.xlu1 %v8846_v48  ;;  %12202 = vpow2.f32 %v8826_v19 }
0x2240   :  { %12204 = vpow2.f32 %v8812_v11 }
0x2242   :  { %v11730_v13 = vpop.permute.xlu2 %11729 }
0x2243   :  { %v11731_v39 = vunpack.i.l.bf16 %v11730_v13  ;;  %v11732_v54 = vunpack.i.h.bf16 %v11730_v13 }
0x2245   :  { %9103 = vmatpush.msra.mxu2 %v11731_v39  ;;  %v15199_v44 = vpop.eup %12202  ;;  %v9270_v28 = vpop.permute.xlu0 %9269 }
0x2246   :  { %v8849_v26 = vsel %vm3413_vm14, %v15199_v44, 0.0  ;;  %v15210_v45 = vpop.eup %12204 }
0x2247   :  { %9104 = vmatpush.msra.mxu2 %v11732_v54  ;;  %8850 = vadd.xlane.f32.xlu0 %v8849_v26  ;;  %v8828_v5 = vsel %vm3413_vm14, %v15210_v45, 0.0 }
0x2249   :  { %11432 = vmatpush.xpose.msk.msrb.mxu2 %vm304_vm2, %v9270_v28 }
0x224d   :  { %v9264_v49 = vpop.permute.xlu0 %9263 }
0x2258   :  { %9267 = vrot.lane.b32.xlu1 %v15093_v16, %s12491_s24 }
0x225b   :  { %9265 = vrot.lane.b32.xlu0 %v15165_v51, %s12490_s23 }
0x227b   :  { %v8785_v17 = vpop.xlane.xlu2 %8784 }
0x227c   :  { %v8805_v47 = vsub.f32 %v8660_v12, %v8785_v17 }
0x227e   :  { %v8814_v14 = vmul.f32 1.442695, %v8805_v47 }
0x2280   :  { %12206 = vpow2.f32 %v8814_v14 }
0x2282   :  { %8787 = vmax.xlane.f32.xlu1 %v8786_v30 }
0x2283   :  { %v8794_v26 = vpop.xlane.xlu2 %8793 }
0x2285   :  { %8790 = vmax.xlane.f32.xlu0 %v8789_v34 }
0x2286   :  { %v15214_v56 = vpop.eup %12206 }
0x2287   :  { %v8831_v40 = vsel %vm3413_vm14, %v15214_v56, 0.0 }
0x2288   :  { %8832 = vadd.xlane.f32.xlu2 %v8831_v40 }
0x228a   :  { %8829 = vadd.xlane.f32.xlu1 %v8828_v5 }
0x228b   :  { %v8797_v6 = vpop.xlane.xlu2 %8796 }
0x2299   :  { %11734 = vrot.lane.b32.xlu0 %v15222_v61, %s12489_s22 }
0x22a1   :  { %11744 = vrot.lane.b32.xlu0 %v15228_v50, %s12489_s22 }
0x22a9   :  { %9189 = vrot.lane.b32.xlu0 %v15101_v8, %s12491_s24 }
0x22b1   :  { %9230 = vrot.lane.b32.xlu0 %v15089_v29, %s12491_s24 }
0x22b2   :  { %v8848_v0 = vpop.xlane.xlu1 %8847 }
0x22b3   :  { %12208 = vrcp.f32 %v8848_v0  ;;  %v8947_v43 = vand.u32 2147483648, %v8848_v0  ;;  %v8945_v22 = vand.u32 2147483647, %v8848_v0  ;;  %vm8941_vm6 = vweird.f32 %v8848_v0 }
0x22b5   :  { %v8948_v31 = vor.u32 1.1754944e-38, %v8947_v43  ;;  %vm8946_vm8 = vcmp.eq.f32.partialorder %v8945_v22, 8.507059e+37 }
0x22b9   :  { %v12209_v10 = vpop.eup %12208  ;;  %9187 = vrot.lane.b32.xlu0 %v15144_v52, %s12490_s23 }
0x22ba   :  { %v8937_v2 = vmul.f32 %v12209_v10, %v8848_v0  ;;  %v8851_v4 = vpop.xlane.xlu0 %8850  ;;  %vm8942_vm0 = vweird.f32 %v12209_v10 }
0x22bb   :  { %12210 = vrcp.f32 %v8851_v4  ;;  %vm8943_vm7 = vmor %vm8941_vm6, %vm8942_vm0  ;;  %v8961_v46 = vand.u32 2147483648, %v8851_v4  ;;  %v8959_v38 = vand.u32 2147483647, %v8851_v4  ;;  %vm8955_vm10 = vweird.f32 %v8851_v4 }
0x22bc   :  { %v8938_v59 = vsub.f32 1.0, %v8937_v2 }
0x22bd   :  { %v8962_v48 = vor.u32 1.1754944e-38, %v8961_v46  ;;  %vm8960_vm12 = vcmp.eq.f32.partialorder %v8959_v38, 8.507059e+37 }
0x22be   :  { %v8939_v25 = vmul.f32 %v12209_v10, %v8938_v59 }
0x22c0   :  { %v8940_v20 = vadd.f32 %v12209_v10, %v8939_v25 }
0x22c1   :  { %v12211_v12 = vpop.eup %12210  ;;  %9308 = vrot.lane.b32.xlu0 %v15103_v3, %s12491_s24 }
0x22c2   :  { %v8944_v55 = vsel %vm8943_vm7, %v12209_v10, %v8940_v20  ;;  %v8951_v1 = vmul.f32 %v12211_v12, %v8851_v4  ;;  %vm8956_vm9 = vweird.f32 %v12211_v12 }
0x22c3   :  { %v8949_v33 = vsel %vm8946_vm8, %v8948_v31, %v8944_v55  ;;  %vm8957_vm11 = vmor %vm8955_vm10, %vm8956_vm9 }
0x22c4   :  { %v8970_v53 = vmul.f32 %v15195_v32, %v8949_v33  ;;  %v8952_v9 = vsub.f32 1.0, %v8951_v1 }
0x22c6   :  { %11414 = vmatmul.msk.f32.vlgmr.msra.gmra.mxu2 %vm3413_vm14, %v8970_v53  ;;  %v8953_v57 = vmul.f32 %v12211_v12, %v8952_v9 }
0x22c8   :  { %v8954_v19 = vadd.f32 %v12211_v12, %v8953_v57 }
0x22c9   :  { %9752 = vrot.lane.b32.xlu0 %v15109_v36, %s12493_s26 }
0x22ca   :  { %v9268_v13 = vpop.permute.xlu1 %9267  ;;  %v8958_v39 = vsel %vm8957_vm11, %v12211_v12, %v8954_v19 }
0x22cb   :  { %11433 = vmatpush.xpose.msk.msrb.mxu2 %vm304_vm2, %v9268_v13  ;;  %v8963_v32 = vsel %vm8960_vm12, %v8962_v48, %v8958_v39 }
0x22cc   :  { %v8971_v54 = vmul.f32 %v15199_v44, %v8963_v32  ;;  %v8808_v44 = vsub.f32 %v15187_v15, %v8794_v26 }
0x22cd   :  { %v9266_v28 = vpop.permute.xlu0 %9265 }
0x22ce   :  { %11415 = vmatmul.msk.f32.gmra.mxu2 %vm3413_vm14, %v8971_v54  ;;  %v8820_v34 = vmul.f32 1.442695, %v8808_v44 }
0x22d1   :  { %9750 = vrot.lane.b32.xlu0 %v15101_v8, %s12493_s26 }
0x22d6   :  { %11434 = vmatmul.msk.f32.vlgmr.msrb.gmra.mxu2 %vm304_vm2, %v9264_v49  ;;  %v8809_v49 = vsub.f32 %v15191_v42, %v8797_v6 }
0x22d9   :  { %9746 = vrot.lane.b32.xlu0 %v15132_v7, %s12494_s1 }
0x22de   :  { %11435 = vmatmul.msk.f32.gmra.mxu2 %vm304_vm2, %v9266_v28 }
0x22f5   :  { %v8788_v62 = vpop.xlane.xlu1 %8787 }
0x22f6   :  { %v8806_v11 = vsub.f32 %v15182_v21, %v8788_v62 }
0x22f8   :  { %v8816_v17 = vmul.f32 1.442695, %v8806_v11  ;;  %v8791_v47 = vpop.xlane.xlu0 %8790 }
0x22f9   :  { %v8807_v14 = vsub.f32 %v15184_v41, %v8791_v47  ;;  %v8822_v41 = vmul.f32 1.442695, %v8809_v49 }
0x22fa   :  { %12212 = vpow2.f32 %v8816_v17 }
0x22fb   :  { %v8833_v30 = vpop.xlane.xlu2 %8832  ;;  %v8818_v40 = vmul.f32 1.442695, %v8807_v14  ;;  %v15281_v14 = vpack.i.bf16 %v15117_v58, %v15089_v29 }
0x22fc   :  { %12214 = vrcp.f32 %v8833_v30  ;;  %v8877_v48 = vand.u32 2147483648, %v8833_v30  ;;  %vm8871_vm0 = vweird.f32 %v8833_v30  ;;  %v8875_v32 = vand.u32 2147483647, %v8833_v30 }
0x22fd   :  { %v8830_v5 = vpop.xlane.xlu1 %8829  ;;  %12216 = vpow2.f32 %v8818_v40 }
0x22fe   :  { %12218 = vrcp.f32 %v8830_v5  ;;  %v8863_v20 = vand.u32 2147483648, %v8830_v5  ;;  %v8861_v33 = vand.u32 2147483647, %v8830_v5  ;;  %vm8857_vm15 = vweird.f32 %v8830_v5 }
0x22ff   :  { %12220 = vpow2.f32 %v8820_v34  ;;  %v8878_v6 = vor.u32 1.1754944e-38, %v8877_v48  ;;  %vm8876_vm7 = vcmp.eq.f32.partialorder %v8875_v32, 8.507059e+37 }
0x2300   :  { %v15256_v0 = vpop.eup %12212  ;;  %12222 = vpow2.f32 %v8822_v41  ;;  %v8864_v9 = vor.u32 1.1754944e-38, %v8863_v20  ;;  %vm8862_vm5 = vcmp.eq.f32.partialorder %v8861_v33, 8.507059e+37 }
0x2301   :  { %v8834_v21 = vsel %vm3413_vm14, %v15256_v0, 0.0 }
0x2302   :  { %v12215_v15 = vpop.eup %12214  ;;  %8835 = vadd.xlane.f32.xlu1 %v8834_v21 }
0x2303   :  { %v8867_v10 = vmul.f32 %v12215_v15, %v8833_v30  ;;  %v15261_v2 = vpop.eup %12216  ;;  %vm8872_vm4 = vweird.f32 %v12215_v15 }
0x2304   :  { %v12219_v4 = vpop.eup %12218  ;;  %v8837_v59 = vsel %vm3413_vm14, %v15261_v2, 0.0  ;;  %vm8873_vm6 = vmor %vm8871_vm0, %vm8872_vm4 }
0x2305   :  { %v15265_v43 = vpop.eup %12220  ;;  %v8868_v25 = vsub.f32 1.0, %v8867_v10  ;;  %v8853_v22 = vmul.f32 %v12219_v4, %v8830_v5  ;;  %8838 = vadd.xlane.f32.xlu2 %v8837_v59  ;;  %vm8858_vm13 = vweird.f32 %v12219_v4 }
0x2306   :  { %v8840_v31 = vsel %vm3413_vm14, %v15265_v43, 0.0  ;;  %vm8859_vm3 = vmor %vm8857_vm15, %vm8858_vm13  ;;  %v15269_v57 = vpop.eup %12222 }
0x2307   :  { %v8854_v42 = vsub.f32 1.0, %v8853_v22  ;;  %v8869_v12 = vmul.f32 %v12215_v15, %v8868_v25  ;;  %v8843_v28 = vsel %vm3413_vm14, %v15269_v57, 0.0 }
0x2309   :  { %v8855_v55 = vmul.f32 %v12219_v4, %v8854_v42  ;;  %v8870_v38 = vadd.f32 %v12215_v15, %v8869_v12 }
0x230a   :  { %8841 = vadd.xlane.f32.xlu1 %v8840_v31 }
0x230b   :  { %v8856_v1 = vadd.f32 %v12219_v4, %v8855_v55  ;;  %v11735_v53 = vpop.permute.xlu0 %11734  ;;  %v8874_v26 = vsel %vm8873_vm6, %v12215_v15, %v8870_v38  ;;  %v8538_v15 = vld [vmem:[#allocation10 + $0x60] sm:$0xff] }
0x230c   :  { %v11736_v46 = vunpack.i.l.bf16 %v11735_v53  ;;  %v11737_v39 = vunpack.i.h.bf16 %v11735_v53  ;;  %v8879_v44 = vsel %vm8876_vm7, %v8878_v6, %v8874_v26 }
0x230d   :  { %v8860_v19 = vsel %vm8859_vm3, %v12219_v4, %v8856_v1  ;;  %v8965_v47 = vmul.f32 %v15214_v56, %v8879_v44 }
0x230e   :  { %v8865_v13 = vsel %vm8862_vm5, %v8864_v9, %v8860_v19  ;;  %8998 = vmatpush.msrb.mxu3 %v11736_v46 }
0x230f   :  { %v8964_v54 = vmul.f32 %v15210_v45, %v8865_v13 }
0x2310   :  { %8999 = vmatpush.msrb.mxu3 %v11737_v39 }
0x2311   :  { %11408 = vmatmul.msk.f32.vlgmr.msrb.gmra.mxu3 %vm3413_vm14, %v8964_v54 }
0x2312   :  { %8844 = vadd.xlane.f32.xlu1 %v8843_v28  ;;  %9151 = vmatpush.msra.mxu3 %v8538_v15 }
0x2313   :  { %v11745_v62 = vpop.permute.xlu0 %11744 }
0x2314   :  { %v11746_v11 = vunpack.i.l.bf16 %v11745_v62  ;;  %v11747_v17 = vunpack.i.h.bf16 %v11745_v62 }
0x2316   :  { %9068 = vmatpush.msra.mxu0 %v11746_v11 }
0x2318   :  { %9069 = vmatpush.msra.mxu0 %v11747_v17 }
0x2319   :  { %11409 = vmatmul.msk.f32.gmra.mxu3 %vm3413_vm14, %v8965_v47 }
0x231b   :  { %v15277_v45 = vpop.permute.xlu0 %9189 }
0x231d   :  { %11739 = vrot.lane.b32.xlu2 %v15281_v14, %s12489_s22 }
0x2323   :  { %v9231_v30 = vpop.permute.xlu0 %9230 }
0x2324   :  { %11428 = vmatpush.xpose.msk.msrb.mxu0 %vm304_vm2, %v9231_v30 }
0x2325   :  { %9185 = vrot.lane.b32.xlu2 %v15132_v7, %s12490_s23 }
0x232b   :  { %9191 = vrot.lane.b32.xlu1 %v15109_v36, %s12491_s24 }
0x232d   :  { %9228 = vrot.lane.b32.xlu2 %v15117_v58, %s12491_s24 }
0x2333   :  { %9224 = vrot.lane.b32.xlu1 %v15150_v35, %s12490_s23 }
0x2335   :  { %9226 = vrot.lane.b32.xlu2 %v15155_v18, %s12490_s23 }
0x233b   :  { %9306 = vrot.lane.b32.xlu1 %v15097_v24, %s12491_s24 }
0x233d   :  { %9302 = vrot.lane.b32.xlu2 %v15124_v27, %s12490_s23 }
0x2343   :  { %9304 = vrot.lane.b32.xlu1 %v15135_v60, %s12490_s23 }
0x2345   :  { %11749 = vrot.lane.b32.xlu2 %v15228_v50, %s12492_s25 }
0x2349   :  { %v15304_v56 = vpop.f32.mrf.mxu2 }
0x234b   :  { %9830 = vrot.lane.b32.xlu1 %v15111_v37, %s12493_s26 }
0x234d   :  { %9828 = vrot.lane.b32.xlu2 %v15093_v16, %s12493_s26 }
0x2351   :  { %v15310_v34 = vpop.f32.mrf.mxu2 }
0x2353   :  { %9748 = vrot.lane.b32.xlu1 %v15144_v52, %s12494_s1 }
0x2359   :  { %v15314_v40 = vpop.f32.mrf.mxu2 }
0x235a   :  { %v9353_v5 = vsel %vm3413_vm14, %v15314_v40, -inf }
0x235b   :  { %9354 = vmax.xlane.f32.xlu0 %v9353_v5 }
0x2361   :  { %v15320_v49 = vpop.f32.mrf.mxu2 }
0x2362   :  { %v9356_v10 = vsel %vm3413_vm14, %v15320_v49, -inf }
0x236f   :  { %9826 = vrot.lane.b32.xlu0 %v15165_v51, %s12494_s1 }
0x2375   :  { %v8836_v21 = vpop.xlane.xlu1 %8835 }
0x2376   :  { %12224 = vrcp.f32 %v8836_v21  ;;  %9357 = vmax.xlane.f32.xlu2 %v9356_v10  ;;  %v8889_v20 = vand.u32 2147483647, %v8836_v21  ;;  %v8891_v31 = vand.u32 2147483648, %v8836_v21  ;;  %vm8885_vm9 = vweird.f32 %v8836_v21 }
0x2378   :  { %v8839_v41 = vpop.xlane.xlu2 %8838  ;;  %vm8890_vm11 = vcmp.eq.f32.partialorder %v8889_v20, 8.507059e+37  ;;  %v8892_v38 = vor.u32 1.1754944e-38, %v8891_v31 }
0x2379   :  { %12226 = vrcp.f32 %v8839_v41  ;;  %vm8899_vm13 = vweird.f32 %v8839_v41  ;;  %v8905_v28 = vand.u32 2147483648, %v8839_v41  ;;  %v8903_v62 = vand.u32 2147483647, %v8839_v41 }
0x237b   :  { %v8906_v15 = vor.u32 1.1754944e-38, %v8905_v28  ;;  %vm8904_vm4 = vcmp.eq.f32.partialorder %v8903_v62, 8.507059e+37 }
0x237c   :  { %v12225_v4 = vpop.eup %12224 }
0x237d   :  { %v8881_v59 = vmul.f32 %v12225_v4, %v8836_v21  ;;  %v8842_v25 = vpop.xlane.xlu1 %8841  ;;  %vm8886_vm8 = vweird.f32 %v12225_v4 }
0x237e   :  { %12228 = vrcp.f32 %v8842_v25  ;;  %vm8887_vm10 = vmor %vm8885_vm9, %vm8886_vm8  ;;  %v8919_v17 = vand.u32 2147483648, %v8842_v25  ;;  %v8917_v30 = vand.u32 2147483647, %v8842_v25  ;;  %vm8913_vm5 = vweird.f32 %v8842_v25 }
0x237f   :  { %v8882_v22 = vsub.f32 1.0, %v8881_v59  ;;  %v12227_v42 = vpop.eup %12226 }
0x2380   :  { %v8895_v55 = vmul.f32 %v12227_v42, %v8839_v41  ;;  %v11740_v33 = vpop.permute.xlu2 %11739  ;;  %vm8900_vm12 = vweird.f32 %v12227_v42  ;;  %v8920_v41 = vor.u32 1.1754944e-38, %v8919_v17  ;;  %vm8918_vm6 = vcmp.eq.f32.partialorder %v8917_v30, 8.507059e+37 }
0x2381   :  { %v8883_v12 = vmul.f32 %v12225_v4, %v8882_v22  ;;  %v11741_v1 = vunpack.i.l.bf16 %v11740_v33  ;;  %v11742_v19 = vunpack.i.h.bf16 %v11740_v33  ;;  %vm15325_vm15 = vmor %vm8899_vm13, %vm8900_vm12 }
0x2382   :  { %v8896_v9 = vsub.f32 1.0, %v8895_v55 }
0x2383   :  { %v8884_v53 = vadd.f32 %v12225_v4, %v8883_v12  ;;  %9033 = vmatpush.msrb.mxu1 %v11741_v1 }
0x2384   :  { %v12229_v46 = vpop.eup %12228  ;;  %v8897_v13 = vmul.f32 %v12227_v42, %v8896_v9 }
0x2385   :  { %v8888_v48 = vsel %vm8887_vm10, %v12225_v4, %v8884_v53  ;;  %v8909_v39 = vmul.f32 %v12229_v46, %v8842_v25  ;;  %v8845_v32 = vpop.xlane.xlu1 %8844  ;;  %9034 = vmatpush.msrb.mxu1 %v11742_v19  ;;  %vm8914_vm3 = vweird.f32 %v12229_v46  ;;  %v9188_v19 = vpop.permute.xlu0 %9187 }
0x2386   :  { %v8893_v54 = vsel %vm8890_vm11, %v8892_v38, %v8888_v48  ;;  %12230 = vrcp.f32 %v8845_v32  ;;  %v8898_v6 = vadd.f32 %v12227_v42, %v8897_v13  ;;  %vm8915_vm0 = vmor %vm8913_vm5, %vm8914_vm3  ;;  %v8933_v55 = vand.u32 2147483648, %v8845_v32 }
0x2387   :  { %v8966_v26 = vmul.f32 %v15256_v0, %v8893_v54  ;;  %v8910_v11 = vsub.f32 1.0, %v8909_v39  ;;  %v8931_v25 = vand.u32 2147483647, %v8845_v32  ;;  %vm8927_vm8 = vweird.f32 %v8845_v32 }
0x2388   :  { %v9186_v5 = vpop.permute.xlu2 %9185  ;;  %v8902_v21 = vsel %vm15325_vm15, %v12227_v42, %v8898_v6 }
0x2389   :  { %v8911_v47 = vmul.f32 %v12229_v46, %v8910_v11  ;;  %11410 = vmatmul.msk.f32.vlgmr.msrb.gmra.mxu1 %vm3413_vm14, %v8966_v26  ;;  %v8907_v4 = vsel %vm8904_vm4, %v8906_v15, %v8902_v21  ;;  %vm8932_vm10 = vcmp.eq.f32.partialorder %v8931_v25, 8.507059e+37 }
0x238a   :  { %v8967_v42 = vmul.f32 %v15261_v2, %v8907_v4 }
0x238b   :  { %v8912_v0 = vadd.f32 %v12229_v46, %v8911_v47 }
0x238c   :  { %v12231_v10 = vpop.eup %12230 }
0x238d   :  { %v8916_v59 = vsel %vm8915_vm0, %v12229_v46, %v8912_v0  ;;  %v8923_v22 = vmul.f32 %v12231_v10, %v8845_v32  ;;  %vm8928_vm7 = vweird.f32 %v12231_v10  ;;  %v9309_v54 = vpop.permute.xlu0 %9308 }
0x238e   :  { %v8921_v20 = vsel %vm8918_vm6, %v8920_v41, %v8916_v59  ;;  %9824 = vrot.lane.b32.xlu2 %v15160_v63, %s12494_s1  ;;  %vm8929_vm9 = vmor %vm8927_vm8, %vm8928_vm7 }
0x238f   :  { %v8968_v31 = vmul.f32 %v15265_v43, %v8921_v20  ;;  %v8924_v12 = vsub.f32 1.0, %v8923_v22  ;;  %v8934_v43 = vor.u32 1.1754944e-38, %v8933_v55 }
0x2390   :  { %v9229_v1 = vpop.permute.xlu2 %9228 }
0x2391   :  { %v8925_v33 = vmul.f32 %v12231_v10, %v8924_v12  ;;  %11411 = vmatmul.msk.f32.gmra.mxu1 %vm3413_vm14, %v8967_v42  ;;  %11412 = vmatmul.msk.f32.vlgmr.msra.gmra.mxu0 %vm3413_vm14, %v8968_v31 }
0x2392   :  { %11429 = vmatpush.xpose.msk.msrb.mxu0 %vm304_vm2, %v9229_v1 }
0x2393   :  { %v8926_v53 = vadd.f32 %v12231_v10, %v8925_v33 }
0x2394   :  { %v9001_v9 = vpop.f32.mrf.mxu3 }
0x2395   :  { %v8930_v46 = vsel %vm8929_vm9, %v12231_v10, %v8926_v53  ;;  %11416 = vmatmul.msk.f32.vlgmr.msra.gmra.mxu3 %vm304_vm2, %v9001_v9  ;;  %v9753_v62 = vpop.permute.xlu0 %9752 }
0x2396   :  { %v8935_v2 = vsel %vm8932_vm10, %v8934_v43, %v8930_v46  ;;  %9869 = vrot.lane.b32.xlu2 %v15103_v3, %s12493_s26 }
0x2397   :  { %v8969_v38 = vmul.f32 %v15269_v57, %v8935_v2 }
0x2398   :  { %v9227_v48 = vpop.permute.xlu2 %9226 }
0x2399   :  { %11413 = vmatmul.msk.f32.gmra.mxu0 %vm3413_vm14, %v8969_v38 }
0x239c   :  { %v9004_v13 = vpop.f32.mrf.mxu3 }
0x239d   :  { %v9192_v39 = vpop.permute.xlu1 %9191  ;;  %11417 = vmatmul.msk.f32.gmra.mxu3 %vm304_vm2, %v9004_v13  ;;  %v9751_v44 = vpop.permute.xlu0 %9750 }
0x239e   :  { %11424 = vmatpush.xpose.msk.msra.mxu1 %vm304_vm2, %v9192_v39 }
0x23a0   :  { %v9303_v32 = vpop.permute.xlu2 %9302 }
0x23a2   :  { %11425 = vmatpush.xpose.msk.msra.mxu1 %vm304_vm2, %v15277_v45 }
0x23a5   :  { %v9225_v28 = vpop.permute.xlu1 %9224  ;;  %11426 = vmatmul.msk.f32.vlgmr.msra.gmra.mxu1 %vm304_vm2, %v9186_v5  ;;  %v15360_v30 = vpop.permute.xlu0 %9746 }
0x23a6   :  { %11436 = vmatpush.xpose.msk.msrb.mxu1 %vm304_vm2, %v9309_v54  ;;  %11430 = vmatmul.msk.f32.vlgmr.msrb.gmra.mxu0 %vm304_vm2, %v9225_v28 }
0x23a8   :  { %v11750_v57 = vpop.permute.xlu2 %11749 }
0x23a9   :  { %v11751_v26 = vunpack.i.l.bf16 %v11750_v57  ;;  %v11752_v11 = vunpack.i.h.bf16 %v11750_v57 }
0x23ad   :  { %v9307_v6 = vpop.permute.xlu1 %9306  ;;  %11427 = vmatmul.msk.f32.gmra.mxu1 %vm304_vm2, %v9188_v19 }
0x23ae   :  { %11431 = vmatmul.msk.f32.gmra.mxu0 %vm304_vm2, %v9227_v48  ;;  %11437 = vmatpush.xpose.msk.msrb.mxu1 %vm304_vm2, %v9307_v6 }
0x23b0   :  { %v9829_v47 = vpop.permute.xlu2 %9828 }
0x23b2   :  { %9629 = vmatpush.msra.mxu1 %v11751_v26 }
0x23b4   :  { %9630 = vmatpush.msra.mxu1 %v11752_v11 }
0x23b5   :  { %v9305_v45 = vpop.permute.xlu1 %9304  ;;  %11438 = vmatmul.msk.f32.vlgmr.msrb.gmra.mxu1 %vm304_vm2, %v9303_v32 }
0x23b6   :  { %11456 = vmatpush.xpose.msk.msrb.mxu1 %vm304_vm2, %v9753_v62 }
0x23ba   :  { %11457 = vmatpush.xpose.msk.msrb.mxu1 %vm304_vm2, %v9751_v44 }
0x23bd   :  { %v9831_v17 = vpop.permute.xlu1 %9830  ;;  %11439 = vmatmul.msk.f32.gmra.mxu1 %vm304_vm2, %v9305_v45 }
0x23be   :  { %11464 = vmatpush.xpose.msk.msrb.mxu3 %vm304_vm2, %v9831_v17 }
0x23c2   :  { %11465 = vmatpush.xpose.msk.msrb.mxu3 %vm304_vm2, %v9829_v47 }
0x23c5   :  { %v9749_v48 = vpop.permute.xlu1 %9748 }
0x23ce   :  { %v9355_v5 = vpop.xlane.xlu0 %9354 }
0x23cf   :  { %v9369_v21 = vsub.f32 %v15314_v40, %v9355_v5 }
0x23d1   :  { %v9381_v15 = vmul.f32 1.442695, %v9369_v21 }
0x23d3   :  { %12232 = vpow2.f32 %v9381_v15 }
0x23d9   :  { %v15363_v0 = vpop.eup %12232 }
0x23da   :  { %v9401_v10 = vsel %vm3413_vm14, %v15363_v0, 0.0 }
0x23db   :  { %9402 = vadd.xlane.f32.xlu1 %v9401_v10 }
0x23e9   :  { %v9358_v41 = vpop.xlane.xlu2 %9357 }
0x23ea   :  { %v9370_v4 = vsub.f32 %v15320_v49, %v9358_v41 }
0x23ec   :  { %v9383_v59 = vmul.f32 1.442695, %v9370_v4 }
0x23ee   :  { %12234 = vpow2.f32 %v9383_v59 }
0x23f1   :  { %v9825_v2 = vpop.permute.xlu2 %9824 }
0x23f4   :  { %v15368_v22 = vpop.eup %12234  ;;  %9867 = vrot.lane.b32.xlu1 %v15097_v24, %s12493_s26 }
0x23f5   :  { %v9404_v40 = vsel %vm3413_vm14, %v15368_v22, 0.0 }
0x23f6   :  { %9405 = vadd.xlane.f32.xlu0 %v9404_v40 }
0x23f9   :  { %v9870_v17 = vpop.permute.xlu2 %9869 }
0x23fc   :  { %9865 = vrot.lane.b32.xlu1 %v15135_v60, %s12494_s1 }
0x2406   :  { %v9036_v20 = vpop.f32.mrf.mxu1 }
0x2407   :  { %11418 = vmatmul.msk.f32.gmra.mxu3 %vm304_vm2, %v9036_v20 }
0x240a   :  { %9863 = vrot.lane.b32.xlu0 %v15124_v27, %s12494_s1 }
0x240e   :  { %v9039_v49 = vpop.f32.mrf.mxu1  ;;  %v9071_v31 = vpop.f32.mrf.mxu0 }
0x240f   :  { %11419 = vmatmul.msk.f32.gmra.mxu3 %vm304_vm2, %v9039_v49 }
0x2416   :  { %v9074_v12 = vpop.f32.mrf.mxu0 }
0x2417   :  { %11420 = vmatmul.msk.f32.gmra.mxu3 %vm304_vm2, %v9071_v31 }
0x241f   :  { %11421 = vmatmul.msk.f32.gmra.mxu3 %vm304_vm2, %v9074_v12 }
0x2422   :  { %v15382_v42 = vpop.f32.mrf.mxu1 }
0x2423   :  { %v15384_v55 = vpop.f32.mrf.mxu0  ;;  %v9341_v33 = vsel %vm3413_vm14, %v15382_v42, -inf }
0x2424   :  { %9342 = vmax.xlane.f32.xlu2 %v9341_v33  ;;  %v9347_v25 = vsel %vm3413_vm14, %v15384_v55, -inf }
0x2426   :  { %9348 = vmax.xlane.f32.xlu1 %v9347_v25 }
0x2427   :  { %11422 = vmatmul.msk.f32.gmra.mxu3 %vm304_vm2, %v15304_v56 }
0x242a   :  { %v15392_v1 = vpop.f32.mrf.mxu1 }
0x242b   :  { %v15394_v53 = vpop.f32.mrf.mxu0  ;;  %v9344_v46 = vsel %vm3413_vm14, %v15392_v1, -inf }
0x242c   :  { %v9350_v43 = vsel %vm3413_vm14, %v15394_v53, -inf }
0x242d   :  { %9351 = vmax.xlane.f32.xlu2 %v9350_v43 }
0x242f   :  { %11423 = vmatmul.msk.f32.gmra.mxu3 %vm304_vm2, %v15310_v34  ;;  %v9827_v34 = vpop.permute.xlu0 %9826 }
0x2432   :  { %v15400_v9 = vpop.f32.mrf.mxu1 }
0x2433   :  { %v9359_v19 = vsel %vm3413_vm14, %v15400_v9, -inf }
0x2434   :  { %9345 = vmax.xlane.f32.xlu0 %v9344_v46 }
0x2437   :  { %11466 = vmatmul.msk.f32.vlgmr.msrb.gmra.mxu3 %vm304_vm2, %v9825_v2 }
0x243a   :  { %v15405_v56 = vpop.f32.mrf.mxu1 }
0x243b   :  { %v9362_v38 = vsel %vm3413_vm14, %v15405_v56, -inf }
0x243c   :  { %9363 = vmax.xlane.f32.xlu1 %v9362_v38  ;;  %9360 = vmax.xlane.f32.xlu0 %v9359_v19  ;;  %v15429_v38 = vpop.f32.mrf.mxu3 }
0x243f   :  { %11467 = vmatmul.msk.f32.gmra.mxu3 %vm304_vm2, %v9827_v34 }
0x244e   :  { %v9403_v13 = vpop.xlane.xlu1 %9402 }
0x244f   :  { %12236 = vrcp.f32 %v9403_v13  ;;  %v9480_v28 = vand.u32 2147483648, %v9403_v13  ;;  %v9478_v26 = vand.u32 2147483647, %v9403_v13  ;;  %vm9474_vm12 = vweird.f32 %v9403_v13 }
0x2451   :  { %v9481_v62 = vor.u32 1.1754944e-38, %v9480_v28  ;;  %vm9479_vm15 = vcmp.eq.f32.partialorder %v9478_v26, 8.507059e+37 }
0x2455   :  { %11754 = vrot.lane.b32.xlu1 %v15222_v61, %s12492_s25  ;;  %v12237_v39 = vpop.eup %12236 }
0x2456   :  { %v9470_v32 = vmul.f32 %v12237_v39, %v9403_v13  ;;  %vm9475_vm11 = vweird.f32 %v12237_v39 }
0x2457   :  { %vm9476_vm13 = vmor %vm9474_vm12, %vm9475_vm11 }
0x2458   :  { %v9471_v54 = vsub.f32 1.0, %v9470_v32 }
0x245a   :  { %v9472_v57 = vmul.f32 %v12237_v39, %v9471_v54 }
0x245c   :  { %v9473_v6 = vadd.f32 %v12237_v39, %v9472_v57 }
0x245d   :  { %11764 = vrot.lane.b32.xlu1 %v15178_v23, %s12492_s25 }
0x245e   :  { %v9477_v11 = vsel %vm9476_vm13, %v12237_v39, %v9473_v6 }
0x245f   :  { %v9482_v45 = vsel %vm9479_vm15, %v9481_v62, %v9477_v11 }
0x2460   :  { %v9529_v44 = vmul.f32 %v15363_v0, %v9482_v45 }
0x2462   :  { %11444 = vmatmul.msk.f32.vlgmr.msra.gmra.mxu1 %vm3413_vm14, %v9529_v44 }
0x2463   :  { %11468 = vmatpush.xpose.msk.msra.mxu1 %vm304_vm2, %v9870_v17 }
0x2465   :  { %9789 = vrot.lane.b32.xlu1 %v15117_v58, %s12493_s26 }
0x2466   :  { %v9868_v47 = vpop.permute.xlu1 %9867 }
0x2467   :  { %11469 = vmatpush.xpose.msk.msra.mxu1 %vm304_vm2, %v9868_v47 }
0x2469   :  { %v9406_v5 = vpop.xlane.xlu0 %9405 }
0x246a   :  { %12238 = vrcp.f32 %v9406_v5  ;;  %v9494_v41 = vand.u32 2147483648, %v9406_v5  ;;  %v9492_v0 = vand.u32 2147483647, %v9406_v5  ;;  %vm9488_vm4 = vweird.f32 %v9406_v5 }
0x246c   :  { %v9495_v40 = vor.u32 1.1754944e-38, %v9494_v41  ;;  %vm9493_vm0 = vcmp.eq.f32.partialorder %v9492_v0, 8.507059e+37 }
0x246e   :  { %v9866_v12 = vpop.permute.xlu1 %9865 }
0x2470   :  { %v12239_v21 = vpop.eup %12238 }
0x2471   :  { %v9484_v15 = vmul.f32 %v12239_v21, %v9406_v5  ;;  %vm9489_vm3 = vweird.f32 %v12239_v21 }
0x2472   :  { %vm9490_vm5 = vmor %vm9488_vm4, %vm9489_vm3 }
0x2473   :  { %v9485_v10 = vsub.f32 1.0, %v9484_v15 }
0x2475   :  { %v9486_v4 = vmul.f32 %v12239_v21, %v9485_v10 }
0x2477   :  { %v9487_v59 = vadd.f32 %v12239_v21, %v9486_v4 }
0x2479   :  { %v9491_v20 = vsel %vm9490_vm5, %v12239_v21, %v9487_v59 }
0x247a   :  { %v9496_v49 = vsel %vm9493_vm0, %v9495_v40, %v9491_v20 }
0x247b   :  { %v9530_v31 = vmul.f32 %v15368_v22, %v9496_v49 }
0x247c   :  { %v9864_v33 = vpop.permute.xlu0 %9863 }
0x247d   :  { %11445 = vmatmul.msk.f32.gmra.mxu1 %vm3413_vm14, %v9530_v31 }
0x2485   :  { %11458 = vmatmul.msk.f32.vlgmr.msrb.gmra.mxu1 %vm304_vm2, %v15360_v30 }
0x248d   :  { %11459 = vmatmul.msk.f32.gmra.mxu1 %vm304_vm2, %v9749_v48  ;;  %v15437_v48 = vpop.f32.mrf.mxu3 }
0x2495   :  { %11470 = vmatmul.msk.f32.vlgmr.msra.gmra.mxu1 %vm304_vm2, %v9864_v33  ;;  %v15445_v57 = vpop.f32.mrf.mxu3 }
0x2497   :  { %v9343_v25 = vpop.xlane.xlu2 %9342 }
0x2498   :  { %v9365_v43 = vsub.f32 %v15382_v42, %v9343_v25 }
0x2499   :  { %v9349_v2 = vpop.xlane.xlu1 %9348 }
0x249a   :  { %v9373_v46 = vmul.f32 1.442695, %v9365_v43  ;;  %v9367_v22 = vsub.f32 %v15384_v55, %v9349_v2 }
0x249c   :  { %12240 = vpow2.f32 %v9373_v46  ;;  %v9377_v19 = vmul.f32 1.442695, %v9367_v22 }
0x249d   :  { %11471 = vmatmul.msk.f32.gmra.mxu1 %vm304_vm2, %v9866_v12 }
0x249e   :  { %12242 = vpow2.f32 %v9377_v19 }
0x24a0   :  { %v9352_v13 = vpop.xlane.xlu2 %9351 }
0x24a1   :  { %v9368_v55 = vsub.f32 %v15394_v53, %v9352_v13  ;;  %v15452_v53 = vpop.f32.mrf.mxu3 }
0x24a2   :  { %v15433_v30 = vpop.eup %12240 }
0x24a3   :  { %v9389_v34 = vsel %vm3413_vm14, %v15433_v30, 0.0  ;;  %v9379_v26 = vmul.f32 1.442695, %v9368_v55 }
0x24a4   :  { %9390 = vadd.xlane.f32.xlu2 %v9389_v34  ;;  %v15439_v42 = vpop.eup %12242 }
0x24a5   :  { %v9395_v28 = vsel %vm3413_vm14, %v15439_v42, 0.0 }
0x24a7   :  { %v9346_v39 = vpop.xlane.xlu0 %9345 }
0x24a8   :  { %v9366_v32 = vsub.f32 %v15392_v1, %v9346_v39 }
0x24aa   :  { %v9375_v54 = vmul.f32 1.442695, %v9366_v32 }
0x24ac   :  { %9396 = vadd.xlane.f32.xlu2 %v9395_v28  ;;  %12244 = vpow2.f32 %v9375_v54 }
0x24ad   :  { %12246 = vpow2.f32 %v9379_v26 }
0x24af   :  { %v9361_v6 = vpop.xlane.xlu0 %9360  ;;  %v9364_v44 = vpop.xlane.xlu1 %9363 }
0x24b0   :  { %v9371_v11 = vsub.f32 %v15400_v9, %v9361_v6  ;;  %v9372_v47 = vsub.f32 %v15405_v56, %v9364_v44  ;;  %v15461_v9 = vpop.f32.mrf.mxu3 }
0x24b2   :  { %v15447_v62 = vpop.eup %12244  ;;  %v9385_v45 = vmul.f32 1.442695, %v9371_v11  ;;  %v9387_v21 = vmul.f32 1.442695, %v9372_v47 }
0x24b3   :  { %v9392_v1 = vsel %vm3413_vm14, %v15447_v62, 0.0  ;;  %v15454_v17 = vpop.eup %12246 }
0x24b4   :  { %9393 = vadd.xlane.f32.xlu0 %v9392_v1  ;;  %12248 = vpow2.f32 %v9385_v45  ;;  %v9398_v5 = vsel %vm3413_vm14, %v15454_v17, 0.0 }
0x24b5   :  { %12250 = vpow2.f32 %v9387_v21 }
0x24b8   :  { %v15469_v59 = vpop.f32.mrf.mxu3 }
0x24ba   :  { %v15459_v15 = vpop.eup %12248 }
0x24bb   :  { %v9407_v10 = vsel %vm3413_vm14, %v15459_v15, 0.0  ;;  %v15467_v4 = vpop.eup %12250 }
0x24bc   :  { %9399 = vadd.xlane.f32.xlu0 %v9398_v5  ;;  %v9410_v40 = vsel %vm3413_vm14, %v15467_v4, 0.0 }
0x24c0   :  { %v15473_v12 = vpop.f32.mrf.mxu3 }
0x24c4   :  { %11759 = vrot.lane.b32.xlu2 %v15281_v14, %s12492_s25  ;;  %9408 = vadd.xlane.f32.xlu0 %v9407_v10 }
0x24c7   :  { %v11755_v41 = vpop.permute.xlu1 %11754 }
0x24c8   :  { %v11756_v56 = vunpack.i.l.bf16 %v11755_v41  ;;  %v11757_v0 = vunpack.i.h.bf16 %v11755_v41  ;;  %v15475_v33 = vpop.f32.mrf.mxu3 }
0x24ca   :  { %9559 = vmatpush.msra.mxu0 %v11756_v56 }
0x24cc   :  { %9560 = vmatpush.msra.mxu0 %v11757_v0  ;;  %9411 = vadd.xlane.f32.xlu0 %v9410_v40 }
0x24cf   :  { %v11765_v20 = vpop.permute.xlu1 %11764 }
0x24d0   :  { %v11766_v49 = vunpack.i.l.bf16 %v11765_v20  ;;  %v11767_v31 = vunpack.i.h.bf16 %v11765_v20  ;;  %v15479_v25 = vpop.f32.mrf.mxu3 }
0x24d1   :  { %v9914_v43 = vsel %vm3413_vm14, %v15479_v25, -inf }
0x24d2   :  { %9664 = vmatpush.msrb.mxu0 %v11766_v49 }
0x24d4   :  { %9665 = vmatpush.msrb.mxu0 %v11767_v31 }
0x24d8   :  { %v15491_v19 = vpop.f32.mrf.mxu3 }
0x24d9   :  { %v9917_v34 = vsel %vm3413_vm14, %v15491_v19, -inf }
0x24df   :  { %v15483_v46 = vpop.f32.mrf.mxu1 }
0x24e0   :  { %9791 = vrot.lane.b32.xlu0 %v15089_v29, %s12493_s26 }
0x24ed   :  { %9915 = vmax.xlane.f32.xlu2 %v9914_v43 }
0x24fa   :  { %v15485_v2 = vpop.f32.mrf.mxu1 }
0x2502   :  { %v15487_v22 = vpop.f32.mrf.mxu1 }
0x2505   :  { %9785 = vrot.lane.b32.xlu2 %v15150_v35, %s12494_s1 }
0x250a   :  { %v15495_v13 = vpop.f32.mrf.mxu1  ;;  %9918 = vmax.xlane.f32.xlu0 %v9917_v34 }
0x250b   :  { %v9905_v39 = vsel %vm3413_vm14, %v15495_v13, -inf }
0x250c   :  { %9906 = vmax.xlane.f32.xlu1 %v9905_v39 }
0x250d   :  { %9787 = vrot.lane.b32.xlu2 %v15155_v18, %s12494_s1 }
0x2517   :  { %v9391_v32 = vpop.xlane.xlu2 %9390 }
0x2518   :  { %12252 = vrcp.f32 %v9391_v32  ;;  %v9424_v6 = vand.u32 2147483648, %v9391_v32  ;;  %v9422_v1 = vand.u32 2147483647, %v9391_v32  ;;  %vm9418_vm7 = vweird.f32 %v9391_v32 }
0x251a   :  { %v9425_v47 = vor.u32 1.1754944e-38, %v9424_v6  ;;  %vm9423_vm9 = vcmp.eq.f32.partialorder %v9422_v1, 8.507059e+37 }
0x251e   :  { %v12253_v55 = vpop.eup %12252 }
0x251f   :  { %v9414_v54 = vmul.f32 %v12253_v55, %v9391_v32  ;;  %v9397_v28 = vpop.xlane.xlu2 %9396  ;;  %vm9419_vm6 = vweird.f32 %v12253_v55 }
0x2520   :  { %12254 = vrcp.f32 %v9397_v28  ;;  %vm9420_vm8 = vmor %vm9418_vm7, %vm9419_vm6  ;;  %v9452_v49 = vand.u32 2147483648, %v9397_v28  ;;  %v9450_v34 = vand.u32 2147483647, %v9397_v28  ;;  %vm9446_vm11 = vweird.f32 %v9397_v28 }
0x2521   :  { %v9415_v26 = vsub.f32 1.0, %v9414_v54 }
0x2522   :  { %v9453_v32 = vor.u32 1.1754944e-38, %v9452_v49  ;;  %vm9451_vm13 = vcmp.eq.f32.partialorder %v9450_v34, 8.507059e+37 }
0x2523   :  { %v9416_v11 = vmul.f32 %v12253_v55, %v9415_v26 }
0x2525   :  { %v9417_v45 = vadd.f32 %v12253_v55, %v9416_v11  ;;  %11774 = vrot.lane.b32.xlu1 %v15228_v50, %s12495_s3 }
0x2526   :  { %v12255_v44 = vpop.eup %12254 }
0x2527   :  { %v9421_v5 = vsel %vm9420_vm8, %v12253_v55, %v9417_v45  ;;  %v9442_v21 = vmul.f32 %v12255_v44, %v9397_v28  ;;  %v11760_v10 = vpop.permute.xlu2 %11759  ;;  %v9394_v56 = vpop.xlane.xlu0 %9393  ;;  %vm9447_vm10 = vweird.f32 %v12255_v44 }
0x2528   :  { %v9426_v41 = vsel %vm9423_vm9, %v9425_v47, %v9421_v5  ;;  %v11761_v0 = vunpack.i.l.bf16 %v11760_v10  ;;  %12256 = vrcp.f32 %v9394_v56  ;;  %v11762_v31 = vunpack.i.h.bf16 %v11760_v10  ;;  %vm9448_vm12 = vmor %vm9446_vm11, %vm9447_vm10 }
0x2529   :  { %v9525_v40 = vmul.f32 %v15433_v30, %v9426_v41  ;;  %v9443_v20 = vsub.f32 1.0, %v9442_v21  ;;  %v9438_v28 = vand.u32 2147483648, %v9394_v56  ;;  %v9436_v47 = vand.u32 2147483647, %v9394_v56 }
0x252a   :  { %9594 = vmatpush.msra.mxu2 %v11761_v0  ;;  %vm9432_vm3 = vweird.f32 %v9394_v56 }
0x252b   :  { %v9444_v43 = vmul.f32 %v12255_v44, %v9443_v20  ;;  %11440 = vmatmul.msk.f32.vlgmr.msra.gmra.mxu0 %vm3413_vm14, %v9525_v40  ;;  %vm9437_vm5 = vcmp.eq.f32.partialorder %v9436_v47, 8.507059e+37 }
0x252c   :  { %9595 = vmatpush.msra.mxu2 %v11762_v31 }
0x252d   :  { %v9445_v39 = vadd.f32 %v12255_v44, %v9444_v43  ;;  %10313 = vrot.lane.b32.xlu1 %v15109_v36, %s12497_s28 }
0x252e   :  { %v12257_v55 = vpop.eup %12256 }
0x252f   :  { %v9449_v30 = vsel %vm9448_vm12, %v12255_v44, %v9445_v39  ;;  %v9428_v26 = vmul.f32 %v12257_v55, %v9394_v56  ;;  %v9400_v6 = vpop.xlane.xlu0 %9399  ;;  %vm9433_vm15 = vweird.f32 %v12257_v55  ;;  %v9439_v44 = vor.u32 1.1754944e-38, %v9438_v28 }
0x2530   :  { %v9454_v54 = vsel %vm9451_vm13, %v9453_v32, %v9449_v30  ;;  %12258 = vrcp.f32 %v9400_v6  ;;  %vm9434_vm4 = vmor %vm9432_vm3, %vm9433_vm15  ;;  %v9466_v49 = vand.u32 2147483648, %v9400_v6  ;;  %v9464_v31 = vand.u32 2147483647, %v9400_v6 }
0x2531   :  { %v9527_v11 = vmul.f32 %v15439_v42, %v9454_v54  ;;  %v9429_v1 = vsub.f32 1.0, %v9428_v26  ;;  %vm9460_vm6 = vweird.f32 %v9400_v6 }
0x2532   :  { %v9467_v43 = vor.u32 1.1754944e-38, %v9466_v49  ;;  %vm9465_vm8 = vcmp.eq.f32.partialorder %v9464_v31, 8.507059e+37 }
0x2533   :  { %11442 = vmatmul.msk.f32.vlgmr.msra.gmra.mxu2 %vm3413_vm14, %v9527_v11  ;;  %v9430_v45 = vmul.f32 %v12257_v55, %v9429_v1 }
0x2535   :  { %v9431_v5 = vadd.f32 %v12257_v55, %v9430_v45  ;;  %10311 = vrot.lane.b32.xlu1 %v15101_v8, %s12497_s28 }
0x2536   :  { %v12259_v36 = vpop.eup %12258 }
0x2537   :  { %v9456_v21 = vmul.f32 %v12259_v36, %v9400_v6  ;;  %v9409_v10 = vpop.xlane.xlu0 %9408  ;;  %v9435_v41 = vsel %vm9434_vm4, %v12257_v55, %v9431_v5  ;;  %vm9461_vm0 = vweird.f32 %v12259_v36 }
0x2538   :  { %12260 = vrcp.f32 %v9409_v10  ;;  %v9440_v0 = vsel %vm9437_vm5, %v9439_v44, %v9435_v41  ;;  %vm9462_vm7 = vmor %vm9460_vm6, %vm9461_vm0  ;;  %v9508_v30 = vand.u32 2147483648, %v9409_v10  ;;  %v9506_v11 = vand.u32 2147483647, %v9409_v10 }
0x2539   :  { %v9457_v42 = vsub.f32 1.0, %v9456_v21  ;;  %v9526_v40 = vmul.f32 %v15447_v62, %v9440_v0  ;;  %vm9502_vm10 = vweird.f32 %v9409_v10 }
0x253a   :  { %v9509_v1 = vor.u32 1.1754944e-38, %v9508_v30  ;;  %vm9507_vm12 = vcmp.eq.f32.partialorder %v9506_v11, 8.507059e+37 }
0x253b   :  { %v9458_v20 = vmul.f32 %v12259_v36, %v9457_v42  ;;  %11441 = vmatmul.msk.f32.gmra.mxu0 %vm3413_vm14, %v9526_v40 }
0x253d   :  { %v9459_v56 = vadd.f32 %v12259_v36, %v9458_v20  ;;  %10352 = vrot.lane.b32.xlu1 %v15089_v29, %s12497_s28 }
0x253e   :  { %v12261_v8 = vpop.eup %12260 }
0x253f   :  { %v9498_v34 = vmul.f32 %v12261_v8, %v9409_v10  ;;  %v9412_v39 = vpop.xlane.xlu0 %9411  ;;  %v9463_v32 = vsel %vm9462_vm7, %v12259_v36, %v9459_v56  ;;  %vm9503_vm9 = vweird.f32 %v12261_v8 }
0x2540   :  { %12262 = vrcp.f32 %v9412_v39  ;;  %v9468_v55 = vsel %vm9465_vm8, %v9467_v43, %v9463_v32  ;;  %vm9504_vm11 = vmor %vm9502_vm10, %vm9503_vm9  ;;  %v9522_v44 = vand.u32 2147483648, %v9412_v39  ;;  %vm9516_vm15 = vweird.f32 %v9412_v39  ;;  %v15532_v32 = vpop.f32.mrf.mxu1 }
0x2541   :  { %v9499_v62 = vsub.f32 1.0, %v9498_v34  ;;  %v9528_v54 = vmul.f32 %v15454_v17, %v9468_v55  ;;  %v9520_v17 = vand.u32 2147483647, %v9412_v39 }
0x2542   :  { %v9523_v10 = vor.u32 1.1754944e-38, %v9522_v44 }
0x2543   :  { %v9500_v26 = vmul.f32 %v12261_v8, %v9499_v62  ;;  %11443 = vmatmul.msk.f32.gmra.mxu2 %vm3413_vm14, %v9528_v54  ;;  %vm9521_vm4 = vcmp.eq.f32.partialorder %v9520_v17, 8.507059e+37 }
0x2545   :  { %v9501_v6 = vadd.f32 %v12261_v8, %v9500_v26 }
0x2546   :  { %v12263_v29 = vpop.eup %12262 }
0x2547   :  { %v9505_v45 = vsel %vm9504_vm11, %v12261_v8, %v9501_v6  ;;  %v9512_v28 = vmul.f32 %v12263_v29, %v9412_v39  ;;  %vm9517_vm13 = vweird.f32 %v12263_v29  ;;  %v9902_v39 = vsel %vm3413_vm14, %v15487_v22, -inf }
0x2548   :  { %v9510_v47 = vsel %vm9507_vm12, %v9509_v1, %v9505_v45  ;;  %vm9518_vm3 = vmor %vm9516_vm15, %vm9517_vm13  ;;  %v15537_v54 = vpop.f32.mrf.mxu1  ;;  %v8539_v1 = vld [vmem:[#allocation10 + $0x68] sm:$0xff] }
0x2549   :  { %v9531_v5 = vmul.f32 %v15459_v15, %v9510_v47  ;;  %v9513_v36 = vsub.f32 1.0, %v9512_v28  ;;  %v9790_v15 = vpop.permute.xlu1 %9789  ;;  %9712 = vmatpush.msrb.mxu2 %v8539_v1 }
0x254b   :  { %v9514_v21 = vmul.f32 %v12263_v29, %v9513_v36  ;;  %11446 = vmatmul.msk.f32.vlgmr.msrb.gmra.mxu0 %vm3413_vm14, %v9531_v5 }
0x254d   :  { %v9515_v41 = vadd.f32 %v12263_v29, %v9514_v21 }
0x254f   :  { %v9519_v42 = vsel %vm9518_vm3, %v12263_v29, %v9515_v41  ;;  %v9923_v29 = vsel %vm3413_vm14, %v15537_v54, -inf }
0x2550   :  { %v9524_v0 = vsel %vm9521_vm4, %v9523_v10, %v9519_v42 }
0x2551   :  { %v9532_v40 = vmul.f32 %v15467_v4, %v9524_v0 }
0x2552   :  { %v9792_v20 = vpop.permute.xlu0 %9791 }
0x2553   :  { %11447 = vmatmul.msk.f32.gmra.mxu0 %vm3413_vm14, %v9532_v40 }
0x2554   :  { %11460 = vmatpush.xpose.msk.msra.mxu0 %vm304_vm2, %v9792_v20 }
0x2558   :  { %11461 = vmatpush.xpose.msk.msra.mxu0 %vm304_vm2, %v9790_v15 }
0x2560   :  { %v9916_v49 = vpop.xlane.xlu2 %9915 }
0x2561   :  { %v9930_v31 = vsub.f32 %v15479_v25, %v9916_v49  ;;  %v9920_v25 = vsel %vm3413_vm14, %v15532_v32, -inf }
0x2563   :  { %v9942_v56 = vmul.f32 1.442695, %v9930_v31 }
0x2565   :  { %12264 = vpow2.f32 %v9942_v56 }
0x2568   :  { %v9786_v8 = vpop.permute.xlu2 %9785 }
0x2569   :  { %11462 = vmatmul.msk.f32.vlgmr.msra.gmra.mxu0 %vm304_vm2, %v9786_v8 }
0x256b   :  { %v15525_v43 = vpop.eup %12264 }
0x256c   :  { %v9962_v4 = vsel %vm3413_vm14, %v15525_v43, 0.0 }
0x256d   :  { %9963 = vadd.xlane.f32.xlu0 %v9962_v4 }
0x2570   :  { %v9788_v34 = vpop.permute.xlu2 %9787 }
0x2571   :  { %11463 = vmatmul.msk.f32.gmra.mxu0 %vm304_vm2, %v9788_v34 }
0x2575   :  { %9903 = vmax.xlane.f32.xlu0 %v9902_v39 }
0x257d   :  { %9921 = vmax.xlane.f32.xlu0 %v9920_v25  ;;  %v9919_v62 = vpop.xlane.xlu0 %9918 }
0x257e   :  { %v9931_v55 = vsub.f32 %v15491_v19, %v9919_v62 }
0x257f   :  { %v9907_v30 = vpop.xlane.xlu1 %9906 }
0x2580   :  { %v9944_v26 = vmul.f32 1.442695, %v9931_v55  ;;  %v9927_v11 = vsub.f32 %v15495_v13, %v9907_v30 }
0x2582   :  { %12266 = vpow2.f32 %v9944_v26  ;;  %v9936_v6 = vmul.f32 1.442695, %v9927_v11 }
0x2584   :  { %12268 = vpow2.f32 %v9936_v6 }
0x2585   :  { %9924 = vmax.xlane.f32.xlu0 %v9923_v29 }
0x2588   :  { %v15542_v45 = vpop.eup %12266 }
0x2589   :  { %v9965_v19 = vsel %vm3413_vm14, %v15542_v45, 0.0 }
0x258a   :  { %v15546_v28 = vpop.eup %12268  ;;  %9966 = vadd.xlane.f32.xlu2 %v9965_v19 }
0x258b   :  { %v9953_v13 = vsel %vm3413_vm14, %v15546_v28, 0.0 }
0x258c   :  { %9954 = vadd.xlane.f32.xlu1 %v9953_v13 }
0x2597   :  { %v11775_v47 = vpop.permute.xlu1 %11774 }
0x2598   :  { %v11776_v5 = vunpack.i.l.bf16 %v11775_v47  ;;  %v11777_v36 = vunpack.i.h.bf16 %v11775_v47 }
0x2599   :  { %11769 = vrot.lane.b32.xlu0 %v15222_v61, %s12495_s3 }
0x259a   :  { %10190 = vmatpush.msrb.mxu1 %v11776_v5 }
0x259c   :  { %10191 = vmatpush.msrb.mxu1 %v11777_v36 }
0x259f   :  { %v10314_v44 = vpop.permute.xlu1 %10313 }
0x25a0   :  { %11488 = vmatpush.xpose.msk.msra.mxu1 %vm304_vm2, %v10314_v44 }
0x25a2   :  { %11779 = vrot.lane.b32.xlu2 %v15178_v23, %s12495_s3 }
0x25a5   :  { %10309 = vrot.lane.b32.xlu1 %v15144_v52, %s12496_s27 }
0x25a7   :  { %v10312_v21 = vpop.permute.xlu1 %10311 }
0x25a8   :  { %v9562_v17 = vpop.f32.mrf.mxu0  ;;  %11489 = vmatpush.xpose.msk.msra.mxu1 %vm304_vm2, %v10312_v21 }
0x25a9   :  { %11448 = vmatmul.msk.f32.vlgmr.msrb.gmra.mxu2 %vm304_vm2, %v9562_v17 }
0x25ad   :  { %10391 = vrot.lane.b32.xlu1 %v15111_v37, %s12497_s28 }
0x25af   :  { %v15591_v5 = vpop.permute.xlu1 %10352 }
0x25b5   :  { %10385 = vrot.lane.b32.xlu1 %v15160_v63, %s12496_s27 }
0x25b6   :  { %v9597_v10 = vpop.f32.mrf.mxu2 }
0x25b8   :  { %v9565_v41 = vpop.f32.mrf.mxu0 }
0x25b9   :  { %11449 = vmatmul.msk.f32.gmra.mxu2 %vm304_vm2, %v9565_v41 }
0x25bd   :  { %10428 = vrot.lane.b32.xlu1 %v15097_v24, %s12497_s28 }
0x25c1   :  { %11450 = vmatmul.msk.f32.gmra.mxu2 %vm304_vm2, %v9597_v10 }
0x25c6   :  { %v9600_v52 = vpop.f32.mrf.mxu2 }
0x25c8   :  { %v9667_v37 = vpop.f32.mrf.mxu0 }
0x25c9   :  { %11451 = vmatmul.msk.f32.gmra.mxu2 %vm304_vm2, %v9600_v52 }
0x25d0   :  { %v9670_v20 = vpop.f32.mrf.mxu0 }
0x25d1   :  { %11452 = vmatmul.msk.f32.gmra.mxu2 %vm304_vm2, %v15483_v46 }
0x25d9   :  { %11453 = vmatmul.msk.f32.gmra.mxu2 %vm304_vm2, %v15485_v2 }
0x25e0   :  { %v9964_v63 = vpop.xlane.xlu0 %9963 }
0x25e1   :  { %12270 = vrcp.f32 %v9964_v63  ;;  %11454 = vmatmul.msk.f32.gmra.mxu2 %vm304_vm2, %v9667_v37  ;;  %v10041_v49 = vand.u32 2147483648, %v9964_v63  ;;  %v10039_v56 = vand.u32 2147483647, %v9964_v63  ;;  %vm10035_vm0 = vweird.f32 %v9964_v63 }
0x25e3   :  { %v10042_v8 = vor.u32 1.1754944e-38, %v10041_v49  ;;  %vm10040_vm7 = vcmp.eq.f32.partialorder %v10039_v56, 8.507059e+37 }
0x25e7   :  { %v12271_v42 = vpop.eup %12270 }
0x25e8   :  { %v10031_v0 = vmul.f32 %v12271_v42, %v9964_v63  ;;  %v9904_v24 = vpop.xlane.xlu0 %9903  ;;  %vm10036_vm5 = vweird.f32 %v12271_v42 }
0x25e9   :  { %v9926_v40 = vsub.f32 %v15487_v22, %v9904_v24  ;;  %11455 = vmatmul.msk.f32.gmra.mxu2 %vm304_vm2, %v9670_v20  ;;  %vm10037_vm6 = vmor %vm10035_vm0, %vm10036_vm5 }
0x25ea   :  { %v10032_v15 = vsub.f32 1.0, %v10031_v0 }
0x25eb   :  { %v9934_v31 = vmul.f32 1.442695, %v9926_v40 }
0x25ec   :  { %v10033_v46 = vmul.f32 %v12271_v42, %v10032_v15 }
0x25ed   :  { %12272 = vpow2.f32 %v9934_v31 }
0x25ee   :  { %v10034_v2 = vadd.f32 %v12271_v42, %v10033_v46 }
0x25f0   :  { %v10038_v4 = vsel %vm10037_vm6, %v12271_v42, %v10034_v2  ;;  %v9922_v34 = vpop.xlane.xlu0 %9921 }
0x25f1   :  { %v10043_v39 = vsel %vm10040_vm7, %v10042_v8, %v10038_v4  ;;  %v9932_v22 = vsub.f32 %v15532_v32, %v9922_v34 }
0x25f2   :  { %v10090_v25 = vmul.f32 %v15525_v43, %v10043_v39 }
0x25f3   :  { %v15577_v62 = vpop.eup %12272  ;;  %v9946_v55 = vmul.f32 1.442695, %v9932_v22 }
0x25f4   :  { %11476 = vmatmul.msk.f32.vlgmr.msrb.gmra.mxu1 %vm3413_vm14, %v10090_v25  ;;  %v9950_v30 = vsel %vm3413_vm14, %v15577_v62, 0.0 }
0x25f5   :  { %12274 = vpow2.f32 %v9946_v55  ;;  %9951 = vadd.xlane.f32.xlu2 %v9950_v30 }
0x25f8   :  { %v9925_v26 = vpop.xlane.xlu0 %9924 }
0x25f9   :  { %v9933_v11 = vsub.f32 %v15537_v54, %v9925_v26 }
0x25fb   :  { %v15583_v6 = vpop.eup %12274  ;;  %v9948_v29 = vmul.f32 1.442695, %v9933_v11 }
0x25fc   :  { %v9968_v32 = vsel %vm3413_vm14, %v15583_v6, 0.0 }
0x25fd   :  { %12276 = vpow2.f32 %v9948_v29  ;;  %9969 = vadd.xlane.f32.xlu0 %v9968_v32  ;;  %v9967_v43 = vpop.xlane.xlu2 %9966 }
0x25fe   :  { %12278 = vrcp.f32 %v9967_v43  ;;  %v10055_v36 = vand.u32 2147483648, %v9967_v43  ;;  %v10053_v21 = vand.u32 2147483647, %v9967_v43  ;;  %vm10049_vm9 = vweird.f32 %v9967_v43 }
0x25ff   :  { %v15595_v40 = vpop.xlane.xlu1 %9954 }
0x2600   :  { %v10056_v37 = vor.u32 1.1754944e-38, %v10055_v36  ;;  %vm10054_vm11 = vcmp.eq.f32.partialorder %v10053_v21, 8.507059e+37  ;;  %12280 = vrcp.f32 %v15595_v40  ;;  %vm9993_vm5 = vweird.f32 %v15595_v40 }
0x2603   :  { %v15587_v1 = vpop.eup %12276 }
0x2604   :  { %v9971_v19 = vsel %vm3413_vm14, %v15587_v1, 0.0  ;;  %v12279_v13 = vpop.eup %12278 }
0x2605   :  { %9972 = vadd.xlane.f32.xlu0 %v9971_v19  ;;  %v10045_v47 = vmul.f32 %v12279_v13, %v9967_v43  ;;  %vm10050_vm8 = vweird.f32 %v12279_v13  ;;  %v11780_v10 = vpop.permute.xlu2 %11779 }
0x2606   :  { %vm10051_vm10 = vmor %vm10049_vm9, %vm10050_vm8  ;;  %v11781_v0 = vunpack.i.l.bf16 %v11780_v10  ;;  %v11782_v15 = vunpack.i.h.bf16 %v11780_v10  ;;  %v12281_v30 = vpop.eup %12280 }
0x2607   :  { %v10046_v54 = vsub.f32 1.0, %v10045_v47  ;;  %v9989_v26 = vmul.f32 %v12281_v30, %v15595_v40  ;;  %vm9994_vm15 = vweird.f32 %v12281_v30 }
0x2608   :  { %vm9995_vm0 = vmor %vm9993_vm5, %vm9994_vm15 }
0x2609   :  { %v10047_v44 = vmul.f32 %v12279_v13, %v10046_v54  ;;  %v9990_v29 = vsub.f32 1.0, %v9989_v26 }
0x260b   :  { %v11770_v17 = vpop.permute.xlu0 %11769  ;;  %v10048_v41 = vadd.f32 %v12279_v13, %v10047_v44  ;;  %v9991_v47 = vmul.f32 %v12281_v30, %v9990_v29 }
0x260c   :  { %v11771_v52 = vunpack.i.l.bf16 %v11770_v17  ;;  %v11772_v63 = vunpack.i.h.bf16 %v11770_v17 }
0x260d   :  { %10307 = vrot.lane.b32.xlu2 %v15132_v7, %s12496_s27  ;;  %v10052_v42 = vsel %vm10051_vm10, %v12279_v13, %v10048_v41  ;;  %v9992_v41 = vadd.f32 %v12281_v30, %v9991_v47 }
0x260e   :  { %10120 = vmatpush.msrb.mxu0 %v11771_v52  ;;  %v10057_v24 = vsel %vm10054_vm11, %v10056_v37, %v10052_v42  ;;  %v9999_v42 = vand.u32 2147483648, %v15595_v40 }
0x260f   :  { %v10091_v20 = vmul.f32 %v15542_v45, %v10057_v24  ;;  %v9997_v24 = vand.u32 2147483647, %v15595_v40 }
0x2610   :  { %10121 = vmatpush.msrb.mxu0 %v11772_v63 }
0x2611   :  { %11477 = vmatmul.msk.f32.gmra.mxu1 %vm3413_vm14, %v10091_v20  ;;  %vm9998_vm6 = vcmp.eq.f32.partialorder %v9997_v24, 8.507059e+37 }
0x2612   :  { %10225 = vmatpush.msra.mxu0 %v11781_v0 }
0x2614   :  { %10226 = vmatpush.msra.mxu0 %v11782_v15 }
0x2615   :  { %10350 = vrot.lane.b32.xlu2 %v15117_v58, %s12497_s28  ;;  %v15615_v58 = vld [vmem:[%s15897_s7 + $0x3] ss:$0 sm:$0xff] }
0x2617   :  { %v15601_v7 = vpop.permute.xlu1 %10309 }
0x2619   :  { %10348 = vrot.lane.b32.xlu0 %v15155_v18, %s12496_s27 }
0x261d   :  { %10346 = vrot.lane.b32.xlu2 %v15150_v35, %s12496_s27  ;;  %v9177_v35 = vadd.f32 %v15615_v58, %v15429_v38 }
0x261f   :  { %v10392_v49 = vpop.permute.xlu1 %10391 }
0x2620   :  { %11496 = vmatpush.xpose.msk.msra.mxu2 %vm304_vm2, %v10392_v49 }
0x2621   :  { %10430 = vrot.lane.b32.xlu0 %v15103_v3, %s12497_s28  ;;  %v9179_v3 = vadd.f32 %v15615_v58, %v15445_v57  ;;  %v9182_v57 = vadd.f32 %v15615_v58, %v15469_v59 }
0x2625   :  { %10389 = vrot.lane.b32.xlu2 %v15093_v16, %s12497_s28 }
0x2627   :  { %v10386_v26 = vpop.permute.xlu1 %10385 }
0x2629   :  { %10426 = vrot.lane.b32.xlu0 %v15135_v60, %s12496_s27  ;;  %v9180_v60 = vadd.f32 %v15615_v58, %v15452_v53 }
0x262c   :  { %v9714_v18 = vpop.f32.mrf.mxu2 }
0x262d   :  { %v15621_v45 = vadd.f32 %v9714_v18, %v9177_v35  ;;  %10387 = vrot.lane.b32.xlu2 %v15165_v51, %s12496_s27  ;;  %v9181_v51 = vadd.f32 %v15615_v58, %v15461_v9  ;;  %v9183_v9 = vadd.f32 %v15615_v58, %v15473_v12  ;;  %v9996_v35 = vsel %vm9995_vm0, %v12281_v30, %v9992_v41 }
0x262e   :  { %v10000_v18 = vor.u32 1.1754944e-38, %v9999_v42 }
0x2635   :  { %10424 = vrot.lane.b32.xlu2 %v15124_v27, %s12496_s27  ;;  %v15641_v27 = vpop.f32.mrf.mxu0 }
0x2636   :  { %v9908_v4 = vsel %vm3413_vm14, %v15641_v27, -inf }
0x263c   :  { %v15627_v16 = vpop.f32.mrf.mxu2 }
0x263d   :  { %v15649_v39 = vpop.f32.mrf.mxu0 }
0x263e   :  { %v9911_v22 = vsel %vm3413_vm14, %v15649_v39, -inf }
0x2644   :  { %v9720_v31 = vpop.f32.mrf.mxu2 }
0x2645   :  { %v15631_v46 = vadd.f32 %v9720_v31, %v9179_v3 }
0x264c   :  { %v9723_v38 = vpop.f32.mrf.mxu2 }
0x264d   :  { %v15635_v56 = vadd.f32 %v9723_v38, %v9180_v60 }
0x2654   :  { %v9726_v2 = vpop.f32.mrf.mxu2 }
0x2655   :  { %v15639_v8 = vadd.f32 %v9726_v2, %v9181_v51 }
0x265c   :  { %v9729_v34 = vpop.f32.mrf.mxu2 }
0x265d   :  { %v15647_v53 = vadd.f32 %v9729_v34, %v9182_v57 }
0x265e   :  { %9909 = vmax.xlane.f32.xlu2 %v9908_v4 }
0x2664   :  { %v9732_v25 = vpop.f32.mrf.mxu2 }
0x2665   :  { %v15656_v59 = vadd.f32 %v9732_v25, %v9183_v9 }
0x2666   :  { %9912 = vmax.xlane.f32.xlu2 %v9911_v22 }
0x2668   :  { %v9952_v55 = vpop.xlane.xlu2 %9951 }
0x2669   :  { %12282 = vrcp.f32 %v9952_v55  ;;  %v9985_v13 = vand.u32 2147483648, %v9952_v55  ;;  %v9983_v36 = vand.u32 2147483647, %v9952_v55  ;;  %vm9979_vm13 = vweird.f32 %v9952_v55 }
0x266b   :  { %v9986_v17 = vor.u32 1.1754944e-38, %v9985_v13  ;;  %vm9984_vm4 = vcmp.eq.f32.partialorder %v9983_v36, 8.507059e+37 }
0x266f   :  { %v12283_v11 = vpop.eup %12282 }
0x2670   :  { %v9975_v32 = vmul.f32 %v12283_v11, %v9952_v55  ;;  %v10308_v43 = vpop.permute.xlu2 %10307  ;;  %v9970_v19 = vpop.xlane.xlu0 %9969  ;;  %vm9980_vm12 = vweird.f32 %v12283_v11 }
0x2671   :  { %12284 = vrcp.f32 %v9970_v19  ;;  %11490 = vmatmul.msk.f32.vlgmr.msra.gmra.mxu1 %vm304_vm2, %v10308_v43  ;;  %vm9981_vm3 = vmor %vm9979_vm13, %vm9980_vm12  ;;  %v10069_v38 = vand.u32 2147483648, %v9970_v19  ;;  %vm10063_vm8 = vweird.f32 %v9970_v19 }
0x2672   :  { %v9976_v12 = vsub.f32 1.0, %v9975_v32 }
0x2674   :  { %v9977_v54 = vmul.f32 %v12283_v11, %v9976_v12 }
0x2676   :  { %v9978_v44 = vadd.f32 %v12283_v11, %v9977_v54 }
0x2677   :  { %v12285_v21 = vpop.eup %12284 }
0x2678   :  { %v9982_v10 = vsel %vm9981_vm3, %v12283_v11, %v9978_v44  ;;  %v10059_v52 = vmul.f32 %v12285_v21, %v9970_v19  ;;  %v10351_v37 = vpop.permute.xlu2 %10350  ;;  %v9973_v63 = vpop.xlane.xlu0 %9972  ;;  %vm10064_vm7 = vweird.f32 %v12285_v21 }
0x2679   :  { %v9987_v0 = vsel %vm9984_vm4, %v9986_v17, %v9982_v10  ;;  %12286 = vrcp.f32 %v9973_v63  ;;  %11491 = vmatmul.msk.f32.gmra.mxu1 %vm304_vm2, %v15601_v7  ;;  %v10001_v7 = vsel %vm9998_vm6, %v10000_v18, %v9996_v35  ;;  %vm10065_vm9 = vmor %vm10063_vm8, %vm10064_vm7  ;;  %v10083_v25 = vand.u32 2147483648, %v9973_v63 }
0x267a   :  { %v10086_v20 = vmul.f32 %v15577_v62, %v9987_v0  ;;  %v10060_v15 = vsub.f32 1.0, %v10059_v52  ;;  %v10067_v62 = vand.u32 2147483647, %v9970_v19  ;;  %v10087_v2 = vmul.f32 %v15546_v28, %v10001_v7  ;;  %v15696_v52 = vpop.f32.mrf.mxu2 }
0x267b   :  { %vm10077_vm12 = vweird.f32 %v9973_v63  ;;  %v10081_v30 = vand.u32 2147483647, %v9973_v63  ;;  %v10084_v29 = vor.u32 1.1754944e-38, %v10083_v25 }
0x267c   :  { %v10061_v49 = vmul.f32 %v12285_v21, %v10060_v15  ;;  %11472 = vmatmul.msk.f32.vlgmr.msrb.gmra.mxu0 %vm3413_vm14, %v10086_v20  ;;  %vm10068_vm10 = vcmp.eq.f32.partialorder %v10067_v62, 8.507059e+37 }
0x267d   :  { %11492 = vmatpush.xpose.msk.msrb.mxu0 %vm304_vm2, %v15591_v5  ;;  %v10070_v5 = vor.u32 1.1754944e-38, %v10069_v38  ;;  %vm10082_vm15 = vcmp.eq.f32.partialorder %v10081_v30, 8.507059e+37 }
0x267e   :  { %v10062_v31 = vadd.f32 %v12285_v21, %v10061_v49 }
0x267f   :  { %v12287_v3 = vpop.eup %12286 }
0x2680   :  { %v10073_v60 = vmul.f32 %v12287_v3, %v9973_v63  ;;  %v10347_v40 = vpop.permute.xlu2 %10346  ;;  %v10066_v57 = vsel %vm10065_vm9, %v12285_v21, %v10062_v31  ;;  %vm10078_vm11 = vweird.f32 %v12287_v3 }
0x2681   :  { %11493 = vmatpush.xpose.msk.msrb.mxu0 %vm304_vm2, %v10351_v37  ;;  %v10071_v34 = vsel %vm10068_vm10, %v10070_v5, %v10066_v57  ;;  %vm10079_vm13 = vmor %vm10077_vm12, %vm10078_vm11 }
0x2682   :  { %v10074_v51 = vsub.f32 1.0, %v10073_v60  ;;  %v10092_v55 = vmul.f32 %v15583_v6, %v10071_v34  ;;  %v10429_v6 = vpop.permute.xlu1 %10428 }
0x2684   :  { %v10075_v4 = vmul.f32 %v12287_v3, %v10074_v51  ;;  %11473 = vmatmul.msk.f32.gmra.mxu0 %vm3413_vm14, %v10087_v2 }
0x2686   :  { %v10076_v9 = vadd.f32 %v12287_v3, %v10075_v4 }
0x2688   :  { %v10390_v22 = vpop.permute.xlu2 %10389  ;;  %v10080_v11 = vsel %vm10079_vm13, %v12287_v3, %v10076_v9 }
0x2689   :  { %11497 = vmatpush.xpose.msk.msra.mxu2 %vm304_vm2, %v10390_v22  ;;  %v10085_v32 = vsel %vm10082_vm15, %v10084_v29, %v10080_v11 }
0x268a   :  { %v10093_v19 = vmul.f32 %v15587_v1, %v10085_v32  ;;  %v15686_v1 = vpop.f32.mrf.mxu1 }
0x268b   :  { %v10349_v28 = vpop.permute.xlu0 %10348 }
0x268c   :  { %11478 = vmatmul.msk.f32.vlgmr.msra.gmra.mxu0 %vm3413_vm14, %v10092_v55  ;;  %11498 = vmatmul.msk.f32.vlgmr.msra.gmra.mxu2 %vm304_vm2, %v10386_v26 }
0x2690   :  { %v10388_v43 = vpop.permute.xlu2 %10387 }
0x2692   :  { %v15688_v54 = vpop.f32.mrf.mxu1 }
0x2693   :  { %v10431_v12 = vpop.permute.xlu0 %10430 }
0x2694   :  { %11479 = vmatmul.msk.f32.gmra.mxu0 %vm3413_vm14, %v10093_v19  ;;  %11499 = vmatmul.msk.f32.gmra.mxu2 %vm304_vm2, %v10388_v43 }
0x2695   :  { %11500 = vmatpush.xpose.msk.msrb.mxu1 %vm304_vm2, %v10431_v12 }
0x2698   :  { %v10425_v13 = vpop.permute.xlu2 %10424 }
0x2699   :  { %11501 = vmatpush.xpose.msk.msrb.mxu1 %vm304_vm2, %v10429_v6 }
0x269b   :  { %v10427_v47 = vpop.permute.xlu0 %10426 }
0x269c   :  { %11502 = vmatmul.msk.f32.vlgmr.msrb.gmra.mxu1 %vm304_vm2, %v10425_v13  ;;  %11494 = vmatmul.msk.f32.vlgmr.msrb.gmra.mxu0 %vm304_vm2, %v10347_v40 }
0x26a4   :  { %11503 = vmatmul.msk.f32.gmra.mxu1 %vm304_vm2, %v10427_v47  ;;  %11495 = vmatmul.msk.f32.gmra.mxu0 %vm304_vm2, %v10349_v28 }
0x26d1   :  { %v9910_v24 = vpop.xlane.xlu2 %9909 }
0x26d2   :  { %v9928_v49 = vsub.f32 %v15641_v27, %v9910_v24 }
0x26d4   :  { %v9938_v7 = vmul.f32 1.442695, %v9928_v49 }
0x26d6   :  { %12288 = vpow2.f32 %v9938_v7 }
0x26d9   :  { %v9913_v31 = vpop.xlane.xlu2 %9912 }
0x26da   :  { %v9929_v60 = vsub.f32 %v15649_v39, %v9913_v31 }
0x26dc   :  { %v9940_v51 = vmul.f32 1.442695, %v9929_v60  ;;  %v15720_v2 = vpop.eup %12288 }
0x26dd   :  { %v9956_v57 = vsel %vm3413_vm14, %v15720_v2, 0.0 }
0x26de   :  { %12290 = vpow2.f32 %v9940_v51 }
0x26e4   :  { %v15724_v4 = vpop.eup %12290 }
0x26e5   :  { %v9959_v39 = vsel %vm3413_vm14, %v15724_v4, 0.0 }
0x26ee   :  { %v10340_v36 = vpop.f32.mrf.mxu1 }
0x26ef   :  { %v10463_v44 = vsel %vm3413_vm14, %v10340_v36, -inf }
0x26f0   :  { %10464 = vmax.xlane.f32.xlu1 %v10463_v44 }
0x26f6   :  { %v10343_v21 = vpop.f32.mrf.mxu1 }
0x26f7   :  { %v10466_v17 = vsel %vm3413_vm14, %v10343_v21, -inf }
0x26f8   :  { %10467 = vmax.xlane.f32.xlu0 %v10466_v17 }
0x26f9   :  { %v15692_v41 = vpop.f32.mrf.mxu0 }
0x2701   :  { %v15694_v10 = vpop.f32.mrf.mxu0 }
0x2709   :  { %v15698_v37 = vpop.f32.mrf.mxu0 }
0x270f   :  { %v15700_v63 = vpop.f32.mrf.mxu2 }
0x2710   :  { %v10475_v42 = vsel %vm3413_vm14, %v15700_v63, -inf }
0x2711   :  { %10476 = vmax.xlane.f32.xlu1 %v10475_v42  ;;  %v15704_v0 = vpop.f32.mrf.mxu0 }
0x2717   :  { %v10421_v20 = vpop.f32.mrf.mxu2 }
0x2718   :  { %v10478_v15 = vsel %vm3413_vm14, %v10421_v20, -inf }
0x2719   :  { %v15708_v35 = vpop.f32.mrf.mxu1  ;;  %10479 = vmax.xlane.f32.xlu2 %v10478_v15  ;;  %v15710_v18 = vpop.f32.mrf.mxu0 }
0x271a   :  { %v10481_v3 = vsel %vm3413_vm14, %v15708_v35, -inf  ;;  %v10469_v28 = vsel %vm3413_vm14, %v15710_v18, -inf }
0x271b   :  { %10482 = vmax.xlane.f32.xlu0 %v10481_v3 }
0x2721   :  { %v10460_v40 = vpop.f32.mrf.mxu1  ;;  %v15715_v38 = vpop.f32.mrf.mxu0 }
0x2722   :  { %v10484_v62 = vsel %vm3413_vm14, %v10460_v40, -inf  ;;  %v10472_v27 = vsel %vm3413_vm14, %v15715_v38, -inf }
0x2723   :  { %10485 = vmax.xlane.f32.xlu2 %v10484_v62  ;;  %10473 = vmax.xlane.f32.xlu0 %v10472_v27 }
0x272b   :  { %9957 = vadd.xlane.f32.xlu0 %v9956_v57 }
0x2733   :  { %9960 = vadd.xlane.f32.xlu0 %v9959_v39 }
0x273b   :  { %11794 = vrot.lane.b32.xlu2 %v15281_v14, %s12498_s29 }
0x2747   :  { %11789 = vrot.lane.b32.xlu0 %v15281_v14, %s12495_s3 }
0x2763   :  { %v10465_v5 = vpop.xlane.xlu1 %10464 }
0x2764   :  { %v10487_v34 = vsub.f32 %v10340_v36, %v10465_v5 }
0x2766   :  { %v10495_v9 = vmul.f32 1.442695, %v10487_v34 }
0x2768   :  { %12292 = vpow2.f32 %v10495_v9 }
0x276b   :  { %v10468_v22 = vpop.xlane.xlu0 %10467 }
0x276c   :  { %v10488_v55 = vsub.f32 %v10343_v21, %v10468_v22 }
0x276e   :  { %v15732_v25 = vpop.eup %12292  ;;  %v10497_v26 = vmul.f32 1.442695, %v10488_v55 }
0x276f   :  { %v10511_v30 = vsel %vm3413_vm14, %v15732_v25, 0.0 }
0x2770   :  { %10512 = vadd.xlane.f32.xlu1 %v10511_v30  ;;  %12294 = vpow2.f32 %v10497_v26 }
0x2776   :  { %v15738_v11 = vpop.eup %12294 }
0x2777   :  { %v10514_v14 = vsel %vm3413_vm14, %v15738_v11, 0.0 }
0x2778   :  { %10470 = vmax.xlane.f32.xlu1 %v10469_v28 }
0x2780   :  { %10515 = vadd.xlane.f32.xlu1 %v10514_v14 }
0x2784   :  { %v10477_v60 = vpop.xlane.xlu1 %10476 }
0x2785   :  { %v10491_v27 = vsub.f32 %v15700_v63, %v10477_v60 }
0x2787   :  { %v10503_v5 = vmul.f32 1.442695, %v10491_v27 }
0x278c   :  { %v10480_v29 = vpop.xlane.xlu2 %10479 }
0x278d   :  { %v10492_v32 = vsub.f32 %v10421_v20, %v10480_v29 }
0x278e   :  { %v15742_v43 = vpop.xlane.xlu0 %10482 }
0x278f   :  { %v10505_v19 = vmul.f32 1.442695, %v10492_v32 }
0x2791   :  { %12296 = vpow2.f32 %v10505_v19 }
0x2796   :  { %v10486_v12 = vpop.xlane.xlu2 %10485  ;;  %v15744_v6 = vpop.xlane.xlu0 %10473 }
0x2797   :  { %v15746_v13 = vpop.eup %12296  ;;  %v10494_v47 = vsub.f32 %v10460_v40, %v10486_v12  ;;  %v8540_v12 = vld [vmem:[#allocation10 + $0x70] sm:$0xff] }
0x2798   :  { %v10526_v36 = vsel %vm3413_vm14, %v15746_v13, 0.0 }
0x2799   :  { %v10509_v44 = vmul.f32 1.442695, %v10494_v47  ;;  %11784 = vrot.lane.b32.xlu1 %v15222_v61, %s12498_s29  ;;  %10527 = vadd.xlane.f32.xlu0 %v10526_v36 }
0x279b   :  { %12298 = vpow2.f32 %v10509_v44 }
0x279e   :  { %v11795_v21 = vpop.permute.xlu2 %11794  ;;  %v9958_v17 = vpop.xlane.xlu0 %9957 }
0x279f   :  { %v11796_v42 = vunpack.i.l.bf16 %v11795_v21  ;;  %12300 = vrcp.f32 %v9958_v17  ;;  %v11797_v20 = vunpack.i.h.bf16 %v11795_v21  ;;  %v10013_v39 = vand.u32 2147483648, %v9958_v17 }
0x27a0   :  { %vm10007_vm4 = vweird.f32 %v9958_v17  ;;  %v10011_v34 = vand.u32 2147483647, %v9958_v17 }
0x27a1   :  { %v15752_v24 = vpop.eup %12298  ;;  %10716 = vmatpush.msrb.mxu2 %v11796_v42  ;;  %v10014_v55 = vor.u32 1.1754944e-38, %v10013_v39 }
0x27a2   :  { %v10532_v15 = vsel %vm3413_vm14, %v15752_v24, 0.0  ;;  %vm10012_vm0 = vcmp.eq.f32.partialorder %v10011_v34, 8.507059e+37 }
0x27a3   :  { %10717 = vmatpush.msrb.mxu2 %v11797_v20  ;;  %10533 = vadd.xlane.f32.xlu0 %v10532_v15 }
0x27a5   :  { %v12301_v49 = vpop.eup %12300 }
0x27a6   :  { %v9961_v3 = vpop.xlane.xlu0 %9960  ;;  %v10003_v7 = vmul.f32 %v12301_v49, %v9958_v17  ;;  %vm10008_vm3 = vweird.f32 %v12301_v49 }
0x27a7   :  { %12302 = vrcp.f32 %v9961_v3  ;;  %vm10009_vm5 = vmor %vm10007_vm4, %vm10008_vm3  ;;  %v10027_v29 = vand.u32 2147483648, %v9961_v3  ;;  %vm10021_vm7 = vweird.f32 %v9961_v3  ;;  %v10025_v19 = vand.u32 2147483647, %v9961_v3 }
0x27a8   :  { %v10004_v61 = vsub.f32 1.0, %v10003_v7  ;;  %12304 = vpow2.f32 %v10503_v5 }
0x27a9   :  { %v10028_v44 = vor.u32 1.1754944e-38, %v10027_v29  ;;  %vm10026_vm9 = vcmp.eq.f32.partialorder %v10025_v19, 8.507059e+37 }
0x27aa   :  { %v10005_v40 = vmul.f32 %v12301_v49, %v10004_v61 }
0x27ac   :  { %v10006_v51 = vadd.f32 %v12301_v49, %v10005_v40 }
0x27ad   :  { %v12303_v31 = vpop.eup %12302 }
0x27ae   :  { %v10017_v62 = vmul.f32 %v12303_v31, %v9961_v3  ;;  %v10010_v9 = vsel %vm10009_vm5, %v12301_v49, %v10006_v51  ;;  %vm10022_vm6 = vweird.f32 %v12303_v31  ;;  %v15758_v47 = vpop.eup %12304  ;;  %v10490_v49 = vsub.f32 %v15715_v38, %v15744_v6 }
0x27af   :  { %v10015_v26 = vsel %vm10012_vm0, %v10014_v55, %v10010_v9  ;;  %vm10023_vm8 = vmor %vm10021_vm7, %vm10022_vm6  ;;  %v10523_v21 = vsel %vm3413_vm14, %v15758_v47, 0.0 }
0x27b0   :  { %v10018_v57 = vsub.f32 1.0, %v10017_v62  ;;  %v10088_v32 = vmul.f32 %v15720_v2, %v10015_v26 }
0x27b2   :  { %v10019_v22 = vmul.f32 %v12303_v31, %v10018_v57 }
0x27b4   :  { %v10020_v14 = vadd.f32 %v12303_v31, %v10019_v22 }
0x27b6   :  { %v10024_v36 = vsel %vm10023_vm8, %v12303_v31, %v10020_v14 }
0x27b7   :  { %v10029_v17 = vsel %vm10026_vm9, %v10028_v44, %v10024_v36 }
0x27b8   :  { %v10089_v2 = vmul.f32 %v15724_v4, %v10029_v17  ;;  %v10501_v4 = vmul.f32 1.442695, %v10490_v49 }
0x27b9   :  { %v11790_v30 = vpop.permute.xlu0 %11789 }
0x27ba   :  { %v11791_v28 = vunpack.i.l.bf16 %v11790_v30  ;;  %v11792_v63 = vunpack.i.h.bf16 %v11790_v30 }
0x27bc   :  { %10155 = vmatpush.msra.mxu3 %v11791_v28 }
0x27be   :  { %10156 = vmatpush.msra.mxu3 %v11792_v63 }
0x27bf   :  { %11474 = vmatmul.msk.f32.vlgmr.msra.gmra.mxu3 %vm3413_vm14, %v10088_v32 }
0x27c0   :  { %10273 = vmatpush.msrb.mxu3 %v8540_v12 }
0x27c3   :  { %10524 = vadd.xlane.f32.xlu1 %v10523_v21 }
0x27c7   :  { %11475 = vmatmul.msk.f32.gmra.mxu3 %vm3413_vm14, %v10089_v2 }
0x27cf   :  { %11480 = vmatmul.msk.f32.vlgmr.msrb.gmra.mxu3 %vm304_vm2, %v15692_v41 }
0x27d7   :  { %11481 = vmatmul.msk.f32.gmra.mxu3 %vm304_vm2, %v15694_v10  ;;  %v10493_v10 = vsub.f32 %v15708_v35, %v15742_v43 }
0x27d9   :  { %v10507_v31 = vmul.f32 1.442695, %v10493_v10 }
0x27dc   :  { %11799 = vrot.lane.b32.xlu1 %v15228_v50, %s12498_s29 }
0x27e3   :  { %v10513_v42 = vpop.xlane.xlu1 %10512 }
0x27e4   :  { %12306 = vrcp.f32 %v10513_v42  ;;  %v10546_v57 = vand.u32 2147483648, %v10513_v42  ;;  %vm10540_vm11 = vweird.f32 %v10513_v42  ;;  %v10544_v39 = vand.u32 2147483647, %v10513_v42 }
0x27e6   :  { %v10547_v22 = vor.u32 1.1754944e-38, %v10546_v57  ;;  %vm10545_vm13 = vcmp.eq.f32.partialorder %v10544_v39, 8.507059e+37 }
0x27ea   :  { %v12307_v7 = vpop.eup %12306 }
0x27eb   :  { %v10471_v20 = vpop.xlane.xlu1 %10470  ;;  %vm10541_vm10 = vweird.f32 %v12307_v7 }
0x27ec   :  { %v10489_v15 = vsub.f32 %v15710_v18, %v10471_v20  ;;  %v10536_v18 = vmul.f32 %v12307_v7, %v10513_v42  ;;  %vm10542_vm12 = vmor %vm10540_vm11, %vm10541_vm10 }
0x27ee   :  { %v10499_v3 = vmul.f32 1.442695, %v10489_v15  ;;  %v10537_v6 = vsub.f32 1.0, %v10536_v18 }
0x27f0   :  { %12308 = vpow2.f32 %v10499_v3  ;;  %v10538_v62 = vmul.f32 %v12307_v7, %v10537_v6 }
0x27f1   :  { %12310 = vpow2.f32 %v10501_v4 }
0x27f2   :  { %v10539_v43 = vadd.f32 %v12307_v7, %v10538_v62 }
0x27f3   :  { %v10516_v61 = vpop.xlane.xlu1 %10515 }
0x27f4   :  { %12312 = vrcp.f32 %v10516_v61  ;;  %v10543_v34 = vsel %vm10542_vm12, %v12307_v7, %v10539_v43  ;;  %v10560_v14 = vand.u32 2147483648, %v10516_v61  ;;  %vm10554_vm3 = vweird.f32 %v10516_v61 }
0x27f5   :  { %12314 = vpow2.f32 %v10507_v31  ;;  %v10548_v30 = vsel %vm10545_vm13, %v10547_v22, %v10543_v34  ;;  %v10558_v32 = vand.u32 2147483647, %v10516_v61 }
0x27f6   :  { %v15774_v41 = vpop.eup %12308  ;;  %v10647_v63 = vmul.f32 %v15732_v25, %v10548_v30  ;;  %v10561_v12 = vor.u32 1.1754944e-38, %v10560_v14 }
0x27f7   :  { %v10517_v50 = vsel %vm3413_vm14, %v15774_v41, 0.0  ;;  %v15780_v38 = vpop.eup %12310  ;;  %vm10559_vm5 = vcmp.eq.f32.partialorder %v10558_v32, 8.507059e+37 }
0x27f8   :  { %10518 = vadd.xlane.f32.xlu2 %v10517_v50  ;;  %v10520_v40 = vsel %vm3413_vm14, %v15780_v38, 0.0 }
0x27fa   :  { %v12313_v60 = vpop.eup %12312 }
0x27fb   :  { %v10550_v27 = vmul.f32 %v12313_v60, %v10516_v61  ;;  %v15784_v35 = vpop.eup %12314  ;;  %vm10555_vm15 = vweird.f32 %v12313_v60 }
0x27fc   :  { %v10529_v5 = vsel %vm3413_vm14, %v15784_v35, 0.0  ;;  %vm10556_vm4 = vmor %vm10554_vm3, %vm10555_vm15 }
0x27fd   :  { %v10551_v51 = vsub.f32 1.0, %v10550_v27 }
0x27ff   :  { %v10552_v9 = vmul.f32 %v12313_v60, %v10551_v51 }
0x2800   :  { %10521 = vadd.xlane.f32.xlu2 %v10520_v40 }
0x2801   :  { %v10553_v28 = vadd.f32 %v12313_v60, %v10552_v9 }
0x2803   :  { %v10557_v19 = vsel %vm10556_vm4, %v12313_v60, %v10553_v28 }
0x2804   :  { %v10562_v36 = vsel %vm10559_vm5, %v10561_v12, %v10557_v19 }
0x2805   :  { %v10648_v44 = vmul.f32 %v15738_v11, %v10562_v36 }
0x2808   :  { %10530 = vadd.xlane.f32.xlu2 %v10529_v5 }
0x280b   :  { %v11785_v55 = vpop.permute.xlu1 %11784 }
0x280c   :  { %v11786_v26 = vunpack.i.l.bf16 %v11785_v55  ;;  %v11787_v29 = vunpack.i.h.bf16 %v11785_v55  ;;  %v10528_v25 = vpop.xlane.xlu0 %10527 }
0x280d   :  { %v10616_v62 = vand.u32 2147483648, %v10528_v25  ;;  %vm10610_vm10 = vweird.f32 %v10528_v25  ;;  %v10614_v43 = vand.u32 2147483647, %v10528_v25 }
0x280e   :  { %10681 = vmatpush.msra.mxu0 %v11786_v26 }
0x280f   :  { %v10617_v39 = vor.u32 1.1754944e-38, %v10616_v62  ;;  %vm10615_vm12 = vcmp.eq.f32.partialorder %v10614_v43, 8.507059e+37 }
0x2810   :  { %10682 = vmatpush.msra.mxu0 %v11787_v29 }
0x2811   :  { %11504 = vmatmul.msk.f32.vlgmr.msra.gmra.mxu0 %vm3413_vm14, %v10647_v63 }
0x2816   :  { %v15808_v22 = vpop.xlane.xlu0 %10533 }
0x2819   :  { %11505 = vmatmul.msk.f32.gmra.mxu0 %vm3413_vm14, %v10648_v44 }
0x2820   :  { %11804 = vrot.lane.b32.xlu2 %v15178_v23, %s12498_s29 }
0x2836   :  { %v10525_v21 = vpop.xlane.xlu1 %10524 }
0x2837   :  { %12316 = vrcp.f32 %v10525_v21  ;;  %v10602_v7 = vand.u32 2147483648, %v10525_v21  ;;  %vm10596_vm6 = vweird.f32 %v10525_v21  ;;  %v10600_v61 = vand.u32 2147483647, %v10525_v21 }
0x2838   :  { %12318 = vrcp.f32 %v10528_v25 }
0x2839   :  { %v10603_v18 = vor.u32 1.1754944e-38, %v10602_v7  ;;  %vm10601_vm8 = vcmp.eq.f32.partialorder %v10600_v61, 8.507059e+37 }
0x283d   :  { %v12317_v17 = vpop.eup %12316 }
0x283e   :  { %v10592_v2 = vmul.f32 %v12317_v17, %v10525_v21  ;;  %v12319_v20 = vpop.eup %12318  ;;  %vm10597_vm0 = vweird.f32 %v12317_v17 }
0x283f   :  { %v10606_v49 = vmul.f32 %v12319_v20, %v10528_v25  ;;  %vm10598_vm7 = vmor %vm10596_vm6, %vm10597_vm0  ;;  %vm10611_vm9 = vweird.f32 %v12319_v20 }
0x2840   :  { %v10593_v42 = vsub.f32 1.0, %v10592_v2  ;;  %vm10612_vm11 = vmor %vm10610_vm10, %vm10611_vm9 }
0x2841   :  { %v10607_v4 = vsub.f32 1.0, %v10606_v49 }
0x2842   :  { %v10158_v15 = vpop.f32.mrf.mxu3  ;;  %v10594_v3 = vmul.f32 %v12317_v17, %v10593_v42 }
0x2843   :  { %11482 = vmatmul.msk.f32.gmra.mxu3 %vm304_vm2, %v10158_v15  ;;  %v10608_v10 = vmul.f32 %v12319_v20, %v10607_v4 }
0x2844   :  { %v10595_v11 = vadd.f32 %v12317_v17, %v10594_v3 }
0x2845   :  { %v10609_v40 = vadd.f32 %v12319_v20, %v10608_v10 }
0x2846   :  { %v10599_v50 = vsel %vm10598_vm7, %v12317_v17, %v10595_v11 }
0x2847   :  { %v10604_v6 = vsel %vm10601_vm8, %v10603_v18, %v10599_v50  ;;  %v10613_v57 = vsel %vm10612_vm11, %v12319_v20, %v10609_v40 }
0x2848   :  { %v10651_v51 = vmul.f32 %v15758_v47, %v10604_v6  ;;  %v10618_v5 = vsel %vm10615_vm12, %v10617_v39, %v10613_v57 }
0x2849   :  { %v10652_v34 = vmul.f32 %v15746_v13, %v10618_v5 }
0x284a   :  { %v10161_v23 = vpop.f32.mrf.mxu3 }
0x284b   :  { %11483 = vmatmul.msk.f32.gmra.mxu3 %vm304_vm2, %v10161_v23 }
0x284e   :  { %v11800_v31 = vpop.permute.xlu1 %11799 }
0x284f   :  { %v11801_v60 = vunpack.i.l.bf16 %v11800_v31  ;;  %v11802_v27 = vunpack.i.h.bf16 %v11800_v31 }
0x2851   :  { %10751 = vmatpush.msra.mxu1 %v11801_v60 }
0x2853   :  { %11484 = vmatmul.msk.f32.gmra.mxu3 %vm304_vm2, %v15686_v1  ;;  %10752 = vmatpush.msra.mxu1 %v11802_v27  ;;  %v8541_v1 = vld [vmem:[#allocation10 + $0x78] sm:$0xff] }
0x2854   :  { %11508 = vmatmul.msk.f32.vlgmr.msra.gmra.mxu1 %vm3413_vm14, %v10651_v51  ;;  %10834 = vmatpush.msra.mxu2 %v8541_v1  ;;  %v10642_v51 = vand.u32 2147483647, %v15808_v22 }
0x285b   :  { %11485 = vmatmul.msk.f32.gmra.mxu3 %vm304_vm2, %v15688_v54 }
0x285c   :  { %11509 = vmatmul.msk.f32.gmra.mxu1 %vm3413_vm14, %v10652_v34 }
0x2863   :  { %11486 = vmatmul.msk.f32.gmra.mxu3 %vm304_vm2, %v15698_v37 }
0x286b   :  { %v10519_v47 = vpop.xlane.xlu2 %10518  ;;  %11487 = vmatmul.msk.f32.gmra.mxu3 %vm304_vm2, %v15704_v0 }
0x286c   :  { %12320 = vrcp.f32 %v10519_v47  ;;  %v10574_v54 = vand.u32 2147483648, %v10519_v47  ;;  %v10572_v37 = vand.u32 2147483647, %v10519_v47  ;;  %vm10568_vm15 = vweird.f32 %v10519_v47 }
0x286e   :  { %v10575_v0 = vor.u32 1.1754944e-38, %v10574_v54  ;;  %vm10573_vm4 = vcmp.eq.f32.partialorder %v10572_v37, 8.507059e+37 }
0x2872   :  { %v12321_v9 = vpop.eup %12320 }
0x2873   :  { %v10564_v55 = vmul.f32 %v12321_v9, %v10519_v47  ;;  %v10522_v13 = vpop.xlane.xlu2 %10521  ;;  %vm10569_vm13 = vweird.f32 %v12321_v9 }
0x2874   :  { %12322 = vrcp.f32 %v10522_v13  ;;  %vm10570_vm3 = vmor %vm10568_vm15, %vm10569_vm13  ;;  %v10588_v21 = vand.u32 2147483648, %v10522_v13  ;;  %v10586_v2 = vand.u32 2147483647, %v10522_v13  ;;  %vm10582_vm0 = vweird.f32 %v10522_v13 }
0x2875   :  { %v10565_v30 = vsub.f32 1.0, %v10564_v55  ;;  %12324 = vrcp.f32 %v15808_v22  ;;  %vm10638_vm13 = vweird.f32 %v15808_v22  ;;  %v10275_v55 = vpop.f32.mrf.mxu3 }
0x2876   :  { %v10589_v15 = vor.u32 1.1754944e-38, %v10588_v21  ;;  %vm10587_vm7 = vcmp.eq.f32.partialorder %v10586_v2, 8.507059e+37 }
0x2877   :  { %v10566_v26 = vmul.f32 %v12321_v9, %v10565_v30  ;;  %v10299_v30 = vadd.f32 %v10275_v55, %v15621_v45 }
0x2879   :  { %v10567_v28 = vadd.f32 %v12321_v9, %v10566_v26 }
0x287a   :  { %v12323_v14 = vpop.eup %12322 }
0x287b   :  { %v10571_v29 = vsel %vm10570_vm3, %v12321_v9, %v10567_v28  ;;  %v10578_v63 = vmul.f32 %v12323_v14, %v10522_v13  ;;  %v10531_v32 = vpop.xlane.xlu2 %10530  ;;  %v12325_v19 = vpop.eup %12324  ;;  %vm10583_vm5 = vweird.f32 %v12323_v14  ;;  %vm10643_vm3 = vcmp.eq.f32.partialorder %v10642_v51, 8.507059e+37 }
0x287c   :  { %v10576_v12 = vsel %vm10573_vm4, %v10575_v0, %v10571_v29  ;;  %12326 = vrcp.f32 %v10531_v32  ;;  %v10634_v25 = vmul.f32 %v12325_v19, %v15808_v22  ;;  %vm10584_vm6 = vmor %vm10582_vm0, %vm10583_vm5  ;;  %v10630_v10 = vand.u32 2147483648, %v10531_v32 }
0x287d   :  { %v10649_v36 = vmul.f32 %v15774_v41, %v10576_v12  ;;  %v10579_v44 = vsub.f32 1.0, %v10578_v63  ;;  %v10628_v6 = vand.u32 2147483647, %v10531_v32  ;;  %vm10624_vm9 = vweird.f32 %v10531_v32  ;;  %v10278_v37 = vpop.f32.mrf.mxu3 }
0x287e   :  { %v10635_v49 = vsub.f32 1.0, %v10634_v25  ;;  %v10631_v40 = vor.u32 1.1754944e-38, %v10630_v10  ;;  %vm10639_vm11 = vweird.f32 %v12325_v19 }
0x287f   :  { %v10580_v17 = vmul.f32 %v12323_v14, %v10579_v44  ;;  %11506 = vmatmul.msk.f32.vlgmr.msrb.gmra.mxu2 %vm3413_vm14, %v10649_v36  ;;  %vm10629_vm12 = vcmp.eq.f32.partialorder %v10628_v6, 8.507059e+37  ;;  %vm10640_vm15 = vmor %vm10638_vm13, %vm10639_vm11 }
0x2880   :  { %v10636_v18 = vmul.f32 %v12325_v19, %v10635_v49 }
0x2881   :  { %v10581_v42 = vadd.f32 %v12323_v14, %v10580_v17 }
0x2882   :  { %v12327_v20 = vpop.eup %12326  ;;  %v10637_v62 = vadd.f32 %v12325_v19, %v10636_v18 }
0x2883   :  { %v10620_v3 = vmul.f32 %v12327_v20, %v10531_v32  ;;  %v11805_v4 = vpop.permute.xlu2 %11804  ;;  %v10585_v11 = vsel %vm10584_vm6, %v12323_v14, %v10581_v42  ;;  %vm10625_vm8 = vweird.f32 %v12327_v20 }
0x2884   :  { %v11806_v41 = vunpack.i.l.bf16 %v11805_v4  ;;  %v10590_v7 = vsel %vm10587_vm7, %v10589_v15, %v10585_v11  ;;  %v11807_v50 = vunpack.i.h.bf16 %v11805_v4  ;;  %vm10626_vm10 = vmor %vm10624_vm9, %vm10625_vm8  ;;  %v10641_v5 = vsel %vm10640_vm15, %v12325_v19, %v10637_v62 }
0x2885   :  { %v10621_v61 = vsub.f32 1.0, %v10620_v3  ;;  %v10650_v23 = vmul.f32 %v15780_v38, %v10590_v7  ;;  %v10644_v38 = vand.u32 2147483648, %v15808_v22 }
0x2886   :  { %10786 = vmatpush.msrb.mxu0 %v11806_v41  ;;  %v9184_v41 = vadd.f32 %v15615_v58, %v15475_v33  ;;  %v10876_v33 = vld [vmem:[%s15898_s8] sm:$0x1] }
0x2887   :  { %v10622_v31 = vmul.f32 %v12327_v20, %v10621_v61  ;;  %11507 = vmatmul.msk.f32.gmra.mxu2 %vm3413_vm14, %v10650_v23  ;;  %v10645_v34 = vor.u32 1.1754944e-38, %v10644_v38 }
0x2888   :  { %10787 = vmatpush.msrb.mxu0 %v11807_v50  ;;  %v9745_v7 = vadd.f32 %v15696_v52, %v9184_v41 }
0x2889   :  { %v10623_v60 = vadd.f32 %v12327_v20, %v10622_v31  ;;  %v10646_v47 = vsel %vm10643_vm3, %v10645_v34, %v10641_v5 }
0x288a   :  { %v10654_v1 = vmul.f32 %v15752_v24, %v10646_v47  ;;  %v9178_v24 = vadd.f32 %v15615_v58, %v15437_v48 }
0x288b   :  { %v10627_v27 = vsel %vm10626_vm10, %v12327_v20, %v10623_v60 }
0x288c   :  { %v10632_v43 = vsel %vm10629_vm12, %v10631_v40, %v10627_v27  ;;  %v9739_v28 = vadd.f32 %v15627_v16, %v9178_v24 }
0x288d   :  { %v10653_v57 = vmul.f32 %v15784_v35, %v10632_v43 }
0x288e   :  { %v10684_v39 = vpop.f32.mrf.mxu0  ;;  %v10300_v14 = vadd.f32 %v10278_v37, %v9739_v28 }
0x288f   :  { %11510 = vmatmul.msk.f32.vlgmr.msrb.gmra.mxu0 %vm3413_vm14, %v10653_v57  ;;  %11512 = vmatmul.msk.f32.vlgmr.msra.gmra.mxu2 %vm304_vm2, %v10684_v39 }
0x2896   :  { %v10687_v9 = vpop.f32.mrf.mxu0 }
0x2897   :  { %11511 = vmatmul.msk.f32.gmra.mxu0 %vm3413_vm14, %v10654_v1  ;;  %11513 = vmatmul.msk.f32.gmra.mxu2 %vm304_vm2, %v10687_v9 }
0x28c6   :  { %v10281_v32 = vpop.f32.mrf.mxu3 }
0x28c7   :  { %v10301_v16 = vadd.f32 %v10281_v32, %v15631_v46 }
0x28ce   :  { %v10284_v19 = vpop.f32.mrf.mxu3 }
0x28cf   :  { %v10302_v21 = vadd.f32 %v10284_v19, %v15635_v56 }
0x28d1   :  { %v10754_v13 = vpop.f32.mrf.mxu1 }
0x28d6   :  { %v10287_v44 = vpop.f32.mrf.mxu3 }
0x28d7   :  { %v10303_v2 = vadd.f32 %v10287_v44, %v15639_v8 }
0x28d9   :  { %v10757_v0 = vpop.f32.mrf.mxu1 }
0x28de   :  { %v10290_v46 = vpop.f32.mrf.mxu3 }
0x28df   :  { %v10304_v15 = vadd.f32 %v10290_v46, %v15647_v53 }
0x28e6   :  { %v10293_v3 = vpop.f32.mrf.mxu3 }
0x28e7   :  { %v10305_v8 = vadd.f32 %v10293_v3, %v15656_v59 }
0x28ee   :  { %v10296_v53 = vpop.f32.mrf.mxu3 }
0x28ef   :  { %v10306_v61 = vadd.f32 %v10296_v53, %v9745_v7 }
0x2902   :  { %v10719_v22 = vpop.f32.mrf.mxu2 }
0x2903   :  { %11514 = vmatmul.msk.f32.gmra.mxu2 %vm304_vm2, %v10719_v22 }
0x290a   :  { %v10722_v35 = vpop.f32.mrf.mxu2 }
0x290b   :  { %11515 = vmatmul.msk.f32.gmra.mxu2 %vm304_vm2, %v10722_v35 }
0x290c   :  { %v10789_v48 = vpop.f32.mrf.mxu0 }
0x2912   :  { %v10836_v54 = vpop.f32.mrf.mxu2 }
0x2913   :  { %v10860_v26 = vadd.f32 %v10836_v54, %v10299_v30  ;;  %11516 = vmatmul.msk.f32.gmra.mxu2 %vm304_vm2, %v10754_v13 }
0x2914   :  { %v10792_v45 = vpop.f32.mrf.mxu0 }
0x2915   :  { %10868 = vst.msk [vmem:[%s15899_s9] sm:$0xff] %vm223_vm1, %v10860_v26 }
0x291a   :  { %v10839_v29 = vpop.f32.mrf.mxu2 }
0x291b   :  { %v10861_v63 = vadd.f32 %v10839_v29, %v10300_v14  ;;  %11517 = vmatmul.msk.f32.gmra.mxu2 %vm304_vm2, %v10757_v0 }
0x291d   :  { %10869 = vst.msk [vmem:[%s15899_s9 + $0x8] sm:$0xff] %vm223_vm1, %v10861_v63 }
0x2923   :  { %11518 = vmatmul.msk.f32.gmra.mxu2 %vm304_vm2, %v10789_v48 }
0x292b   :  { %11519 = vmatmul.msk.f32.gmra.mxu2 %vm304_vm2, %v10792_v45  ;;  %vm10924_vm2 = vcmask 516096  }
0x2986   :  { %v10842_v12 = vpop.f32.mrf.mxu2 }
0x2987   :  { %v10862_v36 = vadd.f32 %v10842_v12, %v10301_v16 }
0x2989   :  { %10870 = vst.msk [vmem:[%s15899_s9 + $0x10] sm:$0xff] %vm223_vm1, %v10862_v36 }
0x298e   :  { %v10845_v25 = vpop.f32.mrf.mxu2 }
0x298f   :  { %v10863_v17 = vadd.f32 %v10845_v25, %v10302_v21 }
0x2991   :  { %10871 = vst.msk [vmem:[%s15899_s9 + $0x18] sm:$0xff] %vm223_vm1, %v10863_v17 }
0x2996   :  { %v10848_v42 = vpop.f32.mrf.mxu2 }
0x2997   :  { %v10864_v20 = vadd.f32 %v10848_v42, %v10303_v2 }
0x2999   :  { %10872 = vst.msk [vmem:[%s15899_s9 + $0x20] sm:$0xff] %vm223_vm1, %v10864_v20 }
0x299e   :  { %v10851_v56 = vpop.f32.mrf.mxu2 }
0x299f   :  { %v10865_v49 = vadd.f32 %v10851_v56, %v10304_v15 }
0x29a1   :  { %10873 = vst.msk [vmem:[%s15899_s9 + $0x28] sm:$0xff] %vm223_vm1, %v10865_v49 }
0x29a6   :  { %v10854_v4 = vpop.f32.mrf.mxu2 }
0x29a7   :  { %v10866_v11 = vadd.f32 %v10854_v4, %v10305_v8 }
0x29a9   :  { %10874 = vst.msk [vmem:[%s15899_s9 + $0x30] sm:$0xff] %vm223_vm1, %v10866_v11 }
0x29ae   :  { %v10857_v23 = vpop.f32.mrf.mxu2 }
0x29af   :  { %v10867_v10 = vadd.f32 %v10857_v23, %v10306_v61 }
0x29b1   :  { %10875 = vst.msk [vmem:[%s15899_s9 + $0x38] sm:$0xff] %vm223_vm1, %v10867_v10  ;;  %11520 = vmatpush.xpose.msk.msra.mxu3 %vm223_vm1, %v10867_v10 }
0x29b5   :  { %11521 = vmatpush.xpose.msk.msra.mxu3 %vm223_vm1, %v10866_v11 }
0x29b9   :  { %11522 = vmatpush.xpose.msk.msra.mxu3 %vm223_vm1, %v10865_v49 }
0x29bd   :  { %11523 = vmatpush.xpose.msk.msra.mxu3 %vm223_vm1, %v10864_v20 }
0x29c1   :  { %11524 = vmatpush.xpose.msk.msra.mxu3 %vm223_vm1, %v10863_v17 }
0x29c5   :  { %11525 = vmatpush.xpose.msk.msra.mxu3 %vm223_vm1, %v10862_v36 }
0x29c9   :  { %11526 = vmatpush.xpose.msk.msra.mxu3 %vm223_vm1, %v10861_v63 }
0x29cd   :  { %11527 = vmatpush.xpose.msk.msra.mxu3 %vm223_vm1, %v10860_v26 }
0x29d0   :  { %11528 = vmatmul.msk.f32.vlgmr.msra.gmra.mxu3 %vm223_vm1, %v10876_v33 }
0x2a53   :  { %v10921_v58 = vpop.f32.mrf.mxu3 }
0x2a54   :  { %10925 = vst.msk [vmem:[%s15900_s10] sm:$0x1] %vm10924_vm2, %v10921_v58 }
0x2a55   :  { %10934 = vsyncpa [#allocation3], 1 }
0x2a56   :  { %10935 = vsyncpa [#allocation5], 1 }
0x2a57   :  { %10936 = vsyncpa [#allocation8], 1 }
0x2a58   :  { %10937 = vsyncpa [#allocation11], 1 }

</bundles_post_ra>
